<compile_context>
chip_gen: v7x
topology: tpu7x:2x2x1
jax: 0.10.0
libtpu: 0.0.40
codegen_flags: <defaults>
</compile_context>

<pallas_src>
import jax
import jax.numpy as jnp
from jax.experimental import pallas as pl
from jax.experimental.pallas import tpu as pltpu


def _gather_h_kernel(x_ref, w_ref, b_ref, *o_refs):
    # x_ref : (1, Cin, tH, W)  VMEM input tile (W = lane dim, lane-dense)
    # w_ref : (K*Cout*Cin,)    SMEM flattened weights (f32 scalars)
    # b_ref : (K*Cout,)        SMEM flattened bias    (f32 scalars)
    # o_refs: K refs, each (1, Cout, tH, W) VMEM output tiles
    K = len(o_refs)
    pad = (K - 1) // 2
    _, Cin, tH, W = x_ref.shape
    Cout = o_refs[0].shape[1]
    out_dtype = o_refs[0].dtype

    # bf16 inputs: multiply in bf16 (v6e/v7x VALU), widen only to accumulate.
    mul_dt = jnp.bfloat16 if x_ref.dtype == jnp.bfloat16 else jnp.float32

    # Load each input channel plane exactly once per tile (lane-dense loads).
    planes = [x_ref[0, c].astype(mul_dt) for c in range(Cin)]

    use_roll = (W % 128 == 0)
    if use_roll:
        # Lane-aligned fast path: XLU rotate + boundary mask, no relayouts.
        col = jax.lax.broadcasted_iota(jnp.int32, (tH, W), 1)
        zero = jnp.zeros((), mul_dt)

        def shifted(d):
            if d == 0:
                return planes
            mask = jnp.logical_and(col + d >= 0, col + d < W)
            return [jnp.where(mask, pltpu.roll(p, (-d) % W, 1), zero)
                    for p in planes]
    else:
        # Fallback for lane widths that are not a multiple of 128: fuse the
        # zero padding in-kernel (two static concats per channel) and take
        # static lane slices.  Only used for small W (e.g. the demo shapes).
        zcols = jnp.zeros((tH, pad), mul_dt)
        padded = [jnp.concatenate([zcols, p, zcols], axis=-1) for p in planes]

        def shifted(d):
            k = d + pad
            return [pp[:, k:k + W] for pp in padded]

    for k in range(K):
        xs = shifted(k - pad)  # horizontal offset d = k - pad
        for o in range(Cout):
            base = k * Cout + o
            # Tiny Cin/Cout: channel contraction as SMEM-scalar * plane MACs
            # on the VPU, accumulated in f32.
            # TODO(synk): an MXU formulation ((K*Cout,Cin) x (Cin,tH*W)) could
            #             relieve the VALU on v7x for f32 inputs.
            acc = (xs[0] * w_ref[base * Cin].astype(mul_dt)).astype(jnp.float32)
            for c in range(1, Cin):
                acc = acc + (xs[c] * w_ref[base * Cin + c].astype(mul_dt)
                             ).astype(jnp.float32)
            acc = acc + b_ref[base]
            # Full-width (tH, W) store, lane-dense along W.
            o_refs[k][0, o] = acc.astype(out_dtype)


def _sublane(itemsize):
    # Min second-minor tile: 8 for 4-byte, 16 for 2-byte, 32 for 1-byte dtypes.
    return max(8, 32 // max(int(itemsize), 1))


def _pick_tile_h(H, N, Cin, Cout, W, K, itemsize, vmem_budget_bytes,
                 max_tile_h=None):
    """Largest H-tile fitting the budget; >=2 grid steps when possible.

    Returns (tile_h, sublane).  tile_h is None when H is not tileable (not a
    multiple of the sublane granularity) AND a full-H block overflows the
    budget -- the caller then pads H on the host.
    """
    sub = _sublane(itemsize)
    # Double-buffered input+output blocks (real itemsize) plus in-kernel
    # intermediates (shifted planes + accumulator), per row of H.
    per_row = 2 * (Cin + K * Cout) * W * itemsize + (2 * Cin + 2) * W * 4
    t = max(1, int(vmem_budget_bytes) // max(per_row, 1))
    if max_tile_h is not None:
        t = min(t, max_tile_h)
    if H % sub != 0:
        # H can only be a single full-extent block here.
        return (H if t >= H else None), sub
    t = min(t, H)
    t = max(sub, (t // sub) * sub)
    while H % t:
        t -= sub
    if N * (H // t) < 2 and H >= 2 * sub:
        # Guarantee >= 2 grid steps so both v7x TensorCores get work.
        t2 = (H // 2 // sub) * sub
        while t2 >= sub and H % t2:
            t2 -= sub
        if t2 >= sub:
            t = min(t, t2)
    return t, sub


def gather_horizontal(x, weights, bias, *, max_tile_h=None):
    """Pallas implementation of GatherHorizontal.forward.

    Args:
      x:       (N, Cin, H, W)  (NCHW, as in PyTorch)
      weights: (9, Cout, Cin)
      bias:    (9, Cout)
    Returns:
      tuple of 9 arrays, each (N, Cout, H, W), same dtype as x.
    """
    N, Cin, H, W = x.shape
    K, Cout, Cin_w = weights.shape
    assert Cin_w == Cin and bias.shape == (K, Cout)
    # NOTE: for best performance production W should be a multiple of 128
    # (lane-dense unmasked stores + XLU-roll shift path); small demo W falls
    # back to masked stores and the fused-concat shift path.

    # Generation-aware VMEM budgeting.
    try:
        vmem_cap = int(pltpu.get_tpu_info().vmem_capacity_bytes)
    except Exception:
        vmem_cap = 64 * 1024 * 1024  # conservative (v7x per-TC VMEM)
    tile_budget = (vmem_cap * 3) // 8               # ~48 MiB v5e/v6e, ~24 MiB v7x
    vmem_limit = min((vmem_cap * 3) // 4, 96 * 1024 * 1024)

    itemsize = jnp.dtype(x.dtype).itemsize
    tH, sub = _pick_tile_h(H, N, Cin, Cout, W, K, itemsize, tile_budget,
                           max_tile_h)
    pad_h = 0
    xp, Hp = x, H
    if tH is None:
        # Full-H block would overflow VMEM and H isn't tileable: pad H on the
        # host to the sublane granularity and slice the outputs back.
        pad_h = (-H) % sub
        Hp = H + pad_h
        xp = jnp.pad(x, ((0, 0), (0, 0), (0, pad_h), (0, 0)))
        tH, _ = _pick_tile_h(Hp, N, Cin, Cout, W, K, itemsize, tile_budget,
                             max_tile_h)

    grid = (N, Hp // tH)

    # Tiny parameter tensors -> flattened f32 scalars in SMEM.
    w_flat = weights.astype(jnp.float32).reshape(-1)
    b_flat = bias.astype(jnp.float32).reshape(-1)

    out_shape = tuple(
        jax.ShapeDtypeStruct((N, Cout, Hp, W), x.dtype) for _ in range(K)
    )

    grid_spec = pltpu.PrefetchScalarGridSpec(
        num_scalar_prefetch=0,
        grid=grid,
        in_specs=[
            # Input tile in native NCHW: lane dim = W, read once per tile and
            # reused for all 9 offsets.
            pl.BlockSpec((1, Cin, tH, W), lambda n, h: (n, 0, h, 0)),
            pl.BlockSpec(memory_space=pltpu.MemorySpace.SMEM),
            pl.BlockSpec(memory_space=pltpu.MemorySpace.SMEM),
        ],
        out_specs=[
            pl.BlockSpec((1, Cout, tH, W), lambda n, h: (n, 0, h, 0))
            for _ in range(K)
        ],
    )

    outs = pl.pallas_call(
        _gather_h_kernel,
        out_shape=out_shape,
        grid_spec=grid_spec,
        compiler_params=pltpu.CompilerParams(
            dimension_semantics=("parallel", "parallel"),
            vmem_limit_bytes=int(vmem_limit),
        ),
    )(xp, w_flat, b_flat)

    if pad_h:
        outs = tuple(o[:, :, :H, :] for o in outs)
    return tuple(outs)


def _reference(x_nchw, weights, bias):
    """Pure-JAX reference for correctness checking."""
    N, Cin, H, W = x_nchw.shape
    K = weights.shape[0]
    pad = (K - 1) // 2
    xp = jnp.pad(x_nchw, ((0, 0), (0, 0), (0, 0), (pad, pad)))
    outs = []
    for k in range(K):
        xs = xp[:, :, :, k:k + W]                    # shift by k - 4
        y = jnp.einsum("nchw,oc->nohw", xs, weights[k])
        y = y + bias[k][None, :, None, None]
        outs.append(y.astype(x_nchw.dtype))
    return tuple(outs)


if __name__ == "__main__":
    key = jax.random.PRNGKey(0)
    k_x, k_w, k_b = jax.random.split(key, 3)

    # Case 1: module-consistent small shapes (fallback shift path, W=16).
    N, Cin, Cout, H, W = 2, 4, 8, 16, 16
    x = jax.random.normal(k_x, (N, Cin, H, W), dtype=jnp.float32)
    weights = jax.random.normal(k_w, (9, Cout, Cin), dtype=jnp.float32)
    bias = jax.random.normal(k_b, (9, Cout), dtype=jnp.float32)

    outs = jax.block_until_ready(gather_horizontal(x, weights, bias))
    refs = _reference(x, weights, bias)
    for o, r in zip(outs, refs):
        assert o.shape == (N, Cout, H, W)
        assert jnp.allclose(o, r, atol=1e-4, rtol=1e-4), \
            float(jnp.max(jnp.abs(o - r)))

    # Case 2: multi-step H grid (tH=8 -> 3 H-tiles) and odd channel counts.
    N2, Ci2, Co2, H2, W2 = 1, 3, 5, 24, 40
    x2 = jax.random.normal(k_x, (N2, Ci2, H2, W2), dtype=jnp.float32)
    w2 = jax.random.normal(k_w, (9, Co2, Ci2), dtype=jnp.float32)
    b2 = jax.random.normal(k_b, (9, Co2), dtype=jnp.float32)

    outs2 = jax.block_until_ready(
        gather_horizontal(x2, w2, b2, max_tile_h=8))
    refs2 = _reference(x2, w2, b2)
    for o, r in zip(outs2, refs2):
        assert o.shape == (N2, Co2, H2, W2)
        assert jnp.allclose(o, r, atol=1e-4, rtol=1e-4), \
            float(jnp.max(jnp.abs(o - r)))

    # Case 3: lane-aligned W=128 -> exercises the pltpu.roll + mask path and
    # the >=2-grid-step split (N=1, H=16 -> tH=8, grid (1, 2)).
    N3, Ci3, Co3, H3, W3 = 1, 3, 5, 16, 128
    x3 = jax.random.normal(k_x, (N3, Ci3, H3, W3), dtype=jnp.float32)
    w3 = jax.random.normal(k_w, (9, Co3, Ci3), dtype=jnp.float32)
    b3 = jax.random.normal(k_b, (9, Co3), dtype=jnp.float32)

    outs3 = jax.block_until_ready(gather_horizontal(x3, w3, b3))
    refs3 = _reference(x3, w3, b3)
    for o, r in zip(outs3, refs3):
        assert o.shape == (N3, Co3, H3, W3)
        assert jnp.allclose(o, r, atol=1e-4, rtol=1e-4), \
            float(jnp.max(jnp.abs(o - r)))

    print("KERNEL_OK")
</pallas_src>

<mosaic_0001>
module attributes {stable_mosaic.version = 11 : i64} {
  func.func @_gather_h_kernel(%arg0: i32, %arg1: i32, %arg2: memref<1x4x16x16xf32, #tpu.memory_space<vmem>>, %arg3: memref<288xf32, #tpu.memory_space<smem>>, %arg4: memref<72xf32, #tpu.memory_space<smem>>, %arg5: memref<1x8x16x16xf32, #tpu.memory_space<vmem>>, %arg6: memref<1x8x16x16xf32, #tpu.memory_space<vmem>>, %arg7: memref<1x8x16x16xf32, #tpu.memory_space<vmem>>, %arg8: memref<1x8x16x16xf32, #tpu.memory_space<vmem>>, %arg9: memref<1x8x16x16xf32, #tpu.memory_space<vmem>>, %arg10: memref<1x8x16x16xf32, #tpu.memory_space<vmem>>, %arg11: memref<1x8x16x16xf32, #tpu.memory_space<vmem>>, %arg12: memref<1x8x16x16xf32, #tpu.memory_space<vmem>>, %arg13: memref<1x8x16x16xf32, #tpu.memory_space<vmem>>) attributes {dimension_semantics = [#tpu.dimension_semantics<parallel>, #tpu.dimension_semantics<parallel>], iteration_bounds = array<i64: 2, 1>, scalar_prefetch = 0 : i64, scratch_operands = 0 : i64, tpu.core_type = #tpu.core_type<tc>, window_params = [{transform_indices = @transform_0, window_bounds = array<i64: 1, 4, 16, 16>}, {transform_indices = @transform_1, window_bounds = array<i64: 288>}, {transform_indices = @transform_2, window_bounds = array<i64: 72>}, {transform_indices = @transform_3, window_bounds = array<i64: 1, 8, 16, 16>}, {transform_indices = @transform_4, window_bounds = array<i64: 1, 8, 16, 16>}, {transform_indices = @transform_5, window_bounds = array<i64: 1, 8, 16, 16>}, {transform_indices = @transform_6, window_bounds = array<i64: 1, 8, 16, 16>}, {transform_indices = @transform_7, window_bounds = array<i64: 1, 8, 16, 16>}, {transform_indices = @transform_8, window_bounds = array<i64: 1, 8, 16, 16>}, {transform_indices = @transform_9, window_bounds = array<i64: 1, 8, 16, 16>}, {transform_indices = @transform_10, window_bounds = array<i64: 1, 8, 16, 16>}, {transform_indices = @transform_11, window_bounds = array<i64: 1, 8, 16, 16>}]} {
    %c0 = arith.constant 0 : index
    %c0_0 = arith.constant 0 : index
    %c0_1 = arith.constant 0 : index
    %c0_2 = arith.constant 0 : index
    %0 = vector.load %arg2[%c0, %c0_0, %c0_1, %c0_2] : memref<1x4x16x16xf32, #tpu.memory_space<vmem>>, vector<1x1x16x16xf32>
    %1 = vector.shape_cast %0 : vector<1x1x16x16xf32> to vector<16x16xf32>
    %c0_3 = arith.constant 0 : index
    %c1 = arith.constant 1 : index
    %c0_4 = arith.constant 0 : index
    %c0_5 = arith.constant 0 : index
    %2 = vector.load %arg2[%c0_3, %c1, %c0_4, %c0_5] : memref<1x4x16x16xf32, #tpu.memory_space<vmem>>, vector<1x1x16x16xf32>
    %3 = vector.shape_cast %2 : vector<1x1x16x16xf32> to vector<16x16xf32>
    %c0_6 = arith.constant 0 : index
    %c2 = arith.constant 2 : index
    %c0_7 = arith.constant 0 : index
    %c0_8 = arith.constant 0 : index
    %4 = vector.load %arg2[%c0_6, %c2, %c0_7, %c0_8] : memref<1x4x16x16xf32, #tpu.memory_space<vmem>>, vector<1x1x16x16xf32>
    %5 = vector.shape_cast %4 : vector<1x1x16x16xf32> to vector<16x16xf32>
    %c0_9 = arith.constant 0 : index
    %c3 = arith.constant 3 : index
    %c0_10 = arith.constant 0 : index
    %c0_11 = arith.constant 0 : index
    %6 = vector.load %arg2[%c0_9, %c3, %c0_10, %c0_11] : memref<1x4x16x16xf32, #tpu.memory_space<vmem>>, vector<1x1x16x16xf32>
    %7 = vector.shape_cast %6 : vector<1x1x16x16xf32> to vector<16x16xf32>
    %cst = arith.constant 0.000000e+00 : f32
    %8 = vector.broadcast %cst : f32 to vector<16x4xf32>
    %9 = tpu.concatenate %8, %1, %8 in 1 : vector<16x4xf32>, vector<16x16xf32>, vector<16x4xf32> -> vector<16x24xf32>
    %10 = tpu.concatenate %8, %3, %8 in 1 : vector<16x4xf32>, vector<16x16xf32>, vector<16x4xf32> -> vector<16x24xf32>
    %11 = tpu.concatenate %8, %5, %8 in 1 : vector<16x4xf32>, vector<16x16xf32>, vector<16x4xf32> -> vector<16x24xf32>
    %12 = tpu.concatenate %8, %7, %8 in 1 : vector<16x4xf32>, vector<16x16xf32>, vector<16x4xf32> -> vector<16x24xf32>
    %13 = vector.extract_strided_slice %9 {offsets = [0, 0], sizes = [16, 16], strides = [1, 1]} : vector<16x24xf32> to vector<16x16xf32>
    %14 = vector.extract_strided_slice %10 {offsets = [0, 0], sizes = [16, 16], strides = [1, 1]} : vector<16x24xf32> to vector<16x16xf32>
    %15 = vector.extract_strided_slice %11 {offsets = [0, 0], sizes = [16, 16], strides = [1, 1]} : vector<16x24xf32> to vector<16x16xf32>
    %16 = vector.extract_strided_slice %12 {offsets = [0, 0], sizes = [16, 16], strides = [1, 1]} : vector<16x24xf32> to vector<16x16xf32>
    %c0_12 = arith.constant 0 : index
    %17 = memref.load %arg3[%c0_12] : memref<288xf32, #tpu.memory_space<smem>>
    %18 = vector.broadcast %17 : f32 to vector<16x16xf32>
    %19 = arith.mulf %13, %18 : vector<16x16xf32>
    %c1_13 = arith.constant 1 : index
    %20 = memref.load %arg3[%c1_13] : memref<288xf32, #tpu.memory_space<smem>>
    %21 = vector.broadcast %20 : f32 to vector<16x16xf32>
    %22 = arith.mulf %14, %21 : vector<16x16xf32>
    %23 = arith.addf %19, %22 : vector<16x16xf32>
    %c2_14 = arith.constant 2 : index
    %24 = memref.load %arg3[%c2_14] : memref<288xf32, #tpu.memory_space<smem>>
    %25 = vector.broadcast %24 : f32 to vector<16x16xf32>
    %26 = arith.mulf %15, %25 : vector<16x16xf32>
    %27 = arith.addf %23, %26 : vector<16x16xf32>
    %c3_15 = arith.constant 3 : index
    %28 = memref.load %arg3[%c3_15] : memref<288xf32, #tpu.memory_space<smem>>
    %29 = vector.broadcast %28 : f32 to vector<16x16xf32>
    %30 = arith.mulf %16, %29 : vector<16x16xf32>
    %31 = arith.addf %27, %30 : vector<16x16xf32>
    %c0_16 = arith.constant 0 : index
    %32 = memref.load %arg4[%c0_16] : memref<72xf32, #tpu.memory_space<smem>>
    %33 = vector.broadcast %32 : f32 to vector<16x16xf32>
    %34 = arith.addf %31, %33 : vector<16x16xf32>
    %c0_17 = arith.constant 0 : index
    %c0_18 = arith.constant 0 : index
    %c0_19 = arith.constant 0 : index
    %c0_20 = arith.constant 0 : index
    %35 = vector.load %arg5[%c0_17, %c0_18, %c0_19, %c0_20] : memref<1x8x16x16xf32, #tpu.memory_space<vmem>>, vector<1x1x16x16xf32>
    %36 = vector.shape_cast %35 : vector<1x1x16x16xf32> to vector<16x16xf32>
    %37 = vector.shape_cast %34 : vector<16x16xf32> to vector<1x1x16x16xf32>
    tpu.vector_store %arg5[%c0_17, %c0_18, %c0_19, %c0_20], %37 {strides = array<i32>} : memref<1x8x16x16xf32, #tpu.memory_space<vmem>>, vector<1x1x16x16xf32>,
    %c4 = arith.constant 4 : index
    %38 = memref.load %arg3[%c4] : memref<288xf32, #tpu.memory_space<smem>>
    %39 = vector.broadcast %38 : f32 to vector<16x16xf32>
    %40 = arith.mulf %13, %39 : vector<16x16xf32>
    %c5 = arith.constant 5 : index
    %41 = memref.load %arg3[%c5] : memref<288xf32, #tpu.memory_space<smem>>
    %42 = vector.broadcast %41 : f32 to vector<16x16xf32>
    %43 = arith.mulf %14, %42 : vector<16x16xf32>
    %44 = arith.addf %40, %43 : vector<16x16xf32>
    %c6 = arith.constant 6 : index
    %45 = memref.load %arg3[%c6] : memref<288xf32, #tpu.memory_space<smem>>
    %46 = vector.broadcast %45 : f32 to vector<16x16xf32>
    %47 = arith.mulf %15, %46 : vector<16x16xf32>
    %48 = arith.addf %44, %47 : vector<16x16xf32>
    %c7 = arith.constant 7 : index
    %49 = memref.load %arg3[%c7] : memref<288xf32, #tpu.memory_space<smem>>
    %50 = vector.broadcast %49 : f32 to vector<16x16xf32>
    %51 = arith.mulf %16, %50 : vector<16x16xf32>
    %52 = arith.addf %48, %51 : vector<16x16xf32>
    %c1_21 = arith.constant 1 : index
    %53 = memref.load %arg4[%c1_21] : memref<72xf32, #tpu.memory_space<smem>>
    %54 = vector.broadcast %53 : f32 to vector<16x16xf32>
    %55 = arith.addf %52, %54 : vector<16x16xf32>
    %c0_22 = arith.constant 0 : index
    %c1_23 = arith.constant 1 : index
    %c0_24 = arith.constant 0 : index
    %c0_25 = arith.constant 0 : index
    %56 = vector.load %arg5[%c0_22, %c1_23, %c0_24, %c0_25] : memref<1x8x16x16xf32, #tpu.memory_space<vmem>>, vector<1x1x16x16xf32>
    %57 = vector.shape_cast %56 : vector<1x1x16x16xf32> to vector<16x16xf32>
    %58 = vector.shape_cast %55 : vector<16x16xf32> to vector<1x1x16x16xf32>
    tpu.vector_store %arg5[%c0_22, %c1_23, %c0_24, %c0_25], %58 {strides = array<i32>} : memref<1x8x16x16xf32, #tpu.memory_space<vmem>>, vector<1x1x16x16xf32>,
    %c8 = arith.constant 8 : index
    %59 = memref.load %arg3[%c8] : memref<288xf32, #tpu.memory_space<smem>>
    %60 = vector.broadcast %59 : f32 to vector<16x16xf32>
    %61 = arith.mulf %13, %60 : vector<16x16xf32>
    %c9 = arith.constant 9 : index
    %62 = memref.load %arg3[%c9] : memref<288xf32, #tpu.memory_space<smem>>
    %63 = vector.broadcast %62 : f32 to vector<16x16xf32>
    %64 = arith.mulf %14, %63 : vector<16x16xf32>
    %65 = arith.addf %61, %64 : vector<16x16xf32>
    %c10 = arith.constant 10 : index
    %66 = memref.load %arg3[%c10] : memref<288xf32, #tpu.memory_space<smem>>
    %67 = vector.broadcast %66 : f32 to vector<16x16xf32>
    %68 = arith.mulf %15, %67 : vector<16x16xf32>
    %69 = arith.addf %65, %68 : vector<16x16xf32>
    %c11 = arith.constant 11 : index
    %70 = memref.load %arg3[%c11] : memref<288xf32, #tpu.memory_space<smem>>
    %71 = vector.broadcast %70 : f32 to vector<16x16xf32>
    %72 = arith.mulf %16, %71 : vector<16x16xf32>
    %73 = arith.addf %69, %72 : vector<16x16xf32>
    %c2_26 = arith.constant 2 : index
    %74 = memref.load %arg4[%c2_26] : memref<72xf32, #tpu.memory_space<smem>>
    %75 = vector.broadcast %74 : f32 to vector<16x16xf32>
    %76 = arith.addf %73, %75 : vector<16x16xf32>
    %c0_27 = arith.constant 0 : index
    %c2_28 = arith.constant 2 : index
    %c0_29 = arith.constant 0 : index
    %c0_30 = arith.constant 0 : index
    %77 = vector.load %arg5[%c0_27, %c2_28, %c0_29, %c0_30] : memref<1x8x16x16xf32, #tpu.memory_space<vmem>>, vector<1x1x16x16xf32>
    %78 = vector.shape_cast %77 : vector<1x1x16x16xf32> to vector<16x16xf32>
    %79 = vector.shape_cast %76 : vector<16x16xf32> to vector<1x1x16x16xf32>
    tpu.vector_store %arg5[%c0_27, %c2_28, %c0_29, %c0_30], %79 {strides = array<i32>} : memref<1x8x16x16xf32, #tpu.memory_space<vmem>>, vector<1x1x16x16xf32>,
    %c12 = arith.constant 12 : index
    %80 = memref.load %arg3[%c12] : memref<288xf32, #tpu.memory_space<smem>>
    %81 = vector.broadcast %80 : f32 to vector<16x16xf32>
    %82 = arith.mulf %13, %81 : vector<16x16xf32>
    %c13 = arith.constant 13 : index
    %83 = memref.load %arg3[%c13] : memref<288xf32, #tpu.memory_space<smem>>
    %84 = vector.broadcast %83 : f32 to vector<16x16xf32>
    %85 = arith.mulf %14, %84 : vector<16x16xf32>
    %86 = arith.addf %82, %85 : vector<16x16xf32>
    %c14 = arith.constant 14 : index
    %87 = memref.load %arg3[%c14] : memref<288xf32, #tpu.memory_space<smem>>
    %88 = vector.broadcast %87 : f32 to vector<16x16xf32>
    %89 = arith.mulf %15, %88 : vector<16x16xf32>
    %90 = arith.addf %86, %89 : vector<16x16xf32>
    %c15 = arith.constant 15 : index
    %91 = memref.load %arg3[%c15] : memref<288xf32, #tpu.memory_space<smem>>
    %92 = vector.broadcast %91 : f32 to vector<16x16xf32>
    %93 = arith.mulf %16, %92 : vector<16x16xf32>
    %94 = arith.addf %90, %93 : vector<16x16xf32>
    %c3_31 = arith.constant 3 : index
    %95 = memref.load %arg4[%c3_31] : memref<72xf32, #tpu.memory_space<smem>>
    %96 = vector.broadcast %95 : f32 to vector<16x16xf32>
    %97 = arith.addf %94, %96 : vector<16x16xf32>
    %c0_32 = arith.constant 0 : index
    %c3_33 = arith.constant 3 : index
    %c0_34 = arith.constant 0 : index
    %c0_35 = arith.constant 0 : index
    %98 = vector.load %arg5[%c0_32, %c3_33, %c0_34, %c0_35] : memref<1x8x16x16xf32, #tpu.memory_space<vmem>>, vector<1x1x16x16xf32>
    %99 = vector.shape_cast %98 : vector<1x1x16x16xf32> to vector<16x16xf32>
    %100 = vector.shape_cast %97 : vector<16x16xf32> to vector<1x1x16x16xf32>
    tpu.vector_store %arg5[%c0_32, %c3_33, %c0_34, %c0_35], %100 {strides = array<i32>} : memref<1x8x16x16xf32, #tpu.memory_space<vmem>>, vector<1x1x16x16xf32>,
    %c16 = arith.constant 16 : index
    %101 = memref.load %arg3[%c16] : memref<288xf32, #tpu.memory_space<smem>>
    %102 = vector.broadcast %101 : f32 to vector<16x16xf32>
    %103 = arith.mulf %13, %102 : vector<16x16xf32>
    %c17 = arith.constant 17 : index
    %104 = memref.load %arg3[%c17] : memref<288xf32, #tpu.memory_space<smem>>
    %105 = vector.broadcast %104 : f32 to vector<16x16xf32>
    %106 = arith.mulf %14, %105 : vector<16x16xf32>
    %107 = arith.addf %103, %106 : vector<16x16xf32>
    %c18 = arith.constant 18 : index
    %108 = memref.load %arg3[%c18] : memref<288xf32, #tpu.memory_space<smem>>
    %109 = vector.broadcast %108 : f32 to vector<16x16xf32>
    %110 = arith.mulf %15, %109 : vector<16x16xf32>
    %111 = arith.addf %107, %110 : vector<16x16xf32>
    %c19 = arith.constant 19 : index
    %112 = memref.load %arg3[%c19] : memref<288xf32, #tpu.memory_space<smem>>
    %113 = vector.broadcast %112 : f32 to vector<16x16xf32>
    %114 = arith.mulf %16, %113 : vector<16x16xf32>
    %115 = arith.addf %111, %114 : vector<16x16xf32>
    %c4_36 = arith.constant 4 : index
    %116 = memref.load %arg4[%c4_36] : memref<72xf32, #tpu.memory_space<smem>>
    %117 = vector.broadcast %116 : f32 to vector<16x16xf32>
    %118 = arith.addf %115, %117 : vector<16x16xf32>
    %c0_37 = arith.constant 0 : index
    %c4_38 = arith.constant 4 : index
    %c0_39 = arith.constant 0 : index
    %c0_40 = arith.constant 0 : index
    %119 = vector.load %arg5[%c0_37, %c4_38, %c0_39, %c0_40] : memref<1x8x16x16xf32, #tpu.memory_space<vmem>>, vector<1x1x16x16xf32>
    %120 = vector.shape_cast %119 : vector<1x1x16x16xf32> to vector<16x16xf32>
    %121 = vector.shape_cast %118 : vector<16x16xf32> to vector<1x1x16x16xf32>
    tpu.vector_store %arg5[%c0_37, %c4_38, %c0_39, %c0_40], %121 {strides = array<i32>} : memref<1x8x16x16xf32, #tpu.memory_space<vmem>>, vector<1x1x16x16xf32>,
    %c20 = arith.constant 20 : index
    %122 = memref.load %arg3[%c20] : memref<288xf32, #tpu.memory_space<smem>>
    %123 = vector.broadcast %122 : f32 to vector<16x16xf32>
    %124 = arith.mulf %13, %123 : vector<16x16xf32>
    %c21 = arith.constant 21 : index
    %125 = memref.load %arg3[%c21] : memref<288xf32, #tpu.memory_space<smem>>
    %126 = vector.broadcast %125 : f32 to vector<16x16xf32>
    %127 = arith.mulf %14, %126 : vector<16x16xf32>
    %128 = arith.addf %124, %127 : vector<16x16xf32>
    %c22 = arith.constant 22 : index
    %129 = memref.load %arg3[%c22] : memref<288xf32, #tpu.memory_space<smem>>
    %130 = vector.broadcast %129 : f32 to vector<16x16xf32>
    %131 = arith.mulf %15, %130 : vector<16x16xf32>
    %132 = arith.addf %128, %131 : vector<16x16xf32>
    %c23 = arith.constant 23 : index
    %133 = memref.load %arg3[%c23] : memref<288xf32, #tpu.memory_space<smem>>
    %134 = vector.broadcast %133 : f32 to vector<16x16xf32>
    %135 = arith.mulf %16, %134 : vector<16x16xf32>
    %136 = arith.addf %132, %135 : vector<16x16xf32>
    %c5_41 = arith.constant 5 : index
    %137 = memref.load %arg4[%c5_41] : memref<72xf32, #tpu.memory_space<smem>>
    %138 = vector.broadcast %137 : f32 to vector<16x16xf32>
    %139 = arith.addf %136, %138 : vector<16x16xf32>
    %c0_42 = arith.constant 0 : index
    %c5_43 = arith.constant 5 : index
    %c0_44 = arith.constant 0 : index
    %c0_45 = arith.constant 0 : index
    %140 = vector.load %arg5[%c0_42, %c5_43, %c0_44, %c0_45] : memref<1x8x16x16xf32, #tpu.memory_space<vmem>>, vector<1x1x16x16xf32>
    %141 = vector.shape_cast %140 : vector<1x1x16x16xf32> to vector<16x16xf32>
    %142 = vector.shape_cast %139 : vector<16x16xf32> to vector<1x1x16x16xf32>
    tpu.vector_store %arg5[%c0_42, %c5_43, %c0_44, %c0_45], %142 {strides = array<i32>} : memref<1x8x16x16xf32, #tpu.memory_space<vmem>>, vector<1x1x16x16xf32>,
    %c24 = arith.constant 24 : index
    %143 = memref.load %arg3[%c24] : memref<288xf32, #tpu.memory_space<smem>>
    %144 = vector.broadcast %143 : f32 to vector<16x16xf32>
    %145 = arith.mulf %13, %144 : vector<16x16xf32>
    %c25 = arith.constant 25 : index
    %146 = memref.load %arg3[%c25] : memref<288xf32, #tpu.memory_space<smem>>
    %147 = vector.broadcast %146 : f32 to vector<16x16xf32>
    %148 = arith.mulf %14, %147 : vector<16x16xf32>
    %149 = arith.addf %145, %148 : vector<16x16xf32>
    %c26 = arith.constant 26 : index
    %150 = memref.load %arg3[%c26] : memref<288xf32, #tpu.memory_space<smem>>
    %151 = vector.broadcast %150 : f32 to vector<16x16xf32>
    %152 = arith.mulf %15, %151 : vector<16x16xf32>
    %153 = arith.addf %149, %152 : vector<16x16xf32>
    %c27 = arith.constant 27 : index
    %154 = memref.load %arg3[%c27] : memref<288xf32, #tpu.memory_space<smem>>
    %155 = vector.broadcast %154 : f32 to vector<16x16xf32>
    %156 = arith.mulf %16, %155 : vector<16x16xf32>
    %157 = arith.addf %153, %156 : vector<16x16xf32>
    %c6_46 = arith.constant 6 : index
    %158 = memref.load %arg4[%c6_46] : memref<72xf32, #tpu.memory_space<smem>>
    %159 = vector.broadcast %158 : f32 to vector<16x16xf32>
    %160 = arith.addf %157, %159 : vector<16x16xf32>
    %c0_47 = arith.constant 0 : index
    %c6_48 = arith.constant 6 : index
    %c0_49 = arith.constant 0 : index
    %c0_50 = arith.constant 0 : index
    %161 = vector.load %arg5[%c0_47, %c6_48, %c0_49, %c0_50] : memref<1x8x16x16xf32, #tpu.memory_space<vmem>>, vector<1x1x16x16xf32>
    %162 = vector.shape_cast %161 : vector<1x1x16x16xf32> to vector<16x16xf32>
    %163 = vector.shape_cast %160 : vector<16x16xf32> to vector<1x1x16x16xf32>
    tpu.vector_store %arg5[%c0_47, %c6_48, %c0_49, %c0_50], %163 {strides = array<i32>} : memref<1x8x16x16xf32, #tpu.memory_space<vmem>>, vector<1x1x16x16xf32>,
    %c28 = arith.constant 28 : index
    %164 = memref.load %arg3[%c28] : memref<288xf32, #tpu.memory_space<smem>>
    %165 = vector.broadcast %164 : f32 to vector<16x16xf32>
    %166 = arith.mulf %13, %165 : vector<16x16xf32>
    %c29 = arith.constant 29 : index
    %167 = memref.load %arg3[%c29] : memref<288xf32, #tpu.memory_space<smem>>
    %168 = vector.broadcast %167 : f32 to vector<16x16xf32>
    %169 = arith.mulf %14, %168 : vector<16x16xf32>
    %170 = arith.addf %166, %169 : vector<16x16xf32>
    %c30 = arith.constant 30 : index
    %171 = memref.load %arg3[%c30] : memref<288xf32, #tpu.memory_space<smem>>
    %172 = vector.broadcast %171 : f32 to vector<16x16xf32>
    %173 = arith.mulf %15, %172 : vector<16x16xf32>
    %174 = arith.addf %170, %173 : vector<16x16xf32>
    %c31 = arith.constant 31 : index
    %175 = memref.load %arg3[%c31] : memref<288xf32, #tpu.memory_space<smem>>
    %176 = vector.broadcast %175 : f32 to vector<16x16xf32>
    %177 = arith.mulf %16, %176 : vector<16x16xf32>
    %178 = arith.addf %174, %177 : vector<16x16xf32>
    %c7_51 = arith.constant 7 : index
    %179 = memref.load %arg4[%c7_51] : memref<72xf32, #tpu.memory_space<smem>>
    %180 = vector.broadcast %179 : f32 to vector<16x16xf32>
    %181 = arith.addf %178, %180 : vector<16x16xf32>
    %c0_52 = arith.constant 0 : index
    %c7_53 = arith.constant 7 : index
    %c0_54 = arith.constant 0 : index
    %c0_55 = arith.constant 0 : index
    %182 = vector.load %arg5[%c0_52, %c7_53, %c0_54, %c0_55] : memref<1x8x16x16xf32, #tpu.memory_space<vmem>>, vector<1x1x16x16xf32>
    %183 = vector.shape_cast %182 : vector<1x1x16x16xf32> to vector<16x16xf32>
    %184 = vector.shape_cast %181 : vector<16x16xf32> to vector<1x1x16x16xf32>
    tpu.vector_store %arg5[%c0_52, %c7_53, %c0_54, %c0_55], %184 {strides = array<i32>} : memref<1x8x16x16xf32, #tpu.memory_space<vmem>>, vector<1x1x16x16xf32>,
    %185 = vector.extract_strided_slice %9 {offsets = [0, 1], sizes = [16, 16], strides = [1, 1]} : vector<16x24xf32> to vector<16x16xf32>
    %186 = vector.extract_strided_slice %10 {offsets = [0, 1], sizes = [16, 16], strides = [1, 1]} : vector<16x24xf32> to vector<16x16xf32>
    %187 = vector.extract_strided_slice %11 {offsets = [0, 1], sizes = [16, 16], strides = [1, 1]} : vector<16x24xf32> to vector<16x16xf32>
    %188 = vector.extract_strided_slice %12 {offsets = [0, 1], sizes = [16, 16], strides = [1, 1]} : vector<16x24xf32> to vector<16x16xf32>
    %c32 = arith.constant 32 : index
    %189 = memref.load %arg3[%c32] : memref<288xf32, #tpu.memory_space<smem>>
    %190 = vector.broadcast %189 : f32 to vector<16x16xf32>
    %191 = arith.mulf %185, %190 : vector<16x16xf32>
    %c33 = arith.constant 33 : index
    %192 = memref.load %arg3[%c33] : memref<288xf32, #tpu.memory_space<smem>>
    %193 = vector.broadcast %192 : f32 to vector<16x16xf32>
    %194 = arith.mulf %186, %193 : vector<16x16xf32>
    %195 = arith.addf %191, %194 : vector<16x16xf32>
    %c34 = arith.constant 34 : index
    %196 = memref.load %arg3[%c34] : memref<288xf32, #tpu.memory_space<smem>>
    %197 = vector.broadcast %196 : f32 to vector<16x16xf32>
    %198 = arith.mulf %187, %197 : vector<16x16xf32>
    %199 = arith.addf %195, %198 : vector<16x16xf32>
    %c35 = arith.constant 35 : index
    %200 = memref.load %arg3[%c35] : memref<288xf32, #tpu.memory_space<smem>>
    %201 = vector.broadcast %200 : f32 to vector<16x16xf32>
    %202 = arith.mulf %188, %201 : vector<16x16xf32>
    %203 = arith.addf %199, %202 : vector<16x16xf32>
    %c8_56 = arith.constant 8 : index
    %204 = memref.load %arg4[%c8_56] : memref<72xf32, #tpu.memory_space<smem>>
    %205 = vector.broadcast %204 : f32 to vector<16x16xf32>
    %206 = arith.addf %203, %205 : vector<16x16xf32>
    %c0_57 = arith.constant 0 : index
    %c0_58 = arith.constant 0 : index
    %c0_59 = arith.constant 0 : index
    %c0_60 = arith.constant 0 : index
    %207 = vector.load %arg6[%c0_57, %c0_58, %c0_59, %c0_60] : memref<1x8x16x16xf32, #tpu.memory_space<vmem>>, vector<1x1x16x16xf32>
    %208 = vector.shape_cast %207 : vector<1x1x16x16xf32> to vector<16x16xf32>
    %209 = vector.shape_cast %206 : vector<16x16xf32> to vector<1x1x16x16xf32>
    tpu.vector_store %arg6[%c0_57, %c0_58, %c0_59, %c0_60], %209 {strides = array<i32>} : memref<1x8x16x16xf32, #tpu.memory_space<vmem>>, vector<1x1x16x16xf32>,
    %c36 = arith.constant 36 : index
    %210 = memref.load %arg3[%c36] : memref<288xf32, #tpu.memory_space<smem>>
    %211 = vector.broadcast %210 : f32 to vector<16x16xf32>
    %212 = arith.mulf %185, %211 : vector<16x16xf32>
    %c37 = arith.constant 37 : index
    %213 = memref.load %arg3[%c37] : memref<288xf32, #tpu.memory_space<smem>>
    %214 = vector.broadcast %213 : f32 to vector<16x16xf32>
    %215 = arith.mulf %186, %214 : vector<16x16xf32>
    %216 = arith.addf %212, %215 : vector<16x16xf32>
    %c38 = arith.constant 38 : index
    %217 = memref.load %arg3[%c38] : memref<288xf32, #tpu.memory_space<smem>>
    %218 = vector.broadcast %217 : f32 to vector<16x16xf32>
    %219 = arith.mulf %187, %218 : vector<16x16xf32>
    %220 = arith.addf %216, %219 : vector<16x16xf32>
    %c39 = arith.constant 39 : index
    %221 = memref.load %arg3[%c39] : memref<288xf32, #tpu.memory_space<smem>>
    %222 = vector.broadcast %221 : f32 to vector<16x16xf32>
    %223 = arith.mulf %188, %222 : vector<16x16xf32>
    %224 = arith.addf %220, %223 : vector<16x16xf32>
    %c9_61 = arith.constant 9 : index
    %225 = memref.load %arg4[%c9_61] : memref<72xf32, #tpu.memory_space<smem>>
    %226 = vector.broadcast %225 : f32 to vector<16x16xf32>
    %227 = arith.addf %224, %226 : vector<16x16xf32>
    %c0_62 = arith.constant 0 : index
    %c1_63 = arith.constant 1 : index
    %c0_64 = arith.constant 0 : index
    %c0_65 = arith.constant 0 : index
    %228 = vector.load %arg6[%c0_62, %c1_63, %c0_64, %c0_65] : memref<1x8x16x16xf32, #tpu.memory_space<vmem>>, vector<1x1x16x16xf32>
    %229 = vector.shape_cast %228 : vector<1x1x16x16xf32> to vector<16x16xf32>
    %230 = vector.shape_cast %227 : vector<16x16xf32> to vector<1x1x16x16xf32>
    tpu.vector_store %arg6[%c0_62, %c1_63, %c0_64, %c0_65], %230 {strides = array<i32>} : memref<1x8x16x16xf32, #tpu.memory_space<vmem>>, vector<1x1x16x16xf32>,
    %c40 = arith.constant 40 : index
    %231 = memref.load %arg3[%c40] : memref<288xf32, #tpu.memory_space<smem>>
    %232 = vector.broadcast %231 : f32 to vector<16x16xf32>
    %233 = arith.mulf %185, %232 : vector<16x16xf32>
    %c41 = arith.constant 41 : index
    %234 = memref.load %arg3[%c41] : memref<288xf32, #tpu.memory_space<smem>>
    %235 = vector.broadcast %234 : f32 to vector<16x16xf32>
    %236 = arith.mulf %186, %235 : vector<16x16xf32>
    %237 = arith.addf %233, %236 : vector<16x16xf32>
    %c42 = arith.constant 42 : index
    %238 = memref.load %arg3[%c42] : memref<288xf32, #tpu.memory_space<smem>>
    %239 = vector.broadcast %238 : f32 to vector<16x16xf32>
    %240 = arith.mulf %187, %239 : vector<16x16xf32>
    %241 = arith.addf %237, %240 : vector<16x16xf32>
    %c43 = arith.constant 43 : index
    %242 = memref.load %arg3[%c43] : memref<288xf32, #tpu.memory_space<smem>>
    %243 = vector.broadcast %242 : f32 to vector<16x16xf32>
    %244 = arith.mulf %188, %243 : vector<16x16xf32>
    %245 = arith.addf %241, %244 : vector<16x16xf32>
    %c10_66 = arith.constant 10 : index
    %246 = memref.load %arg4[%c10_66] : memref<72xf32, #tpu.memory_space<smem>>
    %247 = vector.broadcast %246 : f32 to vector<16x16xf32>
    %248 = arith.addf %245, %247 : vector<16x16xf32>
    %c0_67 = arith.constant 0 : index
    %c2_68 = arith.constant 2 : index
    %c0_69 = arith.constant 0 : index
    %c0_70 = arith.constant 0 : index
    %249 = vector.load %arg6[%c0_67, %c2_68, %c0_69, %c0_70] : memref<1x8x16x16xf32, #tpu.memory_space<vmem>>, vector<1x1x16x16xf32>
    %250 = vector.shape_cast %249 : vector<1x1x16x16xf32> to vector<16x16xf32>
    %251 = vector.shape_cast %248 : vector<16x16xf32> to vector<1x1x16x16xf32>
    tpu.vector_store %arg6[%c0_67, %c2_68, %c0_69, %c0_70], %251 {strides = array<i32>} : memref<1x8x16x16xf32, #tpu.memory_space<vmem>>, vector<1x1x16x16xf32>,
    %c44 = arith.constant 44 : index
    %252 = memref.load %arg3[%c44] : memref<288xf32, #tpu.memory_space<smem>>
    %253 = vector.broadcast %252 : f32 to vector<16x16xf32>
    %254 = arith.mulf %185, %253 : vector<16x16xf32>
    %c45 = arith.constant 45 : index
    %255 = memref.load %arg3[%c45] : memref<288xf32, #tpu.memory_space<smem>>
    %256 = vector.broadcast %255 : f32 to vector<16x16xf32>
    %257 = arith.mulf %186, %256 : vector<16x16xf32>
    %258 = arith.addf %254, %257 : vector<16x16xf32>
    %c46 = arith.constant 46 : index
    %259 = memref.load %arg3[%c46] : memref<288xf32, #tpu.memory_space<smem>>
    %260 = vector.broadcast %259 : f32 to vector<16x16xf32>
    %261 = arith.mulf %187, %260 : vector<16x16xf32>
    %262 = arith.addf %258, %261 : vector<16x16xf32>
    %c47 = arith.constant 47 : index
    %263 = memref.load %arg3[%c47] : memref<288xf32, #tpu.memory_space<smem>>
    %264 = vector.broadcast %263 : f32 to vector<16x16xf32>
    %265 = arith.mulf %188, %264 : vector<16x16xf32>
    %266 = arith.addf %262, %265 : vector<16x16xf32>
    %c11_71 = arith.constant 11 : index
    %267 = memref.load %arg4[%c11_71] : memref<72xf32, #tpu.memory_space<smem>>
    %268 = vector.broadcast %267 : f32 to vector<16x16xf32>
    %269 = arith.addf %266, %268 : vector<16x16xf32>
    %c0_72 = arith.constant 0 : index
    %c3_73 = arith.constant 3 : index
    %c0_74 = arith.constant 0 : index
    %c0_75 = arith.constant 0 : index
    %270 = vector.load %arg6[%c0_72, %c3_73, %c0_74, %c0_75] : memref<1x8x16x16xf32, #tpu.memory_space<vmem>>, vector<1x1x16x16xf32>
    %271 = vector.shape_cast %270 : vector<1x1x16x16xf32> to vector<16x16xf32>
    %272 = vector.shape_cast %269 : vector<16x16xf32> to vector<1x1x16x16xf32>
    tpu.vector_store %arg6[%c0_72, %c3_73, %c0_74, %c0_75], %272 {strides = array<i32>} : memref<1x8x16x16xf32, #tpu.memory_space<vmem>>, vector<1x1x16x16xf32>,
    %c48 = arith.constant 48 : index
    %273 = memref.load %arg3[%c48] : memref<288xf32, #tpu.memory_space<smem>>
    %274 = vector.broadcast %273 : f32 to vector<16x16xf32>
    %275 = arith.mulf %185, %274 : vector<16x16xf32>
    %c49 = arith.constant 49 : index
    %276 = memref.load %arg3[%c49] : memref<288xf32, #tpu.memory_space<smem>>
    %277 = vector.broadcast %276 : f32 to vector<16x16xf32>
    %278 = arith.mulf %186, %277 : vector<16x16xf32>
    %279 = arith.addf %275, %278 : vector<16x16xf32>
    %c50 = arith.constant 50 : index
    %280 = memref.load %arg3[%c50] : memref<288xf32, #tpu.memory_space<smem>>
    %281 = vector.broadcast %280 : f32 to vector<16x16xf32>
    %282 = arith.mulf %187, %281 : vector<16x16xf32>
    %283 = arith.addf %279, %282 : vector<16x16xf32>
    %c51 = arith.constant 51 : index
    %284 = memref.load %arg3[%c51] : memref<288xf32, #tpu.memory_space<smem>>
    %285 = vector.broadcast %284 : f32 to vector<16x16xf32>
    %286 = arith.mulf %188, %285 : vector<16x16xf32>
    %287 = arith.addf %283, %286 : vector<16x16xf32>
    %c12_76 = arith.constant 12 : index
    %288 = memref.load %arg4[%c12_76] : memref<72xf32, #tpu.memory_space<smem>>
    %289 = vector.broadcast %288 : f32 to vector<16x16xf32>
    %290 = arith.addf %287, %289 : vector<16x16xf32>
    %c0_77 = arith.constant 0 : index
    %c4_78 = arith.constant 4 : index
    %c0_79 = arith.constant 0 : index
    %c0_80 = arith.constant 0 : index
    %291 = vector.load %arg6[%c0_77, %c4_78, %c0_79, %c0_80] : memref<1x8x16x16xf32, #tpu.memory_space<vmem>>, vector<1x1x16x16xf32>
    %292 = vector.shape_cast %291 : vector<1x1x16x16xf32> to vector<16x16xf32>
    %293 = vector.shape_cast %290 : vector<16x16xf32> to vector<1x1x16x16xf32>
    tpu.vector_store %arg6[%c0_77, %c4_78, %c0_79, %c0_80], %293 {strides = array<i32>} : memref<1x8x16x16xf32, #tpu.memory_space<vmem>>, vector<1x1x16x16xf32>,
    %c52 = arith.constant 52 : index
    %294 = memref.load %arg3[%c52] : memref<288xf32, #tpu.memory_space<smem>>
    %295 = vector.broadcast %294 : f32 to vector<16x16xf32>
    %296 = arith.mulf %185, %295 : vector<16x16xf32>
    %c53 = arith.constant 53 : index
    %297 = memref.load %arg3[%c53] : memref<288xf32, #tpu.memory_space<smem>>
    %298 = vector.broadcast %297 : f32 to vector<16x16xf32>
    %299 = arith.mulf %186, %298 : vector<16x16xf32>
    %300 = arith.addf %296, %299 : vector<16x16xf32>
    %c54 = arith.constant 54 : index
    %301 = memref.load %arg3[%c54] : memref<288xf32, #tpu.memory_space<smem>>
    %302 = vector.broadcast %301 : f32 to vector<16x16xf32>
    %303 = arith.mulf %187, %302 : vector<16x16xf32>
    %304 = arith.addf %300, %303 : vector<16x16xf32>
    %c55 = arith.constant 55 : index
    %305 = memref.load %arg3[%c55] : memref<288xf32, #tpu.memory_space<smem>>
    %306 = vector.broadcast %305 : f32 to vector<16x16xf32>
    %307 = arith.mulf %188, %306 : vector<16x16xf32>
    %308 = arith.addf %304, %307 : vector<16x16xf32>
    %c13_81 = arith.constant 13 : index
    %309 = memref.load %arg4[%c13_81] : memref<72xf32, #tpu.memory_space<smem>>
    %310 = vector.broadcast %309 : f32 to vector<16x16xf32>
    %311 = arith.addf %308, %310 : vector<16x16xf32>
    %c0_82 = arith.constant 0 : index
    %c5_83 = arith.constant 5 : index
    %c0_84 = arith.constant 0 : index
    %c0_85 = arith.constant 0 : index
    %312 = vector.load %arg6[%c0_82, %c5_83, %c0_84, %c0_85] : memref<1x8x16x16xf32, #tpu.memory_space<vmem>>, vector<1x1x16x16xf32>
    %313 = vector.shape_cast %312 : vector<1x1x16x16xf32> to vector<16x16xf32>
    %314 = vector.shape_cast %311 : vector<16x16xf32> to vector<1x1x16x16xf32>
    tpu.vector_store %arg6[%c0_82, %c5_83, %c0_84, %c0_85], %314 {strides = array<i32>} : memref<1x8x16x16xf32, #tpu.memory_space<vmem>>, vector<1x1x16x16xf32>,
    %c56 = arith.constant 56 : index
    %315 = memref.load %arg3[%c56] : memref<288xf32, #tpu.memory_space<smem>>
    %316 = vector.broadcast %315 : f32 to vector<16x16xf32>
    %317 = arith.mulf %185, %316 : vector<16x16xf32>
    %c57 = arith.constant 57 : index
    %318 = memref.load %arg3[%c57] : memref<288xf32, #tpu.memory_space<smem>>
    %319 = vector.broadcast %318 : f32 to vector<16x16xf32>
    %320 = arith.mulf %186, %319 : vector<16x16xf32>
    %321 = arith.addf %317, %320 : vector<16x16xf32>
    %c58 = arith.constant 58 : index
    %322 = memref.load %arg3[%c58] : memref<288xf32, #tpu.memory_space<smem>>
    %323 = vector.broadcast %322 : f32 to vector<16x16xf32>
    %324 = arith.mulf %187, %323 : vector<16x16xf32>
    %325 = arith.addf %321, %324 : vector<16x16xf32>
    %c59 = arith.constant 59 : index
    %326 = memref.load %arg3[%c59] : memref<288xf32, #tpu.memory_space<smem>>
    %327 = vector.broadcast %326 : f32 to vector<16x16xf32>
    %328 = arith.mulf %188, %327 : vector<16x16xf32>
    %329 = arith.addf %325, %328 : vector<16x16xf32>
    %c14_86 = arith.constant 14 : index
    %330 = memref.load %arg4[%c14_86] : memref<72xf32, #tpu.memory_space<smem>>
    %331 = vector.broadcast %330 : f32 to vector<16x16xf32>
    %332 = arith.addf %329, %331 : vector<16x16xf32>
    %c0_87 = arith.constant 0 : index
    %c6_88 = arith.constant 6 : index
    %c0_89 = arith.constant 0 : index
    %c0_90 = arith.constant 0 : index
    %333 = vector.load %arg6[%c0_87, %c6_88, %c0_89, %c0_90] : memref<1x8x16x16xf32, #tpu.memory_space<vmem>>, vector<1x1x16x16xf32>
    %334 = vector.shape_cast %333 : vector<1x1x16x16xf32> to vector<16x16xf32>
    %335 = vector.shape_cast %332 : vector<16x16xf32> to vector<1x1x16x16xf32>
    tpu.vector_store %arg6[%c0_87, %c6_88, %c0_89, %c0_90], %335 {strides = array<i32>} : memref<1x8x16x16xf32, #tpu.memory_space<vmem>>, vector<1x1x16x16xf32>,
    %c60 = arith.constant 60 : index
    %336 = memref.load %arg3[%c60] : memref<288xf32, #tpu.memory_space<smem>>
    %337 = vector.broadcast %336 : f32 to vector<16x16xf32>
    %338 = arith.mulf %185, %337 : vector<16x16xf32>
    %c61 = arith.constant 61 : index
    %339 = memref.load %arg3[%c61] : memref<288xf32, #tpu.memory_space<smem>>
    %340 = vector.broadcast %339 : f32 to vector<16x16xf32>
    %341 = arith.mulf %186, %340 : vector<16x16xf32>
    %342 = arith.addf %338, %341 : vector<16x16xf32>
    %c62 = arith.constant 62 : index
    %343 = memref.load %arg3[%c62] : memref<288xf32, #tpu.memory_space<smem>>
    %344 = vector.broadcast %343 : f32 to vector<16x16xf32>
    %345 = arith.mulf %187, %344 : vector<16x16xf32>
    %346 = arith.addf %342, %345 : vector<16x16xf32>
    %c63 = arith.constant 63 : index
    %347 = memref.load %arg3[%c63] : memref<288xf32, #tpu.memory_space<smem>>
    %348 = vector.broadcast %347 : f32 to vector<16x16xf32>
    %349 = arith.mulf %188, %348 : vector<16x16xf32>
    %350 = arith.addf %346, %349 : vector<16x16xf32>
    %c15_91 = arith.constant 15 : index
    %351 = memref.load %arg4[%c15_91] : memref<72xf32, #tpu.memory_space<smem>>
    %352 = vector.broadcast %351 : f32 to vector<16x16xf32>
    %353 = arith.addf %350, %352 : vector<16x16xf32>
    %c0_92 = arith.constant 0 : index
    %c7_93 = arith.constant 7 : index
    %c0_94 = arith.constant 0 : index
    %c0_95 = arith.constant 0 : index
    %354 = vector.load %arg6[%c0_92, %c7_93, %c0_94, %c0_95] : memref<1x8x16x16xf32, #tpu.memory_space<vmem>>, vector<1x1x16x16xf32>
    %355 = vector.shape_cast %354 : vector<1x1x16x16xf32> to vector<16x16xf32>
    %356 = vector.shape_cast %353 : vector<16x16xf32> to vector<1x1x16x16xf32>
    tpu.vector_store %arg6[%c0_92, %c7_93, %c0_94, %c0_95], %356 {strides = array<i32>} : memref<1x8x16x16xf32, #tpu.memory_space<vmem>>, vector<1x1x16x16xf32>,
    %357 = vector.extract_strided_slice %9 {offsets = [0, 2], sizes = [16, 16], strides = [1, 1]} : vector<16x24xf32> to vector<16x16xf32>
    %358 = vector.extract_strided_slice %10 {offsets = [0, 2], sizes = [16, 16], strides = [1, 1]} : vector<16x24xf32> to vector<16x16xf32>
    %359 = vector.extract_strided_slice %11 {offsets = [0, 2], sizes = [16, 16], strides = [1, 1]} : vector<16x24xf32> to vector<16x16xf32>
    %360 = vector.extract_strided_slice %12 {offsets = [0, 2], sizes = [16, 16], strides = [1, 1]} : vector<16x24xf32> to vector<16x16xf32>
    %c64 = arith.constant 64 : index
    %361 = memref.load %arg3[%c64] : memref<288xf32, #tpu.memory_space<smem>>
    %362 = vector.broadcast %361 : f32 to vector<16x16xf32>
    %363 = arith.mulf %357, %362 : vector<16x16xf32>
    %c65 = arith.constant 65 : index
    %364 = memref.load %arg3[%c65] : memref<288xf32, #tpu.memory_space<smem>>
    %365 = vector.broadcast %364 : f32 to vector<16x16xf32>
    %366 = arith.mulf %358, %365 : vector<16x16xf32>
    %367 = arith.addf %363, %366 : vector<16x16xf32>
    %c66 = arith.constant 66 : index
    %368 = memref.load %arg3[%c66] : memref<288xf32, #tpu.memory_space<smem>>
    %369 = vector.broadcast %368 : f32 to vector<16x16xf32>
    %370 = arith.mulf %359, %369 : vector<16x16xf32>
    %371 = arith.addf %367, %370 : vector<16x16xf32>
    %c67 = arith.constant 67 : index
    %372 = memref.load %arg3[%c67] : memref<288xf32, #tpu.memory_space<smem>>
    %373 = vector.broadcast %372 : f32 to vector<16x16xf32>
    %374 = arith.mulf %360, %373 : vector<16x16xf32>
    %375 = arith.addf %371, %374 : vector<16x16xf32>
    %c16_96 = arith.constant 16 : index
    %376 = memref.load %arg4[%c16_96] : memref<72xf32, #tpu.memory_space<smem>>
    %377 = vector.broadcast %376 : f32 to vector<16x16xf32>
    %378 = arith.addf %375, %377 : vector<16x16xf32>
    %c0_97 = arith.constant 0 : index
    %c0_98 = arith.constant 0 : index
    %c0_99 = arith.constant 0 : index
    %c0_100 = arith.constant 0 : index
    %379 = vector.load %arg7[%c0_97, %c0_98, %c0_99, %c0_100] : memref<1x8x16x16xf32, #tpu.memory_space<vmem>>, vector<1x1x16x16xf32>
    %380 = vector.shape_cast %379 : vector<1x1x16x16xf32> to vector<16x16xf32>
    %381 = vector.shape_cast %378 : vector<16x16xf32> to vector<1x1x16x16xf32>
    tpu.vector_store %arg7[%c0_97, %c0_98, %c0_99, %c0_100], %381 {strides = array<i32>} : memref<1x8x16x16xf32, #tpu.memory_space<vmem>>, vector<1x1x16x16xf32>,
    %c68 = arith.constant 68 : index
    %382 = memref.load %arg3[%c68] : memref<288xf32, #tpu.memory_space<smem>>
    %383 = vector.broadcast %382 : f32 to vector<16x16xf32>
    %384 = arith.mulf %357, %383 : vector<16x16xf32>
    %c69 = arith.constant 69 : index
    %385 = memref.load %arg3[%c69] : memref<288xf32, #tpu.memory_space<smem>>
    %386 = vector.broadcast %385 : f32 to vector<16x16xf32>
    %387 = arith.mulf %358, %386 : vector<16x16xf32>
    %388 = arith.addf %384, %387 : vector<16x16xf32>
    %c70 = arith.constant 70 : index
    %389 = memref.load %arg3[%c70] : memref<288xf32, #tpu.memory_space<smem>>
    %390 = vector.broadcast %389 : f32 to vector<16x16xf32>
    %391 = arith.mulf %359, %390 : vector<16x16xf32>
    %392 = arith.addf %388, %391 : vector<16x16xf32>
    %c71 = arith.constant 71 : index
    %393 = memref.load %arg3[%c71] : memref<288xf32, #tpu.memory_space<smem>>
    %394 = vector.broadcast %393 : f32 to vector<16x16xf32>
    %395 = arith.mulf %360, %394 : vector<16x16xf32>
    %396 = arith.addf %392, %395 : vector<16x16xf32>
    %c17_101 = arith.constant 17 : index
    %397 = memref.load %arg4[%c17_101] : memref<72xf32, #tpu.memory_space<smem>>
    %398 = vector.broadcast %397 : f32 to vector<16x16xf32>
    %399 = arith.addf %396, %398 : vector<16x16xf32>
    %c0_102 = arith.constant 0 : index
    %c1_103 = arith.constant 1 : index
    %c0_104 = arith.constant 0 : index
    %c0_105 = arith.constant 0 : index
    %400 = vector.load %arg7[%c0_102, %c1_103, %c0_104, %c0_105] : memref<1x8x16x16xf32, #tpu.memory_space<vmem>>, vector<1x1x16x16xf32>
    %401 = vector.shape_cast %400 : vector<1x1x16x16xf32> to vector<16x16xf32>
    %402 = vector.shape_cast %399 : vector<16x16xf32> to vector<1x1x16x16xf32>
    tpu.vector_store %arg7[%c0_102, %c1_103, %c0_104, %c0_105], %402 {strides = array<i32>} : memref<1x8x16x16xf32, #tpu.memory_space<vmem>>, vector<1x1x16x16xf32>,
    %c72 = arith.constant 72 : index
    %403 = memref.load %arg3[%c72] : memref<288xf32, #tpu.memory_space<smem>>
    %404 = vector.broadcast %403 : f32 to vector<16x16xf32>
    %405 = arith.mulf %357, %404 : vector<16x16xf32>
    %c73 = arith.constant 73 : index
    %406 = memref.load %arg3[%c73] : memref<288xf32, #tpu.memory_space<smem>>
    %407 = vector.broadcast %406 : f32 to vector<16x16xf32>
    %408 = arith.mulf %358, %407 : vector<16x16xf32>
    %409 = arith.addf %405, %408 : vector<16x16xf32>
    %c74 = arith.constant 74 : index
    %410 = memref.load %arg3[%c74] : memref<288xf32, #tpu.memory_space<smem>>
    %411 = vector.broadcast %410 : f32 to vector<16x16xf32>
    %412 = arith.mulf %359, %411 : vector<16x16xf32>
    %413 = arith.addf %409, %412 : vector<16x16xf32>
    %c75 = arith.constant 75 : index
    %414 = memref.load %arg3[%c75] : memref<288xf32, #tpu.memory_space<smem>>
    %415 = vector.broadcast %414 : f32 to vector<16x16xf32>
    %416 = arith.mulf %360, %415 : vector<16x16xf32>
    %417 = arith.addf %413, %416 : vector<16x16xf32>
    %c18_106 = arith.constant 18 : index
    %418 = memref.load %arg4[%c18_106] : memref<72xf32, #tpu.memory_space<smem>>
    %419 = vector.broadcast %418 : f32 to vector<16x16xf32>
    %420 = arith.addf %417, %419 : vector<16x16xf32>
    %c0_107 = arith.constant 0 : index
    %c2_108 = arith.constant 2 : index
    %c0_109 = arith.constant 0 : index
    %c0_110 = arith.constant 0 : index
    %421 = vector.load %arg7[%c0_107, %c2_108, %c0_109, %c0_110] : memref<1x8x16x16xf32, #tpu.memory_space<vmem>>, vector<1x1x16x16xf32>
    %422 = vector.shape_cast %421 : vector<1x1x16x16xf32> to vector<16x16xf32>
    %423 = vector.shape_cast %420 : vector<16x16xf32> to vector<1x1x16x16xf32>
    tpu.vector_store %arg7[%c0_107, %c2_108, %c0_109, %c0_110], %423 {strides = array<i32>} : memref<1x8x16x16xf32, #tpu.memory_space<vmem>>, vector<1x1x16x16xf32>,
    %c76 = arith.constant 76 : index
    %424 = memref.load %arg3[%c76] : memref<288xf32, #tpu.memory_space<smem>>
    %425 = vector.broadcast %424 : f32 to vector<16x16xf32>
    %426 = arith.mulf %357, %425 : vector<16x16xf32>
    %c77 = arith.constant 77 : index
    %427 = memref.load %arg3[%c77] : memref<288xf32, #tpu.memory_space<smem>>
    %428 = vector.broadcast %427 : f32 to vector<16x16xf32>
    %429 = arith.mulf %358, %428 : vector<16x16xf32>
    %430 = arith.addf %426, %429 : vector<16x16xf32>
    %c78 = arith.constant 78 : index
    %431 = memref.load %arg3[%c78] : memref<288xf32, #tpu.memory_space<smem>>
    %432 = vector.broadcast %431 : f32 to vector<16x16xf32>
    %433 = arith.mulf %359, %432 : vector<16x16xf32>
    %434 = arith.addf %430, %433 : vector<16x16xf32>
    %c79 = arith.constant 79 : index
    %435 = memref.load %arg3[%c79] : memref<288xf32, #tpu.memory_space<smem>>
    %436 = vector.broadcast %435 : f32 to vector<16x16xf32>
    %437 = arith.mulf %360, %436 : vector<16x16xf32>
    %438 = arith.addf %434, %437 : vector<16x16xf32>
    %c19_111 = arith.constant 19 : index
    %439 = memref.load %arg4[%c19_111] : memref<72xf32, #tpu.memory_space<smem>>
    %440 = vector.broadcast %439 : f32 to vector<16x16xf32>
    %441 = arith.addf %438, %440 : vector<16x16xf32>
    %c0_112 = arith.constant 0 : index
    %c3_113 = arith.constant 3 : index
    %c0_114 = arith.constant 0 : index
    %c0_115 = arith.constant 0 : index
    %442 = vector.load %arg7[%c0_112, %c3_113, %c0_114, %c0_115] : memref<1x8x16x16xf32, #tpu.memory_space<vmem>>, vector<1x1x16x16xf32>
    %443 = vector.shape_cast %442 : vector<1x1x16x16xf32> to vector<16x16xf32>
    %444 = vector.shape_cast %441 : vector<16x16xf32> to vector<1x1x16x16xf32>
    tpu.vector_store %arg7[%c0_112, %c3_113, %c0_114, %c0_115], %444 {strides = array<i32>} : memref<1x8x16x16xf32, #tpu.memory_space<vmem>>, vector<1x1x16x16xf32>,
    %c80 = arith.constant 80 : index
    %445 = memref.load %arg3[%c80] : memref<288xf32, #tpu.memory_space<smem>>
    %446 = vector.broadcast %445 : f32 to vector<16x16xf32>
    %447 = arith.mulf %357, %446 : vector<16x16xf32>
    %c81 = arith.constant 81 : index
    %448 = memref.load %arg3[%c81] : memref<288xf32, #tpu.memory_space<smem>>
    %449 = vector.broadcast %448 : f32 to vector<16x16xf32>
    %450 = arith.mulf %358, %449 : vector<16x16xf32>
    %451 = arith.addf %447, %450 : vector<16x16xf32>
    %c82 = arith.constant 82 : index
    %452 = memref.load %arg3[%c82] : memref<288xf32, #tpu.memory_space<smem>>
    %453 = vector.broadcast %452 : f32 to vector<16x16xf32>
    %454 = arith.mulf %359, %453 : vector<16x16xf32>
    %455 = arith.addf %451, %454 : vector<16x16xf32>
    %c83 = arith.constant 83 : index
    %456 = memref.load %arg3[%c83] : memref<288xf32, #tpu.memory_space<smem>>
    %457 = vector.broadcast %456 : f32 to vector<16x16xf32>
    %458 = arith.mulf %360, %457 : vector<16x16xf32>
    %459 = arith.addf %455, %458 : vector<16x16xf32>
    %c20_116 = arith.constant 20 : index
    %460 = memref.load %arg4[%c20_116] : memref<72xf32, #tpu.memory_space<smem>>
    %461 = vector.broadcast %460 : f32 to vector<16x16xf32>
    %462 = arith.addf %459, %461 : vector<16x16xf32>
    %c0_117 = arith.constant 0 : index
    %c4_118 = arith.constant 4 : index
    %c0_119 = arith.constant 0 : index
    %c0_120 = arith.constant 0 : index
    %463 = vector.load %arg7[%c0_117, %c4_118, %c0_119, %c0_120] : memref<1x8x16x16xf32, #tpu.memory_space<vmem>>, vector<1x1x16x16xf32>
    %464 = vector.shape_cast %463 : vector<1x1x16x16xf32> to vector<16x16xf32>
    %465 = vector.shape_cast %462 : vector<16x16xf32> to vector<1x1x16x16xf32>
    tpu.vector_store %arg7[%c0_117, %c4_118, %c0_119, %c0_120], %465 {strides = array<i32>} : memref<1x8x16x16xf32, #tpu.memory_space<vmem>>, vector<1x1x16x16xf32>,
    %c84 = arith.constant 84 : index
    %466 = memref.load %arg3[%c84] : memref<288xf32, #tpu.memory_space<smem>>
    %467 = vector.broadcast %466 : f32 to vector<16x16xf32>
    %468 = arith.mulf %357, %467 : vector<16x16xf32>
    %c85 = arith.constant 85 : index
    %469 = memref.load %arg3[%c85] : memref<288xf32, #tpu.memory_space<smem>>
    %470 = vector.broadcast %469 : f32 to vector<16x16xf32>
    %471 = arith.mulf %358, %470 : vector<16x16xf32>
    %472 = arith.addf %468, %471 : vector<16x16xf32>
    %c86 = arith.constant 86 : index
    %473 = memref.load %arg3[%c86] : memref<288xf32, #tpu.memory_space<smem>>
    %474 = vector.broadcast %473 : f32 to vector<16x16xf32>
    %475 = arith.mulf %359, %474 : vector<16x16xf32>
    %476 = arith.addf %472, %475 : vector<16x16xf32>
    %c87 = arith.constant 87 : index
    %477 = memref.load %arg3[%c87] : memref<288xf32, #tpu.memory_space<smem>>
    %478 = vector.broadcast %477 : f32 to vector<16x16xf32>
    %479 = arith.mulf %360, %478 : vector<16x16xf32>
    %480 = arith.addf %476, %479 : vector<16x16xf32>
    %c21_121 = arith.constant 21 : index
    %481 = memref.load %arg4[%c21_121] : memref<72xf32, #tpu.memory_space<smem>>
    %482 = vector.broadcast %481 : f32 to vector<16x16xf32>
    %483 = arith.addf %480, %482 : vector<16x16xf32>
    %c0_122 = arith.constant 0 : index
    %c5_123 = arith.constant 5 : index
    %c0_124 = arith.constant 0 : index
    %c0_125 = arith.constant 0 : index
    %484 = vector.load %arg7[%c0_122, %c5_123, %c0_124, %c0_125] : memref<1x8x16x16xf32, #tpu.memory_space<vmem>>, vector<1x1x16x16xf32>
    %485 = vector.shape_cast %484 : vector<1x1x16x16xf32> to vector<16x16xf32>
    %486 = vector.shape_cast %483 : vector<16x16xf32> to vector<1x1x16x16xf32>
    tpu.vector_store %arg7[%c0_122, %c5_123, %c0_124, %c0_125], %486 {strides = array<i32>} : memref<1x8x16x16xf32, #tpu.memory_space<vmem>>, vector<1x1x16x16xf32>,
    %c88 = arith.constant 88 : index
    %487 = memref.load %arg3[%c88] : memref<288xf32, #tpu.memory_space<smem>>
    %488 = vector.broadcast %487 : f32 to vector<16x16xf32>
    %489 = arith.mulf %357, %488 : vector<16x16xf32>
    %c89 = arith.constant 89 : index
    %490 = memref.load %arg3[%c89] : memref<288xf32, #tpu.memory_space<smem>>
    %491 = vector.broadcast %490 : f32 to vector<16x16xf32>
    %492 = arith.mulf %358, %491 : vector<16x16xf32>
    %493 = arith.addf %489, %492 : vector<16x16xf32>
    %c90 = arith.constant 90 : index
    %494 = memref.load %arg3[%c90] : memref<288xf32, #tpu.memory_space<smem>>
    %495 = vector.broadcast %494 : f32 to vector<16x16xf32>
    %496 = arith.mulf %359, %495 : vector<16x16xf32>
    %497 = arith.addf %493, %496 : vector<16x16xf32>
    %c91 = arith.constant 91 : index
    %498 = memref.load %arg3[%c91] : memref<288xf32, #tpu.memory_space<smem>>
    %499 = vector.broadcast %498 : f32 to vector<16x16xf32>
    %500 = arith.mulf %360, %499 : vector<16x16xf32>
    %501 = arith.addf %497, %500 : vector<16x16xf32>
    %c22_126 = arith.constant 22 : index
    %502 = memref.load %arg4[%c22_126] : memref<72xf32, #tpu.memory_space<smem>>
    %503 = vector.broadcast %502 : f32 to vector<16x16xf32>
    %504 = arith.addf %501, %503 : vector<16x16xf32>
    %c0_127 = arith.constant 0 : index
    %c6_128 = arith.constant 6 : index
    %c0_129 = arith.constant 0 : index
    %c0_130 = arith.constant 0 : index
    %505 = vector.load %arg7[%c0_127, %c6_128, %c0_129, %c0_130] : memref<1x8x16x16xf32, #tpu.memory_space<vmem>>, vector<1x1x16x16xf32>
    %506 = vector.shape_cast %505 : vector<1x1x16x16xf32> to vector<16x16xf32>
    %507 = vector.shape_cast %504 : vector<16x16xf32> to vector<1x1x16x16xf32>
    tpu.vector_store %arg7[%c0_127, %c6_128, %c0_129, %c0_130], %507 {strides = array<i32>} : memref<1x8x16x16xf32, #tpu.memory_space<vmem>>, vector<1x1x16x16xf32>,
    %c92 = arith.constant 92 : index
    %508 = memref.load %arg3[%c92] : memref<288xf32, #tpu.memory_space<smem>>
    %509 = vector.broadcast %508 : f32 to vector<16x16xf32>
    %510 = arith.mulf %357, %509 : vector<16x16xf32>
    %c93 = arith.constant 93 : index
    %511 = memref.load %arg3[%c93] : memref<288xf32, #tpu.memory_space<smem>>
    %512 = vector.broadcast %511 : f32 to vector<16x16xf32>
    %513 = arith.mulf %358, %512 : vector<16x16xf32>
    %514 = arith.addf %510, %513 : vector<16x16xf32>
    %c94 = arith.constant 94 : index
    %515 = memref.load %arg3[%c94] : memref<288xf32, #tpu.memory_space<smem>>
    %516 = vector.broadcast %515 : f32 to vector<16x16xf32>
    %517 = arith.mulf %359, %516 : vector<16x16xf32>
    %518 = arith.addf %514, %517 : vector<16x16xf32>
    %c95 = arith.constant 95 : index
    %519 = memref.load %arg3[%c95] : memref<288xf32, #tpu.memory_space<smem>>
    %520 = vector.broadcast %519 : f32 to vector<16x16xf32>
    %521 = arith.mulf %360, %520 : vector<16x16xf32>
    %522 = arith.addf %518, %521 : vector<16x16xf32>
    %c23_131 = arith.constant 23 : index
    %523 = memref.load %arg4[%c23_131] : memref<72xf32, #tpu.memory_space<smem>>
    %524 = vector.broadcast %523 : f32 to vector<16x16xf32>
    %525 = arith.addf %522, %524 : vector<16x16xf32>
    %c0_132 = arith.constant 0 : index
    %c7_133 = arith.constant 7 : index
    %c0_134 = arith.constant 0 : index
    %c0_135 = arith.constant 0 : index
    %526 = vector.load %arg7[%c0_132, %c7_133, %c0_134, %c0_135] : memref<1x8x16x16xf32, #tpu.memory_space<vmem>>, vector<1x1x16x16xf32>
    %527 = vector.shape_cast %526 : vector<1x1x16x16xf32> to vector<16x16xf32>
    %528 = vector.shape_cast %525 : vector<16x16xf32> to vector<1x1x16x16xf32>
    tpu.vector_store %arg7[%c0_132, %c7_133, %c0_134, %c0_135], %528 {strides = array<i32>} : memref<1x8x16x16xf32, #tpu.memory_space<vmem>>, vector<1x1x16x16xf32>,
    %529 = vector.extract_strided_slice %9 {offsets = [0, 3], sizes = [16, 16], strides = [1, 1]} : vector<16x24xf32> to vector<16x16xf32>
    %530 = vector.extract_strided_slice %10 {offsets = [0, 3], sizes = [16, 16], strides = [1, 1]} : vector<16x24xf32> to vector<16x16xf32>
    %531 = vector.extract_strided_slice %11 {offsets = [0, 3], sizes = [16, 16], strides = [1, 1]} : vector<16x24xf32> to vector<16x16xf32>
    %532 = vector.extract_strided_slice %12 {offsets = [0, 3], sizes = [16, 16], strides = [1, 1]} : vector<16x24xf32> to vector<16x16xf32>
    %c96 = arith.constant 96 : index
    %533 = memref.load %arg3[%c96] : memref<288xf32, #tpu.memory_space<smem>>
    %534 = vector.broadcast %533 : f32 to vector<16x16xf32>
    %535 = arith.mulf %529, %534 : vector<16x16xf32>
    %c97 = arith.constant 97 : index
    %536 = memref.load %arg3[%c97] : memref<288xf32, #tpu.memory_space<smem>>
    %537 = vector.broadcast %536 : f32 to vector<16x16xf32>
    %538 = arith.mulf %530, %537 : vector<16x16xf32>
    %539 = arith.addf %535, %538 : vector<16x16xf32>
    %c98 = arith.constant 98 : index
    %540 = memref.load %arg3[%c98] : memref<288xf32, #tpu.memory_space<smem>>
    %541 = vector.broadcast %540 : f32 to vector<16x16xf32>
    %542 = arith.mulf %531, %541 : vector<16x16xf32>
    %543 = arith.addf %539, %542 : vector<16x16xf32>
    %c99 = arith.constant 99 : index
    %544 = memref.load %arg3[%c99] : memref<288xf32, #tpu.memory_space<smem>>
    %545 = vector.broadcast %544 : f32 to vector<16x16xf32>
    %546 = arith.mulf %532, %545 : vector<16x16xf32>
    %547 = arith.addf %543, %546 : vector<16x16xf32>
    %c24_136 = arith.constant 24 : index
    %548 = memref.load %arg4[%c24_136] : memref<72xf32, #tpu.memory_space<smem>>
    %549 = vector.broadcast %548 : f32 to vector<16x16xf32>
    %550 = arith.addf %547, %549 : vector<16x16xf32>
    %c0_137 = arith.constant 0 : index
    %c0_138 = arith.constant 0 : index
    %c0_139 = arith.constant 0 : index
    %c0_140 = arith.constant 0 : index
    %551 = vector.load %arg8[%c0_137, %c0_138, %c0_139, %c0_140] : memref<1x8x16x16xf32, #tpu.memory_space<vmem>>, vector<1x1x16x16xf32>
    %552 = vector.shape_cast %551 : vector<1x1x16x16xf32> to vector<16x16xf32>
    %553 = vector.shape_cast %550 : vector<16x16xf32> to vector<1x1x16x16xf32>
    tpu.vector_store %arg8[%c0_137, %c0_138, %c0_139, %c0_140], %553 {strides = array<i32>} : memref<1x8x16x16xf32, #tpu.memory_space<vmem>>, vector<1x1x16x16xf32>,
    %c100 = arith.constant 100 : index
    %554 = memref.load %arg3[%c100] : memref<288xf32, #tpu.memory_space<smem>>
    %555 = vector.broadcast %554 : f32 to vector<16x16xf32>
    %556 = arith.mulf %529, %555 : vector<16x16xf32>
    %c101 = arith.constant 101 : index
    %557 = memref.load %arg3[%c101] : memref<288xf32, #tpu.memory_space<smem>>
    %558 = vector.broadcast %557 : f32 to vector<16x16xf32>
    %559 = arith.mulf %530, %558 : vector<16x16xf32>
    %560 = arith.addf %556, %559 : vector<16x16xf32>
    %c102 = arith.constant 102 : index
    %561 = memref.load %arg3[%c102] : memref<288xf32, #tpu.memory_space<smem>>
    %562 = vector.broadcast %561 : f32 to vector<16x16xf32>
    %563 = arith.mulf %531, %562 : vector<16x16xf32>
    %564 = arith.addf %560, %563 : vector<16x16xf32>
    %c103 = arith.constant 103 : index
    %565 = memref.load %arg3[%c103] : memref<288xf32, #tpu.memory_space<smem>>
    %566 = vector.broadcast %565 : f32 to vector<16x16xf32>
    %567 = arith.mulf %532, %566 : vector<16x16xf32>
    %568 = arith.addf %564, %567 : vector<16x16xf32>
    %c25_141 = arith.constant 25 : index
    %569 = memref.load %arg4[%c25_141] : memref<72xf32, #tpu.memory_space<smem>>
    %570 = vector.broadcast %569 : f32 to vector<16x16xf32>
    %571 = arith.addf %568, %570 : vector<16x16xf32>
    %c0_142 = arith.constant 0 : index
    %c1_143 = arith.constant 1 : index
    %c0_144 = arith.constant 0 : index
    %c0_145 = arith.constant 0 : index
    %572 = vector.load %arg8[%c0_142, %c1_143, %c0_144, %c0_145] : memref<1x8x16x16xf32, #tpu.memory_space<vmem>>, vector<1x1x16x16xf32>
    %573 = vector.shape_cast %572 : vector<1x1x16x16xf32> to vector<16x16xf32>
    %574 = vector.shape_cast %571 : vector<16x16xf32> to vector<1x1x16x16xf32>
    tpu.vector_store %arg8[%c0_142, %c1_143, %c0_144, %c0_145], %574 {strides = array<i32>} : memref<1x8x16x16xf32, #tpu.memory_space<vmem>>, vector<1x1x16x16xf32>,
    %c104 = arith.constant 104 : index
    %575 = memref.load %arg3[%c104] : memref<288xf32, #tpu.memory_space<smem>>
    %576 = vector.broadcast %575 : f32 to vector<16x16xf32>
    %577 = arith.mulf %529, %576 : vector<16x16xf32>
    %c105 = arith.constant 105 : index
    %578 = memref.load %arg3[%c105] : memref<288xf32, #tpu.memory_space<smem>>
    %579 = vector.broadcast %578 : f32 to vector<16x16xf32>
    %580 = arith.mulf %530, %579 : vector<16x16xf32>
    %581 = arith.addf %577, %580 : vector<16x16xf32>
    %c106 = arith.constant 106 : index
    %582 = memref.load %arg3[%c106] : memref<288xf32, #tpu.memory_space<smem>>
    %583 = vector.broadcast %582 : f32 to vector<16x16xf32>
    %584 = arith.mulf %531, %583 : vector<16x16xf32>
    %585 = arith.addf %581, %584 : vector<16x16xf32>
    %c107 = arith.constant 107 : index
    %586 = memref.load %arg3[%c107] : memref<288xf32, #tpu.memory_space<smem>>
    %587 = vector.broadcast %586 : f32 to vector<16x16xf32>
    %588 = arith.mulf %532, %587 : vector<16x16xf32>
    %589 = arith.addf %585, %588 : vector<16x16xf32>
    %c26_146 = arith.constant 26 : index
    %590 = memref.load %arg4[%c26_146] : memref<72xf32, #tpu.memory_space<smem>>
    %591 = vector.broadcast %590 : f32 to vector<16x16xf32>
    %592 = arith.addf %589, %591 : vector<16x16xf32>
    %c0_147 = arith.constant 0 : index
    %c2_148 = arith.constant 2 : index
    %c0_149 = arith.constant 0 : index
    %c0_150 = arith.constant 0 : index
    %593 = vector.load %arg8[%c0_147, %c2_148, %c0_149, %c0_150] : memref<1x8x16x16xf32, #tpu.memory_space<vmem>>, vector<1x1x16x16xf32>
    %594 = vector.shape_cast %593 : vector<1x1x16x16xf32> to vector<16x16xf32>
    %595 = vector.shape_cast %592 : vector<16x16xf32> to vector<1x1x16x16xf32>
    tpu.vector_store %arg8[%c0_147, %c2_148, %c0_149, %c0_150], %595 {strides = array<i32>} : memref<1x8x16x16xf32, #tpu.memory_space<vmem>>, vector<1x1x16x16xf32>,
    %c108 = arith.constant 108 : index
    %596 = memref.load %arg3[%c108] : memref<288xf32, #tpu.memory_space<smem>>
    %597 = vector.broadcast %596 : f32 to vector<16x16xf32>
    %598 = arith.mulf %529, %597 : vector<16x16xf32>
    %c109 = arith.constant 109 : index
    %599 = memref.load %arg3[%c109] : memref<288xf32, #tpu.memory_space<smem>>
    %600 = vector.broadcast %599 : f32 to vector<16x16xf32>
    %601 = arith.mulf %530, %600 : vector<16x16xf32>
    %602 = arith.addf %598, %601 : vector<16x16xf32>
    %c110 = arith.constant 110 : index
    %603 = memref.load %arg3[%c110] : memref<288xf32, #tpu.memory_space<smem>>
    %604 = vector.broadcast %603 : f32 to vector<16x16xf32>
    %605 = arith.mulf %531, %604 : vector<16x16xf32>
    %606 = arith.addf %602, %605 : vector<16x16xf32>
    %c111 = arith.constant 111 : index
    %607 = memref.load %arg3[%c111] : memref<288xf32, #tpu.memory_space<smem>>
    %608 = vector.broadcast %607 : f32 to vector<16x16xf32>
    %609 = arith.mulf %532, %608 : vector<16x16xf32>
    %610 = arith.addf %606, %609 : vector<16x16xf32>
    %c27_151 = arith.constant 27 : index
    %611 = memref.load %arg4[%c27_151] : memref<72xf32, #tpu.memory_space<smem>>
    %612 = vector.broadcast %611 : f32 to vector<16x16xf32>
    %613 = arith.addf %610, %612 : vector<16x16xf32>
    %c0_152 = arith.constant 0 : index
    %c3_153 = arith.constant 3 : index
    %c0_154 = arith.constant 0 : index
    %c0_155 = arith.constant 0 : index
    %614 = vector.load %arg8[%c0_152, %c3_153, %c0_154, %c0_155] : memref<1x8x16x16xf32, #tpu.memory_space<vmem>>, vector<1x1x16x16xf32>
    %615 = vector.shape_cast %614 : vector<1x1x16x16xf32> to vector<16x16xf32>
    %616 = vector.shape_cast %613 : vector<16x16xf32> to vector<1x1x16x16xf32>
    tpu.vector_store %arg8[%c0_152, %c3_153, %c0_154, %c0_155], %616 {strides = array<i32>} : memref<1x8x16x16xf32, #tpu.memory_space<vmem>>, vector<1x1x16x16xf32>,
    %c112 = arith.constant 112 : index
    %617 = memref.load %arg3[%c112] : memref<288xf32, #tpu.memory_space<smem>>
    %618 = vector.broadcast %617 : f32 to vector<16x16xf32>
    %619 = arith.mulf %529, %618 : vector<16x16xf32>
    %c113 = arith.constant 113 : index
    %620 = memref.load %arg3[%c113] : memref<288xf32, #tpu.memory_space<smem>>
    %621 = vector.broadcast %620 : f32 to vector<16x16xf32>
    %622 = arith.mulf %530, %621 : vector<16x16xf32>
    %623 = arith.addf %619, %622 : vector<16x16xf32>
    %c114 = arith.constant 114 : index
    %624 = memref.load %arg3[%c114] : memref<288xf32, #tpu.memory_space<smem>>
    %625 = vector.broadcast %624 : f32 to vector<16x16xf32>
    %626 = arith.mulf %531, %625 : vector<16x16xf32>
    %627 = arith.addf %623, %626 : vector<16x16xf32>
    %c115 = arith.constant 115 : index
    %628 = memref.load %arg3[%c115] : memref<288xf32, #tpu.memory_space<smem>>
    %629 = vector.broadcast %628 : f32 to vector<16x16xf32>
    %630 = arith.mulf %532, %629 : vector<16x16xf32>
    %631 = arith.addf %627, %630 : vector<16x16xf32>
    %c28_156 = arith.constant 28 : index
    %632 = memref.load %arg4[%c28_156] : memref<72xf32, #tpu.memory_space<smem>>
    %633 = vector.broadcast %632 : f32 to vector<16x16xf32>
    %634 = arith.addf %631, %633 : vector<16x16xf32>
    %c0_157 = arith.constant 0 : index
    %c4_158 = arith.constant 4 : index
    %c0_159 = arith.constant 0 : index
    %c0_160 = arith.constant 0 : index
    %635 = vector.load %arg8[%c0_157, %c4_158, %c0_159, %c0_160] : memref<1x8x16x16xf32, #tpu.memory_space<vmem>>, vector<1x1x16x16xf32>
    %636 = vector.shape_cast %635 : vector<1x1x16x16xf32> to vector<16x16xf32>
    %637 = vector.shape_cast %634 : vector<16x16xf32> to vector<1x1x16x16xf32>
    tpu.vector_store %arg8[%c0_157, %c4_158, %c0_159, %c0_160], %637 {strides = array<i32>} : memref<1x8x16x16xf32, #tpu.memory_space<vmem>>, vector<1x1x16x16xf32>,
    %c116 = arith.constant 116 : index
    %638 = memref.load %arg3[%c116] : memref<288xf32, #tpu.memory_space<smem>>
    %639 = vector.broadcast %638 : f32 to vector<16x16xf32>
    %640 = arith.mulf %529, %639 : vector<16x16xf32>
    %c117 = arith.constant 117 : index
    %641 = memref.load %arg3[%c117] : memref<288xf32, #tpu.memory_space<smem>>
    %642 = vector.broadcast %641 : f32 to vector<16x16xf32>
    %643 = arith.mulf %530, %642 : vector<16x16xf32>
    %644 = arith.addf %640, %643 : vector<16x16xf32>
    %c118 = arith.constant 118 : index
    %645 = memref.load %arg3[%c118] : memref<288xf32, #tpu.memory_space<smem>>
    %646 = vector.broadcast %645 : f32 to vector<16x16xf32>
    %647 = arith.mulf %531, %646 : vector<16x16xf32>
    %648 = arith.addf %644, %647 : vector<16x16xf32>
    %c119 = arith.constant 119 : index
    %649 = memref.load %arg3[%c119] : memref<288xf32, #tpu.memory_space<smem>>
    %650 = vector.broadcast %649 : f32 to vector<16x16xf32>
    %651 = arith.mulf %532, %650 : vector<16x16xf32>
    %652 = arith.addf %648, %651 : vector<16x16xf32>
    %c29_161 = arith.constant 29 : index
    %653 = memref.load %arg4[%c29_161] : memref<72xf32, #tpu.memory_space<smem>>
    %654 = vector.broadcast %653 : f32 to vector<16x16xf32>
    %655 = arith.addf %652, %654 : vector<16x16xf32>
    %c0_162 = arith.constant 0 : index
    %c5_163 = arith.constant 5 : index
    %c0_164 = arith.constant 0 : index
    %c0_165 = arith.constant 0 : index
    %656 = vector.load %arg8[%c0_162, %c5_163, %c0_164, %c0_165] : memref<1x8x16x16xf32, #tpu.memory_space<vmem>>, vector<1x1x16x16xf32>
    %657 = vector.shape_cast %656 : vector<1x1x16x16xf32> to vector<16x16xf32>
    %658 = vector.shape_cast %655 : vector<16x16xf32> to vector<1x1x16x16xf32>
    tpu.vector_store %arg8[%c0_162, %c5_163, %c0_164, %c0_165], %658 {strides = array<i32>} : memref<1x8x16x16xf32, #tpu.memory_space<vmem>>, vector<1x1x16x16xf32>,
    %c120 = arith.constant 120 : index
    %659 = memref.load %arg3[%c120] : memref<288xf32, #tpu.memory_space<smem>>
    %660 = vector.broadcast %659 : f32 to vector<16x16xf32>
    %661 = arith.mulf %529, %660 : vector<16x16xf32>
    %c121 = arith.constant 121 : index
    %662 = memref.load %arg3[%c121] : memref<288xf32, #tpu.memory_space<smem>>
    %663 = vector.broadcast %662 : f32 to vector<16x16xf32>
    %664 = arith.mulf %530, %663 : vector<16x16xf32>
    %665 = arith.addf %661, %664 : vector<16x16xf32>
    %c122 = arith.constant 122 : index
    %666 = memref.load %arg3[%c122] : memref<288xf32, #tpu.memory_space<smem>>
    %667 = vector.broadcast %666 : f32 to vector<16x16xf32>
    %668 = arith.mulf %531, %667 : vector<16x16xf32>
    %669 = arith.addf %665, %668 : vector<16x16xf32>
    %c123 = arith.constant 123 : index
    %670 = memref.load %arg3[%c123] : memref<288xf32, #tpu.memory_space<smem>>
    %671 = vector.broadcast %670 : f32 to vector<16x16xf32>
    %672 = arith.mulf %532, %671 : vector<16x16xf32>
    %673 = arith.addf %669, %672 : vector<16x16xf32>
    %c30_166 = arith.constant 30 : index
    %674 = memref.load %arg4[%c30_166] : memref<72xf32, #tpu.memory_space<smem>>
    %675 = vector.broadcast %674 : f32 to vector<16x16xf32>
    %676 = arith.addf %673, %675 : vector<16x16xf32>
    %c0_167 = arith.constant 0 : index
    %c6_168 = arith.constant 6 : index
    %c0_169 = arith.constant 0 : index
    %c0_170 = arith.constant 0 : index
    %677 = vector.load %arg8[%c0_167, %c6_168, %c0_169, %c0_170] : memref<1x8x16x16xf32, #tpu.memory_space<vmem>>, vector<1x1x16x16xf32>
    %678 = vector.shape_cast %677 : vector<1x1x16x16xf32> to vector<16x16xf32>
    %679 = vector.shape_cast %676 : vector<16x16xf32> to vector<1x1x16x16xf32>
    tpu.vector_store %arg8[%c0_167, %c6_168, %c0_169, %c0_170], %679 {strides = array<i32>} : memref<1x8x16x16xf32, #tpu.memory_space<vmem>>, vector<1x1x16x16xf32>,
    %c124 = arith.constant 124 : index
    %680 = memref.load %arg3[%c124] : memref<288xf32, #tpu.memory_space<smem>>
    %681 = vector.broadcast %680 : f32 to vector<16x16xf32>
    %682 = arith.mulf %529, %681 : vector<16x16xf32>
    %c125 = arith.constant 125 : index
    %683 = memref.load %arg3[%c125] : memref<288xf32, #tpu.memory_space<smem>>
    %684 = vector.broadcast %683 : f32 to vector<16x16xf32>
    %685 = arith.mulf %530, %684 : vector<16x16xf32>
    %686 = arith.addf %682, %685 : vector<16x16xf32>
    %c126 = arith.constant 126 : index
    %687 = memref.load %arg3[%c126] : memref<288xf32, #tpu.memory_space<smem>>
    %688 = vector.broadcast %687 : f32 to vector<16x16xf32>
    %689 = arith.mulf %531, %688 : vector<16x16xf32>
    %690 = arith.addf %686, %689 : vector<16x16xf32>
    %c127 = arith.constant 127 : index
    %691 = memref.load %arg3[%c127] : memref<288xf32, #tpu.memory_space<smem>>
    %692 = vector.broadcast %691 : f32 to vector<16x16xf32>
    %693 = arith.mulf %532, %692 : vector<16x16xf32>
    %694 = arith.addf %690, %693 : vector<16x16xf32>
    %c31_171 = arith.constant 31 : index
    %695 = memref.load %arg4[%c31_171] : memref<72xf32, #tpu.memory_space<smem>>
    %696 = vector.broadcast %695 : f32 to vector<16x16xf32>
    %697 = arith.addf %694, %696 : vector<16x16xf32>
    %c0_172 = arith.constant 0 : index
    %c7_173 = arith.constant 7 : index
    %c0_174 = arith.constant 0 : index
    %c0_175 = arith.constant 0 : index
    %698 = vector.load %arg8[%c0_172, %c7_173, %c0_174, %c0_175] : memref<1x8x16x16xf32, #tpu.memory_space<vmem>>, vector<1x1x16x16xf32>
    %699 = vector.shape_cast %698 : vector<1x1x16x16xf32> to vector<16x16xf32>
    %700 = vector.shape_cast %697 : vector<16x16xf32> to vector<1x1x16x16xf32>
    tpu.vector_store %arg8[%c0_172, %c7_173, %c0_174, %c0_175], %700 {strides = array<i32>} : memref<1x8x16x16xf32, #tpu.memory_space<vmem>>, vector<1x1x16x16xf32>,
    %701 = vector.extract_strided_slice %9 {offsets = [0, 4], sizes = [16, 16], strides = [1, 1]} : vector<16x24xf32> to vector<16x16xf32>
    %702 = vector.extract_strided_slice %10 {offsets = [0, 4], sizes = [16, 16], strides = [1, 1]} : vector<16x24xf32> to vector<16x16xf32>
    %703 = vector.extract_strided_slice %11 {offsets = [0, 4], sizes = [16, 16], strides = [1, 1]} : vector<16x24xf32> to vector<16x16xf32>
    %704 = vector.extract_strided_slice %12 {offsets = [0, 4], sizes = [16, 16], strides = [1, 1]} : vector<16x24xf32> to vector<16x16xf32>
    %c128 = arith.constant 128 : index
    %705 = memref.load %arg3[%c128] : memref<288xf32, #tpu.memory_space<smem>>
    %706 = vector.broadcast %705 : f32 to vector<16x16xf32>
    %707 = arith.mulf %701, %706 : vector<16x16xf32>
    %c129 = arith.constant 129 : index
    %708 = memref.load %arg3[%c129] : memref<288xf32, #tpu.memory_space<smem>>
    %709 = vector.broadcast %708 : f32 to vector<16x16xf32>
    %710 = arith.mulf %702, %709 : vector<16x16xf32>
    %711 = arith.addf %707, %710 : vector<16x16xf32>
    %c130 = arith.constant 130 : index
    %712 = memref.load %arg3[%c130] : memref<288xf32, #tpu.memory_space<smem>>
    %713 = vector.broadcast %712 : f32 to vector<16x16xf32>
    %714 = arith.mulf %703, %713 : vector<16x16xf32>
    %715 = arith.addf %711, %714 : vector<16x16xf32>
    %c131 = arith.constant 131 : index
    %716 = memref.load %arg3[%c131] : memref<288xf32, #tpu.memory_space<smem>>
    %717 = vector.broadcast %716 : f32 to vector<16x16xf32>
    %718 = arith.mulf %704, %717 : vector<16x16xf32>
    %719 = arith.addf %715, %718 : vector<16x16xf32>
    %c32_176 = arith.constant 32 : index
    %720 = memref.load %arg4[%c32_176] : memref<72xf32, #tpu.memory_space<smem>>
    %721 = vector.broadcast %720 : f32 to vector<16x16xf32>
    %722 = arith.addf %719, %721 : vector<16x16xf32>
    %c0_177 = arith.constant 0 : index
    %c0_178 = arith.constant 0 : index
    %c0_179 = arith.constant 0 : index
    %c0_180 = arith.constant 0 : index
    %723 = vector.load %arg9[%c0_177, %c0_178, %c0_179, %c0_180] : memref<1x8x16x16xf32, #tpu.memory_space<vmem>>, vector<1x1x16x16xf32>
    %724 = vector.shape_cast %723 : vector<1x1x16x16xf32> to vector<16x16xf32>
    %725 = vector.shape_cast %722 : vector<16x16xf32> to vector<1x1x16x16xf32>
    tpu.vector_store %arg9[%c0_177, %c0_178, %c0_179, %c0_180], %725 {strides = array<i32>} : memref<1x8x16x16xf32, #tpu.memory_space<vmem>>, vector<1x1x16x16xf32>,
    %c132 = arith.constant 132 : index
    %726 = memref.load %arg3[%c132] : memref<288xf32, #tpu.memory_space<smem>>
    %727 = vector.broadcast %726 : f32 to vector<16x16xf32>
    %728 = arith.mulf %701, %727 : vector<16x16xf32>
    %c133 = arith.constant 133 : index
    %729 = memref.load %arg3[%c133] : memref<288xf32, #tpu.memory_space<smem>>
    %730 = vector.broadcast %729 : f32 to vector<16x16xf32>
    %731 = arith.mulf %702, %730 : vector<16x16xf32>
    %732 = arith.addf %728, %731 : vector<16x16xf32>
    %c134 = arith.constant 134 : index
    %733 = memref.load %arg3[%c134] : memref<288xf32, #tpu.memory_space<smem>>
    %734 = vector.broadcast %733 : f32 to vector<16x16xf32>
    %735 = arith.mulf %703, %734 : vector<16x16xf32>
    %736 = arith.addf %732, %735 : vector<16x16xf32>
    %c135 = arith.constant 135 : index
    %737 = memref.load %arg3[%c135] : memref<288xf32, #tpu.memory_space<smem>>
    %738 = vector.broadcast %737 : f32 to vector<16x16xf32>
    %739 = arith.mulf %704, %738 : vector<16x16xf32>
    %740 = arith.addf %736, %739 : vector<16x16xf32>
    %c33_181 = arith.constant 33 : index
    %741 = memref.load %arg4[%c33_181] : memref<72xf32, #tpu.memory_space<smem>>
    %742 = vector.broadcast %741 : f32 to vector<16x16xf32>
    %743 = arith.addf %740, %742 : vector<16x16xf32>
    %c0_182 = arith.constant 0 : index
    %c1_183 = arith.constant 1 : index
    %c0_184 = arith.constant 0 : index
    %c0_185 = arith.constant 0 : index
    %744 = vector.load %arg9[%c0_182, %c1_183, %c0_184, %c0_185] : memref<1x8x16x16xf32, #tpu.memory_space<vmem>>, vector<1x1x16x16xf32>
    %745 = vector.shape_cast %744 : vector<1x1x16x16xf32> to vector<16x16xf32>
    %746 = vector.shape_cast %743 : vector<16x16xf32> to vector<1x1x16x16xf32>
    tpu.vector_store %arg9[%c0_182, %c1_183, %c0_184, %c0_185], %746 {strides = array<i32>} : memref<1x8x16x16xf32, #tpu.memory_space<vmem>>, vector<1x1x16x16xf32>,
    %c136 = arith.constant 136 : index
    %747 = memref.load %arg3[%c136] : memref<288xf32, #tpu.memory_space<smem>>
    %748 = vector.broadcast %747 : f32 to vector<16x16xf32>
    %749 = arith.mulf %701, %748 : vector<16x16xf32>
    %c137 = arith.constant 137 : index
    %750 = memref.load %arg3[%c137] : memref<288xf32, #tpu.memory_space<smem>>
    %751 = vector.broadcast %750 : f32 to vector<16x16xf32>
    %752 = arith.mulf %702, %751 : vector<16x16xf32>
    %753 = arith.addf %749, %752 : vector<16x16xf32>
    %c138 = arith.constant 138 : index
    %754 = memref.load %arg3[%c138] : memref<288xf32, #tpu.memory_space<smem>>
    %755 = vector.broadcast %754 : f32 to vector<16x16xf32>
    %756 = arith.mulf %703, %755 : vector<16x16xf32>
    %757 = arith.addf %753, %756 : vector<16x16xf32>
    %c139 = arith.constant 139 : index
    %758 = memref.load %arg3[%c139] : memref<288xf32, #tpu.memory_space<smem>>
    %759 = vector.broadcast %758 : f32 to vector<16x16xf32>
    %760 = arith.mulf %704, %759 : vector<16x16xf32>
    %761 = arith.addf %757, %760 : vector<16x16xf32>
    %c34_186 = arith.constant 34 : index
    %762 = memref.load %arg4[%c34_186] : memref<72xf32, #tpu.memory_space<smem>>
    %763 = vector.broadcast %762 : f32 to vector<16x16xf32>
    %764 = arith.addf %761, %763 : vector<16x16xf32>
    %c0_187 = arith.constant 0 : index
    %c2_188 = arith.constant 2 : index
    %c0_189 = arith.constant 0 : index
    %c0_190 = arith.constant 0 : index
    %765 = vector.load %arg9[%c0_187, %c2_188, %c0_189, %c0_190] : memref<1x8x16x16xf32, #tpu.memory_space<vmem>>, vector<1x1x16x16xf32>
    %766 = vector.shape_cast %765 : vector<1x1x16x16xf32> to vector<16x16xf32>
    %767 = vector.shape_cast %764 : vector<16x16xf32> to vector<1x1x16x16xf32>
    tpu.vector_store %arg9[%c0_187, %c2_188, %c0_189, %c0_190], %767 {strides = array<i32>} : memref<1x8x16x16xf32, #tpu.memory_space<vmem>>, vector<1x1x16x16xf32>,
    %c140 = arith.constant 140 : index
    %768 = memref.load %arg3[%c140] : memref<288xf32, #tpu.memory_space<smem>>
    %769 = vector.broadcast %768 : f32 to vector<16x16xf32>
    %770 = arith.mulf %701, %769 : vector<16x16xf32>
    %c141 = arith.constant 141 : index
    %771 = memref.load %arg3[%c141] : memref<288xf32, #tpu.memory_space<smem>>
    %772 = vector.broadcast %771 : f32 to vector<16x16xf32>
    %773 = arith.mulf %702, %772 : vector<16x16xf32>
    %774 = arith.addf %770, %773 : vector<16x16xf32>
    %c142 = arith.constant 142 : index
    %775 = memref.load %arg3[%c142] : memref<288xf32, #tpu.memory_space<smem>>
    %776 = vector.broadcast %775 : f32 to vector<16x16xf32>
    %777 = arith.mulf %703, %776 : vector<16x16xf32>
    %778 = arith.addf %774, %777 : vector<16x16xf32>
    %c143 = arith.constant 143 : index
    %779 = memref.load %arg3[%c143] : memref<288xf32, #tpu.memory_space<smem>>
    %780 = vector.broadcast %779 : f32 to vector<16x16xf32>
    %781 = arith.mulf %704, %780 : vector<16x16xf32>
    %782 = arith.addf %778, %781 : vector<16x16xf32>
    %c35_191 = arith.constant 35 : index
    %783 = memref.load %arg4[%c35_191] : memref<72xf32, #tpu.memory_space<smem>>
    %784 = vector.broadcast %783 : f32 to vector<16x16xf32>
    %785 = arith.addf %782, %784 : vector<16x16xf32>
    %c0_192 = arith.constant 0 : index
    %c3_193 = arith.constant 3 : index
    %c0_194 = arith.constant 0 : index
    %c0_195 = arith.constant 0 : index
    %786 = vector.load %arg9[%c0_192, %c3_193, %c0_194, %c0_195] : memref<1x8x16x16xf32, #tpu.memory_space<vmem>>, vector<1x1x16x16xf32>
    %787 = vector.shape_cast %786 : vector<1x1x16x16xf32> to vector<16x16xf32>
    %788 = vector.shape_cast %785 : vector<16x16xf32> to vector<1x1x16x16xf32>
    tpu.vector_store %arg9[%c0_192, %c3_193, %c0_194, %c0_195], %788 {strides = array<i32>} : memref<1x8x16x16xf32, #tpu.memory_space<vmem>>, vector<1x1x16x16xf32>,
    %c144 = arith.constant 144 : index
    %789 = memref.load %arg3[%c144] : memref<288xf32, #tpu.memory_space<smem>>
    %790 = vector.broadcast %789 : f32 to vector<16x16xf32>
    %791 = arith.mulf %701, %790 : vector<16x16xf32>
    %c145 = arith.constant 145 : index
    %792 = memref.load %arg3[%c145] : memref<288xf32, #tpu.memory_space<smem>>
    %793 = vector.broadcast %792 : f32 to vector<16x16xf32>
    %794 = arith.mulf %702, %793 : vector<16x16xf32>
    %795 = arith.addf %791, %794 : vector<16x16xf32>
    %c146 = arith.constant 146 : index
    %796 = memref.load %arg3[%c146] : memref<288xf32, #tpu.memory_space<smem>>
    %797 = vector.broadcast %796 : f32 to vector<16x16xf32>
    %798 = arith.mulf %703, %797 : vector<16x16xf32>
    %799 = arith.addf %795, %798 : vector<16x16xf32>
    %c147 = arith.constant 147 : index
    %800 = memref.load %arg3[%c147] : memref<288xf32, #tpu.memory_space<smem>>
    %801 = vector.broadcast %800 : f32 to vector<16x16xf32>
    %802 = arith.mulf %704, %801 : vector<16x16xf32>
    %803 = arith.addf %799, %802 : vector<16x16xf32>
    %c36_196 = arith.constant 36 : index
    %804 = memref.load %arg4[%c36_196] : memref<72xf32, #tpu.memory_space<smem>>
    %805 = vector.broadcast %804 : f32 to vector<16x16xf32>
    %806 = arith.addf %803, %805 : vector<16x16xf32>
    %c0_197 = arith.constant 0 : index
    %c4_198 = arith.constant 4 : index
    %c0_199 = arith.constant 0 : index
    %c0_200 = arith.constant 0 : index
    %807 = vector.load %arg9[%c0_197, %c4_198, %c0_199, %c0_200] : memref<1x8x16x16xf32, #tpu.memory_space<vmem>>, vector<1x1x16x16xf32>
    %808 = vector.shape_cast %807 : vector<1x1x16x16xf32> to vector<16x16xf32>
    %809 = vector.shape_cast %806 : vector<16x16xf32> to vector<1x1x16x16xf32>
    tpu.vector_store %arg9[%c0_197, %c4_198, %c0_199, %c0_200], %809 {strides = array<i32>} : memref<1x8x16x16xf32, #tpu.memory_space<vmem>>, vector<1x1x16x16xf32>,
    %c148 = arith.constant 148 : index
    %810 = memref.load %arg3[%c148] : memref<288xf32, #tpu.memory_space<smem>>
    %811 = vector.broadcast %810 : f32 to vector<16x16xf32>
    %812 = arith.mulf %701, %811 : vector<16x16xf32>
    %c149 = arith.constant 149 : index
    %813 = memref.load %arg3[%c149] : memref<288xf32, #tpu.memory_space<smem>>
    %814 = vector.broadcast %813 : f32 to vector<16x16xf32>
    %815 = arith.mulf %702, %814 : vector<16x16xf32>
    %816 = arith.addf %812, %815 : vector<16x16xf32>
    %c150 = arith.constant 150 : index
    %817 = memref.load %arg3[%c150] : memref<288xf32, #tpu.memory_space<smem>>
    %818 = vector.broadcast %817 : f32 to vector<16x16xf32>
    %819 = arith.mulf %703, %818 : vector<16x16xf32>
    %820 = arith.addf %816, %819 : vector<16x16xf32>
    %c151 = arith.constant 151 : index
    %821 = memref.load %arg3[%c151] : memref<288xf32, #tpu.memory_space<smem>>
    %822 = vector.broadcast %821 : f32 to vector<16x16xf32>
    %823 = arith.mulf %704, %822 : vector<16x16xf32>
    %824 = arith.addf %820, %823 : vector<16x16xf32>
    %c37_201 = arith.constant 37 : index
    %825 = memref.load %arg4[%c37_201] : memref<72xf32, #tpu.memory_space<smem>>
    %826 = vector.broadcast %825 : f32 to vector<16x16xf32>
    %827 = arith.addf %824, %826 : vector<16x16xf32>
    %c0_202 = arith.constant 0 : index
    %c5_203 = arith.constant 5 : index
    %c0_204 = arith.constant 0 : index
    %c0_205 = arith.constant 0 : index
    %828 = vector.load %arg9[%c0_202, %c5_203, %c0_204, %c0_205] : memref<1x8x16x16xf32, #tpu.memory_space<vmem>>, vector<1x1x16x16xf32>
    %829 = vector.shape_cast %828 : vector<1x1x16x16xf32> to vector<16x16xf32>
    %830 = vector.shape_cast %827 : vector<16x16xf32> to vector<1x1x16x16xf32>
    tpu.vector_store %arg9[%c0_202, %c5_203, %c0_204, %c0_205], %830 {strides = array<i32>} : memref<1x8x16x16xf32, #tpu.memory_space<vmem>>, vector<1x1x16x16xf32>,
    %c152 = arith.constant 152 : index
    %831 = memref.load %arg3[%c152] : memref<288xf32, #tpu.memory_space<smem>>
    %832 = vector.broadcast %831 : f32 to vector<16x16xf32>
    %833 = arith.mulf %701, %832 : vector<16x16xf32>
    %c153 = arith.constant 153 : index
    %834 = memref.load %arg3[%c153] : memref<288xf32, #tpu.memory_space<smem>>
    %835 = vector.broadcast %834 : f32 to vector<16x16xf32>
    %836 = arith.mulf %702, %835 : vector<16x16xf32>
    %837 = arith.addf %833, %836 : vector<16x16xf32>
    %c154 = arith.constant 154 : index
    %838 = memref.load %arg3[%c154] : memref<288xf32, #tpu.memory_space<smem>>
    %839 = vector.broadcast %838 : f32 to vector<16x16xf32>
    %840 = arith.mulf %703, %839 : vector<16x16xf32>
    %841 = arith.addf %837, %840 : vector<16x16xf32>
    %c155 = arith.constant 155 : index
    %842 = memref.load %arg3[%c155] : memref<288xf32, #tpu.memory_space<smem>>
    %843 = vector.broadcast %842 : f32 to vector<16x16xf32>
    %844 = arith.mulf %704, %843 : vector<16x16xf32>
    %845 = arith.addf %841, %844 : vector<16x16xf32>
    %c38_206 = arith.constant 38 : index
    %846 = memref.load %arg4[%c38_206] : memref<72xf32, #tpu.memory_space<smem>>
    %847 = vector.broadcast %846 : f32 to vector<16x16xf32>
    %848 = arith.addf %845, %847 : vector<16x16xf32>
    %c0_207 = arith.constant 0 : index
    %c6_208 = arith.constant 6 : index
    %c0_209 = arith.constant 0 : index
    %c0_210 = arith.constant 0 : index
    %849 = vector.load %arg9[%c0_207, %c6_208, %c0_209, %c0_210] : memref<1x8x16x16xf32, #tpu.memory_space<vmem>>, vector<1x1x16x16xf32>
    %850 = vector.shape_cast %849 : vector<1x1x16x16xf32> to vector<16x16xf32>
    %851 = vector.shape_cast %848 : vector<16x16xf32> to vector<1x1x16x16xf32>
    tpu.vector_store %arg9[%c0_207, %c6_208, %c0_209, %c0_210], %851 {strides = array<i32>} : memref<1x8x16x16xf32, #tpu.memory_space<vmem>>, vector<1x1x16x16xf32>,
    %c156 = arith.constant 156 : index
    %852 = memref.load %arg3[%c156] : memref<288xf32, #tpu.memory_space<smem>>
    %853 = vector.broadcast %852 : f32 to vector<16x16xf32>
    %854 = arith.mulf %701, %853 : vector<16x16xf32>
    %c157 = arith.constant 157 : index
    %855 = memref.load %arg3[%c157] : memref<288xf32, #tpu.memory_space<smem>>
    %856 = vector.broadcast %855 : f32 to vector<16x16xf32>
    %857 = arith.mulf %702, %856 : vector<16x16xf32>
    %858 = arith.addf %854, %857 : vector<16x16xf32>
    %c158 = arith.constant 158 : index
    %859 = memref.load %arg3[%c158] : memref<288xf32, #tpu.memory_space<smem>>
    %860 = vector.broadcast %859 : f32 to vector<16x16xf32>
    %861 = arith.mulf %703, %860 : vector<16x16xf32>
    %862 = arith.addf %858, %861 : vector<16x16xf32>
    %c159 = arith.constant 159 : index
    %863 = memref.load %arg3[%c159] : memref<288xf32, #tpu.memory_space<smem>>
    %864 = vector.broadcast %863 : f32 to vector<16x16xf32>
    %865 = arith.mulf %704, %864 : vector<16x16xf32>
    %866 = arith.addf %862, %865 : vector<16x16xf32>
    %c39_211 = arith.constant 39 : index
    %867 = memref.load %arg4[%c39_211] : memref<72xf32, #tpu.memory_space<smem>>
    %868 = vector.broadcast %867 : f32 to vector<16x16xf32>
    %869 = arith.addf %866, %868 : vector<16x16xf32>
    %c0_212 = arith.constant 0 : index
    %c7_213 = arith.constant 7 : index
    %c0_214 = arith.constant 0 : index
    %c0_215 = arith.constant 0 : index
    %870 = vector.load %arg9[%c0_212, %c7_213, %c0_214, %c0_215] : memref<1x8x16x16xf32, #tpu.memory_space<vmem>>, vector<1x1x16x16xf32>
    %871 = vector.shape_cast %870 : vector<1x1x16x16xf32> to vector<16x16xf32>
    %872 = vector.shape_cast %869 : vector<16x16xf32> to vector<1x1x16x16xf32>
    tpu.vector_store %arg9[%c0_212, %c7_213, %c0_214, %c0_215], %872 {strides = array<i32>} : memref<1x8x16x16xf32, #tpu.memory_space<vmem>>, vector<1x1x16x16xf32>,
    %873 = vector.extract_strided_slice %9 {offsets = [0, 5], sizes = [16, 16], strides = [1, 1]} : vector<16x24xf32> to vector<16x16xf32>
    %874 = vector.extract_strided_slice %10 {offsets = [0, 5], sizes = [16, 16], strides = [1, 1]} : vector<16x24xf32> to vector<16x16xf32>
    %875 = vector.extract_strided_slice %11 {offsets = [0, 5], sizes = [16, 16], strides = [1, 1]} : vector<16x24xf32> to vector<16x16xf32>
    %876 = vector.extract_strided_slice %12 {offsets = [0, 5], sizes = [16, 16], strides = [1, 1]} : vector<16x24xf32> to vector<16x16xf32>
    %c160 = arith.constant 160 : index
    %877 = memref.load %arg3[%c160] : memref<288xf32, #tpu.memory_space<smem>>
    %878 = vector.broadcast %877 : f32 to vector<16x16xf32>
    %879 = arith.mulf %873, %878 : vector<16x16xf32>
    %c161 = arith.constant 161 : index
    %880 = memref.load %arg3[%c161] : memref<288xf32, #tpu.memory_space<smem>>
    %881 = vector.broadcast %880 : f32 to vector<16x16xf32>
    %882 = arith.mulf %874, %881 : vector<16x16xf32>
    %883 = arith.addf %879, %882 : vector<16x16xf32>
    %c162 = arith.constant 162 : index
    %884 = memref.load %arg3[%c162] : memref<288xf32, #tpu.memory_space<smem>>
    %885 = vector.broadcast %884 : f32 to vector<16x16xf32>
    %886 = arith.mulf %875, %885 : vector<16x16xf32>
    %887 = arith.addf %883, %886 : vector<16x16xf32>
    %c163 = arith.constant 163 : index
    %888 = memref.load %arg3[%c163] : memref<288xf32, #tpu.memory_space<smem>>
    %889 = vector.broadcast %888 : f32 to vector<16x16xf32>
    %890 = arith.mulf %876, %889 : vector<16x16xf32>
    %891 = arith.addf %887, %890 : vector<16x16xf32>
    %c40_216 = arith.constant 40 : index
    %892 = memref.load %arg4[%c40_216] : memref<72xf32, #tpu.memory_space<smem>>
    %893 = vector.broadcast %892 : f32 to vector<16x16xf32>
    %894 = arith.addf %891, %893 : vector<16x16xf32>
    %c0_217 = arith.constant 0 : index
    %c0_218 = arith.constant 0 : index
    %c0_219 = arith.constant 0 : index
    %c0_220 = arith.constant 0 : index
    %895 = vector.load %arg10[%c0_217, %c0_218, %c0_219, %c0_220] : memref<1x8x16x16xf32, #tpu.memory_space<vmem>>, vector<1x1x16x16xf32>
    %896 = vector.shape_cast %895 : vector<1x1x16x16xf32> to vector<16x16xf32>
    %897 = vector.shape_cast %894 : vector<16x16xf32> to vector<1x1x16x16xf32>
    tpu.vector_store %arg10[%c0_217, %c0_218, %c0_219, %c0_220], %897 {strides = array<i32>} : memref<1x8x16x16xf32, #tpu.memory_space<vmem>>, vector<1x1x16x16xf32>,
    %c164 = arith.constant 164 : index
    %898 = memref.load %arg3[%c164] : memref<288xf32, #tpu.memory_space<smem>>
    %899 = vector.broadcast %898 : f32 to vector<16x16xf32>
    %900 = arith.mulf %873, %899 : vector<16x16xf32>
    %c165 = arith.constant 165 : index
    %901 = memref.load %arg3[%c165] : memref<288xf32, #tpu.memory_space<smem>>
    %902 = vector.broadcast %901 : f32 to vector<16x16xf32>
    %903 = arith.mulf %874, %902 : vector<16x16xf32>
    %904 = arith.addf %900, %903 : vector<16x16xf32>
    %c166 = arith.constant 166 : index
    %905 = memref.load %arg3[%c166] : memref<288xf32, #tpu.memory_space<smem>>
    %906 = vector.broadcast %905 : f32 to vector<16x16xf32>
    %907 = arith.mulf %875, %906 : vector<16x16xf32>
    %908 = arith.addf %904, %907 : vector<16x16xf32>
    %c167 = arith.constant 167 : index
    %909 = memref.load %arg3[%c167] : memref<288xf32, #tpu.memory_space<smem>>
    %910 = vector.broadcast %909 : f32 to vector<16x16xf32>
    %911 = arith.mulf %876, %910 : vector<16x16xf32>
    %912 = arith.addf %908, %911 : vector<16x16xf32>
    %c41_221 = arith.constant 41 : index
    %913 = memref.load %arg4[%c41_221] : memref<72xf32, #tpu.memory_space<smem>>
    %914 = vector.broadcast %913 : f32 to vector<16x16xf32>
    %915 = arith.addf %912, %914 : vector<16x16xf32>
    %c0_222 = arith.constant 0 : index
    %c1_223 = arith.constant 1 : index
    %c0_224 = arith.constant 0 : index
    %c0_225 = arith.constant 0 : index
    %916 = vector.load %arg10[%c0_222, %c1_223, %c0_224, %c0_225] : memref<1x8x16x16xf32, #tpu.memory_space<vmem>>, vector<1x1x16x16xf32>
    %917 = vector.shape_cast %916 : vector<1x1x16x16xf32> to vector<16x16xf32>
    %918 = vector.shape_cast %915 : vector<16x16xf32> to vector<1x1x16x16xf32>
    tpu.vector_store %arg10[%c0_222, %c1_223, %c0_224, %c0_225], %918 {strides = array<i32>} : memref<1x8x16x16xf32, #tpu.memory_space<vmem>>, vector<1x1x16x16xf32>,
    %c168 = arith.constant 168 : index
    %919 = memref.load %arg3[%c168] : memref<288xf32, #tpu.memory_space<smem>>
    %920 = vector.broadcast %919 : f32 to vector<16x16xf32>
    %921 = arith.mulf %873, %920 : vector<16x16xf32>
    %c169 = arith.constant 169 : index
    %922 = memref.load %arg3[%c169] : memref<288xf32, #tpu.memory_space<smem>>
    %923 = vector.broadcast %922 : f32 to vector<16x16xf32>
    %924 = arith.mulf %874, %923 : vector<16x16xf32>
    %925 = arith.addf %921, %924 : vector<16x16xf32>
    %c170 = arith.constant 170 : index
    %926 = memref.load %arg3[%c170] : memref<288xf32, #tpu.memory_space<smem>>
    %927 = vector.broadcast %926 : f32 to vector<16x16xf32>
    %928 = arith.mulf %875, %927 : vector<16x16xf32>
    %929 = arith.addf %925, %928 : vector<16x16xf32>
    %c171 = arith.constant 171 : index
    %930 = memref.load %arg3[%c171] : memref<288xf32, #tpu.memory_space<smem>>
    %931 = vector.broadcast %930 : f32 to vector<16x16xf32>
    %932 = arith.mulf %876, %931 : vector<16x16xf32>
    %933 = arith.addf %929, %932 : vector<16x16xf32>
    %c42_226 = arith.constant 42 : index
    %934 = memref.load %arg4[%c42_226] : memref<72xf32, #tpu.memory_space<smem>>
    %935 = vector.broadcast %934 : f32 to vector<16x16xf32>
    %936 = arith.addf %933, %935 : vector<16x16xf32>
    %c0_227 = arith.constant 0 : index
    %c2_228 = arith.constant 2 : index
    %c0_229 = arith.constant 0 : index
    %c0_230 = arith.constant 0 : index
    %937 = vector.load %arg10[%c0_227, %c2_228, %c0_229, %c0_230] : memref<1x8x16x16xf32, #tpu.memory_space<vmem>>, vector<1x1x16x16xf32>
    %938 = vector.shape_cast %937 : vector<1x1x16x16xf32> to vector<16x16xf32>
    %939 = vector.shape_cast %936 : vector<16x16xf32> to vector<1x1x16x16xf32>
    tpu.vector_store %arg10[%c0_227, %c2_228, %c0_229, %c0_230], %939 {strides = array<i32>} : memref<1x8x16x16xf32, #tpu.memory_space<vmem>>, vector<1x1x16x16xf32>,
    %c172 = arith.constant 172 : index
    %940 = memref.load %arg3[%c172] : memref<288xf32, #tpu.memory_space<smem>>
    %941 = vector.broadcast %940 : f32 to vector<16x16xf32>
    %942 = arith.mulf %873, %941 : vector<16x16xf32>
    %c173 = arith.constant 173 : index
    %943 = memref.load %arg3[%c173] : memref<288xf32, #tpu.memory_space<smem>>
    %944 = vector.broadcast %943 : f32 to vector<16x16xf32>
    %945 = arith.mulf %874, %944 : vector<16x16xf32>
    %946 = arith.addf %942, %945 : vector<16x16xf32>
    %c174 = arith.constant 174 : index
    %947 = memref.load %arg3[%c174] : memref<288xf32, #tpu.memory_space<smem>>
    %948 = vector.broadcast %947 : f32 to vector<16x16xf32>
    %949 = arith.mulf %875, %948 : vector<16x16xf32>
    %950 = arith.addf %946, %949 : vector<16x16xf32>
    %c175 = arith.constant 175 : index
    %951 = memref.load %arg3[%c175] : memref<288xf32, #tpu.memory_space<smem>>
    %952 = vector.broadcast %951 : f32 to vector<16x16xf32>
    %953 = arith.mulf %876, %952 : vector<16x16xf32>
    %954 = arith.addf %950, %953 : vector<16x16xf32>
    %c43_231 = arith.constant 43 : index
    %955 = memref.load %arg4[%c43_231] : memref<72xf32, #tpu.memory_space<smem>>
    %956 = vector.broadcast %955 : f32 to vector<16x16xf32>
    %957 = arith.addf %954, %956 : vector<16x16xf32>
    %c0_232 = arith.constant 0 : index
    %c3_233 = arith.constant 3 : index
    %c0_234 = arith.constant 0 : index
    %c0_235 = arith.constant 0 : index
    %958 = vector.load %arg10[%c0_232, %c3_233, %c0_234, %c0_235] : memref<1x8x16x16xf32, #tpu.memory_space<vmem>>, vector<1x1x16x16xf32>
    %959 = vector.shape_cast %958 : vector<1x1x16x16xf32> to vector<16x16xf32>
    %960 = vector.shape_cast %957 : vector<16x16xf32> to vector<1x1x16x16xf32>
    tpu.vector_store %arg10[%c0_232, %c3_233, %c0_234, %c0_235], %960 {strides = array<i32>} : memref<1x8x16x16xf32, #tpu.memory_space<vmem>>, vector<1x1x16x16xf32>,
    %c176 = arith.constant 176 : index
    %961 = memref.load %arg3[%c176] : memref<288xf32, #tpu.memory_space<smem>>
    %962 = vector.broadcast %961 : f32 to vector<16x16xf32>
    %963 = arith.mulf %873, %962 : vector<16x16xf32>
    %c177 = arith.constant 177 : index
    %964 = memref.load %arg3[%c177] : memref<288xf32, #tpu.memory_space<smem>>
    %965 = vector.broadcast %964 : f32 to vector<16x16xf32>
    %966 = arith.mulf %874, %965 : vector<16x16xf32>
    %967 = arith.addf %963, %966 : vector<16x16xf32>
    %c178 = arith.constant 178 : index
    %968 = memref.load %arg3[%c178] : memref<288xf32, #tpu.memory_space<smem>>
    %969 = vector.broadcast %968 : f32 to vector<16x16xf32>
    %970 = arith.mulf %875, %969 : vector<16x16xf32>
    %971 = arith.addf %967, %970 : vector<16x16xf32>
    %c179 = arith.constant 179 : index
    %972 = memref.load %arg3[%c179] : memref<288xf32, #tpu.memory_space<smem>>
    %973 = vector.broadcast %972 : f32 to vector<16x16xf32>
    %974 = arith.mulf %876, %973 : vector<16x16xf32>
    %975 = arith.addf %971, %974 : vector<16x16xf32>
    %c44_236 = arith.constant 44 : index
    %976 = memref.load %arg4[%c44_236] : memref<72xf32, #tpu.memory_space<smem>>
    %977 = vector.broadcast %976 : f32 to vector<16x16xf32>
    %978 = arith.addf %975, %977 : vector<16x16xf32>
    %c0_237 = arith.constant 0 : index
    %c4_238 = arith.constant 4 : index
    %c0_239 = arith.constant 0 : index
    %c0_240 = arith.constant 0 : index
    %979 = vector.load %arg10[%c0_237, %c4_238, %c0_239, %c0_240] : memref<1x8x16x16xf32, #tpu.memory_space<vmem>>, vector<1x1x16x16xf32>
    %980 = vector.shape_cast %979 : vector<1x1x16x16xf32> to vector<16x16xf32>
    %981 = vector.shape_cast %978 : vector<16x16xf32> to vector<1x1x16x16xf32>
    tpu.vector_store %arg10[%c0_237, %c4_238, %c0_239, %c0_240], %981 {strides = array<i32>} : memref<1x8x16x16xf32, #tpu.memory_space<vmem>>, vector<1x1x16x16xf32>,
    %c180 = arith.constant 180 : index
    %982 = memref.load %arg3[%c180] : memref<288xf32, #tpu.memory_space<smem>>
    %983 = vector.broadcast %982 : f32 to vector<16x16xf32>
    %984 = arith.mulf %873, %983 : vector<16x16xf32>
    %c181 = arith.constant 181 : index
    %985 = memref.load %arg3[%c181] : memref<288xf32, #tpu.memory_space<smem>>
    %986 = vector.broadcast %985 : f32 to vector<16x16xf32>
    %987 = arith.mulf %874, %986 : vector<16x16xf32>
    %988 = arith.addf %984, %987 : vector<16x16xf32>
    %c182 = arith.constant 182 : index
    %989 = memref.load %arg3[%c182] : memref<288xf32, #tpu.memory_space<smem>>
    %990 = vector.broadcast %989 : f32 to vector<16x16xf32>
    %991 = arith.mulf %875, %990 : vector<16x16xf32>
    %992 = arith.addf %988, %991 : vector<16x16xf32>
    %c183 = arith.constant 183 : index
    %993 = memref.load %arg3[%c183] : memref<288xf32, #tpu.memory_space<smem>>
    %994 = vector.broadcast %993 : f32 to vector<16x16xf32>
    %995 = arith.mulf %876, %994 : vector<16x16xf32>
    %996 = arith.addf %992, %995 : vector<16x16xf32>
    %c45_241 = arith.constant 45 : index
    %997 = memref.load %arg4[%c45_241] : memref<72xf32, #tpu.memory_space<smem>>
    %998 = vector.broadcast %997 : f32 to vector<16x16xf32>
    %999 = arith.addf %996, %998 : vector<16x16xf32>
    %c0_242 = arith.constant 0 : index
    %c5_243 = arith.constant 5 : index
    %c0_244 = arith.constant 0 : index
    %c0_245 = arith.constant 0 : index
    %1000 = vector.load %arg10[%c0_242, %c5_243, %c0_244, %c0_245] : memref<1x8x16x16xf32, #tpu.memory_space<vmem>>, vector<1x1x16x16xf32>
    %1001 = vector.shape_cast %1000 : vector<1x1x16x16xf32> to vector<16x16xf32>
    %1002 = vector.shape_cast %999 : vector<16x16xf32> to vector<1x1x16x16xf32>
    tpu.vector_store %arg10[%c0_242, %c5_243, %c0_244, %c0_245], %1002 {strides = array<i32>} : memref<1x8x16x16xf32, #tpu.memory_space<vmem>>, vector<1x1x16x16xf32>,
    %c184 = arith.constant 184 : index
    %1003 = memref.load %arg3[%c184] : memref<288xf32, #tpu.memory_space<smem>>
    %1004 = vector.broadcast %1003 : f32 to vector<16x16xf32>
    %1005 = arith.mulf %873, %1004 : vector<16x16xf32>
    %c185 = arith.constant 185 : index
    %1006 = memref.load %arg3[%c185] : memref<288xf32, #tpu.memory_space<smem>>
    %1007 = vector.broadcast %1006 : f32 to vector<16x16xf32>
    %1008 = arith.mulf %874, %1007 : vector<16x16xf32>
    %1009 = arith.addf %1005, %1008 : vector<16x16xf32>
    %c186 = arith.constant 186 : index
    %1010 = memref.load %arg3[%c186] : memref<288xf32, #tpu.memory_space<smem>>
    %1011 = vector.broadcast %1010 : f32 to vector<16x16xf32>
    %1012 = arith.mulf %875, %1011 : vector<16x16xf32>
    %1013 = arith.addf %1009, %1012 : vector<16x16xf32>
    %c187 = arith.constant 187 : index
    %1014 = memref.load %arg3[%c187] : memref<288xf32, #tpu.memory_space<smem>>
    %1015 = vector.broadcast %1014 : f32 to vector<16x16xf32>
    %1016 = arith.mulf %876, %1015 : vector<16x16xf32>
    %1017 = arith.addf %1013, %1016 : vector<16x16xf32>
    %c46_246 = arith.constant 46 : index
    %1018 = memref.load %arg4[%c46_246] : memref<72xf32, #tpu.memory_space<smem>>
    %1019 = vector.broadcast %1018 : f32 to vector<16x16xf32>
    %1020 = arith.addf %1017, %1019 : vector<16x16xf32>
    %c0_247 = arith.constant 0 : index
    %c6_248 = arith.constant 6 : index
    %c0_249 = arith.constant 0 : index
    %c0_250 = arith.constant 0 : index
    %1021 = vector.load %arg10[%c0_247, %c6_248, %c0_249, %c0_250] : memref<1x8x16x16xf32, #tpu.memory_space<vmem>>, vector<1x1x16x16xf32>
    %1022 = vector.shape_cast %1021 : vector<1x1x16x16xf32> to vector<16x16xf32>
    %1023 = vector.shape_cast %1020 : vector<16x16xf32> to vector<1x1x16x16xf32>
    tpu.vector_store %arg10[%c0_247, %c6_248, %c0_249, %c0_250], %1023 {strides = array<i32>} : memref<1x8x16x16xf32, #tpu.memory_space<vmem>>, vector<1x1x16x16xf32>,
    %c188 = arith.constant 188 : index
    %1024 = memref.load %arg3[%c188] : memref<288xf32, #tpu.memory_space<smem>>
    %1025 = vector.broadcast %1024 : f32 to vector<16x16xf32>
    %1026 = arith.mulf %873, %1025 : vector<16x16xf32>
    %c189 = arith.constant 189 : index
    %1027 = memref.load %arg3[%c189] : memref<288xf32, #tpu.memory_space<smem>>
    %1028 = vector.broadcast %1027 : f32 to vector<16x16xf32>
    %1029 = arith.mulf %874, %1028 : vector<16x16xf32>
    %1030 = arith.addf %1026, %1029 : vector<16x16xf32>
    %c190 = arith.constant 190 : index
    %1031 = memref.load %arg3[%c190] : memref<288xf32, #tpu.memory_space<smem>>
    %1032 = vector.broadcast %1031 : f32 to vector<16x16xf32>
    %1033 = arith.mulf %875, %1032 : vector<16x16xf32>
    %1034 = arith.addf %1030, %1033 : vector<16x16xf32>
    %c191 = arith.constant 191 : index
    %1035 = memref.load %arg3[%c191] : memref<288xf32, #tpu.memory_space<smem>>
    %1036 = vector.broadcast %1035 : f32 to vector<16x16xf32>
    %1037 = arith.mulf %876, %1036 : vector<16x16xf32>
    %1038 = arith.addf %1034, %1037 : vector<16x16xf32>
    %c47_251 = arith.constant 47 : index
    %1039 = memref.load %arg4[%c47_251] : memref<72xf32, #tpu.memory_space<smem>>
    %1040 = vector.broadcast %1039 : f32 to vector<16x16xf32>
    %1041 = arith.addf %1038, %1040 : vector<16x16xf32>
    %c0_252 = arith.constant 0 : index
    %c7_253 = arith.constant 7 : index
    %c0_254 = arith.constant 0 : index
    %c0_255 = arith.constant 0 : index
    %1042 = vector.load %arg10[%c0_252, %c7_253, %c0_254, %c0_255] : memref<1x8x16x16xf32, #tpu.memory_space<vmem>>, vector<1x1x16x16xf32>
    %1043 = vector.shape_cast %1042 : vector<1x1x16x16xf32> to vector<16x16xf32>
    %1044 = vector.shape_cast %1041 : vector<16x16xf32> to vector<1x1x16x16xf32>
    tpu.vector_store %arg10[%c0_252, %c7_253, %c0_254, %c0_255], %1044 {strides = array<i32>} : memref<1x8x16x16xf32, #tpu.memory_space<vmem>>, vector<1x1x16x16xf32>,
    %1045 = vector.extract_strided_slice %9 {offsets = [0, 6], sizes = [16, 16], strides = [1, 1]} : vector<16x24xf32> to vector<16x16xf32>
    %1046 = vector.extract_strided_slice %10 {offsets = [0, 6], sizes = [16, 16], strides = [1, 1]} : vector<16x24xf32> to vector<16x16xf32>
    %1047 = vector.extract_strided_slice %11 {offsets = [0, 6], sizes = [16, 16], strides = [1, 1]} : vector<16x24xf32> to vector<16x16xf32>
    %1048 = vector.extract_strided_slice %12 {offsets = [0, 6], sizes = [16, 16], strides = [1, 1]} : vector<16x24xf32> to vector<16x16xf32>
    %c192 = arith.constant 192 : index
    %1049 = memref.load %arg3[%c192] : memref<288xf32, #tpu.memory_space<smem>>
    %1050 = vector.broadcast %1049 : f32 to vector<16x16xf32>
    %1051 = arith.mulf %1045, %1050 : vector<16x16xf32>
    %c193 = arith.constant 193 : index
    %1052 = memref.load %arg3[%c193] : memref<288xf32, #tpu.memory_space<smem>>
    %1053 = vector.broadcast %1052 : f32 to vector<16x16xf32>
    %1054 = arith.mulf %1046, %1053 : vector<16x16xf32>
    %1055 = arith.addf %1051, %1054 : vector<16x16xf32>
    %c194 = arith.constant 194 : index
    %1056 = memref.load %arg3[%c194] : memref<288xf32, #tpu.memory_space<smem>>
    %1057 = vector.broadcast %1056 : f32 to vector<16x16xf32>
    %1058 = arith.mulf %1047, %1057 : vector<16x16xf32>
    %1059 = arith.addf %1055, %1058 : vector<16x16xf32>
    %c195 = arith.constant 195 : index
    %1060 = memref.load %arg3[%c195] : memref<288xf32, #tpu.memory_space<smem>>
    %1061 = vector.broadcast %1060 : f32 to vector<16x16xf32>
    %1062 = arith.mulf %1048, %1061 : vector<16x16xf32>
    %1063 = arith.addf %1059, %1062 : vector<16x16xf32>
    %c48_256 = arith.constant 48 : index
    %1064 = memref.load %arg4[%c48_256] : memref<72xf32, #tpu.memory_space<smem>>
    %1065 = vector.broadcast %1064 : f32 to vector<16x16xf32>
    %1066 = arith.addf %1063, %1065 : vector<16x16xf32>
    %c0_257 = arith.constant 0 : index
    %c0_258 = arith.constant 0 : index
    %c0_259 = arith.constant 0 : index
    %c0_260 = arith.constant 0 : index
    %1067 = vector.load %arg11[%c0_257, %c0_258, %c0_259, %c0_260] : memref<1x8x16x16xf32, #tpu.memory_space<vmem>>, vector<1x1x16x16xf32>
    %1068 = vector.shape_cast %1067 : vector<1x1x16x16xf32> to vector<16x16xf32>
    %1069 = vector.shape_cast %1066 : vector<16x16xf32> to vector<1x1x16x16xf32>
    tpu.vector_store %arg11[%c0_257, %c0_258, %c0_259, %c0_260], %1069 {strides = array<i32>} : memref<1x8x16x16xf32, #tpu.memory_space<vmem>>, vector<1x1x16x16xf32>,
    %c196 = arith.constant 196 : index
    %1070 = memref.load %arg3[%c196] : memref<288xf32, #tpu.memory_space<smem>>
    %1071 = vector.broadcast %1070 : f32 to vector<16x16xf32>
    %1072 = arith.mulf %1045, %1071 : vector<16x16xf32>
    %c197 = arith.constant 197 : index
    %1073 = memref.load %arg3[%c197] : memref<288xf32, #tpu.memory_space<smem>>
    %1074 = vector.broadcast %1073 : f32 to vector<16x16xf32>
    %1075 = arith.mulf %1046, %1074 : vector<16x16xf32>
    %1076 = arith.addf %1072, %1075 : vector<16x16xf32>
    %c198 = arith.constant 198 : index
    %1077 = memref.load %arg3[%c198] : memref<288xf32, #tpu.memory_space<smem>>
    %1078 = vector.broadcast %1077 : f32 to vector<16x16xf32>
    %1079 = arith.mulf %1047, %1078 : vector<16x16xf32>
    %1080 = arith.addf %1076, %1079 : vector<16x16xf32>
    %c199 = arith.constant 199 : index
    %1081 = memref.load %arg3[%c199] : memref<288xf32, #tpu.memory_space<smem>>
    %1082 = vector.broadcast %1081 : f32 to vector<16x16xf32>
    %1083 = arith.mulf %1048, %1082 : vector<16x16xf32>
    %1084 = arith.addf %1080, %1083 : vector<16x16xf32>
    %c49_261 = arith.constant 49 : index
    %1085 = memref.load %arg4[%c49_261] : memref<72xf32, #tpu.memory_space<smem>>
    %1086 = vector.broadcast %1085 : f32 to vector<16x16xf32>
    %1087 = arith.addf %1084, %1086 : vector<16x16xf32>
    %c0_262 = arith.constant 0 : index
    %c1_263 = arith.constant 1 : index
    %c0_264 = arith.constant 0 : index
    %c0_265 = arith.constant 0 : index
    %1088 = vector.load %arg11[%c0_262, %c1_263, %c0_264, %c0_265] : memref<1x8x16x16xf32, #tpu.memory_space<vmem>>, vector<1x1x16x16xf32>
    %1089 = vector.shape_cast %1088 : vector<1x1x16x16xf32> to vector<16x16xf32>
    %1090 = vector.shape_cast %1087 : vector<16x16xf32> to vector<1x1x16x16xf32>
    tpu.vector_store %arg11[%c0_262, %c1_263, %c0_264, %c0_265], %1090 {strides = array<i32>} : memref<1x8x16x16xf32, #tpu.memory_space<vmem>>, vector<1x1x16x16xf32>,
    %c200 = arith.constant 200 : index
    %1091 = memref.load %arg3[%c200] : memref<288xf32, #tpu.memory_space<smem>>
    %1092 = vector.broadcast %1091 : f32 to vector<16x16xf32>
    %1093 = arith.mulf %1045, %1092 : vector<16x16xf32>
    %c201 = arith.constant 201 : index
    %1094 = memref.load %arg3[%c201] : memref<288xf32, #tpu.memory_space<smem>>
    %1095 = vector.broadcast %1094 : f32 to vector<16x16xf32>
    %1096 = arith.mulf %1046, %1095 : vector<16x16xf32>
    %1097 = arith.addf %1093, %1096 : vector<16x16xf32>
    %c202 = arith.constant 202 : index
    %1098 = memref.load %arg3[%c202] : memref<288xf32, #tpu.memory_space<smem>>
    %1099 = vector.broadcast %1098 : f32 to vector<16x16xf32>
    %1100 = arith.mulf %1047, %1099 : vector<16x16xf32>
    %1101 = arith.addf %1097, %1100 : vector<16x16xf32>
    %c203 = arith.constant 203 : index
    %1102 = memref.load %arg3[%c203] : memref<288xf32, #tpu.memory_space<smem>>
    %1103 = vector.broadcast %1102 : f32 to vector<16x16xf32>
    %1104 = arith.mulf %1048, %1103 : vector<16x16xf32>
    %1105 = arith.addf %1101, %1104 : vector<16x16xf32>
    %c50_266 = arith.constant 50 : index
    %1106 = memref.load %arg4[%c50_266] : memref<72xf32, #tpu.memory_space<smem>>
    %1107 = vector.broadcast %1106 : f32 to vector<16x16xf32>
    %1108 = arith.addf %1105, %1107 : vector<16x16xf32>
    %c0_267 = arith.constant 0 : index
    %c2_268 = arith.constant 2 : index
    %c0_269 = arith.constant 0 : index
    %c0_270 = arith.constant 0 : index
    %1109 = vector.load %arg11[%c0_267, %c2_268, %c0_269, %c0_270] : memref<1x8x16x16xf32, #tpu.memory_space<vmem>>, vector<1x1x16x16xf32>
    %1110 = vector.shape_cast %1109 : vector<1x1x16x16xf32> to vector<16x16xf32>
    %1111 = vector.shape_cast %1108 : vector<16x16xf32> to vector<1x1x16x16xf32>
    tpu.vector_store %arg11[%c0_267, %c2_268, %c0_269, %c0_270], %1111 {strides = array<i32>} : memref<1x8x16x16xf32, #tpu.memory_space<vmem>>, vector<1x1x16x16xf32>,
    %c204 = arith.constant 204 : index
    %1112 = memref.load %arg3[%c204] : memref<288xf32, #tpu.memory_space<smem>>
    %1113 = vector.broadcast %1112 : f32 to vector<16x16xf32>
    %1114 = arith.mulf %1045, %1113 : vector<16x16xf32>
    %c205 = arith.constant 205 : index
    %1115 = memref.load %arg3[%c205] : memref<288xf32, #tpu.memory_space<smem>>
    %1116 = vector.broadcast %1115 : f32 to vector<16x16xf32>
    %1117 = arith.mulf %1046, %1116 : vector<16x16xf32>
    %1118 = arith.addf %1114, %1117 : vector<16x16xf32>
    %c206 = arith.constant 206 : index
    %1119 = memref.load %arg3[%c206] : memref<288xf32, #tpu.memory_space<smem>>
    %1120 = vector.broadcast %1119 : f32 to vector<16x16xf32>
    %1121 = arith.mulf %1047, %1120 : vector<16x16xf32>
    %1122 = arith.addf %1118, %1121 : vector<16x16xf32>
    %c207 = arith.constant 207 : index
    %1123 = memref.load %arg3[%c207] : memref<288xf32, #tpu.memory_space<smem>>
    %1124 = vector.broadcast %1123 : f32 to vector<16x16xf32>
    %1125 = arith.mulf %1048, %1124 : vector<16x16xf32>
    %1126 = arith.addf %1122, %1125 : vector<16x16xf32>
    %c51_271 = arith.constant 51 : index
    %1127 = memref.load %arg4[%c51_271] : memref<72xf32, #tpu.memory_space<smem>>
    %1128 = vector.broadcast %1127 : f32 to vector<16x16xf32>
    %1129 = arith.addf %1126, %1128 : vector<16x16xf32>
    %c0_272 = arith.constant 0 : index
    %c3_273 = arith.constant 3 : index
    %c0_274 = arith.constant 0 : index
    %c0_275 = arith.constant 0 : index
    %1130 = vector.load %arg11[%c0_272, %c3_273, %c0_274, %c0_275] : memref<1x8x16x16xf32, #tpu.memory_space<vmem>>, vector<1x1x16x16xf32>
    %1131 = vector.shape_cast %1130 : vector<1x1x16x16xf32> to vector<16x16xf32>
    %1132 = vector.shape_cast %1129 : vector<16x16xf32> to vector<1x1x16x16xf32>
    tpu.vector_store %arg11[%c0_272, %c3_273, %c0_274, %c0_275], %1132 {strides = array<i32>} : memref<1x8x16x16xf32, #tpu.memory_space<vmem>>, vector<1x1x16x16xf32>,
    %c208 = arith.constant 208 : index
    %1133 = memref.load %arg3[%c208] : memref<288xf32, #tpu.memory_space<smem>>
    %1134 = vector.broadcast %1133 : f32 to vector<16x16xf32>
    %1135 = arith.mulf %1045, %1134 : vector<16x16xf32>
    %c209 = arith.constant 209 : index
    %1136 = memref.load %arg3[%c209] : memref<288xf32, #tpu.memory_space<smem>>
    %1137 = vector.broadcast %1136 : f32 to vector<16x16xf32>
    %1138 = arith.mulf %1046, %1137 : vector<16x16xf32>
    %1139 = arith.addf %1135, %1138 : vector<16x16xf32>
    %c210 = arith.constant 210 : index
    %1140 = memref.load %arg3[%c210] : memref<288xf32, #tpu.memory_space<smem>>
    %1141 = vector.broadcast %1140 : f32 to vector<16x16xf32>
    %1142 = arith.mulf %1047, %1141 : vector<16x16xf32>
    %1143 = arith.addf %1139, %1142 : vector<16x16xf32>
    %c211 = arith.constant 211 : index
    %1144 = memref.load %arg3[%c211] : memref<288xf32, #tpu.memory_space<smem>>
    %1145 = vector.broadcast %1144 : f32 to vector<16x16xf32>
    %1146 = arith.mulf %1048, %1145 : vector<16x16xf32>
    %1147 = arith.addf %1143, %1146 : vector<16x16xf32>
    %c52_276 = arith.constant 52 : index
    %1148 = memref.load %arg4[%c52_276] : memref<72xf32, #tpu.memory_space<smem>>
    %1149 = vector.broadcast %1148 : f32 to vector<16x16xf32>
    %1150 = arith.addf %1147, %1149 : vector<16x16xf32>
    %c0_277 = arith.constant 0 : index
    %c4_278 = arith.constant 4 : index
    %c0_279 = arith.constant 0 : index
    %c0_280 = arith.constant 0 : index
    %1151 = vector.load %arg11[%c0_277, %c4_278, %c0_279, %c0_280] : memref<1x8x16x16xf32, #tpu.memory_space<vmem>>, vector<1x1x16x16xf32>
    %1152 = vector.shape_cast %1151 : vector<1x1x16x16xf32> to vector<16x16xf32>
    %1153 = vector.shape_cast %1150 : vector<16x16xf32> to vector<1x1x16x16xf32>
    tpu.vector_store %arg11[%c0_277, %c4_278, %c0_279, %c0_280], %1153 {strides = array<i32>} : memref<1x8x16x16xf32, #tpu.memory_space<vmem>>, vector<1x1x16x16xf32>,
    %c212 = arith.constant 212 : index
    %1154 = memref.load %arg3[%c212] : memref<288xf32, #tpu.memory_space<smem>>
    %1155 = vector.broadcast %1154 : f32 to vector<16x16xf32>
    %1156 = arith.mulf %1045, %1155 : vector<16x16xf32>
    %c213 = arith.constant 213 : index
    %1157 = memref.load %arg3[%c213] : memref<288xf32, #tpu.memory_space<smem>>
    %1158 = vector.broadcast %1157 : f32 to vector<16x16xf32>
    %1159 = arith.mulf %1046, %1158 : vector<16x16xf32>
    %1160 = arith.addf %1156, %1159 : vector<16x16xf32>
    %c214 = arith.constant 214 : index
    %1161 = memref.load %arg3[%c214] : memref<288xf32, #tpu.memory_space<smem>>
    %1162 = vector.broadcast %1161 : f32 to vector<16x16xf32>
    %1163 = arith.mulf %1047, %1162 : vector<16x16xf32>
    %1164 = arith.addf %1160, %1163 : vector<16x16xf32>
    %c215 = arith.constant 215 : index
    %1165 = memref.load %arg3[%c215] : memref<288xf32, #tpu.memory_space<smem>>
    %1166 = vector.broadcast %1165 : f32 to vector<16x16xf32>
    %1167 = arith.mulf %1048, %1166 : vector<16x16xf32>
    %1168 = arith.addf %1164, %1167 : vector<16x16xf32>
    %c53_281 = arith.constant 53 : index
    %1169 = memref.load %arg4[%c53_281] : memref<72xf32, #tpu.memory_space<smem>>
    %1170 = vector.broadcast %1169 : f32 to vector<16x16xf32>
    %1171 = arith.addf %1168, %1170 : vector<16x16xf32>
    %c0_282 = arith.constant 0 : index
    %c5_283 = arith.constant 5 : index
    %c0_284 = arith.constant 0 : index
    %c0_285 = arith.constant 0 : index
    %1172 = vector.load %arg11[%c0_282, %c5_283, %c0_284, %c0_285] : memref<1x8x16x16xf32, #tpu.memory_space<vmem>>, vector<1x1x16x16xf32>
    %1173 = vector.shape_cast %1172 : vector<1x1x16x16xf32> to vector<16x16xf32>
    %1174 = vector.shape_cast %1171 : vector<16x16xf32> to vector<1x1x16x16xf32>
    tpu.vector_store %arg11[%c0_282, %c5_283, %c0_284, %c0_285], %1174 {strides = array<i32>} : memref<1x8x16x16xf32, #tpu.memory_space<vmem>>, vector<1x1x16x16xf32>,
    %c216 = arith.constant 216 : index
    %1175 = memref.load %arg3[%c216] : memref<288xf32, #tpu.memory_space<smem>>
    %1176 = vector.broadcast %1175 : f32 to vector<16x16xf32>
    %1177 = arith.mulf %1045, %1176 : vector<16x16xf32>
    %c217 = arith.constant 217 : index
    %1178 = memref.load %arg3[%c217] : memref<288xf32, #tpu.memory_space<smem>>
    %1179 = vector.broadcast %1178 : f32 to vector<16x16xf32>
    %1180 = arith.mulf %1046, %1179 : vector<16x16xf32>
    %1181 = arith.addf %1177, %1180 : vector<16x16xf32>
    %c218 = arith.constant 218 : index
    %1182 = memref.load %arg3[%c218] : memref<288xf32, #tpu.memory_space<smem>>
    %1183 = vector.broadcast %1182 : f32 to vector<16x16xf32>
    %1184 = arith.mulf %1047, %1183 : vector<16x16xf32>
    %1185 = arith.addf %1181, %1184 : vector<16x16xf32>
    %c219 = arith.constant 219 : index
    %1186 = memref.load %arg3[%c219] : memref<288xf32, #tpu.memory_space<smem>>
    %1187 = vector.broadcast %1186 : f32 to vector<16x16xf32>
    %1188 = arith.mulf %1048, %1187 : vector<16x16xf32>
    %1189 = arith.addf %1185, %1188 : vector<16x16xf32>
    %c54_286 = arith.constant 54 : index
    %1190 = memref.load %arg4[%c54_286] : memref<72xf32, #tpu.memory_space<smem>>
    %1191 = vector.broadcast %1190 : f32 to vector<16x16xf32>
    %1192 = arith.addf %1189, %1191 : vector<16x16xf32>
    %c0_287 = arith.constant 0 : index
    %c6_288 = arith.constant 6 : index
    %c0_289 = arith.constant 0 : index
    %c0_290 = arith.constant 0 : index
    %1193 = vector.load %arg11[%c0_287, %c6_288, %c0_289, %c0_290] : memref<1x8x16x16xf32, #tpu.memory_space<vmem>>, vector<1x1x16x16xf32>
    %1194 = vector.shape_cast %1193 : vector<1x1x16x16xf32> to vector<16x16xf32>
    %1195 = vector.shape_cast %1192 : vector<16x16xf32> to vector<1x1x16x16xf32>
    tpu.vector_store %arg11[%c0_287, %c6_288, %c0_289, %c0_290], %1195 {strides = array<i32>} : memref<1x8x16x16xf32, #tpu.memory_space<vmem>>, vector<1x1x16x16xf32>,
    %c220 = arith.constant 220 : index
    %1196 = memref.load %arg3[%c220] : memref<288xf32, #tpu.memory_space<smem>>
    %1197 = vector.broadcast %1196 : f32 to vector<16x16xf32>
    %1198 = arith.mulf %1045, %1197 : vector<16x16xf32>
    %c221 = arith.constant 221 : index
    %1199 = memref.load %arg3[%c221] : memref<288xf32, #tpu.memory_space<smem>>
    %1200 = vector.broadcast %1199 : f32 to vector<16x16xf32>
    %1201 = arith.mulf %1046, %1200 : vector<16x16xf32>
    %1202 = arith.addf %1198, %1201 : vector<16x16xf32>
    %c222 = arith.constant 222 : index
    %1203 = memref.load %arg3[%c222] : memref<288xf32, #tpu.memory_space<smem>>
    %1204 = vector.broadcast %1203 : f32 to vector<16x16xf32>
    %1205 = arith.mulf %1047, %1204 : vector<16x16xf32>
    %1206 = arith.addf %1202, %1205 : vector<16x16xf32>
    %c223 = arith.constant 223 : index
    %1207 = memref.load %arg3[%c223] : memref<288xf32, #tpu.memory_space<smem>>
    %1208 = vector.broadcast %1207 : f32 to vector<16x16xf32>
    %1209 = arith.mulf %1048, %1208 : vector<16x16xf32>
    %1210 = arith.addf %1206, %1209 : vector<16x16xf32>
    %c55_291 = arith.constant 55 : index
    %1211 = memref.load %arg4[%c55_291] : memref<72xf32, #tpu.memory_space<smem>>
    %1212 = vector.broadcast %1211 : f32 to vector<16x16xf32>
    %1213 = arith.addf %1210, %1212 : vector<16x16xf32>
    %c0_292 = arith.constant 0 : index
    %c7_293 = arith.constant 7 : index
    %c0_294 = arith.constant 0 : index
    %c0_295 = arith.constant 0 : index
    %1214 = vector.load %arg11[%c0_292, %c7_293, %c0_294, %c0_295] : memref<1x8x16x16xf32, #tpu.memory_space<vmem>>, vector<1x1x16x16xf32>
    %1215 = vector.shape_cast %1214 : vector<1x1x16x16xf32> to vector<16x16xf32>
    %1216 = vector.shape_cast %1213 : vector<16x16xf32> to vector<1x1x16x16xf32>
    tpu.vector_store %arg11[%c0_292, %c7_293, %c0_294, %c0_295], %1216 {strides = array<i32>} : memref<1x8x16x16xf32, #tpu.memory_space<vmem>>, vector<1x1x16x16xf32>,
    %1217 = vector.extract_strided_slice %9 {offsets = [0, 7], sizes = [16, 16], strides = [1, 1]} : vector<16x24xf32> to vector<16x16xf32>
    %1218 = vector.extract_strided_slice %10 {offsets = [0, 7], sizes = [16, 16], strides = [1, 1]} : vector<16x24xf32> to vector<16x16xf32>
    %1219 = vector.extract_strided_slice %11 {offsets = [0, 7], sizes = [16, 16], strides = [1, 1]} : vector<16x24xf32> to vector<16x16xf32>
    %1220 = vector.extract_strided_slice %12 {offsets = [0, 7], sizes = [16, 16], strides = [1, 1]} : vector<16x24xf32> to vector<16x16xf32>
    %c224 = arith.constant 224 : index
    %1221 = memref.load %arg3[%c224] : memref<288xf32, #tpu.memory_space<smem>>
    %1222 = vector.broadcast %1221 : f32 to vector<16x16xf32>
    %1223 = arith.mulf %1217, %1222 : vector<16x16xf32>
    %c225 = arith.constant 225 : index
    %1224 = memref.load %arg3[%c225] : memref<288xf32, #tpu.memory_space<smem>>
    %1225 = vector.broadcast %1224 : f32 to vector<16x16xf32>
    %1226 = arith.mulf %1218, %1225 : vector<16x16xf32>
    %1227 = arith.addf %1223, %1226 : vector<16x16xf32>
    %c226 = arith.constant 226 : index
    %1228 = memref.load %arg3[%c226] : memref<288xf32, #tpu.memory_space<smem>>
    %1229 = vector.broadcast %1228 : f32 to vector<16x16xf32>
    %1230 = arith.mulf %1219, %1229 : vector<16x16xf32>
    %1231 = arith.addf %1227, %1230 : vector<16x16xf32>
    %c227 = arith.constant 227 : index
    %1232 = memref.load %arg3[%c227] : memref<288xf32, #tpu.memory_space<smem>>
    %1233 = vector.broadcast %1232 : f32 to vector<16x16xf32>
    %1234 = arith.mulf %1220, %1233 : vector<16x16xf32>
    %1235 = arith.addf %1231, %1234 : vector<16x16xf32>
    %c56_296 = arith.constant 56 : index
    %1236 = memref.load %arg4[%c56_296] : memref<72xf32, #tpu.memory_space<smem>>
    %1237 = vector.broadcast %1236 : f32 to vector<16x16xf32>
    %1238 = arith.addf %1235, %1237 : vector<16x16xf32>
    %c0_297 = arith.constant 0 : index
    %c0_298 = arith.constant 0 : index
    %c0_299 = arith.constant 0 : index
    %c0_300 = arith.constant 0 : index
    %1239 = vector.load %arg12[%c0_297, %c0_298, %c0_299, %c0_300] : memref<1x8x16x16xf32, #tpu.memory_space<vmem>>, vector<1x1x16x16xf32>
    %1240 = vector.shape_cast %1239 : vector<1x1x16x16xf32> to vector<16x16xf32>
    %1241 = vector.shape_cast %1238 : vector<16x16xf32> to vector<1x1x16x16xf32>
    tpu.vector_store %arg12[%c0_297, %c0_298, %c0_299, %c0_300], %1241 {strides = array<i32>} : memref<1x8x16x16xf32, #tpu.memory_space<vmem>>, vector<1x1x16x16xf32>,
    %c228 = arith.constant 228 : index
    %1242 = memref.load %arg3[%c228] : memref<288xf32, #tpu.memory_space<smem>>
    %1243 = vector.broadcast %1242 : f32 to vector<16x16xf32>
    %1244 = arith.mulf %1217, %1243 : vector<16x16xf32>
    %c229 = arith.constant 229 : index
    %1245 = memref.load %arg3[%c229] : memref<288xf32, #tpu.memory_space<smem>>
    %1246 = vector.broadcast %1245 : f32 to vector<16x16xf32>
    %1247 = arith.mulf %1218, %1246 : vector<16x16xf32>
    %1248 = arith.addf %1244, %1247 : vector<16x16xf32>
    %c230 = arith.constant 230 : index
    %1249 = memref.load %arg3[%c230] : memref<288xf32, #tpu.memory_space<smem>>
    %1250 = vector.broadcast %1249 : f32 to vector<16x16xf32>
    %1251 = arith.mulf %1219, %1250 : vector<16x16xf32>
    %1252 = arith.addf %1248, %1251 : vector<16x16xf32>
    %c231 = arith.constant 231 : index
    %1253 = memref.load %arg3[%c231] : memref<288xf32, #tpu.memory_space<smem>>
    %1254 = vector.broadcast %1253 : f32 to vector<16x16xf32>
    %1255 = arith.mulf %1220, %1254 : vector<16x16xf32>
    %1256 = arith.addf %1252, %1255 : vector<16x16xf32>
    %c57_301 = arith.constant 57 : index
    %1257 = memref.load %arg4[%c57_301] : memref<72xf32, #tpu.memory_space<smem>>
    %1258 = vector.broadcast %1257 : f32 to vector<16x16xf32>
    %1259 = arith.addf %1256, %1258 : vector<16x16xf32>
    %c0_302 = arith.constant 0 : index
    %c1_303 = arith.constant 1 : index
    %c0_304 = arith.constant 0 : index
    %c0_305 = arith.constant 0 : index
    %1260 = vector.load %arg12[%c0_302, %c1_303, %c0_304, %c0_305] : memref<1x8x16x16xf32, #tpu.memory_space<vmem>>, vector<1x1x16x16xf32>
    %1261 = vector.shape_cast %1260 : vector<1x1x16x16xf32> to vector<16x16xf32>
    %1262 = vector.shape_cast %1259 : vector<16x16xf32> to vector<1x1x16x16xf32>
    tpu.vector_store %arg12[%c0_302, %c1_303, %c0_304, %c0_305], %1262 {strides = array<i32>} : memref<1x8x16x16xf32, #tpu.memory_space<vmem>>, vector<1x1x16x16xf32>,
    %c232 = arith.constant 232 : index
    %1263 = memref.load %arg3[%c232] : memref<288xf32, #tpu.memory_space<smem>>
    %1264 = vector.broadcast %1263 : f32 to vector<16x16xf32>
    %1265 = arith.mulf %1217, %1264 : vector<16x16xf32>
    %c233 = arith.constant 233 : index
    %1266 = memref.load %arg3[%c233] : memref<288xf32, #tpu.memory_space<smem>>
    %1267 = vector.broadcast %1266 : f32 to vector<16x16xf32>
    %1268 = arith.mulf %1218, %1267 : vector<16x16xf32>
    %1269 = arith.addf %1265, %1268 : vector<16x16xf32>
    %c234 = arith.constant 234 : index
    %1270 = memref.load %arg3[%c234] : memref<288xf32, #tpu.memory_space<smem>>
    %1271 = vector.broadcast %1270 : f32 to vector<16x16xf32>
    %1272 = arith.mulf %1219, %1271 : vector<16x16xf32>
    %1273 = arith.addf %1269, %1272 : vector<16x16xf32>
    %c235 = arith.constant 235 : index
    %1274 = memref.load %arg3[%c235] : memref<288xf32, #tpu.memory_space<smem>>
    %1275 = vector.broadcast %1274 : f32 to vector<16x16xf32>
    %1276 = arith.mulf %1220, %1275 : vector<16x16xf32>
    %1277 = arith.addf %1273, %1276 : vector<16x16xf32>
    %c58_306 = arith.constant 58 : index
    %1278 = memref.load %arg4[%c58_306] : memref<72xf32, #tpu.memory_space<smem>>
    %1279 = vector.broadcast %1278 : f32 to vector<16x16xf32>
    %1280 = arith.addf %1277, %1279 : vector<16x16xf32>
    %c0_307 = arith.constant 0 : index
    %c2_308 = arith.constant 2 : index
    %c0_309 = arith.constant 0 : index
    %c0_310 = arith.constant 0 : index
    %1281 = vector.load %arg12[%c0_307, %c2_308, %c0_309, %c0_310] : memref<1x8x16x16xf32, #tpu.memory_space<vmem>>, vector<1x1x16x16xf32>
    %1282 = vector.shape_cast %1281 : vector<1x1x16x16xf32> to vector<16x16xf32>
    %1283 = vector.shape_cast %1280 : vector<16x16xf32> to vector<1x1x16x16xf32>
    tpu.vector_store %arg12[%c0_307, %c2_308, %c0_309, %c0_310], %1283 {strides = array<i32>} : memref<1x8x16x16xf32, #tpu.memory_space<vmem>>, vector<1x1x16x16xf32>,
    %c236 = arith.constant 236 : index
    %1284 = memref.load %arg3[%c236] : memref<288xf32, #tpu.memory_space<smem>>
    %1285 = vector.broadcast %1284 : f32 to vector<16x16xf32>
    %1286 = arith.mulf %1217, %1285 : vector<16x16xf32>
    %c237 = arith.constant 237 : index
    %1287 = memref.load %arg3[%c237] : memref<288xf32, #tpu.memory_space<smem>>
    %1288 = vector.broadcast %1287 : f32 to vector<16x16xf32>
    %1289 = arith.mulf %1218, %1288 : vector<16x16xf32>
    %1290 = arith.addf %1286, %1289 : vector<16x16xf32>
    %c238 = arith.constant 238 : index
    %1291 = memref.load %arg3[%c238] : memref<288xf32, #tpu.memory_space<smem>>
    %1292 = vector.broadcast %1291 : f32 to vector<16x16xf32>
    %1293 = arith.mulf %1219, %1292 : vector<16x16xf32>
    %1294 = arith.addf %1290, %1293 : vector<16x16xf32>
    %c239 = arith.constant 239 : index
    %1295 = memref.load %arg3[%c239] : memref<288xf32, #tpu.memory_space<smem>>
    %1296 = vector.broadcast %1295 : f32 to vector<16x16xf32>
    %1297 = arith.mulf %1220, %1296 : vector<16x16xf32>
    %1298 = arith.addf %1294, %1297 : vector<16x16xf32>
    %c59_311 = arith.constant 59 : index
    %1299 = memref.load %arg4[%c59_311] : memref<72xf32, #tpu.memory_space<smem>>
    %1300 = vector.broadcast %1299 : f32 to vector<16x16xf32>
    %1301 = arith.addf %1298, %1300 : vector<16x16xf32>
    %c0_312 = arith.constant 0 : index
    %c3_313 = arith.constant 3 : index
    %c0_314 = arith.constant 0 : index
    %c0_315 = arith.constant 0 : index
    %1302 = vector.load %arg12[%c0_312, %c3_313, %c0_314, %c0_315] : memref<1x8x16x16xf32, #tpu.memory_space<vmem>>, vector<1x1x16x16xf32>
    %1303 = vector.shape_cast %1302 : vector<1x1x16x16xf32> to vector<16x16xf32>
    %1304 = vector.shape_cast %1301 : vector<16x16xf32> to vector<1x1x16x16xf32>
    tpu.vector_store %arg12[%c0_312, %c3_313, %c0_314, %c0_315], %1304 {strides = array<i32>} : memref<1x8x16x16xf32, #tpu.memory_space<vmem>>, vector<1x1x16x16xf32>,
    %c240 = arith.constant 240 : index
    %1305 = memref.load %arg3[%c240] : memref<288xf32, #tpu.memory_space<smem>>
    %1306 = vector.broadcast %1305 : f32 to vector<16x16xf32>
    %1307 = arith.mulf %1217, %1306 : vector<16x16xf32>
    %c241 = arith.constant 241 : index
    %1308 = memref.load %arg3[%c241] : memref<288xf32, #tpu.memory_space<smem>>
    %1309 = vector.broadcast %1308 : f32 to vector<16x16xf32>
    %1310 = arith.mulf %1218, %1309 : vector<16x16xf32>
    %1311 = arith.addf %1307, %1310 : vector<16x16xf32>
    %c242 = arith.constant 242 : index
    %1312 = memref.load %arg3[%c242] : memref<288xf32, #tpu.memory_space<smem>>
    %1313 = vector.broadcast %1312 : f32 to vector<16x16xf32>
    %1314 = arith.mulf %1219, %1313 : vector<16x16xf32>
    %1315 = arith.addf %1311, %1314 : vector<16x16xf32>
    %c243 = arith.constant 243 : index
    %1316 = memref.load %arg3[%c243] : memref<288xf32, #tpu.memory_space<smem>>
    %1317 = vector.broadcast %1316 : f32 to vector<16x16xf32>
    %1318 = arith.mulf %1220, %1317 : vector<16x16xf32>
    %1319 = arith.addf %1315, %1318 : vector<16x16xf32>
    %c60_316 = arith.constant 60 : index
    %1320 = memref.load %arg4[%c60_316] : memref<72xf32, #tpu.memory_space<smem>>
    %1321 = vector.broadcast %1320 : f32 to vector<16x16xf32>
    %1322 = arith.addf %1319, %1321 : vector<16x16xf32>
    %c0_317 = arith.constant 0 : index
    %c4_318 = arith.constant 4 : index
    %c0_319 = arith.constant 0 : index
    %c0_320 = arith.constant 0 : index
    %1323 = vector.load %arg12[%c0_317, %c4_318, %c0_319, %c0_320] : memref<1x8x16x16xf32, #tpu.memory_space<vmem>>, vector<1x1x16x16xf32>
    %1324 = vector.shape_cast %1323 : vector<1x1x16x16xf32> to vector<16x16xf32>
    %1325 = vector.shape_cast %1322 : vector<16x16xf32> to vector<1x1x16x16xf32>
    tpu.vector_store %arg12[%c0_317, %c4_318, %c0_319, %c0_320], %1325 {strides = array<i32>} : memref<1x8x16x16xf32, #tpu.memory_space<vmem>>, vector<1x1x16x16xf32>,
    %c244 = arith.constant 244 : index
    %1326 = memref.load %arg3[%c244] : memref<288xf32, #tpu.memory_space<smem>>
    %1327 = vector.broadcast %1326 : f32 to vector<16x16xf32>
    %1328 = arith.mulf %1217, %1327 : vector<16x16xf32>
    %c245 = arith.constant 245 : index
    %1329 = memref.load %arg3[%c245] : memref<288xf32, #tpu.memory_space<smem>>
    %1330 = vector.broadcast %1329 : f32 to vector<16x16xf32>
    %1331 = arith.mulf %1218, %1330 : vector<16x16xf32>
    %1332 = arith.addf %1328, %1331 : vector<16x16xf32>
    %c246 = arith.constant 246 : index
    %1333 = memref.load %arg3[%c246] : memref<288xf32, #tpu.memory_space<smem>>
    %1334 = vector.broadcast %1333 : f32 to vector<16x16xf32>
    %1335 = arith.mulf %1219, %1334 : vector<16x16xf32>
    %1336 = arith.addf %1332, %1335 : vector<16x16xf32>
    %c247 = arith.constant 247 : index
    %1337 = memref.load %arg3[%c247] : memref<288xf32, #tpu.memory_space<smem>>
    %1338 = vector.broadcast %1337 : f32 to vector<16x16xf32>
    %1339 = arith.mulf %1220, %1338 : vector<16x16xf32>
    %1340 = arith.addf %1336, %1339 : vector<16x16xf32>
    %c61_321 = arith.constant 61 : index
    %1341 = memref.load %arg4[%c61_321] : memref<72xf32, #tpu.memory_space<smem>>
    %1342 = vector.broadcast %1341 : f32 to vector<16x16xf32>
    %1343 = arith.addf %1340, %1342 : vector<16x16xf32>
    %c0_322 = arith.constant 0 : index
    %c5_323 = arith.constant 5 : index
    %c0_324 = arith.constant 0 : index
    %c0_325 = arith.constant 0 : index
    %1344 = vector.load %arg12[%c0_322, %c5_323, %c0_324, %c0_325] : memref<1x8x16x16xf32, #tpu.memory_space<vmem>>, vector<1x1x16x16xf32>
    %1345 = vector.shape_cast %1344 : vector<1x1x16x16xf32> to vector<16x16xf32>
    %1346 = vector.shape_cast %1343 : vector<16x16xf32> to vector<1x1x16x16xf32>
    tpu.vector_store %arg12[%c0_322, %c5_323, %c0_324, %c0_325], %1346 {strides = array<i32>} : memref<1x8x16x16xf32, #tpu.memory_space<vmem>>, vector<1x1x16x16xf32>,
    %c248 = arith.constant 248 : index
    %1347 = memref.load %arg3[%c248] : memref<288xf32, #tpu.memory_space<smem>>
    %1348 = vector.broadcast %1347 : f32 to vector<16x16xf32>
    %1349 = arith.mulf %1217, %1348 : vector<16x16xf32>
    %c249 = arith.constant 249 : index
    %1350 = memref.load %arg3[%c249] : memref<288xf32, #tpu.memory_space<smem>>
    %1351 = vector.broadcast %1350 : f32 to vector<16x16xf32>
    %1352 = arith.mulf %1218, %1351 : vector<16x16xf32>
    %1353 = arith.addf %1349, %1352 : vector<16x16xf32>
    %c250 = arith.constant 250 : index
    %1354 = memref.load %arg3[%c250] : memref<288xf32, #tpu.memory_space<smem>>
    %1355 = vector.broadcast %1354 : f32 to vector<16x16xf32>
    %1356 = arith.mulf %1219, %1355 : vector<16x16xf32>
    %1357 = arith.addf %1353, %1356 : vector<16x16xf32>
    %c251 = arith.constant 251 : index
    %1358 = memref.load %arg3[%c251] : memref<288xf32, #tpu.memory_space<smem>>
    %1359 = vector.broadcast %1358 : f32 to vector<16x16xf32>
    %1360 = arith.mulf %1220, %1359 : vector<16x16xf32>
    %1361 = arith.addf %1357, %1360 : vector<16x16xf32>
    %c62_326 = arith.constant 62 : index
    %1362 = memref.load %arg4[%c62_326] : memref<72xf32, #tpu.memory_space<smem>>
    %1363 = vector.broadcast %1362 : f32 to vector<16x16xf32>
    %1364 = arith.addf %1361, %1363 : vector<16x16xf32>
    %c0_327 = arith.constant 0 : index
    %c6_328 = arith.constant 6 : index
    %c0_329 = arith.constant 0 : index
    %c0_330 = arith.constant 0 : index
    %1365 = vector.load %arg12[%c0_327, %c6_328, %c0_329, %c0_330] : memref<1x8x16x16xf32, #tpu.memory_space<vmem>>, vector<1x1x16x16xf32>
    %1366 = vector.shape_cast %1365 : vector<1x1x16x16xf32> to vector<16x16xf32>
    %1367 = vector.shape_cast %1364 : vector<16x16xf32> to vector<1x1x16x16xf32>
    tpu.vector_store %arg12[%c0_327, %c6_328, %c0_329, %c0_330], %1367 {strides = array<i32>} : memref<1x8x16x16xf32, #tpu.memory_space<vmem>>, vector<1x1x16x16xf32>,
    %c252 = arith.constant 252 : index
    %1368 = memref.load %arg3[%c252] : memref<288xf32, #tpu.memory_space<smem>>
    %1369 = vector.broadcast %1368 : f32 to vector<16x16xf32>
    %1370 = arith.mulf %1217, %1369 : vector<16x16xf32>
    %c253 = arith.constant 253 : index
    %1371 = memref.load %arg3[%c253] : memref<288xf32, #tpu.memory_space<smem>>
    %1372 = vector.broadcast %1371 : f32 to vector<16x16xf32>
    %1373 = arith.mulf %1218, %1372 : vector<16x16xf32>
    %1374 = arith.addf %1370, %1373 : vector<16x16xf32>
    %c254 = arith.constant 254 : index
    %1375 = memref.load %arg3[%c254] : memref<288xf32, #tpu.memory_space<smem>>
    %1376 = vector.broadcast %1375 : f32 to vector<16x16xf32>
    %1377 = arith.mulf %1219, %1376 : vector<16x16xf32>
    %1378 = arith.addf %1374, %1377 : vector<16x16xf32>
    %c255 = arith.constant 255 : index
    %1379 = memref.load %arg3[%c255] : memref<288xf32, #tpu.memory_space<smem>>
    %1380 = vector.broadcast %1379 : f32 to vector<16x16xf32>
    %1381 = arith.mulf %1220, %1380 : vector<16x16xf32>
    %1382 = arith.addf %1378, %1381 : vector<16x16xf32>
    %c63_331 = arith.constant 63 : index
    %1383 = memref.load %arg4[%c63_331] : memref<72xf32, #tpu.memory_space<smem>>
    %1384 = vector.broadcast %1383 : f32 to vector<16x16xf32>
    %1385 = arith.addf %1382, %1384 : vector<16x16xf32>
    %c0_332 = arith.constant 0 : index
    %c7_333 = arith.constant 7 : index
    %c0_334 = arith.constant 0 : index
    %c0_335 = arith.constant 0 : index
    %1386 = vector.load %arg12[%c0_332, %c7_333, %c0_334, %c0_335] : memref<1x8x16x16xf32, #tpu.memory_space<vmem>>, vector<1x1x16x16xf32>
    %1387 = vector.shape_cast %1386 : vector<1x1x16x16xf32> to vector<16x16xf32>
    %1388 = vector.shape_cast %1385 : vector<16x16xf32> to vector<1x1x16x16xf32>
    tpu.vector_store %arg12[%c0_332, %c7_333, %c0_334, %c0_335], %1388 {strides = array<i32>} : memref<1x8x16x16xf32, #tpu.memory_space<vmem>>, vector<1x1x16x16xf32>,
    %1389 = vector.extract_strided_slice %9 {offsets = [0, 8], sizes = [16, 16], strides = [1, 1]} : vector<16x24xf32> to vector<16x16xf32>
    %1390 = vector.extract_strided_slice %10 {offsets = [0, 8], sizes = [16, 16], strides = [1, 1]} : vector<16x24xf32> to vector<16x16xf32>
    %1391 = vector.extract_strided_slice %11 {offsets = [0, 8], sizes = [16, 16], strides = [1, 1]} : vector<16x24xf32> to vector<16x16xf32>
    %1392 = vector.extract_strided_slice %12 {offsets = [0, 8], sizes = [16, 16], strides = [1, 1]} : vector<16x24xf32> to vector<16x16xf32>
    %c256 = arith.constant 256 : index
    %1393 = memref.load %arg3[%c256] : memref<288xf32, #tpu.memory_space<smem>>
    %1394 = vector.broadcast %1393 : f32 to vector<16x16xf32>
    %1395 = arith.mulf %1389, %1394 : vector<16x16xf32>
    %c257 = arith.constant 257 : index
    %1396 = memref.load %arg3[%c257] : memref<288xf32, #tpu.memory_space<smem>>
    %1397 = vector.broadcast %1396 : f32 to vector<16x16xf32>
    %1398 = arith.mulf %1390, %1397 : vector<16x16xf32>
    %1399 = arith.addf %1395, %1398 : vector<16x16xf32>
    %c258 = arith.constant 258 : index
    %1400 = memref.load %arg3[%c258] : memref<288xf32, #tpu.memory_space<smem>>
    %1401 = vector.broadcast %1400 : f32 to vector<16x16xf32>
    %1402 = arith.mulf %1391, %1401 : vector<16x16xf32>
    %1403 = arith.addf %1399, %1402 : vector<16x16xf32>
    %c259 = arith.constant 259 : index
    %1404 = memref.load %arg3[%c259] : memref<288xf32, #tpu.memory_space<smem>>
    %1405 = vector.broadcast %1404 : f32 to vector<16x16xf32>
    %1406 = arith.mulf %1392, %1405 : vector<16x16xf32>
    %1407 = arith.addf %1403, %1406 : vector<16x16xf32>
    %c64_336 = arith.constant 64 : index
    %1408 = memref.load %arg4[%c64_336] : memref<72xf32, #tpu.memory_space<smem>>
    %1409 = vector.broadcast %1408 : f32 to vector<16x16xf32>
    %1410 = arith.addf %1407, %1409 : vector<16x16xf32>
    %c0_337 = arith.constant 0 : index
    %c0_338 = arith.constant 0 : index
    %c0_339 = arith.constant 0 : index
    %c0_340 = arith.constant 0 : index
    %1411 = vector.load %arg13[%c0_337, %c0_338, %c0_339, %c0_340] : memref<1x8x16x16xf32, #tpu.memory_space<vmem>>, vector<1x1x16x16xf32>
    %1412 = vector.shape_cast %1411 : vector<1x1x16x16xf32> to vector<16x16xf32>
    %1413 = vector.shape_cast %1410 : vector<16x16xf32> to vector<1x1x16x16xf32>
    tpu.vector_store %arg13[%c0_337, %c0_338, %c0_339, %c0_340], %1413 {strides = array<i32>} : memref<1x8x16x16xf32, #tpu.memory_space<vmem>>, vector<1x1x16x16xf32>,
    %c260 = arith.constant 260 : index
    %1414 = memref.load %arg3[%c260] : memref<288xf32, #tpu.memory_space<smem>>
    %1415 = vector.broadcast %1414 : f32 to vector<16x16xf32>
    %1416 = arith.mulf %1389, %1415 : vector<16x16xf32>
    %c261 = arith.constant 261 : index
    %1417 = memref.load %arg3[%c261] : memref<288xf32, #tpu.memory_space<smem>>
    %1418 = vector.broadcast %1417 : f32 to vector<16x16xf32>
    %1419 = arith.mulf %1390, %1418 : vector<16x16xf32>
    %1420 = arith.addf %1416, %1419 : vector<16x16xf32>
    %c262 = arith.constant 262 : index
    %1421 = memref.load %arg3[%c262] : memref<288xf32, #tpu.memory_space<smem>>
    %1422 = vector.broadcast %1421 : f32 to vector<16x16xf32>
    %1423 = arith.mulf %1391, %1422 : vector<16x16xf32>
    %1424 = arith.addf %1420, %1423 : vector<16x16xf32>
    %c263 = arith.constant 263 : index
    %1425 = memref.load %arg3[%c263] : memref<288xf32, #tpu.memory_space<smem>>
    %1426 = vector.broadcast %1425 : f32 to vector<16x16xf32>
    %1427 = arith.mulf %1392, %1426 : vector<16x16xf32>
    %1428 = arith.addf %1424, %1427 : vector<16x16xf32>
    %c65_341 = arith.constant 65 : index
    %1429 = memref.load %arg4[%c65_341] : memref<72xf32, #tpu.memory_space<smem>>
    %1430 = vector.broadcast %1429 : f32 to vector<16x16xf32>
    %1431 = arith.addf %1428, %1430 : vector<16x16xf32>
    %c0_342 = arith.constant 0 : index
    %c1_343 = arith.constant 1 : index
    %c0_344 = arith.constant 0 : index
    %c0_345 = arith.constant 0 : index
    %1432 = vector.load %arg13[%c0_342, %c1_343, %c0_344, %c0_345] : memref<1x8x16x16xf32, #tpu.memory_space<vmem>>, vector<1x1x16x16xf32>
    %1433 = vector.shape_cast %1432 : vector<1x1x16x16xf32> to vector<16x16xf32>
    %1434 = vector.shape_cast %1431 : vector<16x16xf32> to vector<1x1x16x16xf32>
    tpu.vector_store %arg13[%c0_342, %c1_343, %c0_344, %c0_345], %1434 {strides = array<i32>} : memref<1x8x16x16xf32, #tpu.memory_space<vmem>>, vector<1x1x16x16xf32>,
    %c264 = arith.constant 264 : index
    %1435 = memref.load %arg3[%c264] : memref<288xf32, #tpu.memory_space<smem>>
    %1436 = vector.broadcast %1435 : f32 to vector<16x16xf32>
    %1437 = arith.mulf %1389, %1436 : vector<16x16xf32>
    %c265 = arith.constant 265 : index
    %1438 = memref.load %arg3[%c265] : memref<288xf32, #tpu.memory_space<smem>>
    %1439 = vector.broadcast %1438 : f32 to vector<16x16xf32>
    %1440 = arith.mulf %1390, %1439 : vector<16x16xf32>
    %1441 = arith.addf %1437, %1440 : vector<16x16xf32>
    %c266 = arith.constant 266 : index
    %1442 = memref.load %arg3[%c266] : memref<288xf32, #tpu.memory_space<smem>>
    %1443 = vector.broadcast %1442 : f32 to vector<16x16xf32>
    %1444 = arith.mulf %1391, %1443 : vector<16x16xf32>
    %1445 = arith.addf %1441, %1444 : vector<16x16xf32>
    %c267 = arith.constant 267 : index
    %1446 = memref.load %arg3[%c267] : memref<288xf32, #tpu.memory_space<smem>>
    %1447 = vector.broadcast %1446 : f32 to vector<16x16xf32>
    %1448 = arith.mulf %1392, %1447 : vector<16x16xf32>
    %1449 = arith.addf %1445, %1448 : vector<16x16xf32>
    %c66_346 = arith.constant 66 : index
    %1450 = memref.load %arg4[%c66_346] : memref<72xf32, #tpu.memory_space<smem>>
    %1451 = vector.broadcast %1450 : f32 to vector<16x16xf32>
    %1452 = arith.addf %1449, %1451 : vector<16x16xf32>
    %c0_347 = arith.constant 0 : index
    %c2_348 = arith.constant 2 : index
    %c0_349 = arith.constant 0 : index
    %c0_350 = arith.constant 0 : index
    %1453 = vector.load %arg13[%c0_347, %c2_348, %c0_349, %c0_350] : memref<1x8x16x16xf32, #tpu.memory_space<vmem>>, vector<1x1x16x16xf32>
    %1454 = vector.shape_cast %1453 : vector<1x1x16x16xf32> to vector<16x16xf32>
    %1455 = vector.shape_cast %1452 : vector<16x16xf32> to vector<1x1x16x16xf32>
    tpu.vector_store %arg13[%c0_347, %c2_348, %c0_349, %c0_350], %1455 {strides = array<i32>} : memref<1x8x16x16xf32, #tpu.memory_space<vmem>>, vector<1x1x16x16xf32>,
    %c268 = arith.constant 268 : index
    %1456 = memref.load %arg3[%c268] : memref<288xf32, #tpu.memory_space<smem>>
    %1457 = vector.broadcast %1456 : f32 to vector<16x16xf32>
    %1458 = arith.mulf %1389, %1457 : vector<16x16xf32>
    %c269 = arith.constant 269 : index
    %1459 = memref.load %arg3[%c269] : memref<288xf32, #tpu.memory_space<smem>>
    %1460 = vector.broadcast %1459 : f32 to vector<16x16xf32>
    %1461 = arith.mulf %1390, %1460 : vector<16x16xf32>
    %1462 = arith.addf %1458, %1461 : vector<16x16xf32>
    %c270 = arith.constant 270 : index
    %1463 = memref.load %arg3[%c270] : memref<288xf32, #tpu.memory_space<smem>>
    %1464 = vector.broadcast %1463 : f32 to vector<16x16xf32>
    %1465 = arith.mulf %1391, %1464 : vector<16x16xf32>
    %1466 = arith.addf %1462, %1465 : vector<16x16xf32>
    %c271 = arith.constant 271 : index
    %1467 = memref.load %arg3[%c271] : memref<288xf32, #tpu.memory_space<smem>>
    %1468 = vector.broadcast %1467 : f32 to vector<16x16xf32>
    %1469 = arith.mulf %1392, %1468 : vector<16x16xf32>
    %1470 = arith.addf %1466, %1469 : vector<16x16xf32>
    %c67_351 = arith.constant 67 : index
    %1471 = memref.load %arg4[%c67_351] : memref<72xf32, #tpu.memory_space<smem>>
    %1472 = vector.broadcast %1471 : f32 to vector<16x16xf32>
    %1473 = arith.addf %1470, %1472 : vector<16x16xf32>
    %c0_352 = arith.constant 0 : index
    %c3_353 = arith.constant 3 : index
    %c0_354 = arith.constant 0 : index
    %c0_355 = arith.constant 0 : index
    %1474 = vector.load %arg13[%c0_352, %c3_353, %c0_354, %c0_355] : memref<1x8x16x16xf32, #tpu.memory_space<vmem>>, vector<1x1x16x16xf32>
    %1475 = vector.shape_cast %1474 : vector<1x1x16x16xf32> to vector<16x16xf32>
    %1476 = vector.shape_cast %1473 : vector<16x16xf32> to vector<1x1x16x16xf32>
    tpu.vector_store %arg13[%c0_352, %c3_353, %c0_354, %c0_355], %1476 {strides = array<i32>} : memref<1x8x16x16xf32, #tpu.memory_space<vmem>>, vector<1x1x16x16xf32>,
    %c272 = arith.constant 272 : index
    %1477 = memref.load %arg3[%c272] : memref<288xf32, #tpu.memory_space<smem>>
    %1478 = vector.broadcast %1477 : f32 to vector<16x16xf32>
    %1479 = arith.mulf %1389, %1478 : vector<16x16xf32>
    %c273 = arith.constant 273 : index
    %1480 = memref.load %arg3[%c273] : memref<288xf32, #tpu.memory_space<smem>>
    %1481 = vector.broadcast %1480 : f32 to vector<16x16xf32>
    %1482 = arith.mulf %1390, %1481 : vector<16x16xf32>
    %1483 = arith.addf %1479, %1482 : vector<16x16xf32>
    %c274 = arith.constant 274 : index
    %1484 = memref.load %arg3[%c274] : memref<288xf32, #tpu.memory_space<smem>>
    %1485 = vector.broadcast %1484 : f32 to vector<16x16xf32>
    %1486 = arith.mulf %1391, %1485 : vector<16x16xf32>
    %1487 = arith.addf %1483, %1486 : vector<16x16xf32>
    %c275 = arith.constant 275 : index
    %1488 = memref.load %arg3[%c275] : memref<288xf32, #tpu.memory_space<smem>>
    %1489 = vector.broadcast %1488 : f32 to vector<16x16xf32>
    %1490 = arith.mulf %1392, %1489 : vector<16x16xf32>
    %1491 = arith.addf %1487, %1490 : vector<16x16xf32>
    %c68_356 = arith.constant 68 : index
    %1492 = memref.load %arg4[%c68_356] : memref<72xf32, #tpu.memory_space<smem>>
    %1493 = vector.broadcast %1492 : f32 to vector<16x16xf32>
    %1494 = arith.addf %1491, %1493 : vector<16x16xf32>
    %c0_357 = arith.constant 0 : index
    %c4_358 = arith.constant 4 : index
    %c0_359 = arith.constant 0 : index
    %c0_360 = arith.constant 0 : index
    %1495 = vector.load %arg13[%c0_357, %c4_358, %c0_359, %c0_360] : memref<1x8x16x16xf32, #tpu.memory_space<vmem>>, vector<1x1x16x16xf32>
    %1496 = vector.shape_cast %1495 : vector<1x1x16x16xf32> to vector<16x16xf32>
    %1497 = vector.shape_cast %1494 : vector<16x16xf32> to vector<1x1x16x16xf32>
    tpu.vector_store %arg13[%c0_357, %c4_358, %c0_359, %c0_360], %1497 {strides = array<i32>} : memref<1x8x16x16xf32, #tpu.memory_space<vmem>>, vector<1x1x16x16xf32>,
    %c276 = arith.constant 276 : index
    %1498 = memref.load %arg3[%c276] : memref<288xf32, #tpu.memory_space<smem>>
    %1499 = vector.broadcast %1498 : f32 to vector<16x16xf32>
    %1500 = arith.mulf %1389, %1499 : vector<16x16xf32>
    %c277 = arith.constant 277 : index
    %1501 = memref.load %arg3[%c277] : memref<288xf32, #tpu.memory_space<smem>>
    %1502 = vector.broadcast %1501 : f32 to vector<16x16xf32>
    %1503 = arith.mulf %1390, %1502 : vector<16x16xf32>
    %1504 = arith.addf %1500, %1503 : vector<16x16xf32>
    %c278 = arith.constant 278 : index
    %1505 = memref.load %arg3[%c278] : memref<288xf32, #tpu.memory_space<smem>>
    %1506 = vector.broadcast %1505 : f32 to vector<16x16xf32>
    %1507 = arith.mulf %1391, %1506 : vector<16x16xf32>
    %1508 = arith.addf %1504, %1507 : vector<16x16xf32>
    %c279 = arith.constant 279 : index
    %1509 = memref.load %arg3[%c279] : memref<288xf32, #tpu.memory_space<smem>>
    %1510 = vector.broadcast %1509 : f32 to vector<16x16xf32>
    %1511 = arith.mulf %1392, %1510 : vector<16x16xf32>
    %1512 = arith.addf %1508, %1511 : vector<16x16xf32>
    %c69_361 = arith.constant 69 : index
    %1513 = memref.load %arg4[%c69_361] : memref<72xf32, #tpu.memory_space<smem>>
    %1514 = vector.broadcast %1513 : f32 to vector<16x16xf32>
    %1515 = arith.addf %1512, %1514 : vector<16x16xf32>
    %c0_362 = arith.constant 0 : index
    %c5_363 = arith.constant 5 : index
    %c0_364 = arith.constant 0 : index
    %c0_365 = arith.constant 0 : index
    %1516 = vector.load %arg13[%c0_362, %c5_363, %c0_364, %c0_365] : memref<1x8x16x16xf32, #tpu.memory_space<vmem>>, vector<1x1x16x16xf32>
    %1517 = vector.shape_cast %1516 : vector<1x1x16x16xf32> to vector<16x16xf32>
    %1518 = vector.shape_cast %1515 : vector<16x16xf32> to vector<1x1x16x16xf32>
    tpu.vector_store %arg13[%c0_362, %c5_363, %c0_364, %c0_365], %1518 {strides = array<i32>} : memref<1x8x16x16xf32, #tpu.memory_space<vmem>>, vector<1x1x16x16xf32>,
    %c280 = arith.constant 280 : index
    %1519 = memref.load %arg3[%c280] : memref<288xf32, #tpu.memory_space<smem>>
    %1520 = vector.broadcast %1519 : f32 to vector<16x16xf32>
    %1521 = arith.mulf %1389, %1520 : vector<16x16xf32>
    %c281 = arith.constant 281 : index
    %1522 = memref.load %arg3[%c281] : memref<288xf32, #tpu.memory_space<smem>>
    %1523 = vector.broadcast %1522 : f32 to vector<16x16xf32>
    %1524 = arith.mulf %1390, %1523 : vector<16x16xf32>
    %1525 = arith.addf %1521, %1524 : vector<16x16xf32>
    %c282 = arith.constant 282 : index
    %1526 = memref.load %arg3[%c282] : memref<288xf32, #tpu.memory_space<smem>>
    %1527 = vector.broadcast %1526 : f32 to vector<16x16xf32>
    %1528 = arith.mulf %1391, %1527 : vector<16x16xf32>
    %1529 = arith.addf %1525, %1528 : vector<16x16xf32>
    %c283 = arith.constant 283 : index
    %1530 = memref.load %arg3[%c283] : memref<288xf32, #tpu.memory_space<smem>>
    %1531 = vector.broadcast %1530 : f32 to vector<16x16xf32>
    %1532 = arith.mulf %1392, %1531 : vector<16x16xf32>
    %1533 = arith.addf %1529, %1532 : vector<16x16xf32>
    %c70_366 = arith.constant 70 : index
    %1534 = memref.load %arg4[%c70_366] : memref<72xf32, #tpu.memory_space<smem>>
    %1535 = vector.broadcast %1534 : f32 to vector<16x16xf32>
    %1536 = arith.addf %1533, %1535 : vector<16x16xf32>
    %c0_367 = arith.constant 0 : index
    %c6_368 = arith.constant 6 : index
    %c0_369 = arith.constant 0 : index
    %c0_370 = arith.constant 0 : index
    %1537 = vector.load %arg13[%c0_367, %c6_368, %c0_369, %c0_370] : memref<1x8x16x16xf32, #tpu.memory_space<vmem>>, vector<1x1x16x16xf32>
    %1538 = vector.shape_cast %1537 : vector<1x1x16x16xf32> to vector<16x16xf32>
    %1539 = vector.shape_cast %1536 : vector<16x16xf32> to vector<1x1x16x16xf32>
    tpu.vector_store %arg13[%c0_367, %c6_368, %c0_369, %c0_370], %1539 {strides = array<i32>} : memref<1x8x16x16xf32, #tpu.memory_space<vmem>>, vector<1x1x16x16xf32>,
    %c284 = arith.constant 284 : index
    %1540 = memref.load %arg3[%c284] : memref<288xf32, #tpu.memory_space<smem>>
    %1541 = vector.broadcast %1540 : f32 to vector<16x16xf32>
    %1542 = arith.mulf %1389, %1541 : vector<16x16xf32>
    %c285 = arith.constant 285 : index
    %1543 = memref.load %arg3[%c285] : memref<288xf32, #tpu.memory_space<smem>>
    %1544 = vector.broadcast %1543 : f32 to vector<16x16xf32>
    %1545 = arith.mulf %1390, %1544 : vector<16x16xf32>
    %1546 = arith.addf %1542, %1545 : vector<16x16xf32>
    %c286 = arith.constant 286 : index
    %1547 = memref.load %arg3[%c286] : memref<288xf32, #tpu.memory_space<smem>>
    %1548 = vector.broadcast %1547 : f32 to vector<16x16xf32>
    %1549 = arith.mulf %1391, %1548 : vector<16x16xf32>
    %1550 = arith.addf %1546, %1549 : vector<16x16xf32>
    %c287 = arith.constant 287 : index
    %1551 = memref.load %arg3[%c287] : memref<288xf32, #tpu.memory_space<smem>>
    %1552 = vector.broadcast %1551 : f32 to vector<16x16xf32>
    %1553 = arith.mulf %1392, %1552 : vector<16x16xf32>
    %1554 = arith.addf %1550, %1553 : vector<16x16xf32>
    %c71_371 = arith.constant 71 : index
    %1555 = memref.load %arg4[%c71_371] : memref<72xf32, #tpu.memory_space<smem>>
    %1556 = vector.broadcast %1555 : f32 to vector<16x16xf32>
    %1557 = arith.addf %1554, %1556 : vector<16x16xf32>
    %c0_372 = arith.constant 0 : index
    %c7_373 = arith.constant 7 : index
    %c0_374 = arith.constant 0 : index
    %c0_375 = arith.constant 0 : index
    %1558 = vector.load %arg13[%c0_372, %c7_373, %c0_374, %c0_375] : memref<1x8x16x16xf32, #tpu.memory_space<vmem>>, vector<1x1x16x16xf32>
    %1559 = vector.shape_cast %1558 : vector<1x1x16x16xf32> to vector<16x16xf32>
    %1560 = vector.shape_cast %1557 : vector<16x16xf32> to vector<1x1x16x16xf32>
    tpu.vector_store %arg13[%c0_372, %c7_373, %c0_374, %c0_375], %1560 {strides = array<i32>} : memref<1x8x16x16xf32, #tpu.memory_space<vmem>>, vector<1x1x16x16xf32>,
    return
  }
  func.func @transform_0(%arg0: i32, %arg1: i32) -> (i32, i32, i32, i32) {
    %c0_i32 = arith.constant 0 : i32
    %c0_i32_0 = arith.constant 0 : i32
    %c0_i32_1 = arith.constant 0 : i32
    return %arg0, %c0_i32, %arg1, %c0_i32_0 : i32, i32, i32, i32
  }
  func.func @transform_1(%arg0: i32, %arg1: i32) -> i32 {
    %c0_i32 = arith.constant 0 : i32
    %c0_i32_0 = arith.constant 0 : i32
    return %c0_i32 : i32
  }
  func.func @transform_2(%arg0: i32, %arg1: i32) -> i32 {
    %c0_i32 = arith.constant 0 : i32
    %c0_i32_0 = arith.constant 0 : i32
    return %c0_i32 : i32
  }
  func.func @transform_3(%arg0: i32, %arg1: i32) -> (i32, i32, i32, i32) {
    %c0_i32 = arith.constant 0 : i32
    %c0_i32_0 = arith.constant 0 : i32
    %c0_i32_1 = arith.constant 0 : i32
    return %arg0, %c0_i32, %arg1, %c0_i32_0 : i32, i32, i32, i32
  }
  func.func @transform_4(%arg0: i32, %arg1: i32) -> (i32, i32, i32, i32) {
    %c0_i32 = arith.constant 0 : i32
    %c0_i32_0 = arith.constant 0 : i32
    %c0_i32_1 = arith.constant 0 : i32
    return %arg0, %c0_i32, %arg1, %c0_i32_0 : i32, i32, i32, i32
  }
  func.func @transform_5(%arg0: i32, %arg1: i32) -> (i32, i32, i32, i32) {
    %c0_i32 = arith.constant 0 : i32
    %c0_i32_0 = arith.constant 0 : i32
    %c0_i32_1 = arith.constant 0 : i32
    return %arg0, %c0_i32, %arg1, %c0_i32_0 : i32, i32, i32, i32
  }
  func.func @transform_6(%arg0: i32, %arg1: i32) -> (i32, i32, i32, i32) {
    %c0_i32 = arith.constant 0 : i32
    %c0_i32_0 = arith.constant 0 : i32
    %c0_i32_1 = arith.constant 0 : i32
    return %arg0, %c0_i32, %arg1, %c0_i32_0 : i32, i32, i32, i32
  }
  func.func @transform_7(%arg0: i32, %arg1: i32) -> (i32, i32, i32, i32) {
    %c0_i32 = arith.constant 0 : i32
    %c0_i32_0 = arith.constant 0 : i32
    %c0_i32_1 = arith.constant 0 : i32
    return %arg0, %c0_i32, %arg1, %c0_i32_0 : i32, i32, i32, i32
  }
  func.func @transform_8(%arg0: i32, %arg1: i32) -> (i32, i32, i32, i32) {
    %c0_i32 = arith.constant 0 : i32
    %c0_i32_0 = arith.constant 0 : i32
    %c0_i32_1 = arith.constant 0 : i32
    return %arg0, %c0_i32, %arg1, %c0_i32_0 : i32, i32, i32, i32
  }
  func.func @transform_9(%arg0: i32, %arg1: i32) -> (i32, i32, i32, i32) {
    %c0_i32 = arith.constant 0 : i32
    %c0_i32_0 = arith.constant 0 : i32
    %c0_i32_1 = arith.constant 0 : i32
    return %arg0, %c0_i32, %arg1, %c0_i32_0 : i32, i32, i32, i32
  }
  func.func @transform_10(%arg0: i32, %arg1: i32) -> (i32, i32, i32, i32) {
    %c0_i32 = arith.constant 0 : i32
    %c0_i32_0 = arith.constant 0 : i32
    %c0_i32_1 = arith.constant 0 : i32
    return %arg0, %c0_i32, %arg1, %c0_i32_0 : i32, i32, i32, i32
  }
  func.func @transform_11(%arg0: i32, %arg1: i32) -> (i32, i32, i32, i32) {
    %c0_i32 = arith.constant 0 : i32
    %c0_i32_0 = arith.constant 0 : i32
    %c0_i32_1 = arith.constant 0 : i32
    return %arg0, %c0_i32, %arg1, %c0_i32_0 : i32, i32, i32, i32
  }
}

</mosaic_0001>

<bundles_post_ra>
// kernel: tpu_custom_call.1
= control target key start
LH: loop header
LB: loop body
LE: loop exit
PB: predicated region body
PF: predicated region fallthrough
CT: control target
= control target key end

     0   :  { %s8340_s0 = inlined_call_operand.hbm [shape: f32[2,4,16,16], index: 0, kind: input, shape index: {}]   ;;  %s8341_s1 = inlined_call_operand.hbm [shape: f32[288], index: 1, kind: input, shape index: {}]   ;;  %s8342_s2 = inlined_call_operand.vmem [shape: f32[72], index: 2, kind: input, shape index: {}]   ;;  %s8343_s3 = inlined_call_operand.hbm [shape: f32[2,8,16,16], index: 3, kind: output, shape index: {0}]   ;;  %s8344_s4 = inlined_call_operand.hbm [shape: f32[2,8,16,16], index: 4, kind: output, shape index: {1}]   ;;  %s8345_s5 = inlined_call_operand.hbm [shape: f32[2,8,16,16], index: 5, kind: output, shape index: {2}]   ;;  %s8346_s6 = inlined_call_operand.hbm [shape: f32[2,8,16,16], index: 6, kind: output, shape index: {3}]   ;;  %s8347_s7 = inlined_call_operand.hbm [shape: f32[2,8,16,16], index: 7, kind: output, shape index: {4}]   ;;  %s8348_s8 = inlined_call_operand.hbm [shape: f32[2,8,16,16], index: 8, kind: output, shape index: {5}]   ;;  %s8349_s9 = inlined_call_operand.hbm [shape: f32[2,8,16,16], index: 9, kind: output, shape index: {6}]   ;;  %s8350_s10 = inlined_call_operand.hbm [shape: f32[2,8,16,16], index: 10, kind: output, shape index: {7}]   ;;  %s8351_s11 = inlined_call_operand.hbm [shape: f32[2,8,16,16], index: 11, kind: output, shape index: {8}]  }
   0x1   :  { %8610 = sst [smem:[#allocation171_spill]] %s8340_s0 }
   0x2   :  { %8611 = sst [smem:[#allocation172_spill]] %s8341_s1 }
   0x3   :  { %8612 = sst [smem:[#allocation173_spill]] %s8342_s2 }
   0x4   :  { %8613 = sst [smem:[#allocation174_spill]] %s8343_s3 }
   0x5   :  { %8614 = sst [smem:[#allocation175_spill]] %s8344_s4 }
   0x6   :  { %8615 = sst [smem:[#allocation176_spill]] %s8345_s5 }
   0x7   :  { %8616 = sst [smem:[#allocation177_spill]] %s8346_s6 }
   0x8   :  { %8617 = sst [smem:[#allocation178_spill]] %s8347_s7 }
   0x9   :  { %8618 = sst [smem:[#allocation179_spill]] %s8348_s8 }
   0xa   :  { %8619 = sst [smem:[#allocation180_spill]] %s8349_s9 }
   0xb   :  { %8620 = sst [smem:[#allocation181_spill]] %s8350_s10 }
   0xc   :  { %8621 = sst [smem:[#allocation182_spill]] %s8351_s11 }
   0xd   :  { %17 = vsyncpa [#allocation3], 0 }
   0xe   :  { %19 = vsyncpa [#allocation3 + $0x1], 0 }
   0xf   :  { %20 = vsyncpa [#allocation5], 0 }
  0x10   :  { %21 = vsyncpa [#allocation6], 0 }
  0x11   :  { %22 = vsyncpa [#allocation4], 0 }
  0x12   :  { %24 = vsyncpa [#allocation4 + $0x1], 0 }
  0x13   :  { %25 = vsyncpa [#allocation11], 0 }
  0x14   :  { %27 = vsyncpa [#allocation11 + $0x1], 0 }
  0x15   :  { %28 = vsyncpa [#allocation14], 0 }
  0x16   :  { %30 = vsyncpa [#allocation14 + $0x1], 0 }
  0x17   :  { %31 = vsyncpa [#allocation17], 0 }
  0x18   :  { %33 = vsyncpa [#allocation17 + $0x1], 0 }
  0x19   :  { %34 = vsyncpa [#allocation20], 0 }
  0x1a   :  { %36 = vsyncpa [#allocation20 + $0x1], 0  ;;  %s4937_s17 = smov 0   ;;  %s4939_s18 = smov 0  }
  0x1b   :  { %s4941_s19 = smov 0   ;;  %s4943_s20 = smov 0  }
  0x1c   :  { %s4945_s21 = smov 0   ;;  %s4947_s22 = smov 0  }
  0x1d LB: > { %8622 = sst [smem:[#allocation30_spill]] %s4830_s17  ;;  %s4968_s23 = sadd.s32 4294967295, %s4850_s22   ;;  %s4850_s22 = sphi %s4947_s22, %s42_s22   ;;  %s4846_s21 = sphi %s4945_s21, %s9299_s21   ;;  %s4842_s20 = sphi %s4943_s20, %s9298_s20   ;;  %s4838_s19 = sphi %s4941_s19, %s9297_s19   ;;  %s4834_s18 = sphi %s4939_s18, %s9296_s18   ;;  %s4830_s17 = sphi %s4937_s17, %s9295_s17  }
  0x1e   : > { %8623 = sst [smem:[#allocation31_spill]] %s4834_s18  ;;  %s8352_s24 = sadd.s32 4294967294, %s4850_s22  }
  0x1f   : > { %8624 = sst [smem:[#allocation32_spill]] %s4838_s19  ;;  %p70_p0 = scmp.ne.s32.totalorder %s4838_s19, %s4834_s18 }
  0x20   : > { %8625 = sst [smem:[#allocation33_spill]] %s4842_s20  ;;  %p71_p1 = scmp.eq.s32.totalorder %s4850_s22, 0 }
  0x21   : > { %8626 = sst [smem:[#allocation34_spill]] %s4846_s21  ;;  %p76_p2 = scmp.ne.s32.totalorder %s4834_s18, %s4830_s17 }
  0x22   : > { %8627 = sst [smem:[#allocation35_spill]] %s4850_s22  ;;  %p8359_p3 = scmp.eq.s32.totalorder %s4968_s23, 0 }
  0x23   : > { %8628 = sst [smem:[#allocation36_spill]] %s4968_s23  ;;  %p144_p4 = scmp.eq.s32.totalorder %s4968_s23, 1 }
  0x24   : > { %p72_p5 = por %p71_p1, %p70_p0  ;;  %p150_p6 = scmp.eq.s32.totalorder %s8352_s24, 1 }
  0x25   : > { %p4983_p7 = por %p8359_p3, %p76_p2  ;;  %p4987_p8 = por %p144_p4, %p70_p0 }
  0x26   : > { %p4991_p9 = por %p150_p6, %p76_p2  ;;  %p3777_p10 = scmp.ge.s32.totalorder %s4850_s22, 1 }
  0x27   : > { %s8629_s26 = scalar_select %p4983_p7, 1, 0 }
  0x28   : > { %s8630_s27 = scalar_select %p4987_p8, 1, 0 }
  0x29   : > { %s8632_s28 = scalar_select %p4991_p9, 1, 0 }
  0x2a   : > { %8631 = sst [smem:[#allocation37_spill]] %s8630_s27  ;;  %p381_p11 = scmp.lt.s32.totalorder %s4850_s22, 3 }
  0x2b   : > { %8633 = sst [smem:[#allocation38_spill]] %s8632_s28  ;;  %p4395_p1 = scmp.lt.s32.totalorder %s4850_s22, 2 }
  0x2c   : > { %p4998_p13 = pnand %p3777_p10, %p381_p11  ;;  %s8635_s2 = sld [smem:[#allocation173_spill]] }
  0x2d   : > { %p5008_p4 = pnand %p4395_p1, %p72_p5  ;;  %s54_s24 = sadd.s32 1, %s4846_s21 }
  0x2e   : > { %s8634_s29 = scalar_select %p4998_p13, 1, 0 }
  0x2f   : > { %p4354_p0 = pneg %p4998_p13  ;;  %s8638_s1 = sld [smem:[#allocation172_spill]] }
  0x31   : > { %p5014_p2 = pnand %p4354_p0, %p8359_p3 }
  0x32   : > { %s403_s13 = sshll.u32 %s8635_s2, 4  ;;  %s404_s13 = int_to_ptr.vmem [resolvable:$true] %s403_s13 }
  0x33   : > { %p4464_p6 = pneg %p5014_p2 }
  0x35   : > { %s4462_s30 = scalar_lea.hbm %s8638_s1, 48  ;;  %s4467_s11 = scalar_lea.hbm %s8638_s1, 64 }
  0x36   : > { %p4463_p5 = scmp.ne.s32.totalorder %s8638_s1, %s4462_s30  ;;  %p4468_p1 = scmp.lt.u32.totalorder %s4467_s11, %s4462_s30 }
  0x37   : > { %p4469_p0 = scmp.lt.u32.totalorder %s4462_s30, %s8638_s1 }
  0x38   : > { %p4465_p10 = pnand %p4464_p6, %p4463_p5 }
  0x39   : > { %p4470_p12 = por %p4469_p0, %p4468_p1 }
  0x3a   : > { %p4466_p11 = pneg %p4465_p10 }
  0x3c   : > { %p4471_p3 = pnand %p4470_p12, %p4466_p11 }
  0x3e   : > { %4474 = shalt.err (!%p4471_p3)
}
  0x3f   : > { %s4852_s2 = smov [#allocation7]   ;;  %s4475_s12 = scalar_lea.vmem %s404_s13, 16 }
  0x40   : > { %4357 = dma.hbm_to_smem (!%p5014_p2), %s8638_s1, 48, %s4852_s2, [#allocation5]  }
  0x41   : > { %p4476_p5 = scmp.ne.s32.totalorder %s404_s13, %s4475_s12  ;;  %p4483_p8 = scmp.lt.s32.totalorder %s404_s13, %s404_s13 }
  0x42   : > { %p4484_p7 = scmp.lt.s32.totalorder %s4475_s12, %s4475_s12 }
  0x43   : > { %p4478_p10 = pnand %p4476_p5, %p4464_p6 }
  0x44   : > { %p4485_p13 = por %p4484_p7, %p4483_p8 }
  0x45   : > { %p4479_p9 = pneg %p4478_p10 }
  0x47   : > { %p4486_p1 = pnand %p4485_p13, %p4479_p9 }
  0x49   : > { %4489 = shalt.err (!%p4486_p1)
}
  0x4a   : > { %s4853_s10 = smov [#allocation8]   ;;  %p56_p3 = scmp.ge.s32.totalorder %s54_s24, 2 }
  0x4b   : > { %4360 = dma.vmem_to_smem (!%p5014_p2), %s404_s13, 16, %s4853_s10, [#allocation6]  }
  0x4c   : > { %s8639_s11 = sand.u32 1, %s4838_s19   ;;  %s4316_s28 = sshll.u32 %s4846_s21, 10 }
  0x4d   : > { %s3781_s17 = sshll.u32 %s8639_s11, 6  ;;  %s9301_s24 = smov (%p56_p3, %s54_s24), 0 }
  0x4e   : > { %8640 = sst [smem:[#allocation39_spill]] %s9301_s24  ;;  %s8641_s0 = sld [smem:[#allocation171_spill]] }
  0x4f   : > { %s58_s2 = ssub.s32 %s4846_s21, %s9301_s24  ;;  %s418_s22 = scalar_lea.vmem [#allocation2], %s3781_s17 }
  0x50   : > { %s427_s13 = sshll.u32 %s418_s22, 4  ;;  %p61_p7 = scmp.eq.s32.totalorder %s58_s2, 0  ;;  %s5059_s13 = int_to_ptr.vmem [resolvable:$true] %s427_s13 }
  0x51   : > { %s8642_s25 = sadd.s32 1, %s4838_s19  ;;  %s8644_s10 = smov %s8639_s11 }
  0x52   : > { %s5064_s12 = scalar_select %p61_p7, %s4838_s19, %s8642_s25  }
  0x53   : > { %s5068_s11 = scalar_lea.sflag [#allocation3], %s8644_s10  ;;  %p4492_p9 = pneg %p5008_p4 }
  0x54   : > { %s5055_s15 = scalar_lea.hbm %s8641_s0, %s4316_s28  ;;  %8643 = sst [smem:[#allocation40_spill]] %s5064_s12 }
  0x55   : > { %s4490_s16 = scalar_lea.hbm %s5055_s15, 1024  ;;  %s4495_s30 = scalar_lea.hbm %s8641_s0, 2048 }
  0x56   : > { %p4491_p8 = scmp.ne.s32.totalorder %s5055_s15, %s4490_s16  ;;  %p4496_p2 = scmp.lt.u32.totalorder %s5055_s15, %s8641_s0 }
  0x57   : > { %p4497_p6 = scmp.lt.u32.totalorder %s4495_s30, %s4490_s16  ;;  %p4499_p0 = scmp.lt.u32.totalorder %s4490_s16, %s5055_s15 }
  0x58   : > { %p4493_p12 = pnand %p4492_p9, %p4491_p8 }
  0x59   : > { %p4498_p11 = por %p4497_p6, %p4496_p2 }
  0x5a   : > { %p4494_p13 = pneg %p4493_p12 }
  0x5b   : > { %p4500_p5 = por %p4499_p0, %p4498_p11 }
  0x5d   : > { %p4501_p10 = pnand %p4500_p5, %p4494_p13 }
  0x5f   : > { %4504 = shalt.err (!%p4501_p10)
}
  0x60   : > { %s4505_s25 = scalar_lea.vmem %s5059_s13, 1024  ;;  %s4854_s10 = smov [#allocation2]  }
  0x61   : > { %p4506_p1 = scmp.ne.s32.totalorder %s5059_s13, %s4505_s25  ;;  %s4510_s28 = sshll.u32 %s4854_s10, 4  ;;  %s4511_s28 = int_to_ptr.vmem [resolvable:$false] %s4510_s28 }
  0x62   : > { %s4512_s17 = scalar_lea.vmem %s4511_s28, 2048  ;;  %p4513_p8 = scmp.lt.s32.totalorder %s5059_s13, %s4511_s28 }
  0x63   : > { %p4508_p3 = pnand %p4506_p1, %p4492_p9  ;;  %p4514_p12 = scmp.lt.s32.totalorder %s4512_s17, %s4505_s25 }
  0x65   : > { %p4509_p7 = pneg %p4508_p3  ;;  %p4515_p2 = por %p4514_p12, %p4513_p8 }
  0x67   : > { %p4516_p6 = pnand %p4515_p2, %p4509_p7 }
  0x69   : > { %4519 = shalt.err (!%p4516_p6)
}
  0x6a   : > { %s4855_s16 = smov 128   ;;  %s4856_s30 = smov 8  }
  0x6b   : > { %4364 = dma.hbm_to_vmem [thread:$0]  (!%p5008_p4), %s5055_s15, 1024, %s5059_s13, %s5068_s11, %s4855_s16, %s4855_s16, %s4856_s30  }
  0x6c   : > { %p8645_p9 = scmp.ne.s32.totalorder %s8634_s29, 0 }
  0x6e   : > { %439 = sbr.rel (%p8645_p9) target bundleno = 888 (0x378), region = 32 }
  0x75   : > { %s5099_s2 = sand.u32 1, %s4834_s18   ;;  %p8647_p13 = scmp.ne.s32.totalorder %s8629_s26, 0 }
  0x76   : > { %8646 = sst [smem:[#allocation41_spill]] %s5099_s2  ;;  %s3785_s22 = sshll.u32 %s5099_s2, 6 }
  0x77   : > { %s442_s25 = scalar_lea.sflag [#allocation3], %s5099_s2  ;;  %s445_s10 = scalar_lea.vmem [#allocation2], %s3785_s22 }
  0x78   : > { %4797 = dma.done.wait (%p8647_p13), %s442_s25, 1024  }
  0x79   : > { %4799 = vsyncadd (%p8647_p13), %s442_s25, 4294966272  ;;  %p8648_p11 = scmp.eq.s32.totalorder %s4968_s23, 0 }
  0x7b   : > { %4801 = dma.done.wait (%p8648_p11), [#allocation5], 48   ;;  %p8649_p4 = pmov %p8648_p11 }
  0x7d   : > { %4803 = vsyncadd (%p8649_p4), [#allocation5], 4294967248  ;;  %p8650_p0 = pmov %p8649_p4 }
  0x7f   : > { %4805 = dma.done.wait (%p8650_p0), [#allocation6], 16   ;;  %p8651_p5 = pmov %p8650_p0 }
  0x81   : > { %4807 = vsyncadd (%p8651_p5), [#allocation6], 4294967280 }
  0x82   : > { %458 = sfence }
  0x83   : > { %v3797_v0 = vld [vmem:[%s445_s10 + $0x10] sm:$0xff]  ;;  %v543_v1 = vld [vmem:[%s445_s10] sm:$0xff]  ;;  %s4857_s29 = smov 4   ;;  %v3798_v2 = vld [vmem:[%s445_s10 + $0x18] sm:$0xff]  ;;  %s5115_s26 = sld [smem:[#allocation7 + $0x20]]  ;;  %vm562_vm0 = vcmask 31744  }
  0x84   : > { %570 = vrot.lane.b32.xlu1 %v3797_v0, %s4857_s29  ;;  %556 = vrot.lane.b32.xlu0 %v543_v1, %s4857_s29  ;;  %v544_v3 = vld [vmem:[%s445_s10 + $0x8] sm:$0xff]  ;;  %v3799_v5 = vld [vmem:[%s445_s10 + $0x20] sm:$0xff]  ;;  %s5117_s14 = sld [smem:[#allocation7 + $0x21]]  ;;  %s5119_s15 = sld [smem:[#allocation7 + $0x22]]  ;;  %vm565_vm1 = vcmask 162816   ;;  %vm630_vm2 = vcmask 130048  }
  0x85   : > { %v3800_v4 = vld [vmem:[%s445_s10 + $0x28] sm:$0xff]  ;;  %v3802_v6 = vld [vmem:[%s445_s10 + $0x38] sm:$0xff]  ;;  %v3801_v7 = vld [vmem:[%s445_s10 + $0x30] sm:$0xff]  ;;  %s5121_s13 = sld [smem:[#allocation7 + $0x23]]  ;;  %s5123_s11 = sld [smem:[#allocation8 + $0x8]] }
  0x86   : > { %s5125_s28 = sld [smem:[#allocation7 + $0x24]]  ;;  %s5127_s17 = sld [smem:[#allocation7 + $0x25]] }
  0x87   : > { %s5129_s16 = sld [smem:[#allocation7 + $0x26]]  ;;  %s5131_s30 = sld [smem:[#allocation7 + $0x27]] }
  0x88   : > { %572 = vrot.lane.b32.xlu1 %v3798_v2, %s4857_s29  ;;  %558 = vrot.lane.b32.xlu0 %v544_v3, %s4857_s29  ;;  %s5133_s22 = sld [smem:[#allocation8 + $0x9]]  ;;  %s5135_s25 = sld [smem:[#allocation7 + $0x28]] }
  0x89   : > { %8652 = sst [smem:[#allocation42_spill]] %s5115_s26  ;;  %s5137_s10 = sld [smem:[#allocation7 + $0x29]]  ;;  %v837_v8 = vstv %s5115_s26 }
  0x8a   : > { %8653 = sst [smem:[#allocation43_spill]] %s5117_s14  ;;  %s5141_s0 = sld [smem:[#allocation7 + $0x2b]]  ;;  %v841_v9 = vstv %s5117_s14  ;;  %v847_v10 = vstv %s5119_s15 }
  0x8b   : > { %8654 = sst [smem:[#allocation44_spill]] %s5119_s15  ;;  %s5143_s1 = sld [smem:[#allocation8 + $0xa]]  ;;  %v853_v11 = vstv %s5121_s13  ;;  %v859_v12 = vstv %s5123_s11 }
  0x8c   : > { %584 = vrot.lane.b32.xlu1 %v3800_v4, %s4857_s29  ;;  %582 = vrot.lane.b32.xlu0 %v3799_v5, %s4857_s29  ;;  %8655 = sst [smem:[#allocation45_spill]] %s5121_s13  ;;  %s5145_s24 = sld [smem:[#allocation7 + $0x2c]]  ;;  %v873_v13 = vstv %s5125_s28  ;;  %v877_v14 = vstv %s5127_s17 }
  0x8d   : > { %8656 = sst [smem:[#allocation46_spill]] %s5123_s11  ;;  %s5147_s21 = sld [smem:[#allocation7 + $0x2d]]  ;;  %v883_v15 = vstv %s5129_s16  ;;  %v889_v16 = vstv %s5131_s30 }
  0x8e   : > { %8657 = sst [smem:[#allocation47_spill]] %s5125_s28  ;;  %s5149_s12 = sld [smem:[#allocation7 + $0x2e]]  ;;  %v895_v17 = vstv %s5133_s22  ;;  %v910_v18 = vstv %s5135_s25 }
  0x8f   : > { %8658 = sst [smem:[#allocation48_spill]] %s5127_s17  ;;  %s5151_s19 = sld [smem:[#allocation7 + $0x2f]]  ;;  %v914_v19 = vstv %s5137_s10 }
  0x90   : > { %596 = vrot.lane.b32.xlu1 %v3802_v6, %s4857_s29  ;;  %594 = vrot.lane.b32.xlu0 %v3801_v7, %s4857_s29  ;;  %8659 = sst [smem:[#allocation49_spill]] %s5129_s16  ;;  %s5139_s29 = sld [smem:[#allocation7 + $0x2a]]  ;;  %v926_v21 = vstv %s5141_s0 }
  0x91   : > { %8660 = sst [smem:[#allocation50_spill]] %s5131_s30  ;;  %s5153_s18 = sld [smem:[#allocation8 + $0xb]]  ;;  %v932_v22 = vstv %s5143_s1 }
  0x92   : > { %8661 = sst [smem:[#allocation51_spill]] %s5133_s22  ;;  %s5155_s3 = sld [smem:[#allocation7 + $0x30]]  ;;  %v947_v23 = vstv %s5145_s24 }
  0x93   : > { %8662 = sst [smem:[#allocation52_spill]] %s5135_s25  ;;  %s5157_s9 = sld [smem:[#allocation7 + $0x31]]  ;;  %v951_v24 = vstv %s5147_s21 }
  0x94   : > { %8663 = sst [smem:[#allocation53_spill]] %s5137_s10  ;;  %s5159_s7 = sld [smem:[#allocation7 + $0x32]]  ;;  %v957_v25 = vstv %s5149_s12 }
  0x95   : > { %8665 = sst [smem:[#allocation55_spill]] %s5141_s0  ;;  %s5161_s5 = sld [smem:[#allocation7 + $0x33]]  ;;  %v963_v26 = vstv %s5151_s19 }
  0x96   : > { %8664 = sst [smem:[#allocation54_spill]] %s5139_s29  ;;  %s5163_s8 = sld [smem:[#allocation8 + $0xc]]  ;;  %v920_v20 = vstv %s5139_s29 }
  0x97   : > { %8666 = sst [smem:[#allocation56_spill]] %s5143_s1  ;;  %s5165_s6 = sld [smem:[#allocation7 + $0x34]]  ;;  %v969_v27 = vstv %s5153_s18 }
  0x98   : > { %8667 = sst [smem:[#allocation57_spill]] %s5145_s24  ;;  %s5167_s27 = sld [smem:[#allocation7 + $0x35]] }
  0x99   : > { %8668 = sst [smem:[#allocation58_spill]] %s5147_s21  ;;  %s5169_s4 = sld [smem:[#allocation7 + $0x36]] }
  0x9a   : > { %8669 = sst [smem:[#allocation59_spill]] %s5149_s12  ;;  %s5171_s20 = sld [smem:[#allocation7 + $0x37]] }
  0x9b   : > { %8670 = sst [smem:[#allocation60_spill]] %s5151_s19  ;;  %s5173_s23 = sld [smem:[#allocation7 + $0x38]] }
  0x9c   : > { %8671 = sst [smem:[#allocation61_spill]] %s5153_s18  ;;  %s5175_s2 = sld [smem:[#allocation7 + $0x39]] }
  0x9d   : > { %8672 = sst [smem:[#allocation62_spill]] %s5155_s3  ;;  %s5177_s3 = sld [smem:[#allocation7 + $0x3a]] }
  0x9e   : > { %8673 = sst [smem:[#allocation63_spill]] %s5157_s9  ;;  %s5179_s9 = sld [smem:[#allocation7 + $0x3b]] }
  0x9f   : > { %8674 = sst [smem:[#allocation64_spill]] %s5159_s7  ;;  %s5181_s7 = sld [smem:[#allocation8 + $0xd]] }
  0xa0   : > { %8675 = sst [smem:[#allocation65_spill]] %s5161_s5  ;;  %s5183_s5 = sld [smem:[#allocation7 + $0x3c]] }
  0xa1   : > { %8676 = sst [smem:[#allocation66_spill]] %s5163_s8  ;;  %s5185_s8 = sld [smem:[#allocation7 + $0x3d]] }
  0xa2   : > { %8677 = sst [smem:[#allocation67_spill]] %s5165_s6  ;;  %s5187_s6 = sld [smem:[#allocation7 + $0x3e]] }
  0xa3   : > { %8678 = sst [smem:[#allocation68_spill]] %s5167_s27  ;;  %s5189_s27 = sld [smem:[#allocation7 + $0x40]] }
  0xa4   : > { %8679 = sst [smem:[#allocation69_spill]] %s5169_s4  ;;  %s5191_s4 = sld [smem:[#allocation7 + $0x41]] }
  0xa5   : > { %8680 = sst [smem:[#allocation70_spill]] %s5171_s20  ;;  %s5193_s20 = sld [smem:[#allocation8 + $0xe]] }
  0xa6   : > { %8681 = sst [smem:[#allocation71_spill]] %s5173_s23  ;;  %s5195_s23 = sld [smem:[#allocation7 + $0x44]] }
  0xa7   : > { %8682 = sst [smem:[#allocation72_spill]] %s5175_s2  ;;  %s5197_s2 = sld [smem:[#allocation7 + $0x3f]] }
  0xa8   : > { %8683 = sst [smem:[#allocation73_spill]] %s5177_s3  ;;  %s5199_s3 = sld [smem:[#allocation7 + $0x45]] }
  0xa9   : > { %8684 = sst [smem:[#allocation74_spill]] %s5179_s9  ;;  %s5201_s9 = sld [smem:[#allocation7 + $0x42]] }
  0xaa   : > { %8685 = sst [smem:[#allocation75_spill]] %s5181_s7  ;;  %s5203_s7 = sld [smem:[#allocation7 + $0x48]] }
  0xab   : > { %8686 = sst [smem:[#allocation76_spill]] %s5183_s5  ;;  %s5205_s5 = sld [smem:[#allocation8 + $0xf]] }
  0xac   : > { %8687 = sst [smem:[#allocation77_spill]] %s5185_s8  ;;  %s5207_s8 = sld [smem:[#allocation7 + $0x49]] }
  0xad   : > { %8688 = sst [smem:[#allocation78_spill]] %s5187_s6  ;;  %s5209_s6 = sld [smem:[#allocation7 + $0x43]] }
  0xae   : > { %8689 = sst [smem:[#allocation79_spill]] %s5189_s27  ;;  %s5211_s27 = sld [smem:[#allocation7 + $0x46]] }
  0xaf   : > { %8690 = sst [smem:[#allocation80_spill]] %s5191_s4  ;;  %s5213_s4 = sld [smem:[#allocation7 + $0x4c]] }
  0xb0   : > { %8691 = sst [smem:[#allocation81_spill]] %s5193_s20  ;;  %s5215_s20 = sld [smem:[#allocation7 + $0x4d]] }
  0xb1   : > { %8692 = sst [smem:[#allocation82_spill]] %s5195_s23  ;;  %s5217_s23 = sld [smem:[#allocation8 + $0x10]] }
  0xb2   : > { %8693 = sst [smem:[#allocation83_spill]] %s5197_s2  ;;  %s5219_s2 = sld [smem:[#allocation7 + $0x47]] }
  0xb3   : > { %8694 = sst [smem:[#allocation84_spill]] %s5199_s3  ;;  %s5221_s3 = sld [smem:[#allocation7 + $0x4a]] }
  0xb4   : > { %8695 = sst [smem:[#allocation85_spill]] %s5201_s9  ;;  %s5223_s9 = sld [smem:[#allocation7 + $0x50]] }
  0xb5   : > { %8696 = sst [smem:[#allocation86_spill]] %s5203_s7  ;;  %s5225_s7 = sld [smem:[#allocation8 + $0x11]] }
  0xb6   : > { %8697 = sst [smem:[#allocation87_spill]] %s5205_s5  ;;  %s5302_s26 = sld [smem:[#allocation7 + $0x6c]] }
  0xb7   : > { %8698 = sst [smem:[#allocation88_spill]] %s5207_s8  ;;  %s5227_s5 = sld [smem:[#allocation7 + $0x51]] }
  0xb8   : > { %8699 = sst [smem:[#allocation89_spill]] %s5209_s6  ;;  %s5231_s6 = sld [smem:[#allocation7 + $0x4e]] }
  0xb9   : > { %8700 = sst [smem:[#allocation90_spill]] %s5211_s27  ;;  %s5229_s8 = sld [smem:[#allocation7 + $0x4b]] }
  0xba   : > { %8701 = sst [smem:[#allocation91_spill]] %s5213_s4  ;;  %s5233_s27 = sld [smem:[#allocation7 + $0x54]] }
  0xbb   : > { %8702 = sst [smem:[#allocation92_spill]] %s5215_s20  ;;  %s5235_s4 = sld [smem:[#allocation7 + $0x55]] }
  0xbc   : > { %8703 = sst [smem:[#allocation93_spill]] %s5217_s23  ;;  %s5237_s20 = sld [smem:[#allocation8 + $0x12]] }
  0xbd   : > { %8704 = sst [smem:[#allocation94_spill]] %s5219_s2  ;;  %s5239_s23 = sld [smem:[#allocation7 + $0x4f]] }
  0xbe   : > { %8705 = sst [smem:[#allocation95_spill]] %s5221_s3  ;;  %s5241_s2 = sld [smem:[#allocation7 + $0x52]] }
  0xbf   : > { %8706 = sst [smem:[#allocation96_spill]] %s5223_s9  ;;  %s5243_s3 = sld [smem:[#allocation7 + $0x58]] }
  0xc0   : > { %8707 = sst [smem:[#allocation97_spill]] %s5225_s7  ;;  %s5247_s7 = sld [smem:[#allocation7 + $0x59]] }
  0xc1   : > { %8708 = sst [smem:[#allocation98_spill]] %s5227_s5  ;;  %s5245_s9 = sld [smem:[#allocation8 + $0x13]] }
  0xc2   : > { %8709 = sst [smem:[#allocation99_spill]] %s5229_s8  ;;  %s5249_s5 = sld [smem:[#allocation7 + $0x53]] }
  0xc3   : > { %8710 = sst [smem:[#allocation100_spill]] %s5231_s6  ;;  %s5253_s6 = sld [smem:[#allocation7 + $0x5c]] }
  0xc4   : > { %8711 = sst [smem:[#allocation101_spill]] %s5233_s27  ;;  %s5251_s8 = sld [smem:[#allocation7 + $0x56]] }
  0xc5   : > { %8712 = sst [smem:[#allocation102_spill]] %s5235_s4  ;;  %s5255_s4 = sld [smem:[#allocation7 + $0x5d]] }
  0xc6   : > { %8713 = sst [smem:[#allocation103_spill]] %s5237_s20  ;;  %s5257_s20 = sld [smem:[#allocation8 + $0x14]] }
  0xc7   : > { %8714 = sst [smem:[#allocation104_spill]] %s5239_s23  ;;  %s5259_s23 = sld [smem:[#allocation7 + $0x57]] }
  0xc8   : > { %8715 = sst [smem:[#allocation105_spill]] %s5241_s2  ;;  %s5261_s2 = sld [smem:[#allocation7 + $0x5a]] }
  0xc9   : > { %8716 = sst [smem:[#allocation106_spill]] %s5243_s3  ;;  %s5304_s15 = sld [smem:[#allocation7 + $0x6d]] }
  0xca   : > { %8717 = sst [smem:[#allocation107_spill]] %s5245_s9  ;;  %s5263_s9 = sld [smem:[#allocation7 + $0x60]] }
  0xcb   : > { %8718 = sst [smem:[#allocation108_spill]] %s5247_s7  ;;  %s5265_s7 = sld [smem:[#allocation8 + $0x15]] }
  0xcc   : > { %8719 = sst [smem:[#allocation109_spill]] %s5249_s5  ;;  %s5271_s5 = sld [smem:[#allocation7 + $0x5e]] }
  0xcd   : > { %8720 = sst [smem:[#allocation110_spill]] %s5251_s8  ;;  %s5267_s8 = sld [smem:[#allocation7 + $0x61]] }
  0xce   : > { %8721 = sst [smem:[#allocation111_spill]] %s5253_s6  ;;  %s5269_s6 = sld [smem:[#allocation7 + $0x5b]] }
  0xcf   : > { %8722 = sst [smem:[#allocation112_spill]] %s5255_s4  ;;  %s5273_s4 = sld [smem:[#allocation7 + $0x64]] }
  0xd0   : > { %8723 = sst [smem:[#allocation113_spill]] %s5257_s20  ;;  %s5283_s20 = sld [smem:[#allocation7 + $0x68]] }
  0xd1   : > { %8724 = sst [smem:[#allocation114_spill]] %s5259_s23  ;;  %s5275_s23 = sld [smem:[#allocation7 + $0x65]] }
  0xd2   : > { %8725 = sst [smem:[#allocation115_spill]] %s5261_s2  ;;  %s5277_s2 = sld [smem:[#allocation8 + $0x16]] }
  0xd3   : > { %8726 = sst [smem:[#allocation116_spill]] %s5263_s9  ;;  %s5279_s9 = sld [smem:[#allocation7 + $0x5f]] }
  0xd4   : > { %8727 = sst [smem:[#allocation117_spill]] %s5265_s7  ;;  %s5281_s7 = sld [smem:[#allocation7 + $0x62]] }
  0xd5   : > { %8728 = sst [smem:[#allocation118_spill]] %s5267_s8  ;;  %s8744_s11 = sld [smem:[#allocation63_spill]] }
  0xd6   : > { %8729 = sst [smem:[#allocation119_spill]] %s5269_s6  ;;  %s8743_s13 = sld [smem:[#allocation62_spill]] }
  0xd7   : > { %8730 = sst [smem:[#allocation120_spill]] %s5271_s5  ;;  %s5286_s5 = sld [smem:[#allocation8 + $0x17]] }
  0xd8   : > { %8731 = sst [smem:[#allocation121_spill]] %s5273_s4  ;;  %s5288_s4 = sld [smem:[#allocation7 + $0x69]] }
  0xd9   : > { %8732 = sst [smem:[#allocation122_spill]] %s5275_s23  ;;  %s8745_s14 = sld [smem:[#allocation64_spill]] }
  0xda   : > { %8733 = sst [smem:[#allocation123_spill]] %s5277_s2  ;;  %s8747_s28 = sld [smem:[#allocation65_spill]] }
  0xdb   : > { %8734 = sst [smem:[#allocation124_spill]] %s5279_s9  ;;  %s5294_s9 = sld [smem:[#allocation7 + $0x63]]  ;;  %v988_v29 = vstv %s8744_s11 }
  0xdc   : > { %8735 = sst [smem:[#allocation125_spill]] %s5281_s7  ;;  %s5296_s7 = sld [smem:[#allocation7 + $0x66]]  ;;  %v984_v28 = vstv %s8743_s13 }
  0xdd   : > { %8736 = sst [smem:[#allocation126_spill]] %s5283_s20  ;;  %s5312_s17 = sld [smem:[#allocation7 + $0x67]] }
  0xde   : > { %8737 = sst [smem:[#allocation127_spill]] %s5286_s5  ;;  %s8749_s16 = sld [smem:[#allocation66_spill]] }
  0xdf   : > { %8738 = sst [smem:[#allocation128_spill]] %s5288_s4  ;;  %s5310_s4 = sld [smem:[#allocation8 + $0x18]]  ;;  %v994_v30 = vstv %s8745_s14 }
  0xe0   : > { %8741 = sst [smem:[#allocation131_spill]] %s5302_s26  ;;  %s8751_s26 = sld [smem:[#allocation68_spill]]  ;;  %v1000_v31 = vstv %s8747_s28 }
  0xe1   : > { %8739 = sst [smem:[#allocation129_spill]] %s5294_s9  ;;  %s8750_s30 = sld [smem:[#allocation67_spill]] }
  0xe2   : > { %8740 = sst [smem:[#allocation130_spill]] %s5296_s7  ;;  %s8753_s22 = sld [smem:[#allocation69_spill]] }
  0xe3   : > { %8742 = sst [smem:[#allocation132_spill]] %s5304_s15  ;;  %s5318_s15 = sld [smem:[#allocation7 + $0x6a]] }
  0xe4   : > { %8748 = sst [smem:[#allocation134_spill]] %s5312_s17  ;;  %s8756_s29 = sld [smem:[#allocation71_spill]]  ;;  %v1006_v32 = vstv %s8749_s16 }
  0xe5   : > { %8746 = sst [smem:[#allocation133_spill]] %s5310_s4  ;;  %s5320_s25 = sld [smem:[#allocation7 + $0x70]] }
  0xe6   : > { %s8755_s10 = sld [smem:[#allocation70_spill]]  ;;  %s8757_s4 = sld [smem:[#allocation72_spill]]  ;;  %v1025_v34 = vstv %s8751_s26 }
  0xe7   : > { %s5326_s17 = sld [smem:[#allocation8 + $0x19]]  ;;  %s8759_s0 = sld [smem:[#allocation73_spill]]  ;;  %v1021_v33 = vstv %s8750_s30 }
  0xe8   : > { %s5328_s1 = sld [smem:[#allocation7 + $0x71]]  ;;  %s8761_s24 = sld [smem:[#allocation74_spill]]  ;;  %v1031_v35 = vstv %s8753_s22 }
  0xe9   : > { %8752 = sst [smem:[#allocation135_spill]] %s5318_s15  ;;  %s8762_s21 = sld [smem:[#allocation75_spill]] }
  0xea   : > { %s8763_s15 = sld [smem:[#allocation76_spill]]  ;;  %s8765_s12 = sld [smem:[#allocation77_spill]]  ;;  %v1058_v37 = vstv %s8756_s29 }
  0xeb   : > { %8754 = sst [smem:[#allocation136_spill]] %s5320_s25  ;;  %s5334_s25 = sld [smem:[#allocation7 + $0x6b]] }
  0xec   : > { %s5336_s19 = sld [smem:[#allocation7 + $0x6e]]  ;;  %s8767_s18 = sld [smem:[#allocation78_spill]]  ;;  %v1037_v36 = vstv %s8755_s10  ;;  %v1062_v38 = vstv %s8757_s4 }
  0xed   : > { %8758 = sst [smem:[#allocation137_spill]] %s5326_s17  ;;  %s8769_s17 = sld [smem:[#allocation79_spill]]  ;;  %v1068_v39 = vstv %s8759_s0 }
  0xee   : > { %8760 = sst [smem:[#allocation138_spill]] %s5328_s1  ;;  %s8768_s13 = sld [smem:[#allocation81_spill]]  ;;  %v1074_v40 = vstv %s8761_s24 }
  0xef   : > { %s5342_s1 = sld [smem:[#allocation7 + $0x74]]  ;;  %s8771_s11 = sld [smem:[#allocation80_spill]]  ;;  %v1043_v41 = vstv %s8762_s21 }
  0xf0   : > { %s5344_s14 = sld [smem:[#allocation7 + $0x75]]  ;;  %s5352_s26 = sld [smem:[#allocation7 + $0x6f]]  ;;  %v1095_v42 = vstv %s8763_s15  ;;  %v1099_v43 = vstv %s8765_s12 }
  0xf1   : > { %8764 = sst [smem:[#allocation139_spill]] %s5334_s25  ;;  %s8775_s25 = sld [smem:[#allocation85_spill]] }
  0xf2   : > { %8766 = sst [smem:[#allocation140_spill]] %s5336_s19  ;;  %s8774_s16 = sld [smem:[#allocation83_spill]]  ;;  %v1105_v44 = vstv %s8767_s18 }
  0xf3   : > { %s5350_s19 = sld [smem:[#allocation8 + $0x1a]]  ;;  %s5360_s4 = sld [smem:[#allocation7 + $0x78]]  ;;  %v1132_v46 = vstv %s8769_s17 }
  0xf4   : > { %v1080_v45 = vstv %s8768_s13  ;;  %s5368_s15 = sld [smem:[#allocation7 + $0x79]]  ;;  %s5376_s17 = sld [smem:[#allocation7 + $0x76]] }
  0xf5   : > { %8770 = sst [smem:[#allocation141_spill]] %s5342_s1  ;;  %s8781_s1 = sld [smem:[#allocation89_spill]]  ;;  %v1136_v47 = vstv %s8771_s11 }
  0xf6   : > { %8772 = sst [smem:[#allocation142_spill]] %s5344_s14  ;;  %s5358_s14 = sld [smem:[#allocation7 + $0x72]]  ;;  %v571_v60 = vpop.permute.xlu1 %570  ;;  %v557_v61 = vpop.permute.xlu0 %556 }
  0xf7   : > { %8778 = sst [smem:[#allocation144_spill]] %s5352_s26  ;;  %s5366_s26 = sld [smem:[#allocation8 + $0x1b]]  ;;  %v1142_v50 = vstv %s8775_s25  ;;  %v576_v62 = vsel %vm562_vm0, 0.0, %v571_v60  ;;  %v563_v4 = vsel %vm562_vm0, 0.0, %v557_v61 }
  0xf8   : > { %v1111_v49 = vstv %s8774_s16  ;;  %s5384_s25 = sld [smem:[#allocation7 + $0x7d]]  ;;  %s5422_s27 = sld [smem:[#allocation7 + $0x84]]  ;;  %v5551_v6 = vsel %vm565_vm1, %v576_v62, 0.0  ;;  %v5554_v3 = vsel %vm565_vm1, %v563_v4, 0.0 }
  0xf9   : > { %8776 = sst [smem:[#allocation143_spill]] %s5350_s19  ;;  %s5400_s19 = sld [smem:[#allocation7 + $0x80]]  ;;  %v838_v0 = vmul.f32 %v837_v8, %v5554_v3  ;;  %v842_v60 = vmul.f32 %v841_v9, %v5551_v6  ;;  %v874_v61 = vmul.f32 %v873_v13, %v5554_v3  ;;  %v878_v7 = vmul.f32 %v877_v14, %v5551_v6 }
  0xfa   : > { %8784 = sst [smem:[#allocation146_spill]] %s5360_s4  ;;  %s5374_s4 = sld [smem:[#allocation7 + $0x73]]  ;;  %v573_v62 = vpop.permute.xlu1 %572  ;;  %v559_v4 = vpop.permute.xlu0 %558  ;;  %v911_v1 = vmul.f32 %v910_v18, %v5554_v3  ;;  %v915_v59 = vmul.f32 %v914_v19, %v5551_v6  ;;  %v948_v63 = vmul.f32 %v947_v23, %v5554_v3  ;;  %v952_v5 = vmul.f32 %v951_v24, %v5551_v6 }
  0xfb   : > { %8790 = sst [smem:[#allocation148_spill]] %s5368_s15  ;;  %v1148_v54 = vstv %s8781_s1  ;;  %s5382_s15 = sld [smem:[#allocation7 + $0x7c]]  ;;  %v577_v2 = vsel %vm562_vm0, 0.0, %v573_v62  ;;  %v564_v56 = vsel %vm562_vm0, 0.0, %v559_v4  ;;  %v844_v57 = vadd.f32 %v842_v60, %v838_v0 }
  0xfc   : > { %8782 = sst [smem:[#allocation145_spill]] %s5358_s14  ;;  %s5392_s1 = sld [smem:[#allocation7 + $0x77]]  ;;  %v880_v52 = vadd.f32 %v878_v7, %v874_v61  ;;  %v5585_v58 = vsel %vm565_vm1, %v577_v2, 0.0  ;;  %v5588_v55 = vsel %vm565_vm1, %v564_v56, 0.0  ;;  %v917_v51 = vadd.f32 %v915_v59, %v911_v1 }
  0xfd   : > { %8788 = sst [smem:[#allocation147_spill]] %s5366_s26  ;;  %s5408_s14 = sld [smem:[#allocation7 + $0x81]]  ;;  %v954_v53 = vadd.f32 %v952_v5, %v948_v63  ;;  %v839_v48 = vmul.f32 %v837_v8, %v5588_v55  ;;  %v843_v62 = vmul.f32 %v841_v9, %v5585_v58  ;;  %v875_v4 = vmul.f32 %v873_v13, %v5588_v55 }
  0xfe   : > { %8796 = sst [smem:[#allocation150_spill]] %s5376_s17  ;;  %s5390_s17 = sld [smem:[#allocation8 + $0x1c]]  ;;  %v879_v0 = vmul.f32 %v877_v14, %v5585_v58  ;;  %v585_v2 = vpop.permute.xlu1 %584  ;;  %v583_v56 = vpop.permute.xlu0 %582  ;;  %v912_v59 = vmul.f32 %v910_v18, %v5588_v55  ;;  %v916_v8 = vmul.f32 %v914_v19, %v5585_v58  ;;  %v949_v9 = vmul.f32 %v947_v23, %v5588_v55 }
  0xff   : > { %8801 = sst [smem:[#allocation152_spill]] %s5384_s25  ;;  %s5416_s26 = sld [smem:[#allocation7 + $0x7e]]  ;;  %v953_v13 = vmul.f32 %v951_v24, %v5585_v58  ;;  %v589_v14 = vsel %vm562_vm0, 0.0, %v585_v2  ;;  %v588_v63 = vsel %vm562_vm0, 0.0, %v583_v56  ;;  %v845_v1 = vadd.f32 %v843_v62, %v839_v48 }
 0x100   : > { %8794 = sst [smem:[#allocation149_spill]] %s5374_s4  ;;  %s5398_s25 = sld [smem:[#allocation7 + $0x7a]]  ;;  %v881_v5 = vadd.f32 %v879_v0, %v875_v4  ;;  %v5617_v18 = vsel %vm565_vm1, %v589_v14, 0.0  ;;  %v5620_v19 = vsel %vm565_vm1, %v588_v63, 0.0  ;;  %v918_v23 = vadd.f32 %v916_v8, %v912_v59 }
 0x101   : > { %8800 = sst [smem:[#allocation151_spill]] %s5382_s15  ;;  %s5424_s16 = sld [smem:[#allocation7 + $0x85]]  ;;  %v955_v7 = vadd.f32 %v953_v13, %v949_v9  ;;  %v849_v24 = vmul.f32 %v847_v10, %v5617_v18  ;;  %v848_v60 = vmul.f32 %v847_v10, %v5620_v19  ;;  %v885_v61 = vmul.f32 %v883_v15, %v5617_v18 }
 0x102   : > { %8807 = sst [smem:[#allocation154_spill]] %s5392_s1  ;;  %s5406_s1 = sld [smem:[#allocation8 + $0x1d]]  ;;  %v884_v48 = vmul.f32 %v883_v15, %v5620_v19  ;;  %v597_v62 = vpop.permute.xlu1 %596  ;;  %v595_v4 = vpop.permute.xlu0 %594  ;;  %v922_v0 = vmul.f32 %v920_v20, %v5617_v18  ;;  %v921_v2 = vmul.f32 %v920_v20, %v5620_v19  ;;  %v959_v10 = vmul.f32 %v957_v25, %v5617_v18 }
 0x103   : > { %8812 = sst [smem:[#allocation156_spill]] %s5400_s19  ;;  %s5414_s19 = sld [smem:[#allocation7 + $0x7b]]  ;;  %v958_v56 = vmul.f32 %v957_v25, %v5620_v19  ;;  %v601_v15 = vsel %vm562_vm0, 0.0, %v597_v62  ;;  %v600_v59 = vsel %vm562_vm0, 0.0, %v595_v4  ;;  %v851_v8 = vadd.f32 %v849_v24, %v845_v1 }
 0x104   : > { %8805 = sst [smem:[#allocation153_spill]] %s5390_s17  ;;  %s5430_s10 = sld [smem:[#allocation8 + $0x1e]]  ;;  %v850_v9 = vadd.f32 %v848_v60, %v844_v57  ;;  %v5651_v13 = vsel %vm565_vm1, %v601_v15, 0.0  ;;  %v5654_v20 = vsel %vm565_vm1, %v600_v59, 0.0  ;;  %v887_v14 = vadd.f32 %v885_v61, %v881_v5 }
 0x105   : > { %8817 = sst [smem:[#allocation157_spill]] %s5408_s14  ;;  %s5438_s21 = sld [smem:[#allocation7 + $0x82]]  ;;  %v886_v63 = vadd.f32 %v884_v48, %v880_v52  ;;  %v855_v25 = vmul.f32 %v853_v11, %v5651_v13  ;;  %v854_v62 = vmul.f32 %v853_v11, %v5654_v20  ;;  %v891_v57 = vmul.f32 %v889_v16, %v5651_v13 }
 0x106   : > { %8810 = sst [smem:[#allocation155_spill]] %s5398_s25  ;;  %s5432_s29 = sld [smem:[#allocation7 + $0x7f]]  ;;  %v890_v1 = vmul.f32 %v889_v16, %v5654_v20  ;;  %v924_v24 = vadd.f32 %v922_v0, %v918_v23  ;;  %v928_v52 = vmul.f32 %v926_v21, %v5651_v13  ;;  %v923_v5 = vadd.f32 %v921_v2, %v917_v51 }
 0x107   : > { %8823 = sst [smem:[#allocation158_spill]] %s5422_s27  ;;  %s5446_s24 = sld [smem:[#allocation8 + $0x1f]]  ;;  %v927_v11 = vmul.f32 %v926_v21, %v5654_v20  ;;  %v857_v60 = vadd.f32 %v855_v25, %v851_v8  ;;  %v856_v61 = vadd.f32 %v854_v62, %v850_v9  ;;  %v893_v48 = vadd.f32 %v891_v57, %v887_v14 }
 0x108   : > { %8825 = sst [smem:[#allocation159_spill]] %s5424_s16  ;;  %s5440_s12 = sld [smem:[#allocation7 + $0x88]]  ;;  %v892_v4 = vadd.f32 %v890_v1, %v886_v63  ;;  %v930_v16 = vadd.f32 %v928_v52, %v924_v24  ;;  %v961_v0 = vadd.f32 %v959_v10, %v955_v7  ;;  %v965_v15 = vmul.f32 %v963_v26, %v5651_v13 }
 0x109   : > { %s5448_s25 = sld [smem:[#allocation7 + $0x89]]  ;;  %s5456_s30 = sld [smem:[#allocation7 + $0x86]]  ;;  %v929_v23 = vadd.f32 %v927_v11, %v923_v5  ;;  %v861_v51 = vadd.f32 %v859_v12, %v857_v60  ;;  %v860_v21 = vadd.f32 %v859_v12, %v856_v61  ;;  %v897_v2 = vadd.f32 %v895_v17, %v893_v48 }
 0x10a   : > { %s5464_s2 = sld [smem:[#allocation7 + $0x8d]]  ;;  %s5470_s3 = sld [smem:[#allocation8 + $0x20]]  ;;  %v896_v59 = vadd.f32 %v895_v17, %v892_v4  ;;  %v934_v8 = vadd.f32 %v932_v22, %v930_v16  ;;  %v967_v10 = vadd.f32 %v965_v15, %v961_v0  ;;  %v960_v9 = vadd.f32 %v958_v56, %v954_v53 }
 0x10b   : > { %8828 = sst [smem:[#allocation160_spill]] %s5438_s21  ;;  %s5480_s13 = sld [smem:[#allocation7 + $0x90]]  ;;  %v933_v7 = vadd.f32 %v932_v22, %v929_v23  ;;  %v964_v12 = vmul.f32 %v963_v26, %v5654_v20  ;;  %v986_v17 = vmul.f32 %v984_v28, %v5588_v55  ;;  %v990_v22 = vmul.f32 %v988_v29, %v5585_v58 }
 0x10c   : > { %s5478_s9 = sld [smem:[#allocation7 + $0x8a]]  ;;  %s5486_s8 = sld [smem:[#allocation8 + $0x21]]  ;;  %v971_v56 = vadd.f32 %v969_v27, %v967_v10  ;;  %v996_v14 = vmul.f32 %v994_v30, %v5617_v18  ;;  %v1002_v26 = vmul.f32 %v1000_v31, %v5651_v13  ;;  %v985_v63 = vmul.f32 %v984_v28, %v5554_v3 }
 0x10d   : > { %8833 = sst [smem:[#allocation162_spill]] %s5446_s24  ;;  %s5488_s15 = sld [smem:[#allocation7 + $0x91]]  ;;  %v966_v25 = vadd.f32 %v964_v12, %v960_v9  ;;  %v992_v62 = vadd.f32 %v990_v22, %v986_v17  ;;  %v989_v57 = vmul.f32 %v988_v29, %v5551_v6  ;;  %v995_v1 = vmul.f32 %v994_v30, %v5620_v19 }
 0x10e   : > { %8829 = sst [smem:[#allocation161_spill]] %s5440_s12  ;;  %s5462_s24 = sld [smem:[#allocation7 + $0x8c]]  ;;  %v1001_v24 = vmul.f32 %v1000_v31, %v5654_v20  ;;  %v1023_v52 = vmul.f32 %v1021_v33, %v5588_v55  ;;  %v1027_v28 = vmul.f32 %v1025_v34, %v5585_v58  ;;  %v1033_v5 = vmul.f32 %v1031_v35, %v5617_v18 }
 0x10f   : > { %8835 = sst [smem:[#allocation163_spill]] %s5448_s25  ;;  %s5454_s12 = sld [smem:[#allocation7 + $0x83]]  ;;  %v970_v29 = vadd.f32 %v969_v27, %v966_v25  ;;  %v998_v30 = vadd.f32 %v996_v14, %v992_v62  ;;  %v991_v31 = vadd.f32 %v989_v57, %v985_v63  ;;  %v1039_v61 = vmul.f32 %v1037_v36, %v5651_v13 }
 0x110   : > { %8841 = sst [smem:[#allocation165_spill]] %s5456_s30  ;;  %s5494_s23 = sld [smem:[#allocation7 + $0x8b]]  ;;  %v1029_v60 = vadd.f32 %v1027_v28, %v1023_v52  ;;  %v1022_v48 = vmul.f32 %v1021_v33, %v5554_v3  ;;  %v1026_v4 = vmul.f32 %v1025_v34, %v5551_v6  ;;  %v1032_v23 = vmul.f32 %v1031_v35, %v5620_v19 }
 0x111   : > { %8846 = sst [smem:[#allocation167_spill]] %s5464_s2  ;;  %s8863_s25 = sld [smem:[#allocation156_spill]]  ;;  %v1004_v27 = vadd.f32 %v1002_v26, %v998_v30  ;;  %v997_v16 = vadd.f32 %v995_v1, %v991_v31  ;;  %v1038_v0 = vmul.f32 %v1037_v36, %v5654_v20  ;;  %v1060_v33 = vmul.f32 %v1058_v37, %v5588_v55 }
 0x112   : > { %8854 = sst [smem:[#allocation168_spill]] %s5480_s13  ;;  %s8862_s13 = sld [smem:[#allocation155_spill]]  ;;  %v1035_v15 = vadd.f32 %v1033_v5, %v1029_v60  ;;  %v1064_v34 = vmul.f32 %v1062_v38, %v5585_v58  ;;  %v1059_v12 = vmul.f32 %v1058_v37, %v5554_v3  ;;  %v1063_v17 = vmul.f32 %v1062_v38, %v5551_v6 }
 0x113   : > { %8857 = sst [smem:[#allocation169_spill]] %s5486_s8  ;;  %s5496_s0 = sld [smem:[#allocation7 + $0x8e]]  ;;  %v1008_v35 = vadd.f32 %v1006_v32, %v1004_v27  ;;  %v1003_v36 = vadd.f32 %v1001_v24, %v997_v16  ;;  %v1069_v22 = vmul.f32 %v1068_v39, %v5620_v19  ;;  %v1097_v38 = vmul.f32 %v1095_v42, %v5588_v55 }
 0x114   : > { %8844 = sst [smem:[#allocation166_spill]] %s5462_s24  ;;  %s5502_s20 = sld [smem:[#allocation7 + $0x94]]  ;;  %v1066_v9 = vadd.f32 %v1064_v34, %v1060_v33  ;;  %v1065_v37 = vadd.f32 %v1063_v17, %v1059_v12  ;;  %v1113_v57 = vmul.f32 %v1111_v49, %v5651_v13  ;;  %v1096_v52 = vmul.f32 %v1095_v42, %v5554_v3 }
 0x115   : > { %8839 = sst [smem:[#allocation164_spill]] %s5454_s12  ;;  %s5472_s12 = sld [smem:[#allocation7 + $0x87]]  ;;  %v1106_v5 = vmul.f32 %v1105_v44, %v5620_v19  ;;  %v1134_v30 = vmul.f32 %v1132_v46, %v5588_v55 }
 0x116   : > { %8859 = sst [smem:[#allocation170_spill]] %s5488_s15  ;;  %s5504_s30 = sld [smem:[#allocation7 + $0x95]]  ;;  %v1071_v1 = vadd.f32 %v1069_v22, %v1065_v37 }
 0x117   : > { %s8866_s7 = sld [smem:[#allocation160_spill]]  ;;  %s5512_s4 = sld [smem:[#allocation7 + $0x8f]] }
 0x118   : > { %s5510_s2 = sld [smem:[#allocation8 + $0x22]]  ;;  %s8870_s11 = sld [smem:[#allocation164_spill]] }
 0x119   : > { %s8871_s5 = sld [smem:[#allocation165_spill]]  ;;  %s5518_s17 = sld [smem:[#allocation7 + $0x92]] }
 0x11a   : > { %8864 = sst [smem:[#allocation155_spill]] %s5502_s20  ;;  %s5520_s22 = sld [smem:[#allocation7 + $0x98]] }
 0x11b   : > { %s8876_s21 = sld [smem:[#allocation168_spill]]  ;;  %s5648_s24 = sld [smem:[#allocation7 + $0x99]] }
 0x11c   : > { %8865 = sst [smem:[#allocation156_spill]] %s5504_s30  ;;  %s5674_s18 = sld [smem:[#allocation8 + $0x23]] }
 0x11d   : > { %s5739_s20 = sld [smem:[#allocation8 + $0x24]]  ;;  %s5770_s15 = sld [smem:[#allocation7 + $0x96]] }
 0x11e   : > { %8868 = sst [smem:[#allocation160_spill]] %s5510_s2  ;;  %s8921_s6 = smov 127  }
 0x11f   : > { %8873 = sst [smem:[#allocation164_spill]] %s5518_s17  ;;  %s8555_s17 = smov 127  }
 0x120   : > { %8874 = sst [smem:[#allocation165_spill]] %s5520_s22  ;;  %866 = vrot.lane.b32.xlu1 %v861_v51, %s8555_s17  ;;  %864 = vrot.lane.b32.xlu0 %v860_v21, %s8555_s17  ;;  %s5702_s22 = sld [smem:[#allocation7 + $0x93]]  ;;  %v1028_v51 = vadd.f32 %v1026_v4, %v1022_v48  ;;  %v1070_v21 = vmul.f32 %v1068_v39, %v5617_v18  ;;  %v1101_v39 = vmul.f32 %v1099_v43, %v5585_v58 }
 0x121   : > { %8893 = sst [smem:[#allocation168_spill]] %s5648_s24  ;;  %v1947_v53 = vstv %s5648_s24  ;;  %s5800_s14 = sld [smem:[#allocation7 + $0x97]]  ;;  %v1133_v48 = vmul.f32 %v1132_v46, %v5554_v3 }
 0x122   : > { %8898 = sst [smem:[#allocation42_spill]] %s5674_s18  ;;  %v1854_v11 = vstv %s5674_s18  ;;  %v1034_v10 = vadd.f32 %v1032_v23, %v1028_v51  ;;  %v1072_v63 = vadd.f32 %v1070_v21, %v1066_v9  ;;  %v1103_v24 = vadd.f32 %v1101_v39, %v1097_v38  ;;  %s5830_s30 = sld [smem:[#allocation8 + $0x25]] }
 0x123   : > { %8912 = sst [smem:[#allocation47_spill]] %s5739_s20  ;;  %v1891_v25 = vstv %s5739_s20  ;;  %s8928_s16 = sld [smem:[#allocation82_spill]]  ;;  %v1916_v60 = vstv %s5770_s15  ;;  %v1137_v23 = vmul.f32 %v1136_v47, %v5551_v6  ;;  %v1149_v51 = vmul.f32 %v1148_v54, %v5654_v20 }
 0x124   : > { %902 = vrot.lane.b32.xlu1 %v897_v2, %s8555_s17  ;;  %900 = vrot.lane.b32.xlu0 %v896_v59, %s8555_s17  ;;  %8916 = sst [smem:[#allocation48_spill]] %s5770_s15  ;;  %v1041_v59 = vadd.f32 %v1039_v61, %v1035_v15  ;;  %v1040_v26 = vadd.f32 %v1038_v0, %v1034_v10  ;;  %v1150_v61 = vmul.f32 %v1148_v54, %v5651_v13  ;;  %s8931_s18 = sld [smem:[#allocation84_spill]] }
 0x125   : > { %s8932_s28 = sld [smem:[#allocation90_spill]]  ;;  %s8933_s20 = sld [smem:[#allocation94_spill]]  ;;  %v1143_v15 = vmul.f32 %v1142_v50, %v5620_v19 }
 0x126   : > { %8907 = sst [smem:[#allocation43_spill]] %s5702_s22  ;;  %v1885_v2 = vstv %s5702_s22  ;;  %v1045_v14 = vadd.f32 %v1043_v41, %v1041_v59  ;;  %s5863_s22 = sld [smem:[#allocation7 + $0x9a]] }
 0x127   : > { %8924 = sst [smem:[#allocation52_spill]] %s5800_s14  ;;  %s8938_s2 = sld [smem:[#allocation86_spill]] }
 0x128   : > { %939 = vrot.lane.b32.xlu1 %v934_v8, %s8555_s17  ;;  %937 = vrot.lane.b32.xlu0 %v933_v7, %s8555_s17  ;;  %v1076_v8 = vmul.f32 %v1074_v40, %v5651_v13  ;;  %v1007_v7 = vadd.f32 %v1006_v32, %v1003_v36  ;;  %v1075_v32 = vmul.f32 %v1074_v40, %v5654_v20  ;;  %s8929_s17 = sld [smem:[#allocation87_spill]]  ;;  %8930 = sst [smem:[#allocation53_spill]] %s5830_s30  ;;  %v1922_v36 = vstv %s5800_s14 }
 0x129   : > { %v1044_v40 = vadd.f32 %v1043_v41, %v1040_v26  ;;  %v1100_v41 = vmul.f32 %v1099_v43, %v5551_v6  ;;  %v8934_v46 = vstv %s8928_s16  ;;  %s8942_s27 = sld [smem:[#allocation93_spill]]  ;;  %s8944_s24 = sld [smem:[#allocation88_spill]] }
 0x12a   : > { %v1078_v62 = vadd.f32 %v1076_v8, %v1072_v63  ;;  %v1077_v42 = vadd.f32 %v1075_v32, %v1071_v1  ;;  %v8937_v54 = vstv %s8931_s18  ;;  %v8943_v22 = vmov %v8934_v46  ;;  %s8946_s8 = sld [smem:[#allocation95_spill]]  ;;  %s8948_s14 = sld [smem:[#allocation99_spill]] }
 0x12b   : > { %v1102_v31 = vadd.f32 %v1100_v41, %v1096_v52  ;;  %v1174_v21 = vmul.f32 %v8937_v54, %v5585_v58  ;;  %v8939_v59 = vstv %s8932_s28  ;;  %v8940_v9 = vstv %s8933_s20  ;;  %s5894_s16 = sld [smem:[#allocation7 + $0x9b]]  ;;  %s8953_s20 = sld [smem:[#allocation91_spill]] }
 0x12c   : > { %976 = vrot.lane.b32.xlu1 %v971_v56, %s8921_s6  ;;  %974 = vrot.lane.b32.xlu0 %v970_v29, %s8921_s6  ;;  %v1107_v56 = vmul.f32 %v1105_v44, %v5617_v18  ;;  %v1082_v28 = vadd.f32 %v1080_v45, %v1078_v62  ;;  %v1112_v29 = vmul.f32 %v1111_v49, %v5654_v20  ;;  %8936 = sst [smem:[#allocation57_spill]] %s5863_s22  ;;  %v1928_v52 = vstv %s5830_s30  ;;  %s8960_s18 = sld [smem:[#allocation92_spill]] }
 0x12d   : > { %v1138_v44 = vmul.f32 %v1136_v47, %v5585_v58  ;;  %v1144_v49 = vmul.f32 %v1142_v50, %v5617_v18  ;;  %v1081_v4 = vadd.f32 %v1080_v45, %v1077_v42  ;;  %v1108_v16 = vadd.f32 %v1106_v5, %v1102_v31  ;;  %s8961_s28 = sld [smem:[#allocation100_spill]]  ;;  %s8963_s30 = sld [smem:[#allocation104_spill]] }
 0x12e   : > { %v1109_v43 = vadd.f32 %v1107_v56, %v1103_v24  ;;  %v1170_v45 = vmul.f32 %v8934_v46, %v5588_v55  ;;  %v8935_v33 = vstv %s8929_s17  ;;  %v1180_v10 = vmul.f32 %v8939_v59, %v5617_v18  ;;  %s8957_s17 = sld [smem:[#allocation97_spill]]  ;;  %s6113_s15 = sld [smem:[#allocation7 + $0xa0]] }
 0x12f   : > { %v1140_v0 = vadd.f32 %v1138_v44, %v1134_v30  ;;  %v1114_v34 = vadd.f32 %v1112_v29, %v1108_v16  ;;  %v1186_v8 = vmul.f32 %v8940_v9, %v5651_v13  ;;  %v8945_v26 = vmov %v8937_v54 }
 0x130   : > { %1013 = vrot.lane.b32.xlu1 %v1008_v35, %s8921_s6  ;;  %1011 = vrot.lane.b32.xlu0 %v1007_v7, %s8921_s6  ;;  %v1115_v27 = vadd.f32 %v1113_v57, %v1109_v43  ;;  %v1139_v35 = vadd.f32 %v1137_v23, %v1133_v48  ;;  %v8941_v7 = vmov %v8935_v33  ;;  %v1173_v63 = vmul.f32 %v8945_v26, %v5551_v6 }
 0x131   : > { %v1146_v50 = vadd.f32 %v1144_v49, %v1140_v0  ;;  %v1118_v12 = vadd.f32 %v8941_v7, %v1114_v34  ;;  %v1176_v37 = vadd.f32 %v1174_v21, %v1170_v45  ;;  %v8947_v38 = vmov %v8939_v59  ;;  %8951 = sst [smem:[#allocation58_spill]] %s5894_s16 }
 0x132   : > { %v1119_v47 = vadd.f32 %v8935_v33, %v1115_v27  ;;  %v1145_v17 = vadd.f32 %v1143_v15, %v1139_v35  ;;  %v1179_v39 = vmul.f32 %v8947_v38, %v5620_v19  ;;  %v8950_v1 = vstv %s8938_s2  ;;  %s5927_s2 = sld [smem:[#allocation8 + $0x26]] }
 0x133   : > { %v1152_v32 = vadd.f32 %v1150_v61, %v1146_v50  ;;  %v1207_v24 = vmul.f32 %v8950_v1, %v5588_v55  ;;  %v8952_v41 = vstv %s8942_s27  ;;  %v1182_v29 = vadd.f32 %v1180_v10, %v1176_v37  ;;  %s8969_s27 = sld [smem:[#allocation96_spill]] }
 0x134   : > { %1050 = vrot.lane.b32.xlu1 %v1045_v14, %s8921_s6  ;;  %1048 = vrot.lane.b32.xlu0 %v1044_v40, %s8921_s6  ;;  %v1169_v14 = vmul.f32 %v8943_v22, %v5554_v3  ;;  %v8949_v40 = vmov %v8940_v9  ;;  %v1151_v56 = vadd.f32 %v1149_v51, %v1145_v17  ;;  %v8954_v30 = vstv %s8944_s24  ;;  %s8977_s24 = sld [smem:[#allocation105_spill]]  ;;  %9060 = sst [smem:[#allocation55_spill]] %s6113_s15 }
 0x135   : > { %v1185_v62 = vmul.f32 %v8949_v40, %v5654_v20  ;;  %v1156_v5 = vadd.f32 %v8952_v41, %v1152_v32  ;;  %v8955_v42 = vstv %s8946_s8  ;;  %v8956_v31 = vmov %v8952_v41  ;;  %s8979_s8 = sld [smem:[#allocation109_spill]] }
 0x136   : > { %v1175_v57 = vadd.f32 %v1173_v63, %v1169_v14  ;;  %v1217_v43 = vmul.f32 %v8955_v42, %v5617_v18  ;;  %v1155_v44 = vadd.f32 %v8956_v31, %v1151_v56  ;;  %v8958_v61 = vstv %s8948_s14  ;;  %s8976_s14 = sld [smem:[#allocation98_spill]] }
 0x137   : > { %v1223_v48 = vmul.f32 %v8958_v61, %v5651_v13  ;;  %v1188_v16 = vadd.f32 %v1186_v8, %v1182_v29  ;;  %v8962_v0 = vmov %v8954_v30  ;;  %v8964_v51 = vmov %v8955_v42 }
 0x138   : > { %1087 = vrot.lane.b32.xlu1 %v1082_v28, %s8921_s6  ;;  %1085 = vrot.lane.b32.xlu0 %v1081_v4, %s8921_s6  ;;  %v1211_v28 = vmul.f32 %v8954_v30, %v5585_v58  ;;  %v1181_v49 = vadd.f32 %v1179_v39, %v1175_v57  ;;  %v8959_v4 = vmov %v8950_v1  ;;  %v1210_v15 = vmul.f32 %v8962_v0, %v5551_v6  ;;  %8967 = sst [smem:[#allocation44_spill]] %s5927_s2 }
 0x139   : > { %v1206_v27 = vmul.f32 %v8959_v4, %v5554_v3  ;;  %v1216_v46 = vmul.f32 %v8964_v51, %v5620_v19  ;;  %v8965_v33 = vmov %v8958_v61  ;;  %v8966_v35 = vstv %s8953_s20  ;;  %s5960_s20 = sld [smem:[#allocation7 + $0x9c]] }
 0x13a   : > { %v1213_v23 = vadd.f32 %v1211_v28, %v1207_v24  ;;  %v1187_v45 = vadd.f32 %v1185_v62, %v1181_v49  ;;  %v1222_v34 = vmul.f32 %v8965_v33, %v5654_v20  ;;  %v1244_v50 = vmul.f32 %v8966_v35, %v5588_v55 }
 0x13b   : > { %v1953_v54 = vstv %s5863_s22  ;;  %v8968_v21 = vstv %s8957_s17  ;;  %v8970_v9 = vstv %s8960_s18  ;;  %v8972_v17 = vstv %s8961_s28  ;;  %s8569_s17 = smov 126   ;;  %s8986_s18 = sld [smem:[#allocation107_spill]] }
 0x13c   : > { %1124 = vrot.lane.b32.xlu1 %v1119_v47, %s8921_s6  ;;  %1122 = vrot.lane.b32.xlu0 %v1118_v12, %s8921_s6  ;;  %v1192_v59 = vadd.f32 %v8968_v21, %v1188_v16  ;;  %v1219_v10 = vadd.f32 %v1217_v43, %v1213_v23  ;;  %v1212_v47 = vadd.f32 %v1210_v15, %v1206_v27  ;;  %s8973_s6 = sld [smem:[#allocation103_spill]]  ;;  %v8974_v14 = vstv %s8963_s30  ;;  %s8990_s30 = sld [smem:[#allocation101_spill]] }
 0x13d   : > { %v1248_v8 = vmul.f32 %v8970_v9, %v5585_v58  ;;  %v8971_v7 = vmov %v8968_v21  ;;  %v1254_v22 = vmul.f32 %v8972_v17, %v5617_v18  ;;  %v1260_v26 = vmul.f32 %v8974_v14, %v5651_v13  ;;  %s8992_s28 = sld [smem:[#allocation102_spill]]  ;;  %s8996_s22 = smov 126  }
 0x13e   : > { %v1191_v12 = vadd.f32 %v8971_v7, %v1187_v45  ;;  %v8975_v63 = vmov %v8966_v35  ;;  %v1225_v37 = vadd.f32 %v1223_v48, %v1219_v10  ;;  %v1218_v38 = vadd.f32 %v1216_v46, %v1212_v47 }
 0x13f   : > { %v1243_v32 = vmul.f32 %v8975_v63, %v5554_v3  ;;  %v1250_v39 = vadd.f32 %v1248_v8, %v1244_v50  ;;  %v8978_v40 = vmov %v8970_v9  ;;  %v8980_v56 = vmov %v8972_v17  ;;  %8983 = sst [smem:[#allocation49_spill]] %s5960_s20 }
 0x140   : > { %v1247_v62 = vmul.f32 %v8978_v40, %v5551_v6  ;;  %1161 = vrot.lane.b32.xlu1 %v1156_v5, %s8569_s17  ;;  %1159 = vrot.lane.b32.xlu0 %v1155_v44, %s8569_s17  ;;  %v1253_v57 = vmul.f32 %v8980_v56, %v5620_v19  ;;  %v8981_v1 = vmov %v8974_v14  ;;  %v8982_v41 = vstv %s8969_s27  ;;  %s8993_s17 = sld [smem:[#allocation110_spill]]  ;;  %s5990_s27 = sld [smem:[#allocation7 + $0x9d]] }
 0x141   : > { %v1259_v24 = vmul.f32 %v8981_v1, %v5654_v20  ;;  %v1281_v29 = vmul.f32 %v8982_v41, %v5588_v55  ;;  %v1959_v30 = vstv %s5894_s16  ;;  %v1224_v5 = vadd.f32 %v1222_v34, %v1218_v38  ;;  %s8995_s16 = sld [smem:[#allocation114_spill]] }
 0x142   : > { %v8984_v28 = vstv %s8973_s6  ;;  %v1256_v43 = vadd.f32 %v1254_v22, %v1250_v39  ;;  %v1249_v31 = vadd.f32 %v1247_v62, %v1243_v32  ;;  %v8985_v44 = vstv %s8976_s14  ;;  %s9005_s6 = sld [smem:[#allocation106_spill]]  ;;  %s9007_s14 = sld [smem:[#allocation113_spill]] }
 0x143   : > { %v1229_v42 = vadd.f32 %v8984_v28, %v1225_v37  ;;  %v1285_v49 = vmul.f32 %v8985_v44, %v5585_v58  ;;  %v8987_v61 = vstv %s8977_s24  ;;  %v8988_v4 = vstv %s8979_s8  ;;  %s9009_s24 = sld [smem:[#allocation108_spill]]  ;;  %s9011_s8 = sld [smem:[#allocation115_spill]] }
 0x144   : > { %v1291_v48 = vmul.f32 %v8987_v61, %v5617_v18  ;;  %v1297_v27 = vmul.f32 %v8988_v4, %v5651_v13  ;;  %v8989_v16 = vmov %v8982_v41  ;;  %v8991_v0 = vmov %v8984_v28  ;;  %1197 = vrot.lane.b32.xlu1 %v1192_v59, %s8996_s22  ;;  %1195 = vrot.lane.b32.xlu0 %v1191_v12, %s8996_s22 }
 0x145   : > { %v1280_v23 = vmul.f32 %v8989_v16, %v5554_v3  ;;  %v1228_v15 = vadd.f32 %v8991_v0, %v1224_v5  ;;  %v1262_v51 = vadd.f32 %v1260_v26, %v1256_v43  ;;  %v1255_v46 = vadd.f32 %v1253_v57, %v1249_v31 }
 0x146   : > { %v8994_v45 = vmov %v8985_v44  ;;  %v1287_v34 = vadd.f32 %v1285_v49, %v1281_v29  ;;  %v8997_v35 = vmov %v8987_v61  ;;  %v8998_v21 = vmov %v8988_v4  ;;  %8999 = sst [smem:[#allocation54_spill]] %s5990_s27 }
 0x147   : > { %v1284_v33 = vmul.f32 %v8994_v45, %v5551_v6  ;;  %v1290_v50 = vmul.f32 %v8997_v35, %v5620_v19  ;;  %v1296_v10 = vmul.f32 %v8998_v21, %v5654_v20  ;;  %v1965_v47 = vstv %s5927_s2  ;;  %s9012_s2 = sld [smem:[#allocation119_spill]] }
 0x148   : > { %v9000_v9 = vstv %s8986_s18  ;;  %v1261_v7 = vadd.f32 %v1259_v24, %v1255_v46  ;;  %v9001_v12 = vstv %s8990_s30  ;;  %v1293_v22 = vadd.f32 %v1291_v48, %v1287_v34  ;;  %1234 = vrot.lane.b32.xlu1 %v1229_v42, %s8996_s22  ;;  %1232 = vrot.lane.b32.xlu0 %v1228_v15, %s8996_s22  ;;  %s6020_s18 = sld [smem:[#allocation7 + $0x9e]]  ;;  %s9022_s30 = sld [smem:[#allocation117_spill]] }
 0x149   : > { %v1266_v8 = vadd.f32 %v9000_v9, %v1262_v51  ;;  %v1286_v59 = vadd.f32 %v1284_v33, %v1280_v23  ;;  %v1318_v17 = vmul.f32 %v9001_v12, %v5588_v55  ;;  %v9002_v14 = vstv %s8992_s28  ;;  %s9026_s28 = sld [smem:[#allocation120_spill]] }
 0x14a   : > { %v1322_v26 = vmul.f32 %v9002_v14, %v5585_v58  ;;  %v9003_v63 = vstv %s8993_s17  ;;  %v9004_v37 = vstv %s8995_s16  ;;  %v9006_v39 = vmov %v9000_v9  ;;  %s9020_s17 = sld [smem:[#allocation111_spill]]  ;;  %s9025_s16 = sld [smem:[#allocation112_spill]] }
 0x14b   : > { %v1328_v32 = vmul.f32 %v9003_v63, %v5617_v18  ;;  %v1334_v38 = vmul.f32 %v9004_v37, %v5651_v13  ;;  %v1265_v40 = vadd.f32 %v9006_v39, %v1261_v7  ;;  %v1292_v62 = vadd.f32 %v1290_v50, %v1286_v59 }
 0x14c   : > { %v9008_v56 = vmov %v9001_v12  ;;  %v9010_v1 = vmov %v9002_v14  ;;  %v1299_v41 = vadd.f32 %v1297_v27, %v1293_v22  ;;  %v1324_v29 = vadd.f32 %v1322_v26, %v1318_v17  ;;  %1271 = vrot.lane.b32.xlu1 %v1266_v8, %s8996_s22 }
 0x14d   : > { %v1317_v57 = vmul.f32 %v9008_v56, %v5554_v3  ;;  %v1321_v24 = vmul.f32 %v9010_v1, %v5551_v6  ;;  %v9013_v28 = vmov %v9003_v63  ;;  %v1980_v43 = vstv %s5960_s20  ;;  %1269 = vrot.lane.b32.xlu0 %v1265_v40, %s8996_s22  ;;  %s9027_s20 = sld [smem:[#allocation124_spill]] }
 0x14e   : > { %v1327_v5 = vmul.f32 %v9013_v28, %v5620_v19  ;;  %9014 = sst [smem:[#allocation59_spill]] %s6020_s18  ;;  %v1298_v31 = vadd.f32 %v1296_v10, %v1292_v62  ;;  %v9015_v49 = vmov %v9004_v37  ;;  %v9016_v42 = vstv %s9005_s6  ;;  %s9035_s6 = sld [smem:[#allocation116_spill]] }
 0x14f   : > { %v1323_v44 = vadd.f32 %v1321_v24, %v1317_v57  ;;  %v1333_v61 = vmul.f32 %v9015_v49, %v5654_v20  ;;  %v1355_v48 = vmul.f32 %v9016_v42, %v5588_v55  ;;  %v9017_v4 = vstv %s9007_s14  ;;  %s6050_s14 = sld [smem:[#allocation7 + $0x9f]] }
 0x150   : > { %v1303_v27 = vadd.f32 %v9017_v4, %v1299_v41  ;;  %v1330_v16 = vadd.f32 %v1328_v32, %v1324_v29  ;;  %v9018_v23 = vstv %s9009_s24  ;;  %v9019_v15 = vstv %s9011_s8  ;;  %s9037_s24 = sld [smem:[#allocation123_spill]]  ;;  %s9042_s8 = sld [smem:[#allocation125_spill]] }
 0x151   : > { %v1359_v0 = vmul.f32 %v9018_v23, %v5585_v58  ;;  %v1365_v51 = vmul.f32 %v9019_v15, %v5617_v18  ;;  %v9021_v46 = vmov %v9017_v4  ;;  %v1329_v33 = vadd.f32 %v1327_v5, %v1323_v44 }
 0x152   : > { %v1302_v45 = vadd.f32 %v9021_v46, %v1298_v31  ;;  %v9023_v34 = vstv %s9012_s2  ;;  %v9024_v50 = vmov %v9016_v42  ;;  %v1336_v10 = vadd.f32 %v1334_v38, %v1330_v16  ;;  %s9041_s2 = sld [smem:[#allocation118_spill]]  ;;  %1308 = vrot.lane.b32.xlu1 %v1303_v27, %s8996_s22 }
 0x153   : > { %v1371_v35 = vmul.f32 %v9023_v34, %v5651_v13  ;;  %v1354_v21 = vmul.f32 %v9024_v50, %v5554_v3  ;;  %v1361_v9 = vadd.f32 %v1359_v0, %v1355_v48  ;;  %v9028_v7 = vmov %v9018_v23 }
 0x154   : > { %v1358_v59 = vmul.f32 %v9028_v7, %v5551_v6  ;;  %v1984_v12 = vstv %s5990_s27  ;;  %v1335_v17 = vadd.f32 %v1333_v61, %v1329_v33  ;;  %v9030_v22 = vmov %v9019_v15  ;;  %1306 = vrot.lane.b32.xlu0 %v1302_v45, %s8996_s22  ;;  %s9043_s27 = sld [smem:[#allocation129_spill]] }
 0x155   : > { %9029 = sst [smem:[#allocation45_spill]] %s6050_s14  ;;  %v1364_v14 = vmul.f32 %v9030_v22, %v5620_v19  ;;  %v9031_v26 = vmov %v9023_v34  ;;  %v9032_v63 = vstv %s9020_s17  ;;  %v9033_v37 = vstv %s9022_s30  ;;  %s9051_s17 = sld [smem:[#allocation127_spill]] }
 0x156   : > { %v1370_v8 = vmul.f32 %v9031_v26, %v5654_v20  ;;  %v1392_v32 = vmul.f32 %v9032_v63, %v5588_v55  ;;  %v1340_v38 = vadd.f32 %v9033_v37, %v1336_v10  ;;  %v1367_v39 = vadd.f32 %v1365_v51, %v1361_v9  ;;  %s6080_s30 = sld [smem:[#allocation8 + $0x27]] }
 0x157   : > { %v1360_v40 = vadd.f32 %v1358_v59, %v1354_v21  ;;  %v9034_v62 = vstv %s9025_s16  ;;  %v9036_v57 = vmov %v9033_v37  ;;  %v9038_v24 = vstv %s9026_s28  ;;  %s9056_s16 = sld [smem:[#allocation122_spill]] }
 0x158   : > { %v1396_v56 = vmul.f32 %v9034_v62, %v5585_v58  ;;  %v1339_v1 = vadd.f32 %v9036_v57, %v1335_v17  ;;  %v1402_v41 = vmul.f32 %v9038_v24, %v5617_v18  ;;  %v9039_v29 = vstv %s9027_s20  ;;  %s9054_s20 = sld [smem:[#allocation121_spill]]  ;;  %1345 = vrot.lane.b32.xlu1 %v1340_v38, %s8996_s22  ;;  %s9058_s28 = sld [smem:[#allocation130_spill]] }
 0x159   : > { %v1408_v28 = vmul.f32 %v9039_v29, %v5651_v13  ;;  %v9040_v5 = vmov %v9032_v63  ;;  %v1373_v44 = vadd.f32 %v1371_v35, %v1367_v39  ;;  %v1366_v49 = vadd.f32 %v1364_v14, %v1360_v40 }
 0x15a   : > { %v1391_v31 = vmul.f32 %v9040_v5, %v5554_v3  ;;  %v1398_v61 = vadd.f32 %v1396_v56, %v1392_v32  ;;  %v1990_v42 = vstv %s6020_s18  ;;  %v9045_v48 = vmov %v9034_v62  ;;  %1343 = vrot.lane.b32.xlu0 %v1339_v1, %s8996_s22  ;;  %s9059_s18 = sld [smem:[#allocation134_spill]] }
 0x15b   : > { %v1395_v4 = vmul.f32 %v9045_v48, %v5551_v6  ;;  %v9046_v16 = vmov %v9038_v24  ;;  %v9047_v27 = vmov %v9039_v29  ;;  %v9048_v15 = vstv %s9035_s6  ;;  %s9067_s6 = sld [smem:[#allocation133_spill]] }
 0x15c   : > { %9044 = sst [smem:[#allocation50_spill]] %s6080_s30  ;;  %v1401_v23 = vmul.f32 %v9046_v16, %v5620_v19  ;;  %v1407_v0 = vmul.f32 %v9047_v27, %v5654_v20  ;;  %v1429_v51 = vmul.f32 %v9048_v15, %v5588_v55  ;;  %v9049_v46 = vstv %s9037_s24  ;;  %s9071_s24 = sld [smem:[#allocation128_spill]] }
 0x15d   : > { %v1377_v45 = vadd.f32 %v9049_v46, %v1373_v44  ;;  %v1372_v33 = vadd.f32 %v1370_v8, %v1366_v49  ;;  %v1404_v34 = vadd.f32 %v1402_v41, %v1398_v61  ;;  %v9050_v35 = vstv %s9041_s2  ;;  %s9072_s2 = sld [smem:[#allocation135_spill]] }
 0x15e   : > { %v1433_v50 = vmul.f32 %v9050_v35, %v5585_v58  ;;  %v1397_v21 = vadd.f32 %v1395_v4, %v1391_v31  ;;  %v9052_v10 = vstv %s9042_s8  ;;  %v9053_v7 = vstv %s9043_s27  ;;  %s9070_s27 = sld [smem:[#allocation126_spill]]  ;;  %s6144_s8 = sld [smem:[#allocation7 + $0xa1]] }
 0x15f   : > { %v1439_v9 = vmul.f32 %v9052_v10, %v5617_v18  ;;  %v1445_v59 = vmul.f32 %v9053_v7, %v5651_v13  ;;  %v9055_v17 = vmov %v9048_v15  ;;  %v9057_v14 = vmov %v9049_v46  ;;  %1382 = vrot.lane.b32.xlu1 %v1377_v45, %s8996_s22 }
 0x160   : > { %v1428_v22 = vmul.f32 %v9055_v17, %v5554_v3  ;;  %v1376_v26 = vadd.f32 %v9057_v14, %v1372_v33  ;;  %v1410_v8 = vadd.f32 %v1408_v28, %v1404_v34  ;;  %v1435_v63 = vadd.f32 %v1433_v50, %v1429_v51 }
 0x161   : > { %v1996_v32 = vstv %s6050_s14  ;;  %v1403_v37 = vadd.f32 %v1401_v23, %v1397_v21  ;;  %v9061_v39 = vmov %v9050_v35  ;;  %v9062_v62 = vmov %v9052_v10  ;;  %s9075_s14 = sld [smem:[#allocation139_spill]] }
 0x162   : > { %v1432_v40 = vmul.f32 %v9061_v39, %v5551_v6  ;;  %v1438_v38 = vmul.f32 %v9062_v62, %v5620_v19  ;;  %v9063_v56 = vmov %v9053_v7  ;;  %v9064_v1 = vstv %s9051_s17  ;;  %1380 = vrot.lane.b32.xlu0 %v1376_v26, %s8996_s22  ;;  %s9081_s17 = sld [smem:[#allocation137_spill]] }
 0x163   : > { %v1444_v57 = vmul.f32 %v9063_v56, %v5654_v20  ;;  %v1414_v24 = vadd.f32 %v9064_v1, %v1410_v8  ;;  %v1441_v41 = vadd.f32 %v1439_v9, %v1435_v63  ;;  %v9065_v29 = vstv %s9054_s20  ;;  %s9084_s20 = sld [smem:[#allocation131_spill]] }
 0x164   : > { %v1465_v28 = vmul.f32 %v9065_v29, %v5588_v55  ;;  %v9066_v5 = vstv %s9056_s16  ;;  %v1409_v44 = vadd.f32 %v1407_v0, %v1403_v37  ;;  %v1434_v49 = vadd.f32 %v1432_v40, %v1428_v22  ;;  %s6177_s16 = sld [smem:[#allocation7 + $0xa2]] }
 0x165   : > { %v1469_v31 = vmul.f32 %v9066_v5, %v5585_v58  ;;  %v9068_v61 = vstv %s9058_s28  ;;  %v9069_v4 = vstv %s9059_s18  ;;  %v1447_v23 = vadd.f32 %v1445_v59, %v1441_v41  ;;  %1419 = vrot.lane.b32.xlu1 %v1414_v24, %s8996_s22  ;;  %s9086_s18 = sld [smem:[#allocation132_spill]] }
 0x166   : > { %v1475_v48 = vmul.f32 %v9068_v61, %v5617_v18  ;;  %v1481_v16 = vmul.f32 %v9069_v4, %v5651_v13  ;;  %v9073_v15 = vmov %v9065_v29  ;;  %v2002_v51 = vstv %s6080_s30  ;;  %s9089_s28 = sld [smem:[#allocation140_spill]]  ;;  %s9090_s30 = sld [smem:[#allocation144_spill]] }
 0x167   : > { %v1471_v27 = vadd.f32 %v1469_v31, %v1465_v28  ;;  %v1464_v0 = vmul.f32 %v9073_v15, %v5554_v3  ;;  %v9074_v46 = vmov %v9064_v1  ;;  %v1440_v34 = vadd.f32 %v1438_v38, %v1434_v49 }
 0x168   : > { %v1413_v33 = vadd.f32 %v9074_v46, %v1409_v44  ;;  %v9076_v35 = vmov %v9066_v5  ;;  %v9077_v50 = vmov %v9068_v61  ;;  %v9078_v10 = vstv %s9067_s6  ;;  %s8591_s6 = smov 125  }
 0x169   : > { %v1468_v45 = vmul.f32 %v9076_v35, %v5551_v6  ;;  %v1474_v21 = vmul.f32 %v9077_v50, %v5620_v19  ;;  %v1451_v9 = vadd.f32 %v9078_v10, %v1447_v23  ;;  %v1477_v7 = vadd.f32 %v1475_v48, %v1471_v27 }
 0x16a   : > { %v9079_v59 = vmov %v9069_v4  ;;  %v9080_v22 = vstv %s9070_s27  ;;  %v1446_v26 = vadd.f32 %v1444_v57, %v1440_v34  ;;  %v9082_v63 = vstv %s9071_s24  ;;  %1417 = vrot.lane.b32.xlu0 %v1413_v33, %s8996_s22  ;;  %s9097_s22 = sld [smem:[#allocation136_spill]]  ;;  %s9098_s27 = sld [smem:[#allocation143_spill]] }
 0x16b   : > { %v1480_v17 = vmul.f32 %v9079_v59, %v5654_v20  ;;  %v1502_v14 = vmul.f32 %v9080_v22, %v5588_v55  ;;  %v1470_v8 = vadd.f32 %v1468_v45, %v1464_v0  ;;  %v1506_v37 = vmul.f32 %v9082_v63, %v5585_v58  ;;  %1456 = vrot.lane.b32.xlu1 %v1451_v9, %s8591_s6  ;;  %s6210_s24 = sld [smem:[#allocation7 + $0xa3]] }
 0x16c   : > { %v9083_v39 = vstv %s9072_s2  ;;  %v1483_v62 = vadd.f32 %v1481_v16, %v1477_v7  ;;  %v9085_v38 = vstv %s9075_s14  ;;  %v9087_v57 = vmov %v9080_v22  ;;  %s9101_s14 = sld [smem:[#allocation138_spill]]  ;;  %s9104_s2 = sld [smem:[#allocation145_spill]] }
 0x16d   : > { %v1512_v40 = vmul.f32 %v9083_v39, %v5617_v18  ;;  %v1518_v56 = vmul.f32 %v9085_v38, %v5651_v13  ;;  %v1501_v1 = vmul.f32 %v9087_v57, %v5554_v3  ;;  %v2017_v41 = vstv %s6113_s15  ;;  %s9105_s15 = sld [smem:[#allocation149_spill]] }
 0x16e   : > { %v9088_v29 = vmov %v9078_v10  ;;  %v1476_v5 = vadd.f32 %v1474_v21, %v1470_v8  ;;  %v1508_v24 = vadd.f32 %v1506_v37, %v1502_v14  ;;  %v9091_v31 = vmov %v9082_v63 }
 0x16f   : > { %v1450_v28 = vadd.f32 %v9088_v29, %v1446_v26  ;;  %v1505_v44 = vmul.f32 %v9091_v31, %v5551_v6  ;;  %v9092_v49 = vstv %s9081_s17  ;;  %v9093_v48 = vmov %v9083_v39  ;;  %s9112_s17 = sld [smem:[#allocation147_spill]] }
 0x170   : > { %v1487_v61 = vadd.f32 %v9092_v49, %v1483_v62  ;;  %v1511_v4 = vmul.f32 %v9093_v48, %v5620_v19  ;;  %v9094_v16 = vmov %v9085_v38  ;;  %v9095_v27 = vstv %s9084_s20  ;;  %s9115_s20 = sld [smem:[#allocation142_spill]] }
 0x171   : > { %v1517_v23 = vmul.f32 %v9094_v16, %v5654_v20  ;;  %v1539_v15 = vmul.f32 %v9095_v27, %v5588_v55  ;;  %v1482_v0 = vadd.f32 %v1480_v17, %v1476_v5  ;;  %v1514_v46 = vadd.f32 %v1512_v40, %v1508_v24  ;;  %1454 = vrot.lane.b32.xlu0 %v1450_v28, %s8591_s6 }
 0x172   : > { %v1507_v33 = vadd.f32 %v1505_v44, %v1501_v1  ;;  %v9096_v34 = vstv %s9086_s18  ;;  %v9099_v45 = vstv %s9089_s28  ;;  %v9100_v21 = vstv %s9090_s30  ;;  %1492 = vrot.lane.b32.xlu1 %v1487_v61, %s8591_s6  ;;  %s9113_s30 = sld [smem:[#allocation141_spill]]  ;;  %s6240_s18 = sld [smem:[#allocation8 + $0x28]] }
 0x173   : > { %v1543_v35 = vmul.f32 %v9096_v34, %v5585_v58  ;;  %v1549_v50 = vmul.f32 %v9099_v45, %v5617_v18  ;;  %v1555_v10 = vmul.f32 %v9100_v21, %v5651_v13  ;;  %v9102_v7 = vmov %v9095_v27  ;;  %s9118_s28 = sld [smem:[#allocation150_spill]] }
 0x174   : > { %v1538_v59 = vmul.f32 %v9102_v7, %v5554_v3  ;;  %v2021_v17 = vstv %s6144_s8  ;;  %v9103_v22 = vmov %v9092_v49  ;;  %v1520_v9 = vadd.f32 %v1518_v56, %v1514_v46  ;;  %s6676_s8 = sld [smem:[#allocation7 + $0xac]] }
 0x175   : > { %v1486_v14 = vadd.f32 %v9103_v22, %v1482_v0  ;;  %v1513_v26 = vadd.f32 %v1511_v4, %v1507_v33  ;;  %v1545_v8 = vadd.f32 %v1543_v35, %v1539_v15  ;;  %v9106_v63 = vmov %v9096_v34 }
 0x176   : > { %v1542_v37 = vmul.f32 %v9106_v63, %v5551_v6  ;;  %v9107_v39 = vmov %v9099_v45  ;;  %v9108_v62 = vmov %v9100_v21  ;;  %v9109_v57 = vstv %s9097_s22  ;;  %s9127_s22 = smov 125  }
 0x177   : > { %v1548_v40 = vmul.f32 %v9107_v39, %v5620_v19  ;;  %v1554_v38 = vmul.f32 %v9108_v62, %v5654_v20  ;;  %v1576_v1 = vmul.f32 %v9109_v57, %v5588_v55  ;;  %v9110_v29 = vstv %s9098_s27  ;;  %1490 = vrot.lane.b32.xlu0 %v1486_v14, %s8591_s6  ;;  %s9122_s6 = sld [smem:[#allocation154_spill]]  ;;  %s9128_s27 = sld [smem:[#allocation153_spill]] }
 0x178   : > { %v1524_v28 = vadd.f32 %v9110_v29, %v1520_v9  ;;  %v1519_v56 = vadd.f32 %v1517_v23, %v1513_v26  ;;  %v1551_v5 = vadd.f32 %v1549_v50, %v1545_v8  ;;  %v9111_v24 = vstv %s9101_s14  ;;  %s6270_s14 = sld [smem:[#allocation7 + $0xa4]] }
 0x179   : > { %v1580_v31 = vmul.f32 %v9111_v24, %v5585_v58  ;;  %v1544_v44 = vadd.f32 %v1542_v37, %v1538_v59  ;;  %v9114_v49 = vstv %s9104_s2  ;;  %v9116_v4 = vstv %s9105_s15  ;;  %s9129_s15 = sld [smem:[#allocation146_spill]]  ;;  %s9131_s2 = sld [smem:[#allocation148_spill]] }
 0x17a   : > { %v1586_v48 = vmul.f32 %v9114_v49, %v5617_v18  ;;  %v1592_v16 = vmul.f32 %v9116_v4, %v5651_v13  ;;  %v2027_v23 = vstv %s6177_s16  ;;  %v9117_v27 = vmov %v9110_v29  ;;  %1529 = vrot.lane.b32.xlu1 %v1524_v28, %s9127_s22  ;;  %s6678_s16 = sld [smem:[#allocation7 + $0xad]] }
 0x17b   : > { %v1523_v15 = vadd.f32 %v9117_v27, %v1519_v56  ;;  %v1557_v0 = vadd.f32 %v1555_v10, %v1551_v5  ;;  %v1582_v61 = vadd.f32 %v1580_v31, %v1576_v1  ;;  %v9119_v46 = vmov %v9109_v57 }
 0x17c   : > { %v1575_v33 = vmul.f32 %v9119_v46, %v5554_v3  ;;  %v1550_v34 = vadd.f32 %v1548_v40, %v1544_v44  ;;  %v9120_v35 = vmov %v9111_v24  ;;  %v9121_v50 = vmov %v9114_v49 }
 0x17d   : > { %v1579_v45 = vmul.f32 %v9120_v35, %v5551_v6  ;;  %v1585_v21 = vmul.f32 %v9121_v50, %v5620_v19  ;;  %v9123_v7 = vmov %v9116_v4  ;;  %v9124_v22 = vstv %s9112_s17  ;;  %1527 = vrot.lane.b32.xlu0 %v1523_v15, %s9127_s22  ;;  %s9140_s17 = sld [smem:[#allocation151_spill]] }
 0x17e   : > { %v1591_v59 = vmul.f32 %v9123_v7, %v5654_v20  ;;  %v1561_v10 = vadd.f32 %v9124_v22, %v1557_v0  ;;  %v1588_v14 = vadd.f32 %v1586_v48, %v1582_v61  ;;  %v9125_v9 = vstv %s9113_s30  ;;  %s9146_s30 = sld [smem:[#allocation152_spill]] }
 0x17f   : > { %v1613_v26 = vmul.f32 %v9125_v9, %v5588_v55  ;;  %v9126_v8 = vstv %s9115_s20  ;;  %v1556_v37 = vadd.f32 %v1554_v38, %v1550_v34  ;;  %v1581_v39 = vadd.f32 %v1579_v45, %v1575_v33  ;;  %s9170_s20 = sld [smem:[#allocation159_spill]] }
 0x180   : > { %v1617_v63 = vmul.f32 %v9126_v8, %v5585_v58  ;;  %v9130_v40 = vstv %s9118_s28  ;;  %v2033_v57 = vstv %s6210_s24  ;;  %v1594_v1 = vadd.f32 %v1592_v16, %v1588_v14  ;;  %1566 = vrot.lane.b32.xlu1 %v1561_v10, %s9127_s22  ;;  %s9201_s28 = sld [smem:[#allocation160_spill]]  ;;  %s6689_s24 = sld [smem:[#allocation7 + $0xae]] }
 0x181   : > { %v1623_v62 = vmul.f32 %v9130_v40, %v5617_v18  ;;  %v9132_v56 = vstv %s9122_s6  ;;  %v9133_v28 = vmov %v9125_v9  ;;  %v9134_v31 = vmov %v9124_v22  ;;  %s6300_s6 = sld [smem:[#allocation7 + $0xa5]] }
 0x182   : > { %v1619_v29 = vadd.f32 %v1617_v63, %v1613_v26  ;;  %v1629_v5 = vmul.f32 %v9132_v56, %v5651_v13  ;;  %v1612_v24 = vmul.f32 %v9133_v28, %v5554_v3  ;;  %v1560_v38 = vadd.f32 %v9134_v31, %v1556_v37 }
 0x183   : > { %v1587_v44 = vadd.f32 %v1585_v21, %v1581_v39  ;;  %v9135_v49 = vmov %v9126_v8  ;;  %v9136_v4 = vmov %v9130_v40  ;;  %v9137_v27 = vstv %s9128_s27  ;;  %s9215_s27 = sld [smem:[#allocation155_spill]] }
 0x184   : > { %v1616_v48 = vmul.f32 %v9135_v49, %v5551_v6  ;;  %v1622_v16 = vmul.f32 %v9136_v4, %v5620_v19  ;;  %v1598_v15 = vadd.f32 %v9137_v27, %v1594_v1  ;;  %v1625_v0 = vadd.f32 %v1623_v62, %v1619_v29  ;;  %1564 = vrot.lane.b32.xlu0 %v1560_v38, %s9127_s22 }
 0x185   : > { %v9138_v61 = vmov %v9132_v56  ;;  %v9139_v33 = vstv %s9129_s15  ;;  %v1593_v35 = vadd.f32 %v1591_v59, %v1587_v44  ;;  %v9141_v50 = vstv %s9131_s2  ;;  %s6638_s15 = sld [smem:[#allocation7 + $0xab]]  ;;  %s6659_s2 = sld [smem:[#allocation8 + $0x2a]] }
 0x186   : > { %v1628_v46 = vmul.f32 %v9138_v61, %v5654_v20  ;;  %v1650_v34 = vmul.f32 %v9139_v33, %v5588_v55  ;;  %v1618_v45 = vadd.f32 %v1616_v48, %v1612_v24  ;;  %v1654_v21 = vmul.f32 %v9141_v50, %v5585_v58  ;;  %1603 = vrot.lane.b32.xlu1 %v1598_v15, %s9127_s22 }
 0x187   : > { %v2039_v7 = vstv %s6240_s18  ;;  %v1631_v22 = vadd.f32 %v1629_v5, %v1625_v0  ;;  %v9142_v14 = vstv %s8862_s13  ;;  %v9143_v26 = vstv %s5414_s19  ;;  %s6330_s13 = sld [smem:[#allocation7 + $0xa6]]  ;;  %s9157_s19 = sld [smem:[#allocation157_spill]] }
 0x188   : > { %v1660_v9 = vmul.f32 %v9142_v14, %v5617_v18  ;;  %v1666_v10 = vmul.f32 %v9143_v26, %v5651_v13  ;;  %v9144_v8 = vmov %v9139_v33  ;;  %v9145_v59 = vmov %v9137_v27  ;;  %s6724_s18 = sld [smem:[#allocation7 + $0xb1]] }
 0x189   : > { %v1649_v63 = vmul.f32 %v9144_v8, %v5554_v3  ;;  %v1597_v37 = vadd.f32 %v9145_v59, %v1593_v35  ;;  %v1624_v39 = vadd.f32 %v1622_v16, %v1618_v45  ;;  %v1656_v40 = vadd.f32 %v1654_v21, %v1650_v34 }
 0x18a   : > { %v9147_v62 = vmov %v9141_v50  ;;  %v9148_v29 = vstv %s5406_s1  ;;  %v9149_v5 = vmov %v9142_v14  ;;  %v9150_v24 = vmov %v9143_v26  ;;  %s6363_s1 = sld [smem:[#allocation7 + $0xa7]] }
 0x18b   : > { %v1653_v1 = vmul.f32 %v9147_v62, %v5551_v6  ;;  %v1635_v56 = vadd.f32 %v9148_v29, %v1631_v22  ;;  %v1659_v28 = vmul.f32 %v9149_v5, %v5620_v19  ;;  %v1665_v31 = vmul.f32 %v9150_v24, %v5654_v20  ;;  %1601 = vrot.lane.b32.xlu0 %v1597_v37, %s9127_s22 }
 0x18c   : > { %v9151_v38 = vstv %s9140_s17  ;;  %v1630_v49 = vadd.f32 %v1628_v46, %v1624_v39  ;;  %v1662_v48 = vadd.f32 %v1660_v9, %v1656_v40  ;;  %v2053_v16 = vstv %s6270_s14  ;;  %s6699_s14 = sld [smem:[#allocation7 + $0xaf]]  ;;  %s6745_s17 = sld [smem:[#allocation8 + $0x2c]] }
 0x18d   : > { %v1687_v44 = vmul.f32 %v9151_v38, %v5588_v55  ;;  %v1655_v4 = vadd.f32 %v1653_v1, %v1649_v63  ;;  %v9152_v27 = vstv %s9146_s30  ;;  %v9153_v61 = vstv %s5416_s26  ;;  %1640 = vrot.lane.b32.xlu1 %v1635_v56, %s9127_s22  ;;  %s9164_s26 = sld [smem:[#allocation158_spill]]  ;;  %s6756_s30 = sld [smem:[#allocation7 + $0xb5]] }
 0x18e   : > { %v1691_v0 = vmul.f32 %v9152_v27, %v5585_v58  ;;  %v1697_v33 = vmul.f32 %v9153_v61, %v5617_v18  ;;  %v9154_v15 = vstv %s5432_s29  ;;  %v9155_v35 = vmov %v9151_v38  ;;  %s9168_s29 = sld [smem:[#allocation162_spill]] }
 0x18f   : > { %v1703_v34 = vmul.f32 %v9154_v15, %v5651_v13  ;;  %v1686_v46 = vmul.f32 %v9155_v35, %v5554_v3  ;;  %v9156_v45 = vmov %v9148_v29  ;;  %v1668_v21 = vadd.f32 %v1666_v10, %v1662_v48 }
 0x190   : > { %v1634_v50 = vadd.f32 %v9156_v45, %v1630_v49  ;;  %v1661_v22 = vadd.f32 %v1659_v28, %v1655_v4  ;;  %v9158_v14 = vmov %v9152_v27  ;;  %v1693_v26 = vadd.f32 %v1691_v0, %v1687_v44 }
 0x191   : > { %v1690_v9 = vmul.f32 %v9158_v14, %v5551_v6  ;;  %v9159_v8 = vmov %v9153_v61  ;;  %v9160_v59 = vmov %v9154_v15  ;;  %v9161_v39 = vstv %s8863_s25  ;;  %s6394_s25 = sld [smem:[#allocation8 + $0x29]] }
 0x192   : > { %v1696_v63 = vmul.f32 %v9159_v8, %v5620_v19  ;;  %v1702_v37 = vmul.f32 %v9160_v59, %v5654_v20  ;;  %v1724_v40 = vmul.f32 %v9161_v39, %v5588_v55  ;;  %1638 = vrot.lane.b32.xlu0 %v1634_v50, %s9127_s22  ;;  %v9162_v10 = vstv %s5430_s10  ;;  %s9191_s10 = sld [smem:[#allocation169_spill]] }
 0x193   : > { %v1672_v62 = vadd.f32 %v9162_v10, %v1668_v21  ;;  %v1667_v1 = vadd.f32 %v1665_v31, %v1661_v22  ;;  %v1692_v29 = vadd.f32 %v1690_v9, %v1686_v46  ;;  %v2057_v5 = vstv %s6300_s6  ;;  %s6701_s6 = sld [smem:[#allocation8 + $0x2b]] }
 0x194   : > { %v1699_v28 = vadd.f32 %v1697_v33, %v1693_v26  ;;  %v9163_v24 = vstv %s9157_s19  ;;  %v9165_v44 = vstv %s8866_s7  ;;  %v9166_v49 = vstv %s8870_s11  ;;  %s9176_s7 = sld [smem:[#allocation161_spill]]  ;;  %s9181_s11 = sld [smem:[#allocation163_spill]] }
 0x195   : > { %v1728_v38 = vmul.f32 %v9163_v24, %v5585_v58  ;;  %v1734_v56 = vmul.f32 %v9165_v44, %v5617_v18  ;;  %v1740_v48 = vmul.f32 %v9166_v49, %v5651_v13  ;;  %v9167_v4 = vmov %v9162_v10  ;;  %1677 = vrot.lane.b32.xlu1 %v1672_v62, %s9127_s22  ;;  %s6762_s19 = sld [smem:[#allocation7 + $0xb6]] }
 0x196   : > { %v1671_v27 = vadd.f32 %v9167_v4, %v1667_v1  ;;  %v1698_v31 = vadd.f32 %v1696_v63, %v1692_v29  ;;  %v9169_v0 = vmov %v9161_v39  ;;  %v9171_v33 = vmov %v9163_v24 }
 0x197   : > { %v1723_v61 = vmul.f32 %v9169_v0, %v5554_v3  ;;  %v1727_v15 = vmul.f32 %v9171_v33, %v5551_v6  ;;  %v1705_v35 = vadd.f32 %v1703_v34, %v1699_v28  ;;  %v1730_v46 = vadd.f32 %v1728_v38, %v1724_v40 }
 0x198   : > { %v9172_v45 = vmov %v9165_v44  ;;  %v9173_v21 = vmov %v9166_v49  ;;  %1675 = vrot.lane.b32.xlu0 %v1671_v27, %s9127_s22  ;;  %v1704_v14 = vadd.f32 %v1702_v37, %v1698_v31  ;;  %v9174_v26 = vstv %s9164_s26  ;;  %s6770_s26 = sld [smem:[#allocation7 + $0xb7]] }
 0x199   : > { %v1733_v50 = vmul.f32 %v9172_v45, %v5620_v19  ;;  %v1739_v22 = vmul.f32 %v9173_v21, %v5654_v20  ;;  %v1729_v9 = vadd.f32 %v1727_v15, %v1723_v61  ;;  %v1760_v34 = vmul.f32 %v9174_v26, %v5588_v55 }
 0x19a   : > { %v2063_v8 = vstv %s6330_s13  ;;  %v9175_v63 = vstv %s9168_s29  ;;  %v1736_v39 = vadd.f32 %v1734_v56, %v1730_v46  ;;  %v9177_v40 = vstv %s9170_s20  ;;  %s9234_s29 = sld [smem:[#allocation41_spill]]  ;;  %s6717_s13 = sld [smem:[#allocation7 + $0xb0]] }
 0x19b   : > { %v1709_v59 = vadd.f32 %v9175_v63, %v1705_v35  ;;  %v1764_v10 = vmul.f32 %v9177_v40, %v5585_v58  ;;  %v9178_v62 = vstv %s8871_s5  ;;  %v9179_v1 = vmov %v9175_v63  ;;  %s9188_s5 = sld [smem:[#allocation166_spill]]  ;;  %s6774_s20 = sld [smem:[#allocation8 + $0x2d]] }
 0x19c   : > { %v1770_v37 = vmul.f32 %v9178_v62, %v5617_v18  ;;  %v1708_v29 = vadd.f32 %v9179_v1, %v1704_v14  ;;  %v1735_v28 = vadd.f32 %v1733_v50, %v1729_v9  ;;  %v9180_v24 = vstv %s5472_s12  ;;  %s9195_s12 = sld [smem:[#allocation167_spill]] }
 0x19d   : > { %v1776_v38 = vmul.f32 %v9180_v24, %v5651_v13  ;;  %v9182_v44 = vmov %v9174_v26  ;;  %v1742_v56 = vadd.f32 %v1740_v48, %v1736_v39  ;;  %v1766_v4 = vadd.f32 %v1764_v10, %v1760_v34  ;;  %1714 = vrot.lane.b32.xlu1 %v1709_v59, %s9127_s22 }
 0x19e   : > { %v1759_v49 = vmul.f32 %v9182_v44, %v5554_v3  ;;  %v9183_v27 = vmov %v9177_v40  ;;  %v9184_v0 = vmov %v9178_v62  ;;  %1712 = vrot.lane.b32.xlu0 %v1708_v29, %s9127_s22  ;;  %v1741_v33 = vadd.f32 %v1739_v22, %v1735_v28  ;;  %s6617_s22 = sld [smem:[#allocation7 + $0xa8]] }
 0x19f   : > { %v1763_v31 = vmul.f32 %v9183_v27, %v5551_v6  ;;  %v1769_v61 = vmul.f32 %v9184_v0, %v5620_v19  ;;  %v9185_v15 = vmov %v9180_v24  ;;  %v9186_v48 = vstv %s9176_s7  ;;  %s6782_s7 = sld [smem:[#allocation7 + $0xb8]] }
 0x1a0   : > { %v1775_v35 = vmul.f32 %v9185_v15, %v5654_v20  ;;  %v1797_v46 = vmul.f32 %v9186_v48, %v5588_v55  ;;  %v2069_v45 = vstv %s6363_s1  ;;  %v9187_v50 = vstv %s5470_s3  ;;  %s4861_s3 = smov 124   ;;  %s4862_s1 = smov 123  }
 0x1a1   : > { %v1746_v21 = vadd.f32 %v9187_v50, %v1742_v56  ;;  %v1772_v14 = vadd.f32 %v1770_v37, %v1766_v4  ;;  %v1765_v9 = vadd.f32 %v1763_v31, %v1759_v49  ;;  %v9189_v26 = vstv %s9181_s11  ;;  %s6784_s11 = sld [smem:[#allocation7 + $0xb9]] }
 0x1a2   : > { %v1801_v34 = vmul.f32 %v9189_v26, %v5585_v58  ;;  %v9190_v63 = vmov %v9187_v50  ;;  %v9192_v59 = vstv %s5478_s9  ;;  %v9193_v40 = vstv %s5494_s23  ;;  %s9205_s9 = sld [smem:[#allocation170_spill]]  ;;  %s9208_s23 = sld [smem:[#allocation164_spill]] }
 0x1a3   : > { %v1745_v22 = vadd.f32 %v9190_v63, %v1741_v33  ;;  %v1807_v39 = vmul.f32 %v9192_v59, %v5617_v18  ;;  %v1813_v10 = vmul.f32 %v9193_v40, %v5651_v13  ;;  %v9194_v62 = vmov %v9186_v48  ;;  %1751 = vrot.lane.b32.xlu1 %v1746_v21, %s4861_s3 }
 0x1a4   : > { %v1796_v1 = vmul.f32 %v9194_v62, %v5554_v3  ;;  %v1778_v37 = vadd.f32 %v1776_v38, %v1772_v14  ;;  %v1771_v29 = vadd.f32 %v1769_v61, %v1765_v9  ;;  %v1803_v28 = vadd.f32 %v1801_v34, %v1797_v46 }
 0x1a5   : > { %v9196_v24 = vmov %v9189_v26  ;;  %1749 = vrot.lane.b32.xlu0 %v1745_v22, %s4861_s3  ;;  %v9197_v49 = vmov %v9192_v59  ;;  %v9198_v38 = vmov %v9193_v40  ;;  %v9199_v27 = vstv %s9188_s5  ;;  %s6565_s5 = sshll.u32 %s9234_s29, 7 }
 0x1a6   : > { %v1800_v44 = vmul.f32 %v9196_v24, %v5551_v6  ;;  %v1806_v56 = vmul.f32 %v9197_v49, %v5620_v19  ;;  %v1812_v4 = vmul.f32 %v9198_v38, %v5654_v20  ;;  %v1834_v31 = vmul.f32 %v9199_v27, %v5588_v55  ;;  %9241 = sst [smem:[#allocation60_spill]] %s6565_s5 }
 0x1a7   : > { %v2075_v0 = vstv %s6394_s25  ;;  %v9200_v61 = vstv %s9191_s10  ;;  %v1777_v15 = vadd.f32 %v1775_v35, %v1771_v29  ;;  %v1809_v48 = vadd.f32 %v1807_v39, %v1803_v28  ;;  %s6754_s25 = sld [smem:[#allocation7 + $0xb4]]  ;;  %s6794_s10 = sld [smem:[#allocation7 + $0xba]] }
 0x1a8   : > { %v1782_v33 = vadd.f32 %v9200_v61, %v1778_v37  ;;  %v1802_v46 = vadd.f32 %v1800_v44, %v1796_v1  ;;  %v9202_v50 = vstv %s9195_s12  ;;  %v9203_v14 = vstv %s5496_s0  ;;  %s9218_s0 = sld [smem:[#allocation156_spill]]  ;;  %s6798_s12 = sld [smem:[#allocation7 + $0xbb]] }
 0x1a9   : > { %v1838_v21 = vmul.f32 %v9202_v50, %v5585_v58  ;;  %v1844_v9 = vmul.f32 %v9203_v14, %v5617_v18  ;;  %v9204_v26 = vstv %s5512_s4  ;;  %v9206_v63 = vmov %v9199_v27  ;;  %s6636_s4 = sld [smem:[#allocation7 + $0xaa]] }
 0x1aa   : > { %v1850_v34 = vmul.f32 %v9204_v26, %v5651_v13  ;;  %v1833_v22 = vmul.f32 %v9206_v63, %v5554_v3  ;;  %v9207_v59 = vmov %v9200_v61  ;;  %v1815_v35 = vadd.f32 %v1813_v10, %v1809_v48  ;;  %1787 = vrot.lane.b32.xlu1 %v1782_v33, %s4861_s3 }
 0x1ab   : > { %v1781_v40 = vadd.f32 %v9207_v59, %v1777_v15  ;;  %v1808_v39 = vadd.f32 %v1806_v56, %v1802_v46  ;;  %v9210_v62 = vmov %v9202_v50  ;;  %v1840_v37 = vadd.f32 %v1838_v21, %v1834_v31 }
 0x1ac   : > { %v1837_v1 = vmul.f32 %v9210_v62, %v5551_v6  ;;  %v9211_v29 = vmov %v9203_v14  ;;  %v9212_v24 = vmov %v9204_v26  ;;  %v9213_v49 = vstv %s8876_s21  ;;  %s9227_s21 = sld [smem:[#allocation165_spill]] }
 0x1ad   : > { %v1843_v28 = vmul.f32 %v9211_v29, %v5620_v19  ;;  %v1849_v44 = vmul.f32 %v9212_v24, %v5654_v20  ;;  %v1871_v38 = vmul.f32 %v9213_v49, %v5588_v55  ;;  %1785 = vrot.lane.b32.xlu0 %v1781_v40, %s4861_s3  ;;  %v9214_v10 = vstv %s9201_s28  ;;  %s6800_s28 = sld [smem:[#allocation8 + $0x2e]] }
 0x1ae   : > { %v1819_v56 = vadd.f32 %v9214_v10, %v1815_v35  ;;  %v1814_v27 = vadd.f32 %v1812_v4, %v1808_v39  ;;  %v1839_v61 = vadd.f32 %v1837_v1, %v1833_v22  ;;  %v9216_v31 = vstv %s9205_s9  ;;  %s6814_s9 = sld [smem:[#allocation7 + $0xbc]] }
 0x1af   : > { %v1875_v33 = vmul.f32 %v9216_v31, %v5585_v58  ;;  %v1846_v15 = vadd.f32 %v1844_v9, %v1840_v37  ;;  %v9217_v48 = vstv %s9208_s23  ;;  %v1887_v50 = vmul.f32 %v1885_v2, %v5651_v13  ;;  %s6596_s23 = scalar_lea.vmem [#allocation10], %s6565_s5 }
 0x1b0   : > { %v1881_v46 = vmul.f32 %v9217_v48, %v5617_v18  ;;  %v9219_v21 = vmov %v9213_v49  ;;  %v9221_v26 = vmov %v9214_v10  ;;  %v1845_v4 = vadd.f32 %v1843_v28, %v1839_v61  ;;  %1824 = vrot.lane.b32.xlu1 %v1819_v56, %s4861_s3 }
 0x1b1   : > { %v1870_v14 = vmul.f32 %v9219_v21, %v5554_v3  ;;  %v1818_v63 = vadd.f32 %v9221_v26, %v1814_v27  ;;  %v1877_v22 = vadd.f32 %v1875_v33, %v1871_v38  ;;  %v9224_v59 = vmov %v9216_v31 }
 0x1b2   : > { %v1874_v9 = vmul.f32 %v9224_v59, %v5551_v6  ;;  %v1852_v40 = vadd.f32 %v1850_v34, %v1846_v15  ;;  %v9225_v35 = vmov %v9217_v48  ;;  %v1886_v62 = vmul.f32 %v1885_v2, %v5654_v20 }
 0x1b3   : > { %v1880_v39 = vmul.f32 %v9225_v35, %v5620_v19  ;;  %v9226_v1 = vstv %s9215_s27  ;;  %1822 = vrot.lane.b32.xlu0 %v1818_v63, %s4861_s3  ;;  %v1851_v29 = vadd.f32 %v1849_v44, %v1845_v4  ;;  %v1883_v28 = vadd.f32 %v1881_v46, %v1877_v22  ;;  %s6621_s27 = sld [smem:[#allocation7 + $0xa9]] }
 0x1b4   : > { %v1908_v37 = vmul.f32 %v9226_v1, %v5588_v55  ;;  %v1876_v24 = vadd.f32 %v1874_v9, %v1870_v14  ;;  %v9228_v34 = vstv %s9218_s0  ;;  %v1856_v38 = vadd.f32 %v1854_v11, %v1852_v40  ;;  %s6829_s0 = sld [smem:[#allocation7 + $0xbf]] }
 0x1b5   : > { %v1912_v49 = vmul.f32 %v9228_v34, %v5585_v58  ;;  %v1918_v2 = vmul.f32 %v1916_v60, %v5617_v18  ;;  %v1924_v10 = vmul.f32 %v1922_v36, %v5651_v13  ;;  %v9231_v44 = vmov %v9226_v1 }
 0x1b6   : > { %v1907_v56 = vmul.f32 %v9231_v44, %v5554_v3  ;;  %v1855_v27 = vadd.f32 %v1854_v11, %v1851_v29  ;;  %v1889_v61 = vadd.f32 %v1887_v50, %v1883_v28  ;;  %v1882_v31 = vadd.f32 %v1880_v39, %v1876_v24  ;;  %1861 = vrot.lane.b32.xlu1 %v1856_v38, %s4861_s3 }
 0x1b7   : > { %v1914_v33 = vadd.f32 %v1912_v49, %v1908_v37  ;;  %v9235_v15 = vmov %v9228_v34  ;;  %v1917_v46 = vmul.f32 %v1916_v60, %v5620_v19  ;;  %v1923_v21 = vmul.f32 %v1922_v36, %v5654_v20  ;;  %v867_v49 = vpop.permute.xlu1 %866 }
 0x1b8   : > { %v1911_v48 = vmul.f32 %v9235_v15, %v5551_v6  ;;  %v9236_v11 = vstv %s9227_s21  ;;  %1859 = vrot.lane.b32.xlu0 %v1855_v27, %s4861_s3  ;;  %v1893_v14 = vadd.f32 %v1891_v25, %v1889_v61  ;;  %v1888_v26 = vadd.f32 %v1886_v62, %v1882_v31  ;;  %871 = vst.msk [vmem:[%s6596_s23 + $0x8] sm:$0xff] %vm630_vm2, %v867_v49  ;;  %s6731_s21 = sld [smem:[#allocation7 + $0xb3]] }
 0x1b9   : > { %v1945_v50 = vmul.f32 %v9236_v11, %v5588_v55  ;;  %v1920_v63 = vadd.f32 %v1918_v2, %v1914_v33  ;;  %v1949_v4 = vmul.f32 %v1947_v53, %v5585_v58  ;;  %v1955_v36 = vmul.f32 %v1953_v54, %v5617_v18 }
 0x1ba   : > { %v1913_v60 = vadd.f32 %v1911_v48, %v1907_v56  ;;  %v1961_v22 = vmul.f32 %v1959_v30, %v5651_v13  ;;  %v9239_v59 = vmov %v9236_v11  ;;  %v1892_v40 = vadd.f32 %v1891_v25, %v1888_v26  ;;  %1898 = vrot.lane.b32.xlu1 %v1893_v14, %s4861_s3 }
 0x1bb   : > { %v1944_v9 = vmul.f32 %v9239_v59, %v5554_v3  ;;  %v1926_v35 = vadd.f32 %v1924_v10, %v1920_v63  ;;  %v1951_v39 = vadd.f32 %v1949_v4, %v1945_v50  ;;  %v1948_v62 = vmul.f32 %v1947_v53, %v5551_v6 }
 0x1bc   : > { %v1919_v1 = vadd.f32 %v1917_v46, %v1913_v60  ;;  %v1954_v37 = vmul.f32 %v1953_v54, %v5620_v19  ;;  %v1960_v25 = vmul.f32 %v1959_v30, %v5654_v20  ;;  %v1982_v29 = vmul.f32 %v1980_v43, %v5588_v55  ;;  %1896 = vrot.lane.b32.xlu0 %v1892_v40, %s4861_s3  ;;  %v865_v54 = vpop.permute.xlu0 %864 }
 0x1bd   : > { %v1930_v28 = vadd.f32 %v1928_v52, %v1926_v35  ;;  %v1957_v53 = vadd.f32 %v1955_v36, %v1951_v39  ;;  %v1950_v24 = vadd.f32 %v1948_v62, %v1944_v9  ;;  %v1986_v34 = vmul.f32 %v1984_v12, %v5585_v58  ;;  %870 = vst.msk [vmem:[%s6596_s23] sm:$0xff] %vm630_vm2, %v865_v54 }
 0x1be   : > { %v1925_v30 = vadd.f32 %v1923_v21, %v1919_v1  ;;  %v1992_v38 = vmul.f32 %v1990_v42, %v5617_v18  ;;  %v1998_v2 = vmul.f32 %v1996_v32, %v5651_v13  ;;  %v1981_v10 = vmul.f32 %v1980_v43, %v5554_v3 }
 0x1bf   : > { %v1963_v44 = vadd.f32 %v1961_v22, %v1957_v53  ;;  %v1956_v56 = vadd.f32 %v1954_v37, %v1950_v24  ;;  %v1988_v27 = vadd.f32 %v1986_v34, %v1982_v29  ;;  %v1985_v61 = vmul.f32 %v1984_v12, %v5551_v6  ;;  %1935 = vrot.lane.b32.xlu1 %v1930_v28, %s4861_s3 }
 0x1c0   : > { %v1929_v43 = vadd.f32 %v1928_v52, %v1925_v30  ;;  %v1991_v31 = vmul.f32 %v1990_v42, %v5620_v19  ;;  %v1997_v33 = vmul.f32 %v1996_v32, %v5654_v20  ;;  %v2019_v15 = vmul.f32 %v2017_v41, %v5588_v55  ;;  %v903_v42 = vpop.permute.xlu1 %902  ;;  %v901_v32 = vpop.permute.xlu0 %900 }
 0x1c1   : > { %v1967_v12 = vadd.f32 %v1965_v47, %v1963_v44  ;;  %v1962_v48 = vadd.f32 %v1960_v25, %v1956_v56  ;;  %v1994_v46 = vadd.f32 %v1992_v38, %v1988_v27  ;;  %v1987_v52 = vadd.f32 %v1985_v61, %v1981_v10  ;;  %3866 = vst.msk [vmem:[%s6596_s23 + $0x18] sm:$0xff] %vm630_vm2, %v903_v42 }
 0x1c2   : > { %1933 = vrot.lane.b32.xlu0 %v1929_v43, %s4861_s3  ;;  %v2023_v21 = vmul.f32 %v2021_v17, %v5585_v58  ;;  %v2029_v11 = vmul.f32 %v2027_v23, %v5617_v18  ;;  %v2035_v50 = vmul.f32 %v2033_v57, %v5651_v13  ;;  %v2018_v14 = vmul.f32 %v2017_v41, %v5554_v3 }
 0x1c3   : > { %3865 = vst.msk [vmem:[%s6596_s23 + $0x10] sm:$0xff] %vm630_vm2, %v901_v32  ;;  %v1966_v26 = vadd.f32 %v1965_v47, %v1962_v48  ;;  %v2000_v63 = vadd.f32 %v1998_v2, %v1994_v46  ;;  %v1993_v4 = vadd.f32 %v1991_v31, %v1987_v52  ;;  %v2022_v60 = vmul.f32 %v2021_v17, %v5551_v6 }
 0x1c4   : > { %1972 = vrot.lane.b32.xlu1 %v1967_v12, %s4861_s3  ;;  %v2025_v41 = vadd.f32 %v2023_v21, %v2019_v15  ;;  %v2028_v36 = vmul.f32 %v2027_v23, %v5620_v19  ;;  %v2034_v22 = vmul.f32 %v2033_v57, %v5654_v20  ;;  %v2055_v47 = vmul.f32 %v2053_v16, %v5588_v55  ;;  %v940_v23 = vpop.permute.xlu1 %939  ;;  %v938_v57 = vpop.permute.xlu0 %937 }
 0x1c5   : > { %v2004_v17 = vadd.f32 %v2002_v51, %v2000_v63  ;;  %v1999_v59 = vadd.f32 %v1997_v33, %v1993_v4  ;;  %v2024_v9 = vadd.f32 %v2022_v60, %v2018_v14  ;;  %v2059_v40 = vmul.f32 %v2057_v5, %v5585_v58  ;;  %3873 = vst.msk [vmem:[%s6596_s23 + $0x28] sm:$0xff] %vm630_vm2, %v940_v23 }
 0x1c6   : > { %1970 = vrot.lane.b32.xlu0 %v1966_v26, %s4861_s3  ;;  %v2031_v35 = vadd.f32 %v2029_v11, %v2025_v41  ;;  %v2065_v39 = vmul.f32 %v2063_v8, %v5617_v18  ;;  %v2071_v62 = vmul.f32 %v2069_v45, %v5651_v13  ;;  %v2054_v1 = vmul.f32 %v2053_v16, %v5554_v3 }
 0x1c7   : > { %3872 = vst.msk [vmem:[%s6596_s23 + $0x20] sm:$0xff] %vm630_vm2, %v938_v57  ;;  %v2003_v37 = vadd.f32 %v2002_v51, %v1999_v59  ;;  %v2030_v25 = vadd.f32 %v2028_v36, %v2024_v9  ;;  %v2061_v29 = vadd.f32 %v2059_v40, %v2055_v47  ;;  %v2058_v28 = vmul.f32 %v2057_v5, %v5551_v6 }
 0x1c8   : > { %2009 = vrot.lane.b32.xlu1 %v2004_v17, %s4861_s3  ;;  %v2037_v16 = vadd.f32 %v2035_v50, %v2031_v35  ;;  %v2064_v53 = vmul.f32 %v2063_v8, %v5620_v19  ;;  %v2070_v51 = vmul.f32 %v2069_v45, %v5654_v20  ;;  %v2090_v24 = vstv %s6617_s22  ;;  %v977_v30 = vpop.permute.xlu1 %976  ;;  %v975_v8 = vpop.permute.xlu0 %974  ;;  %s6816_s22 = sld [smem:[#allocation7 + $0xbd]] }
 0x1c9   : > { %v2036_v5 = vadd.f32 %v2034_v22, %v2030_v25  ;;  %v2067_v34 = vadd.f32 %v2065_v39, %v2061_v29  ;;  %v2060_v49 = vadd.f32 %v2058_v28, %v2054_v1  ;;  %v2092_v54 = vmul.f32 %v2090_v24, %v5588_v55  ;;  %3880 = vst.msk [vmem:[%s6596_s23 + $0x38] sm:$0xff] %vm630_vm2, %v977_v30 }
 0x1ca   : > { %2007 = vrot.lane.b32.xlu0 %v2003_v37, %s4861_s3  ;;  %v2041_v38 = vadd.f32 %v2039_v7, %v2037_v16  ;;  %v2094_v45 = vstv %s6621_s27  ;;  %v2100_v2 = vstv %s6636_s4  ;;  %v2106_v10 = vstv %s6638_s15  ;;  %s6729_s3 = sld [smem:[#allocation7 + $0xb2]]  ;;  %s6822_s27 = sld [smem:[#allocation7 + $0xbe]] }
 0x1cb   : > { %3879 = vst.msk [vmem:[%s6596_s23 + $0x30] sm:$0xff] %vm630_vm2, %v975_v8  ;;  %v2040_v44 = vadd.f32 %v2039_v7, %v2036_v5  ;;  %v2073_v56 = vadd.f32 %v2071_v62, %v2067_v34  ;;  %v2066_v27 = vadd.f32 %v2064_v53, %v2060_v49  ;;  %v2096_v61 = vmul.f32 %v2094_v45, %v5585_v58  ;;  %s6831_s4 = sld [smem:[#allocation8 + $0x2f]]  ;;  %s6835_s15 = scalar_lea.vmem [#allocation12], %s6565_s5 }
 0x1cc   : > { %2046 = vrot.lane.b32.xlu1 %v2041_v38, %s4862_s1  ;;  %v2102_v43 = vmul.f32 %v2100_v2, %v5617_v18  ;;  %v2108_v31 = vmul.f32 %v2106_v10, %v5651_v13  ;;  %v2112_v33 = vstv %s6659_s2  ;;  %v2091_v15 = vmul.f32 %v2090_v24, %v5554_v3  ;;  %v1014_v52 = vpop.permute.xlu1 %1013  ;;  %v1012_v42 = vpop.permute.xlu0 %1011  ;;  %9247 = sst [smem:[#allocation46_spill]] %s6835_s15 }
 0x1cd   : > { %v2077_v7 = vadd.f32 %v2075_v0, %v2073_v56  ;;  %v2072_v12 = vadd.f32 %v2070_v51, %v2066_v27  ;;  %v2098_v48 = vadd.f32 %v2096_v61, %v2092_v54  ;;  %v2095_v46 = vmul.f32 %v2094_v45, %v5551_v6  ;;  %3887 = vst.msk [vmem:[%s6596_s23 + $0x48] sm:$0xff] %vm630_vm2, %v1014_v52  ;;  %s6846_s2 = sld [smem:[#allocation7 + $0xc0]] }
 0x1ce   : > { %2044 = vrot.lane.b32.xlu0 %v2040_v44, %s4862_s1  ;;  %v2101_v32 = vmul.f32 %v2100_v2, %v5620_v19  ;;  %v2107_v21 = vmul.f32 %v2106_v10, %v5654_v20  ;;  %v2127_v11 = vstv %s6676_s8  ;;  %v2131_v50 = vstv %s6678_s16  ;;  %3886 = vst.msk [vmem:[%s6596_s23 + $0x40] sm:$0xff] %vm630_vm2, %v1012_v42  ;;  %s6851_s8 = sld [smem:[#allocation7 + $0xc1]]  ;;  %s6856_s16 = sld [smem:[#allocation7 + $0xc2]] }
 0x1cf   : > { %v2076_v14 = vadd.f32 %v2075_v0, %v2072_v12  ;;  %v2104_v26 = vadd.f32 %v2102_v43, %v2098_v48  ;;  %v2097_v63 = vadd.f32 %v2095_v46, %v2091_v15  ;;  %v2129_v4 = vmul.f32 %v2127_v11, %v5588_v55 }
 0x1d0   : > { %2082 = vrot.lane.b32.xlu1 %v2077_v7, %s4862_s1  ;;  %v2133_v60 = vmul.f32 %v2131_v50, %v5585_v58  ;;  %v2137_v41 = vstv %s6689_s24  ;;  %v2143_v36 = vstv %s6699_s14  ;;  %v2149_v22 = vstv %s6701_s6  ;;  %v1051_v9 = vpop.permute.xlu1 %1050  ;;  %v1049_v40 = vpop.permute.xlu0 %1048  ;;  %s6858_s24 = sld [smem:[#allocation7 + $0xc3]]  ;;  %s6870_s14 = sld [smem:[#allocation8 + $0x30]] }
 0x1d1   : > { %v2110_v47 = vadd.f32 %v2108_v31, %v2104_v26  ;;  %v2103_v17 = vadd.f32 %v2101_v32, %v2097_v63  ;;  %v2139_v59 = vmul.f32 %v2137_v41, %v5617_v18  ;;  %v2145_v0 = vmul.f32 %v2143_v36, %v5651_v13  ;;  %3894 = vst.msk [vmem:[%s6596_s23 + $0x58] sm:$0xff] %vm630_vm2, %v1051_v9  ;;  %s6877_s6 = sld [smem:[#allocation7 + $0xc4]] }
 0x1d2   : > { %2080 = vrot.lane.b32.xlu0 %v2076_v14, %s4862_s1  ;;  %v2135_v23 = vadd.f32 %v2133_v60, %v2129_v4  ;;  %v2128_v57 = vmul.f32 %v2127_v11, %v5554_v3  ;;  %v2132_v35 = vmul.f32 %v2131_v50, %v5551_v6  ;;  %v2138_v39 = vmul.f32 %v2137_v41, %v5620_v19 }
 0x1d3   : > { %3893 = vst.msk [vmem:[%s6596_s23 + $0x50] sm:$0xff] %vm630_vm2, %v1049_v40  ;;  %v2114_v62 = vadd.f32 %v2112_v33, %v2110_v47  ;;  %v2109_v1 = vadd.f32 %v2107_v21, %v2103_v17  ;;  %v2144_v37 = vmul.f32 %v2143_v36, %v5654_v20  ;;  %v2164_v25 = vstv %s6717_s13  ;;  %s6879_s13 = sld [smem:[#allocation7 + $0xc5]] }
 0x1d4   : > { %v2141_v29 = vadd.f32 %v2139_v59, %v2135_v23  ;;  %v2134_v28 = vadd.f32 %v2132_v35, %v2128_v57  ;;  %v2166_v16 = vmul.f32 %v2164_v25, %v5588_v55  ;;  %v2168_v53 = vstv %s6724_s18  ;;  %v1088_v49 = vpop.permute.xlu1 %1087  ;;  %v1086_v54 = vpop.permute.xlu0 %1085  ;;  %s6888_s18 = sld [smem:[#allocation7 + $0xc6]] }
 0x1d5   : > { %2119 = vrot.lane.b32.xlu1 %v2114_v62, %s4862_s1  ;;  %v2113_v51 = vadd.f32 %v2112_v33, %v2109_v1  ;;  %v2170_v24 = vmul.f32 %v2168_v53, %v5585_v58  ;;  %v2174_v5 = vstv %s6729_s3  ;;  %v2180_v34 = vstv %s6731_s21  ;;  %3901 = vst.msk [vmem:[%s6596_s23 + $0x68] sm:$0xff] %vm630_vm2, %v1088_v49  ;;  %s6893_s3 = sld [smem:[#allocation7 + $0xc7]]  ;;  %s6898_s21 = sld [smem:[#allocation8 + $0x31]] }
 0x1d6   : > { %v2147_v30 = vadd.f32 %v2145_v0, %v2141_v29  ;;  %v2140_v8 = vadd.f32 %v2138_v39, %v2134_v28  ;;  %v2176_v38 = vmul.f32 %v2174_v5, %v5617_v18  ;;  %v2182_v45 = vmul.f32 %v2180_v34, %v5651_v13  ;;  %3900 = vst.msk [vmem:[%s6596_s23 + $0x60] sm:$0xff] %vm630_vm2, %v1086_v54 }
 0x1d7   : > { %2117 = vrot.lane.b32.xlu0 %v2113_v51, %s4862_s1  ;;  %v2172_v2 = vadd.f32 %v2170_v24, %v2166_v16  ;;  %v2186_v10 = vstv %s6745_s17  ;;  %v2165_v44 = vmul.f32 %v2164_v25, %v5554_v3  ;;  %v2169_v56 = vmul.f32 %v2168_v53, %v5551_v6  ;;  %s6909_s17 = sld [smem:[#allocation7 + $0xc8]] }
 0x1d8   : > { %v2151_v27 = vadd.f32 %v2149_v22, %v2147_v30  ;;  %v2146_v61 = vadd.f32 %v2144_v37, %v2140_v8  ;;  %v2175_v43 = vmul.f32 %v2174_v5, %v5620_v19  ;;  %v2181_v31 = vmul.f32 %v2180_v34, %v5654_v20  ;;  %v1125_v46 = vpop.permute.xlu1 %1124  ;;  %v1123_v52 = vpop.permute.xlu0 %1122 }
 0x1d9   : > { %v2178_v33 = vadd.f32 %v2176_v38, %v2172_v2  ;;  %v2171_v15 = vadd.f32 %v2169_v56, %v2165_v44  ;;  %v2201_v7 = vstv %s6754_s25  ;;  %v2205_v12 = vstv %s6756_s30  ;;  %3908 = vst.msk [vmem:[%s6596_s23 + $0x78] sm:$0xff] %vm630_vm2, %v1125_v46  ;;  %3907 = vst.msk [vmem:[%s6596_s23 + $0x70] sm:$0xff] %vm630_vm2, %v1123_v52  ;;  %s6911_s25 = sld [smem:[#allocation7 + $0xc9]]  ;;  %s6917_s30 = sld [smem:[#allocation7 + $0xca]] }
 0x1da   : > { %2156 = vrot.lane.b32.xlu1 %v2151_v27, %s4862_s1  ;;  %v2150_v48 = vadd.f32 %v2149_v22, %v2146_v61  ;;  %v2203_v42 = vmul.f32 %v2201_v7, %v5588_v55  ;;  %v2207_v32 = vmul.f32 %v2205_v12, %v5585_v58  ;;  %v2211_v21 = vstv %s6762_s19  ;;  %s6921_s19 = sld [smem:[#allocation7 + $0xcb]] }
 0x1db   : > { %v2184_v11 = vadd.f32 %v2182_v45, %v2178_v33  ;;  %v2177_v50 = vadd.f32 %v2175_v43, %v2171_v15  ;;  %v2213_v14 = vmul.f32 %v2211_v21, %v5617_v18  ;;  %v2217_v26 = vstv %s6770_s26  ;;  %s6923_s26 = sld [smem:[#allocation8 + $0x32]] }
 0x1dc   : > { %2154 = vrot.lane.b32.xlu0 %v2150_v48, %s4862_s1  ;;  %v2209_v63 = vadd.f32 %v2207_v32, %v2203_v42  ;;  %v2219_v4 = vmul.f32 %v2217_v26, %v5651_v13  ;;  %v2223_v60 = vstv %s6774_s20  ;;  %v2202_v41 = vmul.f32 %v2201_v7, %v5554_v3  ;;  %v1162_v59 = vpop.permute.xlu1 %1161  ;;  %v1160_v0 = vpop.permute.xlu0 %1159  ;;  %s6937_s20 = sld [smem:[#allocation7 + $0xcc]] }
 0x1dd   : > { %v2188_v36 = vadd.f32 %v2186_v10, %v2184_v11  ;;  %v2183_v22 = vadd.f32 %v2181_v31, %v2177_v50  ;;  %v2206_v47 = vmul.f32 %v2205_v12, %v5551_v6  ;;  %v2212_v17 = vmul.f32 %v2211_v21, %v5620_v19  ;;  %1166 = vst.msk [vmem:[%s6835_s15 + $0x8] sm:$0xff] %vm630_vm2, %v1162_v59 }
 0x1de   : > { %v2215_v9 = vadd.f32 %v2213_v14, %v2209_v63  ;;  %v2218_v40 = vmul.f32 %v2217_v26, %v5654_v20  ;;  %v2238_v23 = vstv %s6782_s7  ;;  %v2242_v57 = vstv %s6784_s11  ;;  %1165 = vst.msk [vmem:[%s6835_s15] sm:$0xff] %vm630_vm2, %v1160_v0  ;;  %s6943_s7 = sld [smem:[#allocation7 + $0xcd]]  ;;  %s6945_s11 = sld [smem:[#allocation7 + $0xce]] }
 0x1df   : > { %2193 = vrot.lane.b32.xlu1 %v2188_v36, %s4862_s1  ;;  %v2187_v35 = vadd.f32 %v2186_v10, %v2183_v22  ;;  %v2208_v39 = vadd.f32 %v2206_v47, %v2202_v41  ;;  %v2240_v62 = vmul.f32 %v2238_v23, %v5588_v55  ;;  %v2244_v1 = vmul.f32 %v2242_v57, %v5585_v58 }
 0x1e0   : > { %v2221_v37 = vadd.f32 %v2219_v4, %v2215_v9  ;;  %v2248_v25 = vstv %s6794_s10  ;;  %v2254_v29 = vstv %s6798_s12  ;;  %v2260_v28 = vstv %s6800_s28  ;;  %v1198_v34 = vpop.permute.xlu1 %1197  ;;  %v1196_v49 = vpop.permute.xlu0 %1195  ;;  %s6958_s10 = sld [smem:[#allocation8 + $0x33]]  ;;  %s4863_s12 = smov 122  }
 0x1e1   : > { %2191 = vrot.lane.b32.xlu0 %v2187_v35, %s4862_s1  ;;  %v2214_v16 = vadd.f32 %v2212_v17, %v2208_v39  ;;  %v2246_v53 = vadd.f32 %v2244_v1, %v2240_v62  ;;  %v2250_v51 = vmul.f32 %v2248_v25, %v5617_v18  ;;  %v2256_v24 = vmul.f32 %v2254_v29, %v5651_v13  ;;  %s6966_s28 = sld [smem:[#allocation7 + $0xd0]] }
 0x1e2   : > { %v2225_v5 = vadd.f32 %v2223_v60, %v2221_v37  ;;  %v2239_v54 = vmul.f32 %v2238_v23, %v5554_v3  ;;  %v2243_v30 = vmul.f32 %v2242_v57, %v5551_v6  ;;  %v2249_v8 = vmul.f32 %v2248_v25, %v5620_v19  ;;  %3920 = vst.msk [vmem:[%s6835_s15 + $0x18] sm:$0xff] %vm630_vm2, %v1198_v34 }
 0x1e3   : > { %v2220_v38 = vadd.f32 %v2218_v40, %v2214_v16  ;;  %3919 = vst.msk [vmem:[%s6835_s15 + $0x10] sm:$0xff] %vm630_vm2, %v1196_v49  ;;  %v2252_v45 = vadd.f32 %v2250_v51, %v2246_v53  ;;  %v2255_v2 = vmul.f32 %v2254_v29, %v5654_v20  ;;  %v2275_v10 = vstv %s6814_s9  ;;  %s6971_s9 = sld [smem:[#allocation7 + $0xd1]] }
 0x1e4   : > { %2230 = vrot.lane.b32.xlu1 %v2225_v5, %s4862_s1  ;;  %v2245_v44 = vadd.f32 %v2243_v30, %v2239_v54  ;;  %v2277_v56 = vmul.f32 %v2275_v10, %v5588_v55  ;;  %v2279_v27 = vstv %s6816_s22  ;;  %v2285_v61 = vstv %s6822_s27  ;;  %v1235_v12 = vpop.permute.xlu1 %1234  ;;  %v1233_v48 = vpop.permute.xlu0 %1232  ;;  %s6980_s22 = sld [smem:[#allocation7 + $0xd2]]  ;;  %s6982_s27 = sld [smem:[#allocation7 + $0xd3]] }
 0x1e5   : > { %v2224_v43 = vadd.f32 %v2223_v60, %v2220_v38  ;;  %v2258_v31 = vadd.f32 %v2256_v24, %v2252_v45  ;;  %v2281_v33 = vmul.f32 %v2279_v27, %v5585_v58  ;;  %v2287_v15 = vmul.f32 %v2285_v61, %v5617_v18  ;;  %3927 = vst.msk [vmem:[%s6835_s15 + $0x28] sm:$0xff] %vm630_vm2, %v1235_v12 }
 0x1e6   : > { %v2251_v7 = vadd.f32 %v2249_v8, %v2245_v44  ;;  %v2291_v46 = vstv %s6829_s0  ;;  %v2297_v52 = vstv %s6831_s4  ;;  %v2276_v42 = vmul.f32 %v2275_v10, %v5554_v3  ;;  %3926 = vst.msk [vmem:[%s6835_s15 + $0x20] sm:$0xff] %vm630_vm2, %v1233_v48  ;;  %s6990_s0 = sld [smem:[#allocation8 + $0x34]] }
 0x1e7   : > { %2228 = vrot.lane.b32.xlu0 %v2224_v43, %s4862_s1  ;;  %v2262_v32 = vadd.f32 %v2260_v28, %v2258_v31  ;;  %v2283_v21 = vadd.f32 %v2281_v33, %v2277_v56  ;;  %v2293_v11 = vmul.f32 %v2291_v46, %v5651_v13  ;;  %v2280_v50 = vmul.f32 %v2279_v27, %v5551_v6  ;;  %s7001_s4 = sld [smem:[#allocation7 + $0xd4]] }
 0x1e8   : > { %v2257_v14 = vadd.f32 %v2255_v2, %v2251_v7  ;;  %v2286_v26 = vmul.f32 %v2285_v61, %v5620_v19  ;;  %v2292_v63 = vmul.f32 %v2291_v46, %v5654_v20  ;;  %v2312_v4 = vstv %s6846_s2  ;;  %v1272_v17 = vpop.permute.xlu1 %1271  ;;  %v1270_v59 = vpop.permute.xlu0 %1269  ;;  %s7003_s2 = sld [smem:[#allocation7 + $0xd5]] }
 0x1e9   : > { %2267 = vrot.lane.b32.xlu1 %v2262_v32, %s4862_s1  ;;  %v2289_v60 = vadd.f32 %v2287_v15, %v2283_v21  ;;  %v2282_v41 = vadd.f32 %v2280_v50, %v2276_v42  ;;  %v2314_v36 = vmul.f32 %v2312_v4, %v5588_v55  ;;  %v2316_v22 = vstv %s6851_s8  ;;  %3934 = vst.msk [vmem:[%s6835_s15 + $0x38] sm:$0xff] %vm630_vm2, %v1272_v17  ;;  %s7008_s8 = sld [smem:[#allocation7 + $0xd6]] }
 0x1ea   : > { %v2261_v47 = vadd.f32 %v2260_v28, %v2257_v14  ;;  %v2318_v0 = vmul.f32 %v2316_v22, %v5585_v58  ;;  %v2322_v9 = vstv %s6856_s16  ;;  %v2328_v40 = vstv %s6858_s24  ;;  %3933 = vst.msk [vmem:[%s6835_s15 + $0x30] sm:$0xff] %vm630_vm2, %v1270_v59  ;;  %s7013_s16 = sld [smem:[#allocation7 + $0xd7]]  ;;  %s7018_s24 = sld [smem:[#allocation8 + $0x35]] }
 0x1eb   : > { %v2295_v23 = vadd.f32 %v2293_v11, %v2289_v60  ;;  %v2288_v57 = vadd.f32 %v2286_v26, %v2282_v41  ;;  %v2324_v35 = vmul.f32 %v2322_v9, %v5617_v18  ;;  %v2330_v39 = vmul.f32 %v2328_v40, %v5651_v13 }
 0x1ec   : > { %2265 = vrot.lane.b32.xlu0 %v2261_v47, %s4862_s1  ;;  %v2320_v62 = vadd.f32 %v2318_v0, %v2314_v36  ;;  %v2334_v1 = vstv %s6870_s14  ;;  %v2313_v37 = vmul.f32 %v2312_v4, %v5554_v3  ;;  %v2317_v25 = vmul.f32 %v2316_v22, %v5551_v6  ;;  %v1309_v5 = vpop.permute.xlu1 %1308  ;;  %v1307_v34 = vpop.permute.xlu0 %1306  ;;  %s7024_s14 = scalar_lea.vmem [#allocation13], %s6565_s5 }
 0x1ed   : > { %v2299_v29 = vadd.f32 %v2297_v52, %v2295_v23  ;;  %v2294_v28 = vadd.f32 %v2292_v63, %v2288_v57  ;;  %v2323_v16 = vmul.f32 %v2322_v9, %v5620_v19  ;;  %v2329_v53 = vmul.f32 %v2328_v40, %v5654_v20  ;;  %3941 = vst.msk [vmem:[%s6835_s15 + $0x48] sm:$0xff] %vm630_vm2, %v1309_v5 }
 0x1ee   : > { %v2326_v51 = vadd.f32 %v2324_v35, %v2320_v62  ;;  %v2319_v24 = vadd.f32 %v2317_v25, %v2313_v37  ;;  %v2348_v49 = vstv %s6877_s6  ;;  %v2352_v54 = vstv %s6879_s13  ;;  %3940 = vst.msk [vmem:[%s6835_s15 + $0x40] sm:$0xff] %vm630_vm2, %v1307_v34  ;;  %s7032_s6 = sld [smem:[#allocation7 + $0xd8]]  ;;  %s7034_s13 = sld [smem:[#allocation7 + $0xd9]] }
 0x1ef   : > { %2304 = vrot.lane.b32.xlu1 %v2299_v29, %s4862_s1  ;;  %v2298_v30 = vadd.f32 %v2297_v52, %v2294_v28  ;;  %v2350_v8 = vmul.f32 %v2348_v49, %v5588_v55  ;;  %v2354_v38 = vmul.f32 %v2352_v54, %v5585_v58  ;;  %v2358_v45 = vstv %s6888_s18  ;;  %s7040_s18 = sld [smem:[#allocation7 + $0xda]] }
 0x1f0   : > { %v2332_v2 = vadd.f32 %v2330_v39, %v2326_v51  ;;  %v2325_v10 = vadd.f32 %v2323_v16, %v2319_v24  ;;  %v2360_v44 = vmul.f32 %v2358_v45, %v5617_v18  ;;  %v2364_v56 = vstv %s6893_s3  ;;  %v1346_v48 = vpop.permute.xlu1 %1345  ;;  %v1344_v46 = vpop.permute.xlu0 %1343  ;;  %s7044_s3 = sld [smem:[#allocation7 + $0xdb]] }
 0x1f1   : > { %2302 = vrot.lane.b32.xlu0 %v2298_v30, %s4862_s1  ;;  %v2356_v27 = vadd.f32 %v2354_v38, %v2350_v8  ;;  %v2366_v61 = vmul.f32 %v2364_v56, %v5651_v13  ;;  %v2370_v43 = vstv %s6898_s21  ;;  %v2349_v31 = vmul.f32 %v2348_v49, %v5554_v3  ;;  %3948 = vst.msk [vmem:[%s6835_s15 + $0x58] sm:$0xff] %vm630_vm2, %v1346_v48  ;;  %s6956_s1 = sld [smem:[#allocation7 + $0xcf]]  ;;  %s7046_s21 = sld [smem:[#allocation8 + $0x36]] }
 0x1f2   : > { %v2336_v33 = vadd.f32 %v2334_v1, %v2332_v2  ;;  %v2331_v15 = vadd.f32 %v2329_v53, %v2325_v10  ;;  %v2353_v7 = vmul.f32 %v2352_v54, %v5551_v6  ;;  %v2359_v12 = vmul.f32 %v2358_v45, %v5620_v19  ;;  %3947 = vst.msk [vmem:[%s6835_s15 + $0x50] sm:$0xff] %vm630_vm2, %v1344_v46 }
 0x1f3   : > { %v2362_v52 = vadd.f32 %v2360_v44, %v2356_v27  ;;  %v2365_v42 = vmul.f32 %v2364_v56, %v5654_v20  ;;  %v2385_v32 = vstv %s6909_s17  ;;  %v2389_v21 = vstv %s6911_s25  ;;  %s7060_s17 = sld [smem:[#allocation7 + $0xdc]]  ;;  %s7066_s25 = sld [smem:[#allocation7 + $0xdd]] }
 0x1f4   : > { %2341 = vrot.lane.b32.xlu1 %v2336_v33, %s4863_s12  ;;  %v2335_v11 = vadd.f32 %v2334_v1, %v2331_v15  ;;  %v2355_v50 = vadd.f32 %v2353_v7, %v2349_v31  ;;  %v2387_v14 = vmul.f32 %v2385_v32, %v5588_v55  ;;  %v2391_v26 = vmul.f32 %v2389_v21, %v5585_v58  ;;  %v1383_v59 = vpop.permute.xlu1 %1382  ;;  %v1381_v0 = vpop.permute.xlu0 %1380 }
 0x1f5   : > { %v2368_v63 = vadd.f32 %v2366_v61, %v2362_v52  ;;  %v2395_v4 = vstv %s6917_s30  ;;  %v2401_v60 = vstv %s6921_s19  ;;  %v2407_v41 = vstv %s6923_s26  ;;  %3955 = vst.msk [vmem:[%s6835_s15 + $0x68] sm:$0xff] %vm630_vm2, %v1383_v59  ;;  %s7068_s30 = sld [smem:[#allocation7 + $0xde]]  ;;  %s7079_s19 = sld [smem:[#allocation7 + $0xdf]] }
 0x1f6   : > { %2339 = vrot.lane.b32.xlu0 %v2335_v11, %s4863_s12  ;;  %v2361_v36 = vadd.f32 %v2359_v12, %v2355_v50  ;;  %v2393_v22 = vadd.f32 %v2391_v26, %v2387_v14  ;;  %v2397_v47 = vmul.f32 %v2395_v4, %v5617_v18  ;;  %v2403_v17 = vmul.f32 %v2401_v60, %v5651_v13  ;;  %s7081_s26 = sld [smem:[#allocation8 + $0x37]] }
 0x1f7   : > { %v2372_v9 = vadd.f32 %v2370_v43, %v2368_v63  ;;  %v2386_v40 = vmul.f32 %v2385_v32, %v5554_v3  ;;  %v2390_v23 = vmul.f32 %v2389_v21, %v5551_v6  ;;  %v2396_v57 = vmul.f32 %v2395_v4, %v5620_v19  ;;  %3954 = vst.msk [vmem:[%s6835_s15 + $0x60] sm:$0xff] %vm630_vm2, %v1381_v0 }
 0x1f8   : > { %v2367_v35 = vadd.f32 %v2365_v42, %v2361_v36  ;;  %v2399_v39 = vadd.f32 %v2397_v47, %v2393_v22  ;;  %v2402_v62 = vmul.f32 %v2401_v60, %v5654_v20  ;;  %v2422_v1 = vstv %s6937_s20  ;;  %v1420_v5 = vpop.permute.xlu1 %1419  ;;  %v1418_v34 = vpop.permute.xlu0 %1417  ;;  %s7089_s20 = sld [smem:[#allocation7 + $0xe0]] }
 0x1f9   : > { %2377 = vrot.lane.b32.xlu1 %v2372_v9, %s4863_s12  ;;  %v2392_v37 = vadd.f32 %v2390_v23, %v2386_v40  ;;  %v2424_v25 = vmul.f32 %v2422_v1, %v5588_v55  ;;  %v2426_v29 = vstv %s6943_s7  ;;  %v2432_v28 = vstv %s6945_s11  ;;  %3962 = vst.msk [vmem:[%s6835_s15 + $0x78] sm:$0xff] %vm630_vm2, %v1420_v5  ;;  %s7098_s7 = sld [smem:[#allocation7 + $0xe1]]  ;;  %s7103_s11 = sld [smem:[#allocation7 + $0xe2]] }
 0x1fa   : > { %v2371_v16 = vadd.f32 %v2370_v43, %v2367_v35  ;;  %v2405_v53 = vadd.f32 %v2403_v17, %v2399_v39  ;;  %v2428_v51 = vmul.f32 %v2426_v29, %v5585_v58  ;;  %v2434_v24 = vmul.f32 %v2432_v28, %v5617_v18  ;;  %3961 = vst.msk [vmem:[%s6835_s15 + $0x70] sm:$0xff] %vm630_vm2, %v1418_v34 }
 0x1fb   : > { %v2398_v49 = vadd.f32 %v2396_v57, %v2392_v37  ;;  %v2438_v54 = vstv %s6956_s1  ;;  %v2444_v30 = vstv %s6958_s10  ;;  %v2423_v8 = vmul.f32 %v2422_v1, %v5554_v3  ;;  %s7105_s1 = sld [smem:[#allocation7 + $0xe3]]  ;;  %s7113_s10 = sld [smem:[#allocation8 + $0x38]] }
 0x1fc   : > { %2375 = vrot.lane.b32.xlu0 %v2371_v16, %s4863_s12  ;;  %v2409_v38 = vadd.f32 %v2407_v41, %v2405_v53  ;;  %v2430_v45 = vadd.f32 %v2428_v51, %v2424_v25  ;;  %v2440_v2 = vmul.f32 %v2438_v54, %v5651_v13  ;;  %v2427_v10 = vmul.f32 %v2426_v29, %v5551_v6  ;;  %v1457_v7 = vpop.permute.xlu1 %1456  ;;  %v1455_v12 = vpop.permute.xlu0 %1454 }
 0x1fd   : > { %v2404_v44 = vadd.f32 %v2402_v62, %v2398_v49  ;;  %v2433_v56 = vmul.f32 %v2432_v28, %v5620_v19  ;;  %v2439_v27 = vmul.f32 %v2438_v54, %v5654_v20  ;;  %v2459_v61 = vstv %s6966_s28  ;;  %1461 = vst.msk [vmem:[%s7024_s14 + $0x8] sm:$0xff] %vm630_vm2, %v1457_v7  ;;  %1460 = vst.msk [vmem:[%s7024_s14] sm:$0xff] %vm630_vm2, %v1455_v12  ;;  %s7124_s28 = sld [smem:[#allocation7 + $0xe4]] }
 0x1fe   : > { %2414 = vrot.lane.b32.xlu1 %v2409_v38, %s4863_s12  ;;  %v2436_v43 = vadd.f32 %v2434_v24, %v2430_v45  ;;  %v2429_v31 = vadd.f32 %v2427_v10, %v2423_v8  ;;  %v2461_v33 = vmul.f32 %v2459_v61, %v5588_v55  ;;  %v2463_v15 = vstv %s6971_s9  ;;  %s7126_s9 = sld [smem:[#allocation7 + $0xe5]] }
 0x1ff   : > { %v2408_v48 = vadd.f32 %v2407_v41, %v2404_v44  ;;  %v2465_v46 = vmul.f32 %v2463_v15, %v5585_v58  ;;  %v2469_v52 = vstv %s6980_s22  ;;  %v2475_v42 = vstv %s6982_s27  ;;  %s7133_s22 = sld [smem:[#allocation7 + $0xe6]]  ;;  %s7138_s27 = sld [smem:[#allocation7 + $0xe7]] }
 0x200   : > { %v2442_v32 = vadd.f32 %v2440_v2, %v2436_v43  ;;  %v2435_v21 = vadd.f32 %v2433_v56, %v2429_v31  ;;  %v2471_v11 = vmul.f32 %v2469_v52, %v5617_v18  ;;  %v2477_v50 = vmul.f32 %v2475_v42, %v5651_v13  ;;  %v1493_v47 = vpop.permute.xlu1 %1492  ;;  %v1491_v17 = vpop.permute.xlu0 %1490 }
 0x201   : > { %2412 = vrot.lane.b32.xlu0 %v2408_v48, %s4863_s12  ;;  %v2467_v14 = vadd.f32 %v2465_v46, %v2461_v33  ;;  %v2481_v26 = vstv %s6990_s0  ;;  %v2460_v63 = vmul.f32 %v2459_v61, %v5554_v3  ;;  %v2464_v4 = vmul.f32 %v2463_v15, %v5551_v6  ;;  %3974 = vst.msk [vmem:[%s7024_s14 + $0x18] sm:$0xff] %vm630_vm2, %v1493_v47  ;;  %s7143_s0 = sld [smem:[#allocation8 + $0x39]] }
 0x202   : > { %v2446_v60 = vadd.f32 %v2444_v30, %v2442_v32  ;;  %v2441_v41 = vadd.f32 %v2439_v27, %v2435_v21  ;;  %v2470_v36 = vmul.f32 %v2469_v52, %v5620_v19  ;;  %v2476_v22 = vmul.f32 %v2475_v42, %v5654_v20  ;;  %3973 = vst.msk [vmem:[%s7024_s14 + $0x10] sm:$0xff] %vm630_vm2, %v1491_v17 }
 0x203   : > { %v2473_v59 = vadd.f32 %v2471_v11, %v2467_v14  ;;  %v2466_v0 = vadd.f32 %v2464_v4, %v2460_v63  ;;  %v2496_v9 = vstv %s7001_s4  ;;  %v2500_v40 = vstv %s7003_s2  ;;  %s7156_s4 = sld [smem:[#allocation7 + $0xe8]]  ;;  %s7158_s2 = sld [smem:[#allocation7 + $0xe9]] }
 0x204   : > { %2451 = vrot.lane.b32.xlu1 %v2446_v60, %s4863_s12  ;;  %v2445_v23 = vadd.f32 %v2444_v30, %v2441_v41  ;;  %v2498_v57 = vmul.f32 %v2496_v9, %v5588_v55  ;;  %v2502_v35 = vmul.f32 %v2500_v40, %v5585_v58  ;;  %v2506_v39 = vstv %s7008_s8  ;;  %v1530_v51 = vpop.permute.xlu1 %1529  ;;  %v1528_v24 = vpop.permute.xlu0 %1527  ;;  %s7164_s8 = sld [smem:[#allocation7 + $0xea]] }
 0x205   : > { %v2479_v62 = vadd.f32 %v2477_v50, %v2473_v59  ;;  %v2472_v1 = vadd.f32 %v2470_v36, %v2466_v0  ;;  %v2508_v37 = vmul.f32 %v2506_v39, %v5617_v18  ;;  %v2512_v25 = vstv %s7013_s16  ;;  %3981 = vst.msk [vmem:[%s7024_s14 + $0x28] sm:$0xff] %vm630_vm2, %v1530_v51  ;;  %3980 = vst.msk [vmem:[%s7024_s14 + $0x20] sm:$0xff] %vm630_vm2, %v1528_v24  ;;  %s7168_s16 = sld [smem:[#allocation7 + $0xeb]] }
 0x206   : > { %2449 = vrot.lane.b32.xlu0 %v2445_v23, %s4863_s12  ;;  %v2504_v29 = vadd.f32 %v2502_v35, %v2498_v57  ;;  %v2514_v28 = vmul.f32 %v2512_v25, %v5651_v13  ;;  %v2518_v16 = vstv %s7018_s24  ;;  %v2497_v53 = vmul.f32 %v2496_v9, %v5554_v3  ;;  %s7170_s24 = sld [smem:[#allocation8 + $0x3a]] }
 0x207   : > { %v2483_v5 = vadd.f32 %v2481_v26, %v2479_v62  ;;  %v2478_v34 = vadd.f32 %v2476_v22, %v2472_v1  ;;  %v2501_v49 = vmul.f32 %v2500_v40, %v5551_v6  ;;  %v2507_v54 = vmul.f32 %v2506_v39, %v5620_v19 }
 0x208   : > { %v2510_v30 = vadd.f32 %v2508_v37, %v2504_v29  ;;  %v2513_v8 = vmul.f32 %v2512_v25, %v5654_v20  ;;  %v2533_v38 = vstv %s7032_s6  ;;  %v2537_v45 = vstv %s7034_s13  ;;  %v1567_v33 = vpop.permute.xlu1 %1566  ;;  %v1565_v15 = vpop.permute.xlu0 %1564  ;;  %s7184_s6 = sld [smem:[#allocation7 + $0xec]]  ;;  %s7190_s13 = sld [smem:[#allocation7 + $0xed]] }
 0x209   : > { %2488 = vrot.lane.b32.xlu1 %v2483_v5, %s4863_s12  ;;  %v2482_v2 = vadd.f32 %v2481_v26, %v2478_v34  ;;  %v2503_v10 = vadd.f32 %v2501_v49, %v2497_v53  ;;  %v2535_v44 = vmul.f32 %v2533_v38, %v5588_v55  ;;  %v2539_v56 = vmul.f32 %v2537_v45, %v5585_v58 }
 0x20a   : > { %v2516_v27 = vadd.f32 %v2514_v28, %v2510_v30  ;;  %v2543_v61 = vstv %s7040_s18  ;;  %v2549_v43 = vstv %s7044_s3  ;;  %v2555_v31 = vstv %s7046_s21  ;;  %3988 = vst.msk [vmem:[%s7024_s14 + $0x38] sm:$0xff] %vm630_vm2, %v1567_v33  ;;  %s7192_s18 = sld [smem:[#allocation7 + $0xee]]  ;;  %s7205_s3 = sld [smem:[#allocation8 + $0x3b]] }
 0x20b   : > { %2486 = vrot.lane.b32.xlu0 %v2482_v2, %s4863_s12  ;;  %v2509_v7 = vadd.f32 %v2507_v54, %v2503_v10  ;;  %v2541_v12 = vadd.f32 %v2539_v56, %v2535_v44  ;;  %v2545_v48 = vmul.f32 %v2543_v61, %v5617_v18  ;;  %v2551_v46 = vmul.f32 %v2549_v43, %v5651_v13  ;;  %s4864_s21 = smov 121  }
 0x20c   : > { %3987 = vst.msk [vmem:[%s7024_s14 + $0x30] sm:$0xff] %vm630_vm2, %v1565_v15  ;;  %v2520_v52 = vadd.f32 %v2518_v16, %v2516_v27  ;;  %v2534_v42 = vmul.f32 %v2533_v38, %v5554_v3  ;;  %v2538_v32 = vmul.f32 %v2537_v45, %v5551_v6  ;;  %v2544_v21 = vmul.f32 %v2543_v61, %v5620_v19  ;;  %v1604_v36 = vpop.permute.xlu1 %1603  ;;  %v1602_v22 = vpop.permute.xlu0 %1601 }
 0x20d   : > { %v2515_v11 = vadd.f32 %v2513_v8, %v2509_v7  ;;  %v2547_v50 = vadd.f32 %v2545_v48, %v2541_v12  ;;  %v2550_v14 = vmul.f32 %v2549_v43, %v5654_v20  ;;  %v2570_v26 = vstv %s7060_s17  ;;  %3995 = vst.msk [vmem:[%s7024_s14 + $0x48] sm:$0xff] %vm630_vm2, %v1604_v36  ;;  %3994 = vst.msk [vmem:[%s7024_s14 + $0x40] sm:$0xff] %vm630_vm2, %v1602_v22  ;;  %s7213_s17 = sld [smem:[#allocation7 + $0xf0]] }
 0x20e   : > { %2525 = vrot.lane.b32.xlu1 %v2520_v52, %s4863_s12  ;;  %v2540_v63 = vadd.f32 %v2538_v32, %v2534_v42  ;;  %v2572_v4 = vmul.f32 %v2570_v26, %v5588_v55  ;;  %v2574_v60 = vstv %s7066_s25  ;;  %v2580_v41 = vstv %s7068_s30  ;;  %s7216_s25 = scalar_lea.vmem [#allocation15], %s6565_s5  ;;  %s7225_s30 = sld [smem:[#allocation7 + $0xf1]] }
 0x20f   : > { %v2519_v47 = vadd.f32 %v2518_v16, %v2515_v11  ;;  %v2553_v17 = vadd.f32 %v2551_v46, %v2547_v50  ;;  %v2576_v59 = vmul.f32 %v2574_v60, %v5585_v58  ;;  %v2582_v0 = vmul.f32 %v2580_v41, %v5617_v18  ;;  %9248 = sst [smem:[#allocation51_spill]] %s7216_s25 }
 0x210   : > { %v2546_v9 = vadd.f32 %v2544_v21, %v2540_v63  ;;  %v2586_v40 = vstv %s7079_s19  ;;  %v2592_v23 = vstv %s7081_s26  ;;  %v2571_v57 = vmul.f32 %v2570_v26, %v5554_v3  ;;  %v1641_v16 = vpop.permute.xlu1 %1640  ;;  %v1639_v53 = vpop.permute.xlu0 %1638  ;;  %s7230_s19 = sld [smem:[#allocation7 + $0xf2]]  ;;  %s7232_s26 = sld [smem:[#allocation7 + $0xf3]] }
 0x211   : > { %2523 = vrot.lane.b32.xlu0 %v2519_v47, %s4863_s12  ;;  %v2557_v35 = vadd.f32 %v2555_v31, %v2553_v17  ;;  %v2578_v39 = vadd.f32 %v2576_v59, %v2572_v4  ;;  %v2588_v62 = vmul.f32 %v2586_v40, %v5651_v13  ;;  %v2575_v1 = vmul.f32 %v2574_v60, %v5551_v6 }
 0x212   : > { %v2552_v37 = vadd.f32 %v2550_v14, %v2546_v9  ;;  %v2581_v25 = vmul.f32 %v2580_v41, %v5620_v19  ;;  %v2587_v29 = vmul.f32 %v2586_v40, %v5654_v20  ;;  %v2607_v28 = vstv %s7089_s20  ;;  %4002 = vst.msk [vmem:[%s7024_s14 + $0x58] sm:$0xff] %vm630_vm2, %v1641_v16  ;;  %4001 = vst.msk [vmem:[%s7024_s14 + $0x50] sm:$0xff] %vm630_vm2, %v1639_v53  ;;  %s7240_s20 = sld [smem:[#allocation8 + $0x3c]] }
 0x213   : > { %2562 = vrot.lane.b32.xlu1 %v2557_v35, %s4863_s12  ;;  %v2584_v51 = vadd.f32 %v2582_v0, %v2578_v39  ;;  %v2577_v24 = vadd.f32 %v2575_v1, %v2571_v57  ;;  %v2609_v5 = vmul.f32 %v2607_v28, %v5588_v55  ;;  %v2611_v34 = vstv %s7098_s7  ;;  %s7251_s7 = sld [smem:[#allocation7 + $0xf4]] }
 0x214   : > { %v2556_v49 = vadd.f32 %v2555_v31, %v2552_v37  ;;  %v2613_v54 = vmul.f32 %v2611_v34, %v5585_v58  ;;  %v2617_v30 = vstv %s7103_s11  ;;  %v2623_v8 = vstv %s7105_s1  ;;  %v1678_v43 = vpop.permute.xlu1 %1677  ;;  %v1676_v31 = vpop.permute.xlu0 %1675  ;;  %s7253_s11 = sld [smem:[#allocation7 + $0xf5]]  ;;  %s7258_s1 = sld [smem:[#allocation7 + $0xf6]] }
 0x215   : > { %v2590_v38 = vadd.f32 %v2588_v62, %v2584_v51  ;;  %v2583_v45 = vadd.f32 %v2581_v25, %v2577_v24  ;;  %v2619_v2 = vmul.f32 %v2617_v30, %v5617_v18  ;;  %v2625_v10 = vmul.f32 %v2623_v8, %v5651_v13  ;;  %4009 = vst.msk [vmem:[%s7024_s14 + $0x68] sm:$0xff] %vm630_vm2, %v1678_v43 }
 0x216   : > { %2560 = vrot.lane.b32.xlu0 %v2556_v49, %s4863_s12  ;;  %v2615_v44 = vadd.f32 %v2613_v54, %v2609_v5  ;;  %v2629_v56 = vstv %s7113_s10  ;;  %v2608_v27 = vmul.f32 %v2607_v28, %v5554_v3  ;;  %v2612_v61 = vmul.f32 %v2611_v34, %v5551_v6  ;;  %4008 = vst.msk [vmem:[%s7024_s14 + $0x60] sm:$0xff] %vm630_vm2, %v1676_v31  ;;  %s7263_s10 = sld [smem:[#allocation7 + $0xf7]] }
 0x217   : > { %v2594_v33 = vadd.f32 %v2592_v23, %v2590_v38  ;;  %v2589_v15 = vadd.f32 %v2587_v29, %v2583_v45  ;;  %v2618_v7 = vmul.f32 %v2617_v30, %v5620_v19  ;;  %v2624_v12 = vmul.f32 %v2623_v8, %v5654_v20 }
 0x218   : > { %v2621_v48 = vadd.f32 %v2619_v2, %v2615_v44  ;;  %v2614_v46 = vadd.f32 %v2612_v61, %v2608_v27  ;;  %v2643_v52 = vstv %s7124_s28  ;;  %v2647_v42 = vstv %s7126_s9  ;;  %v1715_v60 = vpop.permute.xlu1 %1714  ;;  %v1713_v41 = vpop.permute.xlu0 %1712  ;;  %s7270_s28 = sld [smem:[#allocation8 + $0x3d]]  ;;  %s7279_s9 = sld [smem:[#allocation7 + $0xf8]] }
 0x219   : > { %2599 = vrot.lane.b32.xlu1 %v2594_v33, %s4863_s12  ;;  %v2593_v32 = vadd.f32 %v2592_v23, %v2589_v15  ;;  %v2645_v21 = vmul.f32 %v2643_v52, %v5588_v55  ;;  %v2649_v11 = vmul.f32 %v2647_v42, %v5585_v58  ;;  %v2653_v50 = vstv %s7133_s22  ;;  %4016 = vst.msk [vmem:[%s7024_s14 + $0x78] sm:$0xff] %vm630_vm2, %v1715_v60  ;;  %s7281_s22 = sld [smem:[#allocation7 + $0xf9]] }
 0x21a   : > { %v2627_v14 = vadd.f32 %v2625_v10, %v2621_v48  ;;  %v2620_v26 = vadd.f32 %v2618_v7, %v2614_v46  ;;  %v2655_v63 = vmul.f32 %v2653_v50, %v5617_v18  ;;  %v2659_v4 = vstv %s7138_s27  ;;  %4015 = vst.msk [vmem:[%s7024_s14 + $0x70] sm:$0xff] %vm630_vm2, %v1713_v41  ;;  %s7287_s27 = sld [smem:[#allocation7 + $0xfa]] }
 0x21b   : > { %2597 = vrot.lane.b32.xlu0 %v2593_v32, %s4863_s12  ;;  %v2651_v36 = vadd.f32 %v2649_v11, %v2645_v21  ;;  %v2661_v22 = vmul.f32 %v2659_v4, %v5651_v13  ;;  %v2665_v47 = vstv %s7143_s0  ;;  %v2644_v17 = vmul.f32 %v2643_v52, %v5554_v3  ;;  %s7203_s12 = sld [smem:[#allocation7 + $0xef]]  ;;  %s7293_s0 = sld [smem:[#allocation7 + $0xfb]] }
 0x21c   : > { %v2631_v59 = vadd.f32 %v2629_v56, %v2627_v14  ;;  %v2626_v0 = vadd.f32 %v2624_v12, %v2620_v26  ;;  %v2648_v9 = vmul.f32 %v2647_v42, %v5551_v6  ;;  %v2654_v40 = vmul.f32 %v2653_v50, %v5620_v19  ;;  %v1752_v29 = vpop.permute.xlu1 %1751  ;;  %v1750_v28 = vpop.permute.xlu0 %1749 }
 0x21d   : > { %v2657_v23 = vadd.f32 %v2655_v63, %v2651_v36  ;;  %v2660_v57 = vmul.f32 %v2659_v4, %v5654_v20  ;;  %v2680_v35 = vstv %s7156_s4  ;;  %v2684_v39 = vstv %s7158_s2  ;;  %1756 = vst.msk [vmem:[%s7216_s25 + $0x8] sm:$0xff] %vm630_vm2, %v1752_v29  ;;  %1755 = vst.msk [vmem:[%s7216_s25] sm:$0xff] %vm630_vm2, %v1750_v28  ;;  %s7295_s4 = sld [smem:[#allocation8 + $0x3e]]  ;;  %s7307_s2 = sld [smem:[#allocation7 + $0xfc]] }
 0x21e   : > { %2636 = vrot.lane.b32.xlu1 %v2631_v59, %s4864_s21  ;;  %v2630_v62 = vadd.f32 %v2629_v56, %v2626_v0  ;;  %v2650_v1 = vadd.f32 %v2648_v9, %v2644_v17  ;;  %v2682_v37 = vmul.f32 %v2680_v35, %v5588_v55  ;;  %v2686_v25 = vmul.f32 %v2684_v39, %v5585_v58 }
 0x21f   : > { %v2663_v16 = vadd.f32 %v2661_v22, %v2657_v23  ;;  %v2690_v53 = vstv %s7164_s8  ;;  %v2696_v51 = vstv %s7168_s16  ;;  %v2702_v24 = vstv %s7170_s24  ;;  %s7315_s8 = sld [smem:[#allocation7 + $0xfd]]  ;;  %s7317_s16 = sld [smem:[#allocation7 + $0xfe]] }
 0x220   : > { %2634 = vrot.lane.b32.xlu0 %v2630_v62, %s4864_s21  ;;  %v2656_v5 = vadd.f32 %v2654_v40, %v2650_v1  ;;  %v2688_v34 = vadd.f32 %v2686_v25, %v2682_v37  ;;  %v2692_v49 = vmul.f32 %v2690_v53, %v5617_v18  ;;  %v2698_v54 = vmul.f32 %v2696_v51, %v5651_v13  ;;  %v1788_v27 = vpop.permute.xlu1 %1787  ;;  %v1786_v15 = vpop.permute.xlu0 %1785  ;;  %s7326_s24 = sld [smem:[#allocation7 + $0xff]] }
 0x221   : > { %v2667_v30 = vadd.f32 %v2665_v47, %v2663_v16  ;;  %v2681_v8 = vmul.f32 %v2680_v35, %v5554_v3  ;;  %v2685_v38 = vmul.f32 %v2684_v39, %v5551_v6  ;;  %v2691_v45 = vmul.f32 %v2690_v53, %v5620_v19  ;;  %4028 = vst.msk [vmem:[%s7216_s25 + $0x18] sm:$0xff] %vm630_vm2, %v1788_v27 }
 0x222   : > { %v2662_v2 = vadd.f32 %v2660_v57, %v2656_v5  ;;  %v2694_v10 = vadd.f32 %v2692_v49, %v2688_v34  ;;  %v2697_v44 = vmul.f32 %v2696_v51, %v5654_v20  ;;  %v2717_v56 = vstv %s7184_s6  ;;  %4027 = vst.msk [vmem:[%s7216_s25 + $0x10] sm:$0xff] %vm630_vm2, %v1786_v15  ;;  %s7328_s6 = sld [smem:[#allocation8 + $0x3f]] }
 0x223   : > { %2672 = vrot.lane.b32.xlu1 %v2667_v30, %s4864_s21  ;;  %v2687_v61 = vadd.f32 %v2685_v38, %v2681_v8  ;;  %v2719_v43 = vmul.f32 %v2717_v56, %v5588_v55  ;;  %v2721_v31 = vstv %s7190_s13  ;;  %v2727_v33 = vstv %s7192_s18  ;;  %s7338_s13 = sld [smem:[#allocation7 + $0x100]]  ;;  %s7343_s18 = sld [smem:[#allocation7 + $0x101]] }
 0x224   : > { %v2666_v7 = vadd.f32 %v2665_v47, %v2662_v2  ;;  %v2700_v12 = vadd.f32 %v2698_v54, %v2694_v10  ;;  %v2723_v48 = vmul.f32 %v2721_v31, %v5585_v58  ;;  %v2729_v46 = vmul.f32 %v2727_v33, %v5617_v18  ;;  %v1825_v63 = vpop.permute.xlu1 %1824 }
 0x225   : > { %v2693_v52 = vadd.f32 %v2691_v45, %v2687_v61  ;;  %v2733_v42 = vstv %s7203_s12  ;;  %v2739_v32 = vstv %s7205_s3  ;;  %v2718_v21 = vmul.f32 %v2717_v56, %v5554_v3  ;;  %4035 = vst.msk [vmem:[%s7216_s25 + $0x28] sm:$0xff] %vm630_vm2, %v1825_v63  ;;  %v1823_v22 = vpop.permute.xlu0 %1822  ;;  %s7350_s12 = sld [smem:[#allocation7 + $0x102]]  ;;  %s7352_s3 = sld [smem:[#allocation7 + $0x103]] }
 0x226   : > { %2670 = vrot.lane.b32.xlu0 %v2666_v7, %s4864_s21  ;;  %v2704_v11 = vadd.f32 %v2702_v24, %v2700_v12  ;;  %v2725_v50 = vadd.f32 %v2723_v48, %v2719_v43  ;;  %v2735_v14 = vmul.f32 %v2733_v42, %v5651_v13  ;;  %v2722_v26 = vmul.f32 %v2721_v31, %v5551_v6 }
 0x227   : > { %v2699_v4 = vadd.f32 %v2697_v44, %v2693_v52  ;;  %v2728_v60 = vmul.f32 %v2727_v33, %v5620_v19  ;;  %v2734_v41 = vmul.f32 %v2733_v42, %v5654_v20  ;;  %v2754_v36 = vstv %s7213_s17  ;;  %4034 = vst.msk [vmem:[%s7216_s25 + $0x20] sm:$0xff] %vm630_vm2, %v1823_v22  ;;  %s7362_s17 = sld [smem:[#allocation8 + $0x40]] }
 0x228   : > { %2709 = vrot.lane.b32.xlu1 %v2704_v11, %s4864_s21  ;;  %v2731_v47 = vadd.f32 %v2729_v46, %v2725_v50  ;;  %v2724_v17 = vadd.f32 %v2722_v26, %v2718_v21  ;;  %v2756_v59 = vmul.f32 %v2754_v36, %v5588_v55  ;;  %v2758_v0 = vstv %s7225_s30  ;;  %v1862_v37 = vpop.permute.xlu1 %1861  ;;  %s7371_s30 = sld [smem:[#allocation7 + $0x104]] }
 0x229   : > { %v2703_v9 = vadd.f32 %v2702_v24, %v2699_v4  ;;  %v2760_v40 = vmul.f32 %v2758_v0, %v5585_v58  ;;  %v2764_v23 = vstv %s7230_s19  ;;  %v2770_v57 = vstv %s7232_s26  ;;  %4042 = vst.msk [vmem:[%s7216_s25 + $0x38] sm:$0xff] %vm630_vm2, %v1862_v37  ;;  %s7373_s19 = sld [smem:[#allocation7 + $0x105]]  ;;  %s7378_s26 = sld [smem:[#allocation7 + $0x106]] }
 0x22a   : > { %v2737_v35 = vadd.f32 %v2735_v14, %v2731_v47  ;;  %v2730_v39 = vadd.f32 %v2728_v60, %v2724_v17  ;;  %v2766_v62 = vmul.f32 %v2764_v23, %v5617_v18  ;;  %v2772_v1 = vmul.f32 %v2770_v57, %v5651_v13  ;;  %v1860_v53 = vpop.permute.xlu0 %1859 }
 0x22b   : > { %2707 = vrot.lane.b32.xlu0 %v2703_v9, %s4864_s21  ;;  %v2762_v25 = vadd.f32 %v2760_v40, %v2756_v59  ;;  %v2776_v29 = vstv %s7240_s20  ;;  %v2755_v28 = vmul.f32 %v2754_v36, %v5554_v3  ;;  %v2759_v16 = vmul.f32 %v2758_v0, %v5551_v6  ;;  %4041 = vst.msk [vmem:[%s7216_s25 + $0x30] sm:$0xff] %vm630_vm2, %v1860_v53  ;;  %s7385_s20 = sld [smem:[#allocation7 + $0x107]] }
 0x22c   : > { %v2741_v51 = vadd.f32 %v2739_v32, %v2737_v35  ;;  %v2736_v24 = vadd.f32 %v2734_v41, %v2730_v39  ;;  %v2765_v5 = vmul.f32 %v2764_v23, %v5620_v19  ;;  %v2771_v34 = vmul.f32 %v2770_v57, %v5654_v20  ;;  %v1899_v44 = vpop.permute.xlu1 %1898 }
 0x22d   : > { %v2768_v49 = vadd.f32 %v2766_v62, %v2762_v25  ;;  %v2761_v54 = vadd.f32 %v2759_v16, %v2755_v28  ;;  %v2791_v30 = vstv %s7251_s7  ;;  %v2795_v8 = vstv %s7253_s11  ;;  %4049 = vst.msk [vmem:[%s7216_s25 + $0x48] sm:$0xff] %vm630_vm2, %v1899_v44  ;;  %s7390_s7 = sld [smem:[#allocation8 + $0x41]]  ;;  %s7399_s11 = sld [smem:[#allocation7 + $0x108]] }
 0x22e   : > { %2746 = vrot.lane.b32.xlu1 %v2741_v51, %s4864_s21  ;;  %v2740_v38 = vadd.f32 %v2739_v32, %v2736_v24  ;;  %v2793_v45 = vmul.f32 %v2791_v30, %v5588_v55  ;;  %v2797_v2 = vmul.f32 %v2795_v8, %v5585_v58  ;;  %v2801_v10 = vstv %s7258_s1  ;;  %v1897_v31 = vpop.permute.xlu0 %1896  ;;  %s7401_s1 = sld [smem:[#allocation7 + $0x109]] }
 0x22f   : > { %v2774_v56 = vadd.f32 %v2772_v1, %v2768_v49  ;;  %v2767_v27 = vadd.f32 %v2765_v5, %v2761_v54  ;;  %v2803_v61 = vmul.f32 %v2801_v10, %v5617_v18  ;;  %v2807_v43 = vstv %s7263_s10  ;;  %4048 = vst.msk [vmem:[%s7216_s25 + $0x40] sm:$0xff] %vm630_vm2, %v1897_v31  ;;  %s7404_s10 = scalar_lea.vmem [#allocation16], %s6565_s5 }
 0x230   : > { %2744 = vrot.lane.b32.xlu0 %v2740_v38, %s4864_s21  ;;  %v2799_v33 = vadd.f32 %v2797_v2, %v2793_v45  ;;  %v2809_v15 = vmul.f32 %v2807_v43, %v5651_v13  ;;  %v2813_v7 = vstv %s7270_s28  ;;  %v2792_v12 = vmul.f32 %v2791_v30, %v5554_v3  ;;  %s7412_s28 = sld [smem:[#allocation7 + $0x10a]] }
 0x231   : > { %v2778_v48 = vadd.f32 %v2776_v29, %v2774_v56  ;;  %v2773_v46 = vadd.f32 %v2771_v34, %v2767_v27  ;;  %v2796_v52 = vmul.f32 %v2795_v8, %v5551_v6  ;;  %v2802_v42 = vmul.f32 %v2801_v10, %v5620_v19  ;;  %v1936_v14 = vpop.permute.xlu1 %1935 }
 0x232   : > { %v2805_v32 = vadd.f32 %v2803_v61, %v2799_v33  ;;  %v2808_v21 = vmul.f32 %v2807_v43, %v5654_v20  ;;  %v2828_v11 = vstv %s7279_s9  ;;  %v2832_v50 = vstv %s7281_s22  ;;  %4056 = vst.msk [vmem:[%s7216_s25 + $0x58] sm:$0xff] %vm630_vm2, %v1936_v14  ;;  %s7416_s9 = sld [smem:[#allocation7 + $0x10b]]  ;;  %s7418_s22 = sld [smem:[#allocation8 + $0x42]] }
 0x233   : > { %2783 = vrot.lane.b32.xlu1 %v2778_v48, %s4864_s21  ;;  %v2777_v26 = vadd.f32 %v2776_v29, %v2773_v46  ;;  %v2798_v63 = vadd.f32 %v2796_v52, %v2792_v12  ;;  %v2830_v4 = vmul.f32 %v2828_v11, %v5588_v55  ;;  %v2834_v60 = vmul.f32 %v2832_v50, %v5585_v58 }
 0x234   : > { %v2811_v41 = vadd.f32 %v2809_v15, %v2805_v32  ;;  %v2838_v36 = vstv %s7287_s27  ;;  %v2844_v22 = vstv %s7293_s0  ;;  %v2850_v47 = vstv %s7295_s4  ;;  %v1934_v17 = vpop.permute.xlu0 %1933  ;;  %s7432_s27 = sld [smem:[#allocation7 + $0x10c]]  ;;  %s7438_s0 = sld [smem:[#allocation7 + $0x10d]] }
 0x235   : > { %2781 = vrot.lane.b32.xlu0 %v2777_v26, %s4864_s21  ;;  %v2804_v59 = vadd.f32 %v2802_v42, %v2798_v63  ;;  %v2836_v0 = vadd.f32 %v2834_v60, %v2830_v4  ;;  %v2840_v9 = vmul.f32 %v2838_v36, %v5617_v18  ;;  %v2846_v40 = vmul.f32 %v2844_v22, %v5651_v13  ;;  %s7440_s4 = sld [smem:[#allocation7 + $0x10e]] }
 0x236   : > { %4055 = vst.msk [vmem:[%s7216_s25 + $0x50] sm:$0xff] %vm630_vm2, %v1934_v17  ;;  %v2815_v23 = vadd.f32 %v2813_v7, %v2811_v41  ;;  %v2829_v57 = vmul.f32 %v2828_v11, %v5554_v3  ;;  %v2833_v35 = vmul.f32 %v2832_v50, %v5551_v6  ;;  %v2839_v39 = vmul.f32 %v2838_v36, %v5620_v19  ;;  %v1973_v62 = vpop.permute.xlu1 %1972 }
 0x237   : > { %v2810_v1 = vadd.f32 %v2808_v21, %v2804_v59  ;;  %v2842_v37 = vadd.f32 %v2840_v9, %v2836_v0  ;;  %v2845_v25 = vmul.f32 %v2844_v22, %v5654_v20  ;;  %v2865_v29 = vstv %s7307_s2  ;;  %4063 = vst.msk [vmem:[%s7216_s25 + $0x68] sm:$0xff] %vm630_vm2, %v1973_v62  ;;  %s7451_s2 = sld [smem:[#allocation8 + $0x43]] }
 0x238   : > { %2820 = vrot.lane.b32.xlu1 %v2815_v23, %s4864_s21  ;;  %v2835_v28 = vadd.f32 %v2833_v35, %v2829_v57  ;;  %v2867_v16 = vmul.f32 %v2865_v29, %v5588_v55  ;;  %v2869_v53 = vstv %s7315_s8  ;;  %v2875_v51 = vstv %s7317_s16  ;;  %v1971_v24 = vpop.permute.xlu0 %1970  ;;  %s8593_s8 = smov 120   ;;  %s7461_s16 = sld [smem:[#allocation7 + $0x110]] }
 0x239   : > { %v2814_v5 = vadd.f32 %v2813_v7, %v2810_v1  ;;  %v2848_v34 = vadd.f32 %v2846_v40, %v2842_v37  ;;  %v2871_v49 = vmul.f32 %v2869_v53, %v5585_v58  ;;  %v2877_v54 = vmul.f32 %v2875_v51, %v5617_v18  ;;  %4062 = vst.msk [vmem:[%s7216_s25 + $0x60] sm:$0xff] %vm630_vm2, %v1971_v24 }
 0x23a   : > { %v2841_v30 = vadd.f32 %v2839_v39, %v2835_v28  ;;  %v2881_v8 = vstv %s7326_s24  ;;  %v2887_v38 = vstv %s7328_s6  ;;  %v2866_v45 = vmul.f32 %v2865_v29, %v5554_v3  ;;  %v2010_v2 = vpop.permute.xlu1 %2009  ;;  %s7466_s24 = sld [smem:[#allocation7 + $0x111]]  ;;  %s7473_s6 = sld [smem:[#allocation7 + $0x112]] }
 0x23b   : > { %2818 = vrot.lane.b32.xlu0 %v2814_v5, %s4864_s21  ;;  %v2852_v10 = vadd.f32 %v2850_v47, %v2848_v34  ;;  %v2873_v44 = vadd.f32 %v2871_v49, %v2867_v16  ;;  %v2883_v56 = vmul.f32 %v2881_v8, %v5651_v13  ;;  %v2870_v27 = vmul.f32 %v2869_v53, %v5551_v6 }
 0x23c   : > { %4070 = vst.msk [vmem:[%s7216_s25 + $0x78] sm:$0xff] %vm630_vm2, %v2010_v2  ;;  %v2847_v61 = vadd.f32 %v2845_v25, %v2841_v30  ;;  %v2876_v43 = vmul.f32 %v2875_v51, %v5620_v19  ;;  %v2882_v31 = vmul.f32 %v2881_v8, %v5654_v20  ;;  %v2902_v33 = vstv %s7338_s13  ;;  %v2008_v15 = vpop.permute.xlu0 %2007  ;;  %s7475_s13 = sld [smem:[#allocation7 + $0x113]] }
 0x23d   : > { %2857 = vrot.lane.b32.xlu1 %v2852_v10, %s4864_s21  ;;  %v2879_v7 = vadd.f32 %v2877_v54, %v2873_v44  ;;  %v2872_v12 = vadd.f32 %v2870_v27, %v2866_v45  ;;  %v2904_v48 = vmul.f32 %v2902_v33, %v5588_v55  ;;  %v2906_v46 = vstv %s7343_s18  ;;  %4069 = vst.msk [vmem:[%s7216_s25 + $0x70] sm:$0xff] %vm630_vm2, %v2008_v15  ;;  %s7483_s18 = sld [smem:[#allocation8 + $0x44]] }
 0x23e   : > { %v2851_v52 = vadd.f32 %v2850_v47, %v2847_v61  ;;  %v2908_v42 = vmul.f32 %v2906_v46, %v5585_v58  ;;  %v2912_v32 = vstv %s7350_s12  ;;  %v2918_v21 = vstv %s7352_s3  ;;  %v2047_v11 = vpop.permute.xlu1 %2046  ;;  %s7492_s12 = sld [smem:[#allocation7 + $0x114]]  ;;  %s7494_s3 = sld [smem:[#allocation7 + $0x115]] }
 0x23f   : > { %v2885_v50 = vadd.f32 %v2883_v56, %v2879_v7  ;;  %v2878_v14 = vadd.f32 %v2876_v43, %v2872_v12  ;;  %v2914_v26 = vmul.f32 %v2912_v32, %v5617_v18  ;;  %v2920_v63 = vmul.f32 %v2918_v21, %v5651_v13  ;;  %2051 = vst.msk [vmem:[%s7404_s10 + $0x8] sm:$0xff] %vm630_vm2, %v2047_v11 }
 0x240   : > { %2855 = vrot.lane.b32.xlu0 %v2851_v52, %s4864_s21  ;;  %v2910_v4 = vadd.f32 %v2908_v42, %v2904_v48  ;;  %v2924_v60 = vstv %s7362_s17  ;;  %v2903_v41 = vmul.f32 %v2902_v33, %v5554_v3  ;;  %v2907_v36 = vmul.f32 %v2906_v46, %v5551_v6  ;;  %v2045_v22 = vpop.permute.xlu0 %2044  ;;  %s7501_s17 = sld [smem:[#allocation7 + $0x116]] }
 0x241   : > { %v2889_v47 = vadd.f32 %v2887_v38, %v2885_v50  ;;  %v2884_v17 = vadd.f32 %v2882_v31, %v2878_v14  ;;  %v2913_v59 = vmul.f32 %v2912_v32, %v5620_v19  ;;  %v2919_v0 = vmul.f32 %v2918_v21, %v5654_v20  ;;  %2050 = vst.msk [vmem:[%s7404_s10] sm:$0xff] %vm630_vm2, %v2045_v22 }
 0x242   : > { %v2916_v9 = vadd.f32 %v2914_v26, %v2910_v4  ;;  %v2909_v40 = vadd.f32 %v2907_v36, %v2903_v41  ;;  %v2938_v23 = vstv %s7371_s30  ;;  %v2942_v57 = vstv %s7373_s19  ;;  %v2083_v35 = vpop.permute.xlu1 %2082  ;;  %s7506_s30 = sld [smem:[#allocation7 + $0x117]]  ;;  %s7511_s19 = sld [smem:[#allocation8 + $0x45]] }
 0x243   : > { %2894 = vrot.lane.b32.xlu1 %v2889_v47, %s4864_s21  ;;  %v2888_v39 = vadd.f32 %v2887_v38, %v2884_v17  ;;  %v2940_v62 = vmul.f32 %v2938_v23, %v5588_v55  ;;  %v2944_v1 = vmul.f32 %v2942_v57, %v5585_v58  ;;  %v2948_v37 = vstv %s7378_s26  ;;  %4082 = vst.msk [vmem:[%s7404_s10 + $0x18] sm:$0xff] %vm630_vm2, %v2083_v35  ;;  %s7520_s26 = sld [smem:[#allocation7 + $0x118]] }
 0x244   : > { %v2922_v25 = vadd.f32 %v2920_v63, %v2916_v9  ;;  %v2915_v29 = vadd.f32 %v2913_v59, %v2909_v40  ;;  %v2950_v28 = vmul.f32 %v2948_v37, %v5617_v18  ;;  %v2954_v16 = vstv %s7385_s20  ;;  %v2081_v53 = vpop.permute.xlu0 %2080  ;;  %s7522_s20 = sld [smem:[#allocation7 + $0x119]] }
 0x245   : > { %2892 = vrot.lane.b32.xlu0 %v2888_v39, %s4864_s21  ;;  %v2946_v51 = vadd.f32 %v2944_v1, %v2940_v62  ;;  %v2956_v24 = vmul.f32 %v2954_v16, %v5651_v13  ;;  %v2960_v5 = vstv %s7390_s7  ;;  %v2939_v34 = vmul.f32 %v2938_v23, %v5554_v3  ;;  %4081 = vst.msk [vmem:[%s7404_s10 + $0x10] sm:$0xff] %vm630_vm2, %v2081_v53  ;;  %s7449_s21 = sld [smem:[#allocation7 + $0x10f]]  ;;  %s7530_s7 = sld [smem:[#allocation7 + $0x11a]] }
 0x246   : > { %v2926_v49 = vadd.f32 %v2924_v60, %v2922_v25  ;;  %v2921_v54 = vadd.f32 %v2919_v0, %v2915_v29  ;;  %v2943_v30 = vmul.f32 %v2942_v57, %v5551_v6  ;;  %v2949_v8 = vmul.f32 %v2948_v37, %v5620_v19 }
 0x247   : > { %v2952_v38 = vadd.f32 %v2950_v28, %v2946_v51  ;;  %v2955_v45 = vmul.f32 %v2954_v16, %v5654_v20  ;;  %v2975_v2 = vstv %s7399_s11  ;;  %v2979_v10 = vstv %s7401_s1  ;;  %v2120_v44 = vpop.permute.xlu1 %2119  ;;  %s7534_s11 = sld [smem:[#allocation7 + $0x11b]]  ;;  %s7536_s1 = sld [smem:[#allocation8 + $0x46]] }
 0x248   : > { %2931 = vrot.lane.b32.xlu1 %v2926_v49, %s8593_s8  ;;  %v2925_v56 = vadd.f32 %v2924_v60, %v2921_v54  ;;  %v2945_v27 = vadd.f32 %v2943_v30, %v2939_v34  ;;  %v2977_v61 = vmul.f32 %v2975_v2, %v5588_v55  ;;  %v2981_v43 = vmul.f32 %v2979_v10, %v5585_v58 }
 0x249   : > { %4089 = vst.msk [vmem:[%s7404_s10 + $0x28] sm:$0xff] %vm630_vm2, %v2120_v44  ;;  %v2958_v31 = vadd.f32 %v2956_v24, %v2952_v38  ;;  %v2985_v33 = vstv %s7412_s28  ;;  %v2991_v15 = vstv %s7416_s9  ;;  %v2997_v7 = vstv %s7418_s22  ;;  %v2118_v12 = vpop.permute.xlu0 %2117  ;;  %s7546_s28 = sld [smem:[#allocation7 + $0x11c]]  ;;  %s7548_s9 = sld [smem:[#allocation7 + $0x11d]] }
 0x24a   : > { %2929 = vrot.lane.b32.xlu0 %v2925_v56, %s8593_s8  ;;  %v2951_v48 = vadd.f32 %v2949_v8, %v2945_v27  ;;  %v2983_v46 = vadd.f32 %v2981_v43, %v2977_v61  ;;  %v2987_v52 = vmul.f32 %v2985_v33, %v5617_v18  ;;  %v2993_v42 = vmul.f32 %v2991_v15, %v5651_v13  ;;  %s7552_s22 = sld [smem:[#allocation7]] }
 0x24b   : > { %4088 = vst.msk [vmem:[%s7404_s10 + $0x20] sm:$0xff] %vm630_vm2, %v2118_v12  ;;  %v2962_v32 = vadd.f32 %v2960_v5, %v2958_v31  ;;  %v2976_v21 = vmul.f32 %v2975_v2, %v5554_v3  ;;  %v2980_v11 = vmul.f32 %v2979_v10, %v5551_v6  ;;  %v2986_v50 = vmul.f32 %v2985_v33, %v5620_v19 }
 0x24c   : > { %v2957_v14 = vadd.f32 %v2955_v45, %v2951_v48  ;;  %v2989_v26 = vadd.f32 %v2987_v52, %v2983_v46  ;;  %v2992_v63 = vmul.f32 %v2991_v15, %v5654_v20  ;;  %v3012_v4 = vstv %s7432_s27  ;;  %v2157_v60 = vpop.permute.xlu1 %2156  ;;  %s7554_s27 = sld [smem:[#allocation7 + $0x1]] }
 0x24d   : > { %2967 = vrot.lane.b32.xlu1 %v2962_v32, %s8593_s8  ;;  %v2982_v41 = vadd.f32 %v2980_v11, %v2976_v21  ;;  %v3014_v36 = vmul.f32 %v3012_v4, %v5588_v55  ;;  %v3016_v22 = vstv %s7438_s0  ;;  %v3022_v47 = vstv %s7440_s4  ;;  %4096 = vst.msk [vmem:[%s7404_s10 + $0x38] sm:$0xff] %vm630_vm2, %v2157_v60  ;;  %s7560_s0 = sld [smem:[#allocation7 + $0x11e]]  ;;  %s7564_s4 = sld [smem:[#allocation7 + $0x4]] }
 0x24e   : > { %v2961_v17 = vadd.f32 %v2960_v5, %v2957_v14  ;;  %v2995_v59 = vadd.f32 %v2993_v42, %v2989_v26  ;;  %v3018_v0 = vmul.f32 %v3016_v22, %v5585_v58  ;;  %v3024_v9 = vmul.f32 %v3022_v47, %v5617_v18  ;;  %v2155_v40 = vpop.permute.xlu0 %2154 }
 0x24f   : > { %v2988_v23 = vadd.f32 %v2986_v50, %v2982_v41  ;;  %v3028_v57 = vstv %s7449_s21  ;;  %v3034_v35 = vstv %s7451_s2  ;;  %v3013_v39 = vmul.f32 %v3012_v4, %v5554_v3  ;;  %4095 = vst.msk [vmem:[%s7404_s10 + $0x30] sm:$0xff] %vm630_vm2, %v2155_v40  ;;  %s7568_s21 = sld [smem:[#allocation7 + $0x11f]]  ;;  %s7570_s2 = sld [smem:[#allocation7 + $0x5]] }
 0x250   : > { %2965 = vrot.lane.b32.xlu0 %v2961_v17, %s8593_s8  ;;  %v2999_v62 = vadd.f32 %v2997_v7, %v2995_v59  ;;  %v3020_v1 = vadd.f32 %v3018_v0, %v3014_v36  ;;  %v3030_v37 = vmul.f32 %v3028_v57, %v5651_v13  ;;  %v3017_v25 = vmul.f32 %v3016_v22, %v5551_v6 }
 0x251   : > { %v2994_v29 = vadd.f32 %v2992_v63, %v2988_v23  ;;  %v3023_v28 = vmul.f32 %v3022_v47, %v5620_v19  ;;  %v3029_v16 = vmul.f32 %v3028_v57, %v5654_v20  ;;  %v3049_v53 = vstv %s7461_s16  ;;  %v2194_v51 = vpop.permute.xlu1 %2193  ;;  %s7575_s16 = sld [smem:[#allocation8 + $0x47]] }
 0x252   : > { %3004 = vrot.lane.b32.xlu1 %v2999_v62, %s8593_s8  ;;  %v3026_v24 = vadd.f32 %v3024_v9, %v3020_v1  ;;  %v3019_v5 = vadd.f32 %v3017_v25, %v3013_v39  ;;  %v3051_v34 = vmul.f32 %v3049_v53, %v5588_v55  ;;  %v3053_v49 = vstv %s7466_s24  ;;  %4103 = vst.msk [vmem:[%s7404_s10 + $0x48] sm:$0xff] %vm630_vm2, %v2194_v51  ;;  %s7579_s24 = sld [smem:[#allocation7 + $0x8]] }
 0x253   : > { %v2998_v54 = vadd.f32 %v2997_v7, %v2994_v29  ;;  %v3055_v30 = vmul.f32 %v3053_v49, %v5585_v58  ;;  %v3059_v8 = vstv %s7473_s6  ;;  %v3065_v38 = vstv %s7475_s13  ;;  %v2192_v45 = vpop.permute.xlu0 %2191  ;;  %s7584_s6 = sld [smem:[#allocation7 + $0x2]]  ;;  %s7586_s13 = sld [smem:[#allocation7 + $0x9]] }
 0x254   : > { %v3032_v2 = vadd.f32 %v3030_v37, %v3026_v24  ;;  %v3025_v10 = vadd.f32 %v3023_v28, %v3019_v5  ;;  %v3061_v44 = vmul.f32 %v3059_v8, %v5617_v18  ;;  %v3067_v56 = vmul.f32 %v3065_v38, %v5651_v13  ;;  %4102 = vst.msk [vmem:[%s7404_s10 + $0x40] sm:$0xff] %vm630_vm2, %v2192_v45 }
 0x255   : > { %3002 = vrot.lane.b32.xlu0 %v2998_v54, %s8593_s8  ;;  %v3057_v27 = vadd.f32 %v3055_v30, %v3051_v34  ;;  %v3071_v61 = vstv %s7483_s18  ;;  %v3050_v43 = vmul.f32 %v3049_v53, %v5554_v3  ;;  %v3054_v31 = vmul.f32 %v3053_v49, %v5551_v6  ;;  %s7591_s18 = sld [smem:[#allocation7 + $0xc]] }
 0x256   : > { %v3036_v33 = vadd.f32 %v3034_v35, %v3032_v2  ;;  %v3031_v15 = vadd.f32 %v3029_v16, %v3025_v10  ;;  %v3060_v7 = vmul.f32 %v3059_v8, %v5620_v19  ;;  %v3066_v12 = vmul.f32 %v3065_v38, %v5654_v20  ;;  %v2231_v48 = vpop.permute.xlu1 %2230 }
 0x257   : > { %v3063_v46 = vadd.f32 %v3061_v44, %v3057_v27  ;;  %v3056_v52 = vadd.f32 %v3054_v31, %v3050_v43  ;;  %v3086_v42 = vstv %s7492_s12  ;;  %v3090_v32 = vstv %s7494_s3  ;;  %4110 = vst.msk [vmem:[%s7404_s10 + $0x58] sm:$0xff] %vm630_vm2, %v2231_v48  ;;  %s7598_s12 = sld [smem:[#allocation7 + $0x3]]  ;;  %s7600_s3 = sld [smem:[#allocation7 + $0x6]] }
 0x258   : > { %3041 = vrot.lane.b32.xlu1 %v3036_v33, %s8593_s8  ;;  %v3035_v21 = vadd.f32 %v3034_v35, %v3031_v15  ;;  %v3088_v11 = vmul.f32 %v3086_v42, %v5588_v55  ;;  %v3092_v50 = vmul.f32 %v3090_v32, %v5585_v58  ;;  %v3096_v14 = vstv %s7501_s17  ;;  %9249 = sst [smem:[#allocation56_spill]] %s7579_s24  ;;  %s9252_s17 = sld [smem:[#allocation36_spill]] }
 0x259   : > { %v3069_v26 = vadd.f32 %v3067_v56, %v3063_v46  ;;  %v3062_v63 = vadd.f32 %v3060_v7, %v3056_v52  ;;  %v3098_v4 = vmul.f32 %v3096_v14, %v5617_v18  ;;  %v3102_v60 = vstv %s7506_s30  ;;  %v2229_v41 = vpop.permute.xlu0 %2228  ;;  %9250 = sst [smem:[#allocation62_spill]] %s7586_s13  ;;  %s3306_s13 = sshll.u32 %s7024_s14, 4  ;;  %s7701_s13 = int_to_ptr.vmem [resolvable:$true] %s3306_s13 }
 0x25a   : > { %3039 = vrot.lane.b32.xlu0 %v3035_v21, %s8593_s8  ;;  %v3094_v36 = vadd.f32 %v3092_v50, %v3088_v11  ;;  %v3104_v22 = vmul.f32 %v3102_v60, %v5651_v13  ;;  %v3108_v47 = vstv %s7511_s19  ;;  %v3087_v17 = vmul.f32 %v3086_v42, %v5554_v3  ;;  %4109 = vst.msk [vmem:[%s7404_s10 + $0x50] sm:$0xff] %vm630_vm2, %v2229_v41  ;;  %s7605_s30 = sld [smem:[#allocation8]]  ;;  %s9253_s19 = sld [smem:[#allocation33_spill]] }
 0x25b   : > { %v3073_v59 = vadd.f32 %v3071_v61, %v3069_v26  ;;  %v3068_v0 = vadd.f32 %v3066_v12, %v3062_v63  ;;  %v3091_v9 = vmul.f32 %v3090_v32, %v5551_v6  ;;  %v3097_v40 = vmul.f32 %v3096_v14, %v5620_v19  ;;  %v2268_v23 = vpop.permute.xlu1 %2267  ;;  %9251 = sst [smem:[#allocation63_spill]] %s7591_s18 }
 0x25c   : > { %v3100_v57 = vadd.f32 %v3098_v4, %v3094_v36  ;;  %v3103_v35 = vmul.f32 %v3102_v60, %v5654_v20  ;;  %v3123_v39 = vstv %s7520_s26  ;;  %v3127_v62 = vstv %s7522_s20  ;;  %4117 = vst.msk [vmem:[%s7404_s10 + $0x68] sm:$0xff] %vm630_vm2, %v2268_v23  ;;  %s7607_s26 = sld [smem:[#allocation7 + $0xd]]  ;;  %s7611_s20 = sld [smem:[#allocation7 + $0x7]] }
 0x25d   : > { %3078 = vrot.lane.b32.xlu1 %v3073_v59, %s8593_s8  ;;  %v3072_v1 = vadd.f32 %v3071_v61, %v3068_v0  ;;  %v3093_v37 = vadd.f32 %v3091_v9, %v3087_v17  ;;  %v3125_v25 = vmul.f32 %v3123_v39, %v5588_v55  ;;  %v3129_v29 = vmul.f32 %v3127_v62, %v5585_v58  ;;  %s9260_s18 = sld [smem:[#allocation37_spill]] }
 0x25e   : > { %v3106_v28 = vadd.f32 %v3104_v22, %v3100_v57  ;;  %v3133_v16 = vstv %s7530_s7  ;;  %v3139_v53 = vstv %s7534_s11  ;;  %v3145_v51 = vstv %s7536_s1  ;;  %v2266_v24 = vpop.permute.xlu0 %2265  ;;  %s7613_s7 = sld [smem:[#allocation7 + $0xa]]  ;;  %s7622_s11 = sand.u32 1, %s9252_s17  }
 0x25f   : > { %3076 = vrot.lane.b32.xlu0 %v3072_v1, %s8593_s8  ;;  %v3099_v5 = vadd.f32 %v3097_v40, %v3093_v37  ;;  %v3131_v34 = vadd.f32 %v3129_v29, %v3125_v25  ;;  %v3135_v49 = vmul.f32 %v3133_v16, %v5617_v18  ;;  %v3141_v54 = vmul.f32 %v3139_v53, %v5651_v13 }
 0x260   : > { %4116 = vst.msk [vmem:[%s7404_s10 + $0x60] sm:$0xff] %vm630_vm2, %v2266_v24  ;;  %v3110_v30 = vadd.f32 %v3108_v47, %v3106_v28  ;;  %v3124_v8 = vmul.f32 %v3123_v39, %v5554_v3  ;;  %v3128_v38 = vmul.f32 %v3127_v62, %v5551_v6  ;;  %v3134_v45 = vmul.f32 %v3133_v16, %v5620_v19 }
 0x261   : > { %v3105_v2 = vadd.f32 %v3103_v35, %v3099_v5  ;;  %v3137_v10 = vadd.f32 %v3135_v49, %v3131_v34  ;;  %v3140_v44 = vmul.f32 %v3139_v53, %v5654_v20  ;;  %v3160_v56 = vstv %s7546_s28  ;;  %v2305_v27 = vpop.permute.xlu1 %2304  ;;  %s7625_s28 = sshll.u32 %s9253_s19, 11  ;;  %s9258_s19 = sld [smem:[#allocation175_spill]] }
 0x262   : > { %9254 = sst [smem:[#allocation61_spill]] %s7607_s26  ;;  %3115 = vrot.lane.b32.xlu1 %v3110_v30, %s8593_s8  ;;  %v3130_v61 = vadd.f32 %v3128_v38, %v3124_v8  ;;  %v3162_v43 = vmul.f32 %v3160_v56, %v5588_v55  ;;  %v3164_v31 = vstv %s7548_s9  ;;  %v3170_v33 = vstv %s7560_s0  ;;  %4124 = vst.msk [vmem:[%s7404_s10 + $0x78] sm:$0xff] %vm630_vm2, %v2305_v27  ;;  %s7629_s8 = sld [smem:[#allocation8 + $0x1]] }
 0x263   : > { %v3109_v15 = vadd.f32 %v3108_v47, %v3105_v2  ;;  %v3143_v7 = vadd.f32 %v3141_v54, %v3137_v10  ;;  %v3166_v12 = vmul.f32 %v3164_v31, %v5585_v58  ;;  %v3172_v48 = vmul.f32 %v3170_v33, %v5617_v18  ;;  %v2303_v46 = vpop.permute.xlu0 %2302  ;;  %s9257_s9 = smov 120   ;;  %s3270_s26 = sshll.u32 %s6596_s23, 4  ;;  %s7648_s26 = int_to_ptr.vmem [resolvable:$true] %s3270_s26 }
 0x264   : > { %9255 = sst [smem:[#allocation64_spill]] %s7613_s7  ;;  %v3136_v52 = vadd.f32 %v3134_v45, %v3130_v61  ;;  %v3176_v42 = vstv %s7568_s21  ;;  %v3161_v32 = vmul.f32 %v3160_v56, %v5554_v3  ;;  %4123 = vst.msk [vmem:[%s7404_s10 + $0x70] sm:$0xff] %vm630_vm2, %v2303_v46  ;;  %v3165_v14 = vmul.f32 %v3164_v31, %v5551_v6  ;;  %s7655_s23 = scalar_lea.vmem [#allocation18], %s6565_s5 }
 0x265   : > { %3113 = vrot.lane.b32.xlu0 %v3109_v15, %s9257_s9  ;;  %v3147_v21 = vadd.f32 %v3145_v51, %v3143_v7  ;;  %v3168_v11 = vadd.f32 %v3166_v12, %v3162_v43  ;;  %v3178_v50 = vmul.f32 %v3176_v42, %v5651_v13  ;;  %v3171_v63 = vmul.f32 %v3170_v33, %v5620_v19  ;;  %s4520_s24 = scalar_lea.vmem %s7648_s26, 2048  ;;  %p9263_p1 = scmp.ne.s32.totalorder %s9260_s18, 0 }
 0x266   : > { %v3142_v26 = vadd.f32 %v3140_v44, %v3136_v52  ;;  %v2342_v4 = vpop.permute.xlu1 %2341  ;;  %v605_v60 = vstv %s7552_s22  ;;  %v3182_v36 = vstv %s7575_s16  ;;  %v3167_v22 = vadd.f32 %v3165_v14, %v3161_v32  ;;  %s8601_s22 = scalar_lea.sflag [#allocation11], %s7622_s11  ;;  %p4521_p10 = scmp.ne.s32.totalorder %s7648_s26, %s4520_s24 }
 0x267   : > { %s9259_s29 = smov %s9258_s19  ;;  %s7644_s21 = scalar_lea.hbm %s9258_s19, %s7625_s28  ;;  %3152 = vrot.lane.b32.xlu1 %v3147_v21, %s9257_s9  ;;  %v3174_v41 = vadd.f32 %v3172_v48, %v3168_v11  ;;  %v3177_v47 = vmul.f32 %v3176_v42, %v5654_v20  ;;  %2346 = vst.msk [vmem:[%s7655_s23 + $0x8] sm:$0xff] %vm630_vm2, %v2342_v4 }
 0x268   : > { %9256 = sst [smem:[#allocation65_spill]] %s7629_s8  ;;  %s9261_s19 = sld [smem:[#allocation177_spill]]  ;;  %v3146_v17 = vadd.f32 %v3145_v51, %v3142_v26  ;;  %v2340_v59 = vpop.permute.xlu0 %2339 }
 0x269   : > { %p4522_p3 = pnand %p4521_p10, %p9263_p1  ;;  %s4866_s5 = smov [#allocation10]  }
 0x26a   : > { %s4524_s8 = sshll.u32 %s4866_s5, 4  ;;  %s4525_s8 = int_to_ptr.vmem [resolvable:$false] %s4524_s8 }
 0x26b   : > { %p4523_p7 = pneg %p4522_p3  ;;  %s4526_s15 = scalar_lea.vmem %s4525_s8, 4096 }
 0x26c   : > { %p4527_p8 = scmp.lt.s32.totalorder %s7648_s26, %s4525_s8  ;;  %p4528_p12 = scmp.lt.s32.totalorder %s4526_s15, %s4520_s24 }
 0x26e   : > { %s9262_s25 = smov %s9261_s19  ;;  %s7663_s7 = scalar_lea.hbm %s9261_s19, %s7625_s28 }
 0x26f   : > { %p4529_p2 = por %p4528_p12, %p4527_p8 }
 0x271   : > { %p4530_p6 = pnand %p4529_p2, %p4523_p7 }
 0x273   : > { %4533 = shalt.err (!%p4530_p6)
}
 0x274   : > { %s4534_s1 = scalar_lea.hbm %s7644_s21, 2048  ;;  %s4538_s5 = scalar_lea.hbm %s9259_s29, 4096 }
 0x275   : > { %p4535_p9 = scmp.ne.s32.totalorder %s7644_s21, %s4534_s1  ;;  %p4539_p4 = scmp.lt.u32.totalorder %s7644_s21, %s9259_s29 }
 0x276   : > { %p4540_p0 = scmp.lt.u32.totalorder %s4538_s5, %s4534_s1  ;;  %p4542_p10 = scmp.lt.u32.totalorder %s4534_s1, %s7644_s21 }
 0x277   : > { %p4536_p13 = pnand %p4535_p9, %p9263_p1 }
 0x278   : > { %p4541_p5 = por %p4540_p0, %p4539_p4 }
 0x279   : > { %p4537_p11 = pneg %p4536_p13 }
 0x27a   : > { %p4543_p3 = por %p4542_p10, %p4541_p5 }
 0x27c   : > { %p4544_p7 = pnand %p4543_p3, %p4537_p11 }
 0x27e   : > { %4547 = shalt.err (!%p4544_p7)
}
 0x27f   : > { %s8604_s15 = smov 128   ;;  %s8606_s24 = smov 8   ;;  %v606_v0 = vmul.f32 %v605_v60, %v5554_v3  ;;  %v607_v9 = vmul.f32 %v605_v60, %v5588_v55  ;;  %v3180_v40 = vadd.f32 %v3178_v50, %v3174_v41  ;;  %v3173_v23 = vadd.f32 %v3171_v63, %v3167_v22  ;;  %2345 = vst.msk [vmem:[%s7655_s23] sm:$0xff] %vm630_vm2, %v2340_v59  ;;  %v2378_v28 = vpop.permute.xlu1 %2377 }
 0x280   : > { %4337 = dma.vmem_to_hbm [thread:$0]  (%p9263_p1), %s7648_s26, 2048, %s7644_s21, %s8601_s22, %s8604_s15, %s8604_s15, %s8606_s24  }
 0x281   : > { %v609_v57 = vstv %s7554_s27  ;;  %v615_v35 = vstv %s7584_s6  ;;  %3150 = vrot.lane.b32.xlu0 %v3146_v17, %s9257_s9  ;;  %s9264_s1 = sld [smem:[#allocation179_spill]]  ;;  %s3342_s17 = sshll.u32 %s7404_s10, 4  ;;  %v3184_v25 = vadd.f32 %v3182_v36, %v3180_v40  ;;  %v3179_v29 = vadd.f32 %v3177_v47, %v3173_v23  ;;  %s7754_s17 = int_to_ptr.vmem [resolvable:$true] %s3342_s17 }
 0x282   : > { %v610_v39 = vmul.f32 %v609_v57, %v5551_v6  ;;  %v611_v62 = vmul.f32 %v609_v57, %v5585_v58  ;;  %v7716_v1 = vmul.f32 %v615_v35, %v5620_v19  ;;  %v7719_v37 = vmul.f32 %v615_v35, %v5617_v18  ;;  %s8603_s14 = scalar_lea.sflag [#allocation14], %s7622_s11  ;;  %s4548_s27 = scalar_lea.vmem %s7701_s13, 2048 }
 0x283   : > { %p4549_p8 = scmp.ne.s32.totalorder %s7701_s13, %s4548_s27  ;;  %s4869_s6 = smov [#allocation13]  }
 0x284   : > { %s4552_s5 = sshll.u32 %s4869_s6, 4  ;;  %s4553_s5 = int_to_ptr.vmem [resolvable:$false] %s4552_s5 }
 0x285   : > { %p4550_p12 = pnand %p4549_p8, %p9263_p1  ;;  %s4554_s19 = scalar_lea.vmem %s4553_s5, 4096 }
 0x286   : > { %p4555_p6 = scmp.lt.s32.totalorder %s7701_s13, %s4553_s5  ;;  %p4556_p9 = scmp.lt.s32.totalorder %s4554_s19, %s4548_s27 }
 0x287   : > { %s7710_s0 = scalar_lea.hbm %s9264_s1, %s7625_s28  ;;  %p4551_p2 = pneg %p4550_p12 }
 0x288   : > { %p4557_p13 = por %p4556_p9, %p4555_p6 }
 0x28a   : > { %p4558_p11 = pnand %p4557_p13, %p4551_p2 }
 0x28c   : > { %4561 = shalt.err (!%p4558_p11)
}
 0x28d   : > { %s4562_s8 = scalar_lea.hbm %s7663_s7, 2048  ;;  %s4566_s6 = scalar_lea.hbm %s9262_s25, 4096 }
 0x28e   : > { %p4563_p4 = scmp.ne.s32.totalorder %s7663_s7, %s4562_s8  ;;  %p4567_p10 = scmp.lt.u32.totalorder %s7663_s7, %s9262_s25 }
 0x28f   : > { %p4568_p3 = scmp.lt.u32.totalorder %s4566_s6, %s4562_s8  ;;  %p4570_p8 = scmp.lt.u32.totalorder %s4562_s8, %s7663_s7 }
 0x290   : > { %p4564_p0 = pnand %p4563_p4, %p9263_p1 }
 0x291   : > { %p4569_p7 = por %p4568_p3, %p4567_p10 }
 0x292   : > { %p4565_p5 = pneg %p4564_p0 }
 0x293   : > { %p4571_p12 = por %p4570_p8, %p4569_p7 }
 0x295   : > { %p4572_p2 = pnand %p4571_p12, %p4565_p5 }
 0x297   : > { %4575 = shalt.err (!%p4572_p2)
}
 0x298   : > { %4339 = dma.vmem_to_hbm [thread:$0]  (%p9263_p1), %s7701_s13, 2048, %s7663_s7, %s8603_s14, %s8604_s15, %s8604_s15, %s8606_s24   ;;  %v612_v16 = vadd.f32 %v610_v39, %v606_v0  ;;  %v613_v53 = vadd.f32 %v611_v62, %v607_v9  ;;  %v3183_v5 = vadd.f32 %v3182_v36, %v3179_v29  ;;  %v2376_v30 = vpop.permute.xlu0 %2375 }
 0x299   : > { %4136 = vst.msk [vmem:[%s7655_s23 + $0x18] sm:$0xff] %vm630_vm2, %v2378_v28  ;;  %v621_v51 = vstv %s7598_s12  ;;  %v627_v24 = vstv %s7605_s30  ;;  %s7758_s22 = sld [smem:[#allocation7 + $0x10]]  ;;  %3189 = vrot.lane.b32.xlu1 %v3184_v25, %s9257_s9  ;;  %s7766_s10 = sld [smem:[#allocation7 + $0xb]] }
 0x29a   : > { %v622_v34 = vmul.f32 %v621_v51, %v5654_v20  ;;  %v623_v49 = vmul.f32 %v621_v51, %v5651_v13  ;;  %v634_v54 = vstv %s7564_s4  ;;  %s7768_s13 = sld [smem:[#allocation8 + $0x2]]  ;;  %s8602_s7 = scalar_lea.sflag [#allocation17], %s7622_s11 }
 0x29b   : > { %s4576_s12 = scalar_lea.vmem %s7754_s17, 2048  ;;  %s4870_s30 = smov [#allocation16]  }
 0x29c   : > { %p4577_p6 = scmp.ne.s32.totalorder %s7754_s17, %s4576_s12  ;;  %s4580_s16 = sshll.u32 %s4870_s30, 4  ;;  %s4581_s16 = int_to_ptr.vmem [resolvable:$false] %s4580_s16 }
 0x29d   : > { %s4582_s27 = scalar_lea.vmem %s4581_s16, 4096  ;;  %p4583_p11 = scmp.lt.s32.totalorder %s7754_s17, %s4581_s16 }
 0x29e   : > { %p4578_p9 = pnand %p4577_p6, %p9263_p1  ;;  %p4584_p4 = scmp.lt.s32.totalorder %s4582_s27, %s4576_s12 }
 0x2a0   : > { %p4579_p13 = pneg %p4578_p9  ;;  %p4585_p0 = por %p4584_p4, %p4583_p11 }
 0x2a2   : > { %p4586_p5 = pnand %p4585_p0, %p4579_p13 }
 0x2a4   : > { %4589 = shalt.err (!%p4586_p5)
}
 0x2a5   : > { %s4590_s4 = scalar_lea.hbm %s7710_s0, 2048  ;;  %s4594_s26 = scalar_lea.hbm %s9264_s1, 4096 }
 0x2a6   : > { %p4591_p10 = scmp.ne.s32.totalorder %s7710_s0, %s4590_s4  ;;  %p4595_p8 = scmp.lt.u32.totalorder %s7710_s0, %s9264_s1 }
 0x2a7   : > { %p4596_p12 = scmp.lt.u32.totalorder %s4594_s26, %s4590_s4  ;;  %p4598_p6 = scmp.lt.u32.totalorder %s4590_s4, %s7710_s0 }
 0x2a8   : > { %p4592_p3 = pnand %p4591_p10, %p9263_p1 }
 0x2a9   : > { %p4597_p2 = por %p4596_p12, %p4595_p8 }
 0x2aa   : > { %p4593_p7 = pneg %p4592_p3 }
 0x2ab   : > { %p4599_p9 = por %p4598_p6, %p4597_p2 }
 0x2ad   : > { %p4600_p13 = pnand %p4599_p9, %p4593_p7 }
 0x2af   : > { %4603 = shalt.err (!%p4600_p13)
}
 0x2b0   : > { %4341 = dma.vmem_to_hbm [thread:$0]  (%p9263_p1), %s7754_s17, 2048, %s7710_s0, %s8602_s7, %s8604_s15, %s8604_s15, %s8606_s24   ;;  %v618_v8 = vadd.f32 %v7716_v1, %v612_v16  ;;  %v619_v38 = vadd.f32 %v7719_v37, %v613_v53  ;;  %v635_v45 = vmul.f32 %v634_v54, %v5554_v3  ;;  %v636_v2 = vmul.f32 %v634_v54, %v5588_v55  ;;  %v2415_v27 = vpop.permute.xlu1 %2414  ;;  %v2413_v21 = vpop.permute.xlu0 %2412 }
 0x2b1   : > { %3187 = vrot.lane.b32.xlu0 %v3183_v5, %s9257_s9  ;;  %4135 = vst.msk [vmem:[%s7655_s23 + $0x10] sm:$0xff] %vm630_vm2, %v2376_v30  ;;  %v638_v10 = vstv %s7570_s2  ;;  %v644_v44 = vstv %s7600_s3  ;;  %s9265_s5 = sld [smem:[#allocation46_spill]]  ;;  %s7807_s12 = sld [smem:[#allocation7 + $0x11]] }
 0x2b2   : > { %v650_v56 = vstv %s7611_s20  ;;  %v624_v61 = vadd.f32 %v622_v34, %v618_v8  ;;  %v625_v43 = vadd.f32 %v623_v49, %v619_v38  ;;  %v639_v31 = vmul.f32 %v638_v10, %v5551_v6  ;;  %s7811_s0 = sld [smem:[#allocation7 + $0xe]]  ;;  %s9266_s17 = sld [smem:[#allocation65_spill]]  ;;  %4143 = vst.msk [vmem:[%s7655_s23 + $0x28] sm:$0xff] %vm630_vm2, %v2415_v27  ;;  %4142 = vst.msk [vmem:[%s7655_s23 + $0x20] sm:$0xff] %vm630_vm2, %v2413_v21 }
 0x2b3   : > { %v640_v33 = vmul.f32 %v638_v10, %v5585_v58  ;;  %s7813_s9 = sld [smem:[#allocation7 + $0xf]]  ;;  %s9267_s2 = sld [smem:[#allocation56_spill]]  ;;  %v645_v15 = vmul.f32 %v644_v44, %v5620_v19  ;;  %v646_v7 = vmul.f32 %v644_v44, %v5617_v18  ;;  %v651_v12 = vmul.f32 %v650_v56, %v5654_v20 }
 0x2b4   : > { %s9268_s3 = sld [smem:[#allocation62_spill]]  ;;  %s9269_s20 = sld [smem:[#allocation64_spill]]  ;;  %v652_v48 = vmul.f32 %v650_v56, %v5651_v13  ;;  %v628_v46 = vadd.f32 %v627_v24, %v624_v61  ;;  %v629_v52 = vadd.f32 %v627_v24, %v625_v43  ;;  %v641_v42 = vadd.f32 %v639_v31, %v635_v45 }
 0x2b5   : > { %s9270_s30 = sld [smem:[#allocation51_spill]]  ;;  %s9271_s4 = sld [smem:[#allocation176_spill]]  ;;  %v642_v32 = vadd.f32 %v640_v33, %v636_v2 }
 0x2b6   : > { %s9272_s8 = sld [smem:[#allocation60_spill]]  ;;  %s7828_s21 = sld [smem:[#allocation7 + $0x12]]  ;;  %v647_v63 = vadd.f32 %v645_v15, %v641_v42 }
 0x2b7   : > { %s3288_s26 = sshll.u32 %s9265_s5, 4  ;;  %s9273_s27 = sld [smem:[#allocation178_spill]]  ;;  %v648_v4 = vadd.f32 %v646_v7, %v642_v32  ;;  %s7830_s26 = int_to_ptr.vmem [resolvable:$true] %s3288_s26 }
 0x2b8   : > { %v656_v11 = vstv %s9266_s17 }
 0x2b9   : > { %v663_v50 = vstv %s9267_s2  ;;  %s4604_s2 = scalar_lea.vmem %s7830_s26, 2048 }
 0x2ba   : > { %v667_v14 = vstv %s9268_s3  ;;  %v673_v26 = vstv %s9269_s20  ;;  %v664_v60 = vmul.f32 %v663_v50, %v5554_v3  ;;  %v665_v41 = vmul.f32 %v663_v50, %v5588_v55  ;;  %p4605_p11 = scmp.ne.s32.totalorder %s7830_s26, %s4604_s2  ;;  %s4871_s3 = smov [#allocation12]  }
 0x2bb   : > { %s7825_s19 = scalar_lea.hbm %s9271_s4, %s7625_s28  ;;  %s4608_s20 = sshll.u32 %s4871_s3, 4  ;;  %s4609_s20 = int_to_ptr.vmem [resolvable:$false] %s4608_s20 }
 0x2bc   : > { %s7846_s14 = scalar_lea.vmem [#allocation9], %s9272_s8  ;;  %p4606_p4 = pnand %p4605_p11, %p9263_p1 }
 0x2bd   : > { %s7840_s5 = scalar_lea.hbm %s9273_s27, %s7625_s28  ;;  %631 = vst.msk [vmem:[%s7846_s14] sm:$0xff] %vm630_vm2, %v628_v46  ;;  %632 = vst.msk [vmem:[%s7846_s14 + $0x8] sm:$0xff] %vm630_vm2, %v629_v52  ;;  %s4610_s6 = scalar_lea.vmem %s4609_s20, 4096 }
 0x2be   : > { %p4607_p0 = pneg %p4606_p4  ;;  %p4611_p5 = scmp.lt.s32.totalorder %s7830_s26, %s4609_s20 }
 0x2bf   : > { %p4612_p10 = scmp.lt.s32.totalorder %s4610_s6, %s4604_s2 }
 0x2c1   : > { %p4613_p3 = por %p4612_p10, %p4611_p5 }
 0x2c3   : > { %p4614_p7 = pnand %p4613_p3, %p4607_p0 }
 0x2c5   : > { %4617 = shalt.err (!%p4614_p7)
}
 0x2c6   : > { %s4618_s16 = scalar_lea.hbm %s7825_s19, 2048  ;;  %s4622_s3 = scalar_lea.hbm %s9271_s4, 4096 }
 0x2c7   : > { %p4619_p8 = scmp.ne.s32.totalorder %s7825_s19, %s4618_s16  ;;  %p4623_p6 = scmp.lt.u32.totalorder %s7825_s19, %s9271_s4 }
 0x2c8   : > { %p4624_p9 = scmp.lt.u32.totalorder %s4622_s3, %s4618_s16  ;;  %p4626_p11 = scmp.lt.u32.totalorder %s4618_s16, %s7825_s19 }
 0x2c9   : > { %p4620_p12 = pnand %p4619_p8, %p9263_p1 }
 0x2ca   : > { %p4625_p13 = por %p4624_p9, %p4623_p6 }
 0x2cb   : > { %p4621_p2 = pneg %p4620_p12 }
 0x2cc   : > { %p4627_p4 = por %p4626_p11, %p4625_p13 }
 0x2ce   : > { %p4628_p0 = pnand %p4627_p4, %p4621_p2 }
 0x2d0   : > { %4631 = shalt.err (!%p4628_p0)
}
 0x2d1   : > { %s9274_s2 = smov 8   ;;  %s9275_s6 = smov 128   ;;  %v668_v36 = vmul.f32 %v667_v14, %v5551_v6  ;;  %v669_v22 = vmul.f32 %v667_v14, %v5585_v58  ;;  %v674_v47 = vmul.f32 %v673_v26, %v5620_v19  ;;  %v675_v17 = vmul.f32 %v673_v26, %v5617_v18  ;;  %v2452_v59 = vpop.permute.xlu1 %2451 }
 0x2d2   : > { %s9276_s1 = scalar_lea.sflag [#allocation11], %s7622_s11  ;;  %s7884_s15 = sld [smem:[#allocation8 + $0x3]]  ;;  %v653_v0 = vadd.f32 %v651_v12, %v647_v63  ;;  %v654_v9 = vadd.f32 %v652_v48, %v648_v4  ;;  %v679_v40 = vstv %s7766_s10  ;;  %v685_v23 = vstv %s7768_s13  ;;  %4150 = vst.msk [vmem:[%s7655_s23 + $0x38] sm:$0xff] %vm630_vm2, %v2452_v59 }
 0x2d3   : > { %4338 = dma.vmem_to_hbm [thread:$0]  (%p9263_p1), %s7830_s26, 2048, %s7825_s19, %s9276_s1, %s9275_s6, %s9275_s6, %s9274_s2   ;;  %v670_v57 = vadd.f32 %v668_v36, %v664_v60  ;;  %v671_v35 = vadd.f32 %v669_v22, %v665_v41  ;;  %v680_v39 = vmul.f32 %v679_v40, %v5654_v20  ;;  %v681_v62 = vmul.f32 %v679_v40, %v5651_v13 }
 0x2d4   : > { %s9277_s24 = sshll.u32 %s9270_s30, 4  ;;  %s7892_s1 = sld [smem:[#allocation7 + $0x13]]  ;;  %s7888_s24 = int_to_ptr.vmem [resolvable:$true] %s9277_s24 }
 0x2d5   : > { %s7894_s7 = sld [smem:[#allocation8 + $0x4]]  ;;  %s4632_s30 = scalar_lea.vmem %s7888_s24, 2048 }
 0x2d6   : > { %p4633_p5 = scmp.ne.s32.totalorder %s7888_s24, %s4632_s30  ;;  %s4872_s10 = smov [#allocation15]  }
 0x2d7   : > { %s4636_s19 = sshll.u32 %s4872_s10, 4  ;;  %s4637_s19 = int_to_ptr.vmem [resolvable:$false] %s4636_s19 }
 0x2d8   : > { %p4634_p10 = pnand %p4633_p5, %p9263_p1  ;;  %s4638_s26 = scalar_lea.vmem %s4637_s19, 4096 }
 0x2d9   : > { %p4639_p7 = scmp.lt.s32.totalorder %s7888_s24, %s4637_s19  ;;  %p4640_p8 = scmp.lt.s32.totalorder %s4638_s26, %s4632_s30 }
 0x2da   : > { %p4635_p3 = pneg %p4634_p10 }
 0x2db   : > { %p4641_p12 = por %p4640_p8, %p4639_p7 }
 0x2dd   : > { %p4642_p2 = pnand %p4641_p12, %p4635_p3 }
 0x2df   : > { %4645 = shalt.err (!%p4642_p2)
}
 0x2e0   : > { %s4646_s16 = scalar_lea.hbm %s7840_s5, 2048  ;;  %s4650_s10 = scalar_lea.hbm %s9273_s27, 4096 }
 0x2e1   : > { %p4647_p6 = scmp.ne.s32.totalorder %s7840_s5, %s4646_s16  ;;  %p4651_p11 = scmp.lt.u32.totalorder %s7840_s5, %s9273_s27 }
 0x2e2   : > { %p4652_p4 = scmp.lt.u32.totalorder %s4650_s10, %s4646_s16  ;;  %p4654_p5 = scmp.lt.u32.totalorder %s4646_s16, %s7840_s5 }
 0x2e3   : > { %p4648_p9 = pnand %p4647_p6, %p9263_p1 }
 0x2e4   : > { %p4653_p0 = por %p4652_p4, %p4651_p11 }
 0x2e5   : > { %p4649_p13 = pneg %p4648_p9 }
 0x2e6   : > { %p4655_p10 = por %p4654_p5, %p4653_p0 }
 0x2e8   : > { %p4656_p3 = pnand %p4655_p10, %p4649_p13 }
 0x2ea   : > { %4659 = shalt.err (!%p4656_p3)
}
 0x2eb   : > { %s9278_s30 = scalar_lea.sflag [#allocation14], %s7622_s11  ;;  %s9279_s26 = sld [smem:[#allocation63_spill]]  ;;  %v2450_v1 = vpop.permute.xlu0 %2449  ;;  %v657_v37 = vadd.f32 %v656_v11, %v653_v0  ;;  %v658_v25 = vadd.f32 %v656_v11, %v654_v9  ;;  %v676_v16 = vadd.f32 %v674_v47, %v670_v57  ;;  %v677_v53 = vadd.f32 %v675_v17, %v671_v35  ;;  %v2489_v30 = vpop.permute.xlu1 %2488 }
 0x2ec   : > { %s9280_s4 = sld [smem:[#allocation61_spill]]  ;;  %4149 = vst.msk [vmem:[%s7655_s23 + $0x30] sm:$0xff] %vm630_vm2, %v2450_v1  ;;  %v702_v49 = vstv %s7811_s0  ;;  %v708_v54 = vstv %s7813_s9  ;;  %s7944_s17 = sld [smem:[#allocation7 + $0x14]]  ;;  %4157 = vst.msk [vmem:[%s7655_s23 + $0x48] sm:$0xff] %vm630_vm2, %v2489_v30 }
 0x2ed   : > { %4340 = dma.vmem_to_hbm [thread:$0]  (%p9263_p1), %s7888_s24, 2048, %s7840_s5, %s9278_s30, %s9275_s6, %s9275_s6, %s9274_s2   ;;  %v682_v8 = vadd.f32 %v680_v39, %v676_v16  ;;  %v683_v38 = vadd.f32 %v681_v62, %v677_v53  ;;  %v703_v45 = vmul.f32 %v702_v49, %v5620_v19  ;;  %v704_v2 = vmul.f32 %v702_v49, %v5617_v18 }
 0x2ee   : > { %3811 = vst.msk [vmem:[%s7846_s14 + $0x10] sm:$0xff] %vm630_vm2, %v657_v37  ;;  %3812 = vst.msk [vmem:[%s7846_s14 + $0x18] sm:$0xff] %vm630_vm2, %v658_v25  ;;  %s7946_s5 = sld [smem:[#allocation7 + $0x15]]  ;;  %s7950_s24 = sld [smem:[#allocation7 + $0x16]]  ;;  %v709_v56 = vmul.f32 %v708_v54, %v5654_v20  ;;  %v710_v27 = vmul.f32 %v708_v54, %v5651_v13  ;;  %v714_v33 = vstv %s7884_s15  ;;  %v721_v15 = vstv %s7758_s22 }
 0x2ef   : > { %s7952_s0 = sld [smem:[#allocation7 + $0x17]]  ;;  %v2487_v61 = vpop.permute.xlu0 %2486  ;;  %v686_v43 = vadd.f32 %v685_v23, %v682_v8  ;;  %v687_v31 = vadd.f32 %v685_v23, %v683_v38  ;;  %v722_v48 = vmul.f32 %v721_v15, %v5554_v3  ;;  %v723_v46 = vmul.f32 %v721_v15, %v5588_v55  ;;  %s7976_s13 = sld [smem:[#allocation8 + $0x5]]  ;;  %v2526_v11 = vpop.permute.xlu1 %2525 }
 0x2f0   : > { %4156 = vst.msk [vmem:[%s7655_s23 + $0x40] sm:$0xff] %vm630_vm2, %v2487_v61  ;;  %v725_v52 = vstv %s7807_s12  ;;  %v731_v42 = vstv %s7828_s21  ;;  %v737_v32 = vstv %s7892_s1  ;;  %s7978_s22 = sld [smem:[#allocation7 + $0x18]]  ;;  %s7988_s12 = sld [smem:[#allocation7 + $0x19]] }
 0x2f1   : > { %v692_v29 = vstv %s9279_s26  ;;  %3818 = vst.msk [vmem:[%s7846_s14 + $0x20] sm:$0xff] %vm630_vm2, %v686_v43  ;;  %3819 = vst.msk [vmem:[%s7846_s14 + $0x28] sm:$0xff] %vm630_vm2, %v687_v31  ;;  %v743_v21 = vstv %s7894_s7  ;;  %v726_v26 = vmul.f32 %v725_v52, %v5551_v6  ;;  %v727_v63 = vmul.f32 %v725_v52, %v5585_v58  ;;  %s7990_s9 = sld [smem:[#allocation7 + $0x1a]]  ;;  %s7996_s21 = sld [smem:[#allocation7 + $0x1b]] }
 0x2f2   : > { %v696_v28 = vstv %s9280_s4  ;;  %v693_v51 = vmul.f32 %v692_v29, %v5554_v3  ;;  %v694_v24 = vmul.f32 %v692_v29, %v5588_v55  ;;  %4164 = vst.msk [vmem:[%s7655_s23 + $0x58] sm:$0xff] %vm630_vm2, %v2526_v11  ;;  %v732_v4 = vmul.f32 %v731_v42, %v5620_v19  ;;  %s7998_s15 = sld [smem:[#allocation8 + $0x6]]  ;;  %s8012_s1 = sld [smem:[#allocation7 + $0x1c]] }
 0x2f3   : > { %v697_v5 = vmul.f32 %v696_v28, %v5551_v6  ;;  %v698_v34 = vmul.f32 %v696_v28, %v5585_v58  ;;  %v733_v60 = vmul.f32 %v731_v42, %v5617_v18  ;;  %v738_v41 = vmul.f32 %v737_v32, %v5654_v20  ;;  %v2524_v0 = vpop.permute.xlu0 %2523  ;;  %v2563_v37 = vpop.permute.xlu1 %2562  ;;  %s8014_s7 = sld [smem:[#allocation7 + $0x1d]]  ;;  %s8022_s16 = sld [smem:[#allocation7 + $0x1e]] }
 0x2f4   : > { %v739_v36 = vmul.f32 %v737_v32, %v5651_v13  ;;  %v728_v17 = vadd.f32 %v726_v26, %v722_v48  ;;  %v729_v59 = vadd.f32 %v727_v63, %v723_v46  ;;  %v750_v9 = vstv %s7944_s17  ;;  %4163 = vst.msk [vmem:[%s7655_s23 + $0x50] sm:$0xff] %vm630_vm2, %v2524_v0  ;;  %4171 = vst.msk [vmem:[%s7655_s23 + $0x68] sm:$0xff] %vm630_vm2, %v2563_v37  ;;  %s8024_s3 = sld [smem:[#allocation7 + $0x1f]]  ;;  %s3360_s20 = sshll.u32 %s7655_s23, 4  ;;  %s8057_s20 = int_to_ptr.vmem [resolvable:$true] %s3360_s20 }
 0x2f5   : > { %v699_v10 = vadd.f32 %v697_v5, %v693_v51  ;;  %v700_v44 = vadd.f32 %v698_v34, %v694_v24  ;;  %v754_v40 = vstv %s7946_s5  ;;  %v760_v23 = vstv %s7950_s24  ;;  %s8047_s10 = sld [smem:[#allocation8 + $0x7]]  ;;  %s9281_s26 = sld [smem:[#allocation180_spill]] }
 0x2f6   : > { %v766_v57 = vstv %s7952_s0  ;;  %v734_v35 = vadd.f32 %v732_v4, %v728_v17  ;;  %v735_v39 = vadd.f32 %v733_v60, %v729_v59  ;;  %v751_v62 = vmul.f32 %v750_v9, %v5554_v3  ;;  %s4873_s17 = smov [#allocation18]  }
 0x2f7   : > { %v705_v7 = vadd.f32 %v703_v45, %v699_v10  ;;  %v706_v12 = vadd.f32 %v704_v2, %v700_v44  ;;  %v752_v1 = vmul.f32 %v750_v9, %v5588_v55  ;;  %v755_v25 = vmul.f32 %v754_v40, %v5551_v6  ;;  %v2561_v8 = vpop.permute.xlu0 %2560  ;;  %s4664_s5 = sshll.u32 %s4873_s17, 4  ;;  %s4665_s5 = int_to_ptr.vmem [resolvable:$false] %s4664_s5 }
 0x2f8   : > { %v756_v29 = vmul.f32 %v754_v40, %v5585_v58  ;;  %v761_v28 = vmul.f32 %v760_v23, %v5620_v19  ;;  %v762_v16 = vmul.f32 %v760_v23, %v5617_v18  ;;  %v740_v53 = vadd.f32 %v738_v41, %v734_v35  ;;  %4170 = vst.msk [vmem:[%s7655_s23 + $0x60] sm:$0xff] %vm630_vm2, %v2561_v8  ;;  %s4666_s24 = scalar_lea.vmem %s4665_s5, 4096  ;;  %p4667_p2 = scmp.lt.s32.totalorder %s8057_s20, %s4665_s5 }
 0x2f9   : > { %v711_v50 = vadd.f32 %v709_v56, %v705_v7  ;;  %v712_v14 = vadd.f32 %v710_v27, %v706_v12  ;;  %v741_v51 = vadd.f32 %v739_v36, %v735_v39  ;;  %v767_v24 = vmul.f32 %v766_v57, %v5654_v20  ;;  %v2600_v7 = vpop.permute.xlu1 %2599 }
 0x2fa   : > { %v768_v5 = vmul.f32 %v766_v57, %v5651_v13  ;;  %v757_v34 = vadd.f32 %v755_v25, %v751_v62  ;;  %v758_v49 = vadd.f32 %v756_v29, %v752_v1  ;;  %v772_v54 = vstv %s7976_s13  ;;  %4178 = vst.msk [vmem:[%s7655_s23 + $0x78] sm:$0xff] %vm630_vm2, %v2600_v7 }
 0x2fb   : > { %v715_v22 = vadd.f32 %v714_v33, %v711_v50  ;;  %v716_v47 = vadd.f32 %v714_v33, %v712_v14  ;;  %v779_v30 = vstv %s7978_s22  ;;  %v744_v38 = vadd.f32 %v743_v21, %v740_v53  ;;  %v2598_v50 = vpop.permute.xlu0 %2597  ;;  %s8055_s4 = scalar_lea.hbm %s9281_s26, %s7625_s28 }
 0x2fc   : > { %v745_v45 = vadd.f32 %v743_v21, %v741_v51  ;;  %v780_v2 = vmul.f32 %v779_v30, %v5554_v3  ;;  %v781_v10 = vmul.f32 %v779_v30, %v5588_v55  ;;  %v763_v44 = vadd.f32 %v761_v28, %v757_v34  ;;  %4177 = vst.msk [vmem:[%s7655_s23 + $0x70] sm:$0xff] %vm630_vm2, %v2598_v50  ;;  %s4660_s23 = scalar_lea.vmem %s8057_s20, 2048 }
 0x2fd   : > { %3825 = vst.msk [vmem:[%s7846_s14 + $0x30] sm:$0xff] %vm630_vm2, %v715_v22  ;;  %3826 = vst.msk [vmem:[%s7846_s14 + $0x38] sm:$0xff] %vm630_vm2, %v716_v47  ;;  %v764_v56 = vadd.f32 %v762_v16, %v758_v49  ;;  %v783_v27 = vstv %s7988_s12  ;;  %v789_v61 = vstv %s7990_s9  ;;  %v2637_v9 = vpop.permute.xlu1 %2636  ;;  %p4661_p7 = scmp.ne.s32.totalorder %s8057_s20, %s4660_s23  ;;  %p4668_p6 = scmp.lt.s32.totalorder %s4666_s24, %s4660_s23 }
 0x2fe   : > { %3832 = vst.msk [vmem:[%s7846_s14 + $0x40] sm:$0xff] %vm630_vm2, %v744_v38  ;;  %3833 = vst.msk [vmem:[%s7846_s14 + $0x48] sm:$0xff] %vm630_vm2, %v745_v45  ;;  %v784_v43 = vmul.f32 %v783_v27, %v5551_v6  ;;  %v785_v31 = vmul.f32 %v783_v27, %v5585_v58  ;;  %v790_v33 = vmul.f32 %v789_v61, %v5620_v19  ;;  %v795_v46 = vstv %s7996_s21 }
 0x2ff   : > { %v791_v15 = vmul.f32 %v789_v61, %v5617_v18  ;;  %v769_v12 = vadd.f32 %v767_v24, %v763_v44  ;;  %v770_v48 = vadd.f32 %v768_v5, %v764_v56  ;;  %v801_v52 = vstv %s7998_s15  ;;  %p4662_p8 = pnand %p4661_p7, %p9263_p1  ;;  %p4669_p9 = por %p4668_p6, %p4667_p2 }
 0x300   : > { %v786_v42 = vadd.f32 %v784_v43, %v780_v2  ;;  %v787_v32 = vadd.f32 %v785_v31, %v781_v10  ;;  %v796_v21 = vmul.f32 %v795_v46, %v5654_v20  ;;  %v797_v11 = vmul.f32 %v795_v46, %v5651_v13 }
 0x301   : > { %v773_v14 = vadd.f32 %v772_v54, %v769_v12  ;;  %v774_v26 = vadd.f32 %v772_v54, %v770_v48  ;;  %v808_v63 = vstv %s8012_s1  ;;  %v812_v4 = vstv %s8014_s7  ;;  %p4663_p12 = pneg %p4662_p8 }
 0x302   : > { %v792_v60 = vadd.f32 %v790_v33, %v786_v42  ;;  %v793_v41 = vadd.f32 %v791_v15, %v787_v32  ;;  %v809_v36 = vmul.f32 %v808_v63, %v5554_v3  ;;  %v810_v22 = vmul.f32 %v808_v63, %v5588_v55 }
 0x303   : > { %3839 = vst.msk [vmem:[%s7846_s14 + $0x50] sm:$0xff] %vm630_vm2, %v773_v14  ;;  %3840 = vst.msk [vmem:[%s7846_s14 + $0x58] sm:$0xff] %vm630_vm2, %v774_v26  ;;  %v813_v47 = vmul.f32 %v812_v4, %v5551_v6  ;;  %v814_v17 = vmul.f32 %v812_v4, %v5585_v58  ;;  %v818_v59 = vstv %s8022_s16  ;;  %v824_v0 = vstv %s8024_s3  ;;  %p4670_p13 = pnand %p4669_p9, %p4663_p12 }
 0x304   : > { %v798_v40 = vadd.f32 %v796_v21, %v792_v60  ;;  %v799_v23 = vadd.f32 %v797_v11, %v793_v41  ;;  %v819_v57 = vmul.f32 %v818_v59, %v5620_v19  ;;  %v820_v3 = vmul.f32 %v818_v59, %v5617_v18 }
 0x305   : > { %4673 = shalt.err (!%p4670_p13)
}
 0x306   : > { %s4674_s0 = scalar_lea.hbm %s8055_s4, 2048  ;;  %s4678_s12 = scalar_lea.hbm %s9281_s26, 4096 }
 0x307   : > { %p4675_p11 = scmp.ne.s32.totalorder %s8055_s4, %s4674_s0  ;;  %p4679_p5 = scmp.lt.u32.totalorder %s8055_s4, %s9281_s26 }
 0x308   : > { %p4680_p10 = scmp.lt.u32.totalorder %s4678_s12, %s4674_s0  ;;  %p4682_p7 = scmp.lt.u32.totalorder %s4674_s0, %s8055_s4 }
 0x309   : > { %p4676_p4 = pnand %p4675_p11, %p9263_p1 }
 0x30a   : > { %p4681_p3 = por %p4680_p10, %p4679_p5 }
 0x30b   : > { %p4677_p0 = pneg %p4676_p4 }
 0x30c   : > { %p4683_p8 = por %p4682_p7, %p4681_p3 }
 0x30e   : > { %p4684_p12 = pnand %p4683_p8, %p4677_p0 }
 0x310   : > { %4687 = shalt.err (!%p4684_p12)
}
 0x311   : > { %s9282_s1 = scalar_lea.sflag [#allocation17], %s7622_s11  ;;  %s8100_s7 = scalar_lea.vmem [#allocation19], %s9272_s8  ;;  %v815_v55 = vadd.f32 %v813_v47, %v809_v36  ;;  %v816_v58 = vadd.f32 %v814_v17, %v810_v22  ;;  %v825_v6 = vmul.f32 %v824_v0, %v5654_v20  ;;  %v826_v18 = vmul.f32 %v824_v0, %v5651_v13  ;;  %v2635_v19 = vpop.permute.xlu0 %2634  ;;  %v2673_v13 = vpop.permute.xlu1 %2672 }
 0x312   : > { %4342 = dma.vmem_to_hbm [thread:$0]  (%p9263_p1), %s8057_s20, 2048, %s8055_s4, %s9282_s1, %s9275_s6, %s9275_s6, %s9274_s2   ;;  %v802_v35 = vadd.f32 %v801_v52, %v798_v40  ;;  %v803_v39 = vadd.f32 %v801_v52, %v799_v23 }
 0x313   : > { %2641 = vst.msk [vmem:[%s8100_s7 + $0x8] sm:$0xff] %vm630_vm2, %v2637_v9  ;;  %2640 = vst.msk [vmem:[%s8100_s7] sm:$0xff] %vm630_vm2, %v2635_v19  ;;  %v821_v62 = vadd.f32 %v819_v57, %v815_v55  ;;  %v822_v1 = vadd.f32 %v820_v3, %v816_v58  ;;  %s9283_s16 = sld [smem:[#allocation41_spill]]  ;;  %v830_v20 = vstv %s8047_s10  ;;  %s3252_s3 = sshll.u32 %s7846_s14, 4  ;;  %s8126_s3 = int_to_ptr.vmem [resolvable:$true] %s3252_s3 }
 0x314   : > { %3846 = vst.msk [vmem:[%s7846_s14 + $0x60] sm:$0xff] %vm630_vm2, %v802_v35  ;;  %3847 = vst.msk [vmem:[%s7846_s14 + $0x68] sm:$0xff] %vm630_vm2, %v803_v39  ;;  %s9284_s19 = sld [smem:[#allocation174_spill]]  ;;  %s4688_s23 = scalar_lea.vmem %s8126_s3, 2048 }
 0x315   : > { %v827_v37 = vadd.f32 %v825_v6, %v821_v62  ;;  %v828_v25 = vadd.f32 %v826_v18, %v822_v1  ;;  %4190 = vst.msk [vmem:[%s8100_s7 + $0x18] sm:$0xff] %vm630_vm2, %v2673_v13  ;;  %v2671_v16 = vpop.permute.xlu0 %2670  ;;  %v2710_v53 = vpop.permute.xlu1 %2709  ;;  %p4689_p2 = scmp.ne.s32.totalorder %s8126_s3, %s4688_s23  ;;  %s4874_s17 = smov [#allocation9]  }
 0x316   : > { %4189 = vst.msk [vmem:[%s8100_s7 + $0x10] sm:$0xff] %vm630_vm2, %v2671_v16  ;;  %s4692_s5 = sshll.u32 %s4874_s17, 4  ;;  %s4693_s5 = int_to_ptr.vmem [resolvable:$false] %s4692_s5 }
 0x317   : > { %v831_v29 = vadd.f32 %v830_v20, %v827_v37  ;;  %v832_v28 = vadd.f32 %v830_v20, %v828_v25  ;;  %p4690_p6 = pnand %p4689_p2, %p9263_p1  ;;  %s4694_s24 = scalar_lea.vmem %s4693_s5, 4096 }
 0x318   : > { %p4695_p13 = scmp.lt.s32.totalorder %s8126_s3, %s4693_s5  ;;  %p4696_p11 = scmp.lt.s32.totalorder %s4694_s24, %s4688_s23 }
 0x319   : > { %3853 = vst.msk [vmem:[%s7846_s14 + $0x70] sm:$0xff] %vm630_vm2, %v831_v29  ;;  %3854 = vst.msk [vmem:[%s7846_s14 + $0x78] sm:$0xff] %vm630_vm2, %v832_v28  ;;  %s3197_s10 = scalar_lea.sflag [#allocation4], %s9283_s16  ;;  %p4691_p9 = pneg %p4690_p6 }
 0x31a   : > { %s9285_s30 = smov %s9284_s19  ;;  %s8124_s4 = scalar_lea.hbm %s9284_s19, %s7625_s28 }
 0x31b   : > { %p4697_p4 = por %p4696_p11, %p4695_p13 }
 0x31d   : > { %p4698_p0 = pnand %p4697_p4, %p4691_p9 }
 0x31f   : > { %4701 = shalt.err (!%p4698_p0)
}
 0x320   : > { %s4702_s14 = scalar_lea.hbm %s8124_s4, 2048  ;;  %s4706_s22 = scalar_lea.hbm %s9285_s30, 4096 }
 0x321   : > { %p4703_p5 = scmp.ne.s32.totalorder %s8124_s4, %s4702_s14  ;;  %p4707_p7 = scmp.lt.u32.totalorder %s8124_s4, %s9285_s30 }
 0x322   : > { %p4708_p8 = scmp.lt.u32.totalorder %s4706_s22, %s4702_s14  ;;  %p4710_p2 = scmp.lt.u32.totalorder %s4702_s14, %s8124_s4 }
 0x323   : > { %p4704_p10 = pnand %p4703_p5, %p9263_p1 }
 0x324   : > { %p4709_p12 = por %p4708_p8, %p4707_p7 }
 0x325   : > { %p4705_p3 = pneg %p4704_p10 }
 0x326   : > { %p4711_p6 = por %p4710_p2, %p4709_p12 }
 0x328   : > { %p4712_p9 = pnand %p4711_p6, %p4705_p3 }
 0x32a   : > { %4715 = shalt.err (!%p4712_p9)
}
 0x32b   : > { %4336 = dma.vmem_to_hbm [thread:$0]  (%p9263_p1), %s8126_s3, 2048, %s8124_s4, %s3197_s10, %s9275_s6, %s9275_s6, %s9274_s2   ;;  %v2708_v51 = vpop.permute.xlu0 %2707  ;;  %v2747_v24 = vpop.permute.xlu1 %2746 }
 0x32c   : > { %4197 = vst.msk [vmem:[%s8100_s7 + $0x28] sm:$0xff] %vm630_vm2, %v2710_v53  ;;  %4196 = vst.msk [vmem:[%s8100_s7 + $0x20] sm:$0xff] %vm630_vm2, %v2708_v51  ;;  %s3378_s21 = sshll.u32 %s8100_s7, 4  ;;  %s9286_s3 = sld [smem:[#allocation181_spill]]  ;;  %s8190_s21 = int_to_ptr.vmem [resolvable:$true] %s3378_s21 }
 0x32d   : > { %4204 = vst.msk [vmem:[%s8100_s7 + $0x38] sm:$0xff] %vm630_vm2, %v2747_v24  ;;  %s3232_s20 = scalar_lea.sflag [#allocation20], %s7622_s11  ;;  %s4716_s19 = scalar_lea.vmem %s8190_s21, 2048 }
 0x32e   : > { %p4717_p13 = scmp.ne.s32.totalorder %s8190_s21, %s4716_s19  ;;  %s4875_s4 = smov [#allocation19]  }
 0x32f   : > { %v2745_v5 = vpop.permute.xlu0 %2744  ;;  %v2784_v34 = vpop.permute.xlu1 %2783  ;;  %s4720_s10 = sshll.u32 %s4875_s4, 4  ;;  %s4721_s10 = int_to_ptr.vmem [resolvable:$false] %s4720_s10 }
 0x330   : > { %4203 = vst.msk [vmem:[%s8100_s7 + $0x30] sm:$0xff] %vm630_vm2, %v2745_v5  ;;  %4211 = vst.msk [vmem:[%s8100_s7 + $0x48] sm:$0xff] %vm630_vm2, %v2784_v34  ;;  %p4718_p11 = pnand %p4717_p13, %p9263_p1  ;;  %s4722_s23 = scalar_lea.vmem %s4721_s10, 4096 }
 0x331   : > { %p4723_p0 = scmp.lt.s32.totalorder %s8190_s21, %s4721_s10  ;;  %p4724_p5 = scmp.lt.s32.totalorder %s4722_s23, %s4716_s19 }
 0x332   : > { %s8188_s15 = scalar_lea.hbm %s9286_s3, %s7625_s28  ;;  %p4719_p4 = pneg %p4718_p11 }
 0x333   : > { %v2782_v49 = vpop.permute.xlu0 %2781  ;;  %v2821_v54 = vpop.permute.xlu1 %2820  ;;  %p4725_p10 = por %p4724_p5, %p4723_p0 }
 0x334   : > { %4210 = vst.msk [vmem:[%s8100_s7 + $0x40] sm:$0xff] %vm630_vm2, %v2782_v49  ;;  %4218 = vst.msk [vmem:[%s8100_s7 + $0x58] sm:$0xff] %vm630_vm2, %v2821_v54 }
 0x335   : > { %p4726_p3 = pnand %p4725_p10, %p4719_p4 }
 0x337   : > { %v2819_v30 = vpop.permute.xlu0 %2818  ;;  %v2858_v8 = vpop.permute.xlu1 %2857 }
 0x338   : > { %4217 = vst.msk [vmem:[%s8100_s7 + $0x50] sm:$0xff] %vm630_vm2, %v2819_v30  ;;  %4225 = vst.msk [vmem:[%s8100_s7 + $0x68] sm:$0xff] %vm630_vm2, %v2858_v8 }
 0x33b   : > { %v2856_v38 = vpop.permute.xlu0 %2855  ;;  %v2895_v45 = vpop.permute.xlu1 %2894 }
 0x33c   : > { %4224 = vst.msk [vmem:[%s8100_s7 + $0x60] sm:$0xff] %vm630_vm2, %v2856_v38  ;;  %4232 = vst.msk [vmem:[%s8100_s7 + $0x78] sm:$0xff] %vm630_vm2, %v2895_v45 }
 0x33f   : > { %v2893_v2 = vpop.permute.xlu0 %2892 }
 0x340   : > { %4231 = vst.msk [vmem:[%s8100_s7 + $0x70] sm:$0xff] %vm630_vm2, %v2893_v2 }
 0x341   : > { %4729 = shalt.err (!%p4726_p3)
}
 0x342   : > { %s4730_s7 = scalar_lea.hbm %s8188_s15, 2048  ;;  %s4734_s24 = scalar_lea.hbm %s9286_s3, 4096 }
 0x343   : > { %p4731_p7 = scmp.ne.s32.totalorder %s8188_s15, %s4730_s7  ;;  %p4735_p2 = scmp.lt.u32.totalorder %s8188_s15, %s9286_s3 }
 0x344   : > { %p4736_p6 = scmp.lt.u32.totalorder %s4734_s24, %s4730_s7  ;;  %p4738_p13 = scmp.lt.u32.totalorder %s4730_s7, %s8188_s15 }
 0x345   : > { %p4732_p8 = pnand %p4731_p7, %p9263_p1 }
 0x346   : > { %p4737_p9 = por %p4736_p6, %p4735_p2 }
 0x347   : > { %p4733_p12 = pneg %p4732_p8 }
 0x348   : > { %p4739_p11 = por %p4738_p13, %p4737_p9 }
 0x34a   : > { %p4740_p4 = pnand %p4739_p11, %p4733_p12 }
 0x34c   : > { %4743 = shalt.err (!%p4740_p4)
}
 0x34d   : > { %4343 = dma.vmem_to_hbm [thread:$0]  (%p9263_p1), %s8190_s21, 2048, %s8188_s15, %s3232_s20, %s9275_s6, %s9275_s6, %s9274_s2   ;;  %v2932_v10 = vpop.permute.xlu1 %2931  ;;  %v2930_v44 = vpop.permute.xlu0 %2929 }
 0x34e   : > { %s8222_s13 = scalar_lea.vmem [#allocation21], %s9272_s8  ;;  %s9287_s9 = sld [smem:[#allocation182_spill]] }
 0x34f   : > { %2936 = vst.msk [vmem:[%s8222_s13 + $0x8] sm:$0xff] %vm630_vm2, %v2932_v10  ;;  %2935 = vst.msk [vmem:[%s8222_s13] sm:$0xff] %vm630_vm2, %v2930_v44  ;;  %s3396_s8 = sshll.u32 %s8222_s13, 4  ;;  %s4876_s16 = smov [#allocation21]   ;;  %s8261_s8 = int_to_ptr.vmem [resolvable:$true] %s3396_s8 }
 0x350   : > { %s4744_s1 = scalar_lea.vmem %s8261_s8, 2048  ;;  %s4748_s15 = sshll.u32 %s4876_s16, 4  ;;  %s4749_s15 = int_to_ptr.vmem [resolvable:$false] %s4748_s15 }
 0x351   : > { %v2968_v56 = vpop.permute.xlu1 %2967  ;;  %v2966_v27 = vpop.permute.xlu0 %2965  ;;  %p4745_p0 = scmp.ne.s32.totalorder %s8261_s8, %s4744_s1  ;;  %s4750_s19 = scalar_lea.vmem %s4749_s15, 4096 }
 0x352   : > { %4244 = vst.msk [vmem:[%s8222_s13 + $0x18] sm:$0xff] %vm630_vm2, %v2968_v56  ;;  %4243 = vst.msk [vmem:[%s8222_s13 + $0x10] sm:$0xff] %vm630_vm2, %v2966_v27  ;;  %p4751_p3 = scmp.lt.s32.totalorder %s8261_s8, %s4749_s15  ;;  %p4752_p7 = scmp.lt.s32.totalorder %s4750_s19, %s4744_s1 }
 0x353   : > { %p4746_p5 = pnand %p4745_p0, %p9263_p1 }
 0x354   : > { %s8259_s21 = scalar_lea.hbm %s9287_s9, %s7625_s28  ;;  %p4753_p8 = por %p4752_p7, %p4751_p3 }
 0x355   : > { %v3005_v61 = vpop.permute.xlu1 %3004  ;;  %v3003_v43 = vpop.permute.xlu0 %3002  ;;  %p4747_p10 = pneg %p4746_p5 }
 0x356   : > { %4251 = vst.msk [vmem:[%s8222_s13 + $0x28] sm:$0xff] %vm630_vm2, %v3005_v61  ;;  %4250 = vst.msk [vmem:[%s8222_s13 + $0x20] sm:$0xff] %vm630_vm2, %v3003_v43 }
 0x357   : > { %p4754_p12 = pnand %p4753_p8, %p4747_p10 }
 0x359   : > { %v3042_v31 = vpop.permute.xlu1 %3041  ;;  %v3040_v33 = vpop.permute.xlu0 %3039 }
 0x35a   : > { %4258 = vst.msk [vmem:[%s8222_s13 + $0x38] sm:$0xff] %vm630_vm2, %v3042_v31  ;;  %4257 = vst.msk [vmem:[%s8222_s13 + $0x30] sm:$0xff] %vm630_vm2, %v3040_v33 }
 0x35d   : > { %v3079_v15 = vpop.permute.xlu1 %3078  ;;  %v3077_v7 = vpop.permute.xlu0 %3076 }
 0x35e   : > { %4265 = vst.msk [vmem:[%s8222_s13 + $0x48] sm:$0xff] %vm630_vm2, %v3079_v15  ;;  %4264 = vst.msk [vmem:[%s8222_s13 + $0x40] sm:$0xff] %vm630_vm2, %v3077_v7 }
 0x361   : > { %v3116_v12 = vpop.permute.xlu1 %3115  ;;  %v3114_v48 = vpop.permute.xlu0 %3113 }
 0x362   : > { %4272 = vst.msk [vmem:[%s8222_s13 + $0x58] sm:$0xff] %vm630_vm2, %v3116_v12  ;;  %4271 = vst.msk [vmem:[%s8222_s13 + $0x50] sm:$0xff] %vm630_vm2, %v3114_v48 }
 0x365   : > { %v3153_v46 = vpop.permute.xlu1 %3152  ;;  %v3151_v52 = vpop.permute.xlu0 %3150 }
 0x366   : > { %4279 = vst.msk [vmem:[%s8222_s13 + $0x68] sm:$0xff] %vm630_vm2, %v3153_v46  ;;  %4278 = vst.msk [vmem:[%s8222_s13 + $0x60] sm:$0xff] %vm630_vm2, %v3151_v52 }
 0x369   : > { %v3190_v42 = vpop.permute.xlu1 %3189  ;;  %v3188_v32 = vpop.permute.xlu0 %3187 }
 0x36a   : > { %4286 = vst.msk [vmem:[%s8222_s13 + $0x78] sm:$0xff] %vm630_vm2, %v3190_v42  ;;  %4285 = vst.msk [vmem:[%s8222_s13 + $0x70] sm:$0xff] %vm630_vm2, %v3188_v32 }
 0x36b   : > { %4757 = shalt.err (!%p4754_p12)
}
 0x36c   : > { %s4758_s28 = scalar_lea.hbm %s8259_s21, 2048  ;;  %s4762_s23 = scalar_lea.hbm %s9287_s9, 4096 }
 0x36d   : > { %p4759_p2 = scmp.ne.s32.totalorder %s8259_s21, %s4758_s28  ;;  %p4763_p13 = scmp.lt.u32.totalorder %s8259_s21, %s9287_s9 }
 0x36e   : > { %p4764_p11 = scmp.lt.u32.totalorder %s4762_s23, %s4758_s28  ;;  %p4766_p0 = scmp.lt.u32.totalorder %s4758_s28, %s8259_s21 }
 0x36f   : > { %p4760_p6 = pnand %p4759_p2, %p9263_p1 }
 0x370   : > { %p4765_p4 = por %p4764_p11, %p4763_p13 }
 0x371   : > { %p4761_p9 = pneg %p4760_p6 }
 0x372   : > { %p4767_p5 = por %p4766_p0, %p4765_p4 }
 0x374   : > { %p4768_p10 = pnand %p4767_p5, %p4761_p9 }
 0x376   : > { %4771 = shalt.err (!%p4768_p10)
}
 0x377   : > { %4344 = dma.vmem_to_hbm [thread:$0]  (%p9263_p1), %s8261_s8, 2048, %s8259_s21, %s3232_s20, %s9275_s6, %s9275_s6, %s9274_s2  }
 0x378 PF: > { %s9288_s5 = sld [smem:[#allocation30_spill]]  ;;  %s9289_s24 = sld [smem:[#allocation38_spill]] }
 0x379   : > { %s9290_s14 = sld [smem:[#allocation35_spill]] }
 0x37e   : > { %s3411_s0 = sand.u32 1, %s9288_s5   ;;  %p9291_p3 = scmp.ne.s32.totalorder %s9289_s24, 0 }
 0x37f   : > { %p9292_p7 = scmp.ge.s32.totalorder %s9290_s14, 2  ;;  %s3412_s18 = scalar_lea.sflag [#allocation4], %s3411_s0 }
 0x381   : > { %p8296_p8 = pnand %p9292_p7, %p9291_p3 }
 0x383   : > { %4809 = dma.done.wait (!%p8296_p8), %s3412_s18, 2048  }
 0x384   : > { %4811 = vsyncadd (!%p8296_p8), %s3412_s18, 4294965248  ;;  %s9294_s11 = sadd.s32 4294967294, %s9290_s14  }
 0x385   : > { %s3420_s2 = sand.u32 1, %s9294_s11  }
 0x386   : > { %s3421_s6 = scalar_lea.sflag [#allocation11], %s3420_s2 }
 0x387   : > { %4813 = dma.done.wait (!%p8296_p8), %s3421_s6, 4096  }
 0x388   : > { %4815 = vsyncadd (!%p8296_p8), %s3421_s6, 4294963200  ;;  %s3439_s20 = scalar_lea.sflag [#allocation14], %s3420_s2 }
 0x389   : > { %4817 = dma.done.wait (!%p8296_p8), %s3439_s20, 4096  }
 0x38a   : > { %4819 = vsyncadd (!%p8296_p8), %s3439_s20, 4294963200  ;;  %s3457_s8 = scalar_lea.sflag [#allocation17], %s3420_s2 }
 0x38b   : > { %4821 = dma.done.wait (!%p8296_p8), %s3457_s8, 4096  }
 0x38c   : > { %4823 = vsyncadd (!%p8296_p8), %s3457_s8, 4294963200  ;;  %s3475_s22 = scalar_lea.sflag [#allocation20], %s3420_s2 }
 0x38d   : > { %4825 = dma.done.wait (!%p8296_p8), %s3475_s22, 4096  }
 0x38e   : > { %4827 = vsyncadd (!%p8296_p8), %s3475_s22, 4294963200  ;;  %s42_s22 = sadd.s32 1, %s9290_s14   ;;  %s9295_s17 = sld [smem:[#allocation31_spill]] }
 0x38f   : > { %p39_p1 = scmp.ge.s32.totalorder %s42_s22, 4   ;;  %s9296_s18 = sld [smem:[#allocation32_spill]] }
 0x390   : > { %s9297_s19 = sld [smem:[#allocation40_spill]]  ;;  %s9298_s20 = sld [smem:[#allocation34_spill]] }
 0x391   : > { %s9299_s21 = sld [smem:[#allocation39_spill]]  ;;  %41 = sbr.rel (!%p39_p1) target bundleno = 29 (0x1d), region = 281 }
 0x398   :  { %3489 = vsyncpa [#allocation3], 1 }
 0x399   :  { %3491 = vsyncpa [#allocation3 + $0x1], 1 }
 0x39a   :  { %3492 = vsyncpa [#allocation4], 1 }
 0x39b   :  { %3494 = vsyncpa [#allocation4 + $0x1], 1 }
 0x39c   :  { %3495 = vsyncpa [#allocation11], 1 }
 0x39d   :  { %3497 = vsyncpa [#allocation11 + $0x1], 1 }
 0x39e   :  { %3498 = vsyncpa [#allocation14], 1 }
 0x39f   :  { %3500 = vsyncpa [#allocation14 + $0x1], 1 }
 0x3a0   :  { %3501 = vsyncpa [#allocation17], 1 }
 0x3a1   :  { %3503 = vsyncpa [#allocation17 + $0x1], 1 }
 0x3a2   :  { %3504 = vsyncpa [#allocation20], 1 }
 0x3a3   :  { %3506 = vsyncpa [#allocation20 + $0x1], 1 }
 0x3a4   :  { %3507 = vsyncpa [#allocation5], 1 }
 0x3a5   :  { %3509 = vsyncpa [#allocation5 + $0x1], 1 }
 0x3a6   :  { %3510 = vsyncpa [#allocation6], 1 }
 0x3a7   :  { %3512 = vsyncpa [#allocation6 + $0x1], 1 }

</bundles_post_ra>
